<compile_context>
chip_gen: v7x
topology: tpu7x:2x2x1
jax: 0.10.0
libtpu: 0.0.40
codegen_flags: <defaults>
</compile_context>

<pallas_src>
import math
import functools

import jax
import jax.numpy as jnp
from jax.experimental import pallas as pl
from jax.experimental.pallas import tpu as pltpu

LN_EPS = 1e-5  # PyTorch nn.LayerNorm default


def _vmem():
    return pl.BlockSpec(memory_space=pltpu.MemorySpace.VMEM)


def _bf16(x):
    return x.astype(jnp.bfloat16)


def _mm(a_bf16, w_bf16):
    """Plain lane-dense matmul: bf16 operands, f32 MXU accumulation."""
    return jnp.dot(a_bf16, w_bf16, preferred_element_type=jnp.float32)


def _layernorm(y, gamma, beta):
    """Single-pass LayerNorm; gamma fused into the rsqrt factor."""
    inv_n = 1.0 / y.shape[-1]
    mean = jnp.sum(y, axis=-1, keepdims=True) * inv_n
    var = jnp.sum(y * y, axis=-1, keepdims=True) * inv_n - mean * mean
    return (y - mean) * (gamma * jax.lax.rsqrt(var + LN_EPS)) + beta


# ---------------------------------------------------------------------------
# In-kernel sublayers (plain functions traced into the one fused kernel)
# ---------------------------------------------------------------------------

def _mha_core(q_bf, kv_bf, k_off, v_off, num_heads, head_dim):
    """Per-head scaled-dot-product attention.

    q_bf:  (Sq, H*dh) bf16, scale already folded into the Q projection.
    kv_bf: bf16 tensor containing the K head-block at lane offset k_off and
           the V head-block at lane offset v_off (each H*dh wide).
    Returns ctx laid out as (Sq, H*dh) f32 (heads concatenated on lanes) so
    the output projection is a single lane-dense matmul.
    """
    dh = head_dim
    parts = []
    for h in range(num_heads):
        qh = q_bf[:, h * dh:(h + 1) * dh]                       # (Sq, dh)
        kh = kv_bf[:, k_off + h * dh:k_off + (h + 1) * dh]      # (Sk, dh)
        vh = kv_bf[:, v_off + h * dh:v_off + (h + 1) * dh]      # (Sk, dh)
        logits = jax.lax.dot_general(                           # q @ k^T
            qh, kh, (((1,), (1,)), ((), ())),
            preferred_element_type=jnp.float32)                 # (Sq, Sk)
        logits = logits - jnp.max(logits, axis=-1, keepdims=True)
        e = jnp.exp(logits)
        # EUP approx reciprocal instead of a VALU divide.
        probs = e * pl.reciprocal(jnp.sum(e, axis=-1, keepdims=True),
                                  approx=True)
        parts.append(jnp.dot(_bf16(probs), vh,
                             preferred_element_type=jnp.float32))  # (Sq, dh)
    return jnp.concatenate(parts, axis=-1)                      # (Sq, H*dh)


def _enc_attn_addnorm(x, ap, num_heads, head_dim):
    """LN(x + MultiHead(x, x, x)) with a fused (D, 3*H*dh) QKV projection."""
    hd = num_heads * head_dim
    qkv = _mm(_bf16(x), ap["w_qkv"]) + ap["b_qkv"]              # (S, 3*H*dh) f32
    qkv_bf = _bf16(qkv)                                         # cast once
    ctx = _mha_core(qkv_bf[:, :hd], qkv_bf, hd, 2 * hd, num_heads, head_dim)
    out = _mm(_bf16(ctx), ap["w_o"]) + ap["b_o"]                # (S, D)
    return _layernorm(x + out, ap["gamma"], ap["beta"])


def _dec_attn_addnorm(t, memory, kv_bf, k_off, ap, num_heads, head_dim):
    """LN(memory + MultiHead(q=t, k=memory, v=memory)).

    K/V of `memory` were hoisted: kv_bf holds the pre-projected K/V for this
    sublayer at lane offset k_off / k_off + H*dh.  The residual is `memory`
    (x[-1] in the reference AddAndNorm), mirroring the module exactly.
    """
    hd = num_heads * head_dim
    q = _mm(_bf16(t), ap["w_q"]) + ap["b_q"]                    # (T, H*dh) f32
    ctx = _mha_core(_bf16(q), kv_bf, k_off, k_off + hd, num_heads, head_dim)
    out = _mm(_bf16(ctx), ap["w_o"]) + ap["b_o"]                # (T, D)
    return _layernorm(memory + out, ap["gamma"], ap["beta"])


def _ffn_addnorm(x, fp):
    """LN(x + W2 relu(W1 x + b1) + b2)."""
    h = jnp.maximum(_mm(_bf16(x), fp["w1"]) + fp["b1"], 0.0)    # (S, F)
    y = _mm(_bf16(h), fp["w2"]) + fp["b2"]                      # (S, D)
    return _layernorm(x + y, fp["gamma"], fp["beta"])


# ---------------------------------------------------------------------------
# The single fused kernel
# ---------------------------------------------------------------------------

def _transformer_kernel(*refs, treedef, num_heads, head_dim, n_enc, n_dec):
    src_ref, tgt_ref = refs[0], refs[1]
    out_ref = refs[-1]
    p = jax.tree_util.tree_unflatten(treedef, refs[2:-1])   # pytree of VMEM refs

    hd = num_heads * head_dim

    def load_layer(tree, l):   # load layer-l slice of every stacked parameter
        return jax.tree_util.tree_map(lambda r: r[l], tree)

    # ---- Encoder: x = LN(x + MH(x,x,x)); x = LN(x + FF(x))
    x = src_ref[...]
    for l in range(n_enc):
        lp = load_layer(p["enc"], l)
        x = _enc_attn_addnorm(x, lp["attn"], num_heads, head_dim)
        x = _ffn_addnorm(x, lp["ff"])
    memory = x

    # ---- Decoder: memory is constant, so project K/V for every self/cross
    # sublayer of every layer with ONE wide lane-dense matmul and cast once.
    kv_all = _mm(_bf16(memory), p["dec_kv_w"][...]) + p["dec_kv_b"][...]
    kv_bf = _bf16(kv_all)                         # (S, n_dec * 2 * 2*H*dh)

    per_sub = 2 * hd                              # [K heads | V heads] width
    t = tgt_ref[...]
    for l in range(n_dec):
        lp = load_layer(p["dec"], l)
        t = _dec_attn_addnorm(t, memory, kv_bf, (2 * l) * per_sub,
                              lp["self"], num_heads, head_dim)
        t = _dec_attn_addnorm(t, memory, kv_bf, (2 * l + 1) * per_sub,
                              lp["cross"], num_heads, head_dim)
        t = _ffn_addnorm(t, lp["ff"])

    # ---- Final vocab projection (vocab zero-padded to a 128-lane multiple so
    # the output store is unmasked; wrapper slices it back).
    # TODO(synk): reference Decoder.forward returns self.linear(tgt) which is a
    # NameError; implementing the clearly intended self.linear(target).
    out_ref[...] = _mm(_bf16(t), p["out_w"][...]) + p["out_b"][...]


# ---------------------------------------------------------------------------
# Wrapper: one pallas_call for the whole forward
# ---------------------------------------------------------------------------

def transformer_forward(src, target, pos_src, pos_tgt, params, *,
                        num_heads, head_dim, n_enc, n_dec, vocab_size):
    # Positional encodings are input independent: pre-add outside the kernel
    # (drops two VMEM inputs and two in-kernel elementwise passes).
    src_in = src + pos_src
    tgt_in = target + pos_tgt

    flat, treedef = jax.tree_util.tree_flatten(params)
    T = target.shape[0]
    v_pad = params["out_w"].shape[1]
    kernel = functools.partial(_transformer_kernel, treedef=treedef,
                               num_heads=num_heads, head_dim=head_dim,
                               n_enc=n_enc, n_dec=n_dec)
    # TODO(synk): for realistic sizes (d_model>=1024, 6+6 layers, big vocab) do
    # NOT assume whole-model VMEM residency (v7x has 64 MiB physical): add a
    # layer grid axis with weights in HBM (memory_space=pl.ANY) + double
    # buffered DMA, a 'parallel' query-tile axis for the v7x 2-TC split, and an
    # explicit pltpu.CompilerParams(vmem_limit_bytes=...).  At these toy sizes
    # a single whole-in-VMEM invocation is the fastest layout.
    out = pl.pallas_call(
        kernel,
        out_shape=jax.ShapeDtypeStruct((T, v_pad), jnp.float32),
        in_specs=[_vmem()] * (2 + len(flat)),
        out_specs=_vmem(),
    )(src_in, tgt_in, *flat)
    return out[:, :vocab_size]


# ---------------------------------------------------------------------------
# Glue: position encoding (reproduces the reference quirk where
# 10000 ** (dim // dim_model) == 1 for all dim < dim_model) and parameters.
# nn.Dropout in the reference is constructed but never applied -> no-op here.
# ---------------------------------------------------------------------------

def position_encoding(seq_len, dim_model):
    pos = jnp.arange(seq_len, dtype=jnp.float32).reshape(-1, 1)
    dim = jnp.arange(dim_model, dtype=jnp.float32).reshape(1, -1)
    phase = pos / (10000.0 ** jnp.floor(dim / dim_model))
    return jnp.where(dim.astype(jnp.int32) % 2 == 0, jnp.sin(phase), jnp.cos(phase))


def _linear_params(key, dim_in, dim_out):
    kw, kb = jax.random.split(key)
    bound = 1.0 / math.sqrt(dim_in)
    w = jax.random.uniform(kw, (dim_out, dim_in), jnp.float32, -bound, bound)
    b = jax.random.uniform(kb, (dim_out,), jnp.float32, -bound, bound)
    return w, b


def _head_block(key, num_heads, dim_in, dim_out, mul=1.0):
    """Per-head Linear weights packed head-major on the output (lane) axis,
    pre-transposed to (dim_in, H*dim_out); `mul` folds the attention scale."""
    ws, bs = [], []
    for hk in jax.random.split(key, num_heads):
        w, b = _linear_params(hk, dim_in, dim_out)
        ws.append(w.T * mul)
        bs.append(b * mul)
    return jnp.concatenate(ws, axis=1), jnp.concatenate(bs)


def _ln_params(dim_model):
    return dict(gamma=jnp.ones((1, dim_model), jnp.float32),
                beta=jnp.zeros((1, dim_model), jnp.float32))


def _mha_enc_params(key, num_heads, dim_model, dim_qk, dim_v):
    kq, kk, kv, ko = jax.random.split(key, 4)
    scale = 1.0 / math.sqrt(dim_qk)                    # folded into Q proj
    wq, bq = _head_block(kq, num_heads, dim_model, dim_qk, scale)
    wk, bk = _head_block(kk, num_heads, dim_model, dim_qk)
    wv, bv = _head_block(kv, num_heads, dim_model, dim_v)
    wo, bo = _linear_params(ko, dim_v * num_heads, dim_model)   # (D, H*dv), (D,)
    return dict(
        w_qkv=_bf16(jnp.concatenate([wq, wk, wv], axis=1)),     # (D, 3*H*dk)
        b_qkv=jnp.concatenate([bq, bk, bv])[None, :],           # (1, 3*H*dk)
        w_o=_bf16(wo.T), b_o=bo[None, :],                       # (H*dv, D), (1, D)
        **_ln_params(dim_model))


def _mha_dec_params(key, num_heads, dim_model, dim_qk, dim_v):
    """Decoder attention sublayer: Q/O weights per sublayer; K/V weights are
    returned separately to be concatenated into the hoisted memory-K/V matmul."""
    kq, kk, kv, ko = jax.random.split(key, 4)
    scale = 1.0 / math.sqrt(dim_qk)
    wq, bq = _head_block(kq, num_heads, dim_model, dim_qk, scale)
    wk, bk = _head_block(kk, num_heads, dim_model, dim_qk)
    wv, bv = _head_block(kv, num_heads, dim_model, dim_v)
    wo, bo = _linear_params(ko, dim_v * num_heads, dim_model)
    sub = dict(w_q=_bf16(wq), b_q=bq[None, :],
               w_o=_bf16(wo.T), b_o=bo[None, :],
               **_ln_params(dim_model))
    kv_w = jnp.concatenate([wk, wv], axis=1)        # (D, H*dk + H*dv)
    kv_b = jnp.concatenate([bk, bv])                # (H*dk + H*dv,)
    return sub, kv_w, kv_b


def _ffn_params(key, dim_model, dim_ff):
    k1, k2 = jax.random.split(key)
    w1, b1 = _linear_params(k1, dim_model, dim_ff)
    w2, b2 = _linear_params(k2, dim_ff, dim_model)
    return dict(w1=_bf16(w1.T), b1=b1[None, :],
                w2=_bf16(w2.T), b2=b2[None, :],
                **_ln_params(dim_model))


def _stack_layers(layers):
    """Stack identical per-layer pytrees on a leading 'layer' axis."""
    return jax.tree_util.tree_map(lambda *xs: jnp.stack(xs), *layers)


def init_transformer_params(key, n_enc, n_dec, dim_model, num_heads,
                            dim_ff, vocab_size):
    dim_k = dim_v = dim_model // num_heads
    enc = []
    for _ in range(n_enc):
        key, k1, k2 = jax.random.split(key, 3)
        enc.append({"attn": _mha_enc_params(k1, num_heads, dim_model, dim_k, dim_v),
                    "ff": _ffn_params(k2, dim_model, dim_ff)})
    dec, kv_ws, kv_bs = [], [], []
    for _ in range(n_dec):
        key, k1, k2, k3 = jax.random.split(key, 4)
        s, sw, sb = _mha_dec_params(k1, num_heads, dim_model, dim_k, dim_v)
        c, cw, cb = _mha_dec_params(k2, num_heads, dim_model, dim_k, dim_v)
        dec.append({"self": s, "cross": c,
                    "ff": _ffn_params(k3, dim_model, dim_ff)})
        kv_ws += [sw, cw]
        kv_bs += [sb, cb]
    key, ko = jax.random.split(key)
    ow, ob = _linear_params(ko, dim_model, vocab_size)          # (V, D), (V,)
    v_pad = ((vocab_size + 127) // 128) * 128                   # lane-dense out
    out_w = jnp.zeros((dim_model, v_pad), jnp.float32).at[:, :vocab_size].set(ow.T)
    out_b = jnp.zeros((1, v_pad), jnp.float32).at[0, :vocab_size].set(ob)
    return {
        "enc": _stack_layers(enc),
        "dec": _stack_layers(dec),
        # Hoisted memory-K/V projection: [l0.self | l0.cross | l1.self | ...],
        # each block = [K heads | V heads]  ->  (D, n_dec*2*(H*dk + H*dv)).
        "dec_kv_w": _bf16(jnp.concatenate(kv_ws, axis=1)),
        "dec_kv_b": jnp.concatenate(kv_bs)[None, :],
        "out_w": _bf16(out_w),
        "out_b": out_b,
    }


if __name__ == "__main__":
    N_ENC, N_DEC = 2, 2
    # dim_model / dim_ff chosen as 128-multiples so all matmul outputs are
    # lane-dense; still small (whole model well under 1 MB -> VMEM resident).
    DIM_MODEL, NUM_HEADS, DIM_FF, VOCAB = 128, 4, 256, 10
    SRC_LEN, TGT_LEN = 8, 8
    HEAD_DIM = DIM_MODEL // NUM_HEADS

    key = jax.random.PRNGKey(0)
    kp, ks, kt = jax.random.split(key, 3)
    params = init_transformer_params(kp, N_ENC, N_DEC, DIM_MODEL, NUM_HEADS,
                                     DIM_FF, VOCAB)
    src = jax.random.normal(ks, (SRC_LEN, DIM_MODEL), jnp.float32)
    target = jax.random.normal(kt, (TGT_LEN, DIM_MODEL), jnp.float32)

    # Position encodings are input independent: compute once, outside the jit.
    pos_src = position_encoding(SRC_LEN, DIM_MODEL)
    pos_tgt = position_encoding(TGT_LEN, DIM_MODEL)

    fwd = jax.jit(functools.partial(transformer_forward,
                                    num_heads=NUM_HEADS, head_dim=HEAD_DIM,
                                    n_enc=N_ENC, n_dec=N_DEC,
                                    vocab_size=VOCAB))
    out = jax.block_until_ready(fwd(src, target, pos_src, pos_tgt, params))

    assert out.shape == (TGT_LEN, VOCAB), out.shape
    assert bool(jnp.all(jnp.isfinite(out)))
    print("KERNEL_OK")
</pallas_src>

<mosaic_0001>
module attributes {stable_mosaic.version = 11 : i64} {
  func.func @_transformer_kernel(%arg0: memref<8x128xf32, #tpu.memory_space<vmem>>, %arg1: memref<8x128xf32, #tpu.memory_space<vmem>>, %arg2: memref<2x1x128xf32, #tpu.memory_space<vmem>>, %arg3: memref<2x1x128xf32, #tpu.memory_space<vmem>>, %arg4: memref<2x1x128xf32, #tpu.memory_space<vmem>>, %arg5: memref<2x1x128xf32, #tpu.memory_space<vmem>>, %arg6: memref<2x128x128xbf16, #tpu.memory_space<vmem>>, %arg7: memref<2x128x128xbf16, #tpu.memory_space<vmem>>, %arg8: memref<2x1x256xf32, #tpu.memory_space<vmem>>, %arg9: memref<2x1x128xf32, #tpu.memory_space<vmem>>, %arg10: memref<2x1x128xf32, #tpu.memory_space<vmem>>, %arg11: memref<2x1x128xf32, #tpu.memory_space<vmem>>, %arg12: memref<2x128x256xbf16, #tpu.memory_space<vmem>>, %arg13: memref<2x256x128xbf16, #tpu.memory_space<vmem>>, %arg14: memref<2x1x128xf32, #tpu.memory_space<vmem>>, %arg15: memref<2x1x128xf32, #tpu.memory_space<vmem>>, %arg16: memref<2x1x128xf32, #tpu.memory_space<vmem>>, %arg17: memref<2x1x128xf32, #tpu.memory_space<vmem>>, %arg18: memref<2x128x128xbf16, #tpu.memory_space<vmem>>, %arg19: memref<2x128x128xbf16, #tpu.memory_space<vmem>>, %arg20: memref<1x1024xf32, #tpu.memory_space<vmem>>, %arg21: memref<128x1024xbf16, #tpu.memory_space<vmem>>, %arg22: memref<2x1x128xf32, #tpu.memory_space<vmem>>, %arg23: memref<2x1x384xf32, #tpu.memory_space<vmem>>, %arg24: memref<2x1x128xf32, #tpu.memory_space<vmem>>, %arg25: memref<2x1x128xf32, #tpu.memory_space<vmem>>, %arg26: memref<2x128x128xbf16, #tpu.memory_space<vmem>>, %arg27: memref<2x128x384xbf16, #tpu.memory_space<vmem>>, %arg28: memref<2x1x256xf32, #tpu.memory_space<vmem>>, %arg29: memref<2x1x128xf32, #tpu.memory_space<vmem>>, %arg30: memref<2x1x128xf32, #tpu.memory_space<vmem>>, %arg31: memref<2x1x128xf32, #tpu.memory_space<vmem>>, %arg32: memref<2x128x256xbf16, #tpu.memory_space<vmem>>, %arg33: memref<2x256x128xbf16, #tpu.memory_space<vmem>>, %arg34: memref<1x128xf32, #tpu.memory_space<vmem>>, %arg35: memref<128x128xbf16, #tpu.memory_space<vmem>>, %arg36: memref<8x128xf32, #tpu.memory_space<vmem>>) attributes {dimension_semantics = [], scalar_prefetch = 0 : i64, scratch_operands = 0 : i64, tpu.core_type = #tpu.core_type<tc>} {
    %c0 = arith.constant 0 : index
    %c0_0 = arith.constant 0 : index
    %0 = vector.load %arg0[%c0, %c0_0] : memref<8x128xf32, #tpu.memory_space<vmem>>, vector<8x128xf32>
    %c0_1 = arith.constant 0 : index
    %c0_2 = arith.constant 0 : index
    %c0_3 = arith.constant 0 : index
    %1 = vector.load %arg22[%c0_1, %c0_2, %c0_3] : memref<2x1x128xf32, #tpu.memory_space<vmem>>, vector<1x1x128xf32>
    %2 = vector.shape_cast %1 : vector<1x1x128xf32> to vector<1x128xf32>
    %c0_4 = arith.constant 0 : index
    %c0_5 = arith.constant 0 : index
    %c0_6 = arith.constant 0 : index
    %3 = vector.load %arg23[%c0_4, %c0_5, %c0_6] : memref<2x1x384xf32, #tpu.memory_space<vmem>>, vector<1x1x384xf32>
    %4 = vector.shape_cast %3 : vector<1x1x384xf32> to vector<1x384xf32>
    %c0_7 = arith.constant 0 : index
    %c0_8 = arith.constant 0 : index
    %c0_9 = arith.constant 0 : index
    %5 = vector.load %arg24[%c0_7, %c0_8, %c0_9] : memref<2x1x128xf32, #tpu.memory_space<vmem>>, vector<1x1x128xf32>
    %6 = vector.shape_cast %5 : vector<1x1x128xf32> to vector<1x128xf32>
    %c0_10 = arith.constant 0 : index
    %c0_11 = arith.constant 0 : index
    %c0_12 = arith.constant 0 : index
    %7 = vector.load %arg25[%c0_10, %c0_11, %c0_12] : memref<2x1x128xf32, #tpu.memory_space<vmem>>, vector<1x1x128xf32>
    %8 = vector.shape_cast %7 : vector<1x1x128xf32> to vector<1x128xf32>
    %c0_13 = arith.constant 0 : index
    %c0_14 = arith.constant 0 : index
    %c0_15 = arith.constant 0 : index
    %9 = vector.load %arg26[%c0_13, %c0_14, %c0_15] : memref<2x128x128xbf16, #tpu.memory_space<vmem>>, vector<1x128x128xbf16>
    %10 = vector.shape_cast %9 : vector<1x128x128xbf16> to vector<128x128xbf16>
    %c0_16 = arith.constant 0 : index
    %c0_17 = arith.constant 0 : index
    %c0_18 = arith.constant 0 : index
    %11 = vector.load %arg27[%c0_16, %c0_17, %c0_18] : memref<2x128x384xbf16, #tpu.memory_space<vmem>>, vector<1x128x384xbf16>
    %12 = vector.shape_cast %11 : vector<1x128x384xbf16> to vector<128x384xbf16>
    %c0_19 = arith.constant 0 : index
    %c0_20 = arith.constant 0 : index
    %c0_21 = arith.constant 0 : index
    %13 = vector.load %arg28[%c0_19, %c0_20, %c0_21] : memref<2x1x256xf32, #tpu.memory_space<vmem>>, vector<1x1x256xf32>
    %14 = vector.shape_cast %13 : vector<1x1x256xf32> to vector<1x256xf32>
    %c0_22 = arith.constant 0 : index
    %c0_23 = arith.constant 0 : index
    %c0_24 = arith.constant 0 : index
    %15 = vector.load %arg29[%c0_22, %c0_23, %c0_24] : memref<2x1x128xf32, #tpu.memory_space<vmem>>, vector<1x1x128xf32>
    %16 = vector.shape_cast %15 : vector<1x1x128xf32> to vector<1x128xf32>
    %c0_25 = arith.constant 0 : index
    %c0_26 = arith.constant 0 : index
    %c0_27 = arith.constant 0 : index
    %17 = vector.load %arg30[%c0_25, %c0_26, %c0_27] : memref<2x1x128xf32, #tpu.memory_space<vmem>>, vector<1x1x128xf32>
    %18 = vector.shape_cast %17 : vector<1x1x128xf32> to vector<1x128xf32>
    %c0_28 = arith.constant 0 : index
    %c0_29 = arith.constant 0 : index
    %c0_30 = arith.constant 0 : index
    %19 = vector.load %arg31[%c0_28, %c0_29, %c0_30] : memref<2x1x128xf32, #tpu.memory_space<vmem>>, vector<1x1x128xf32>
    %20 = vector.shape_cast %19 : vector<1x1x128xf32> to vector<1x128xf32>
    %c0_31 = arith.constant 0 : index
    %c0_32 = arith.constant 0 : index
    %c0_33 = arith.constant 0 : index
    %21 = vector.load %arg32[%c0_31, %c0_32, %c0_33] : memref<2x128x256xbf16, #tpu.memory_space<vmem>>, vector<1x128x256xbf16>
    %22 = vector.shape_cast %21 : vector<1x128x256xbf16> to vector<128x256xbf16>
    %c0_34 = arith.constant 0 : index
    %c0_35 = arith.constant 0 : index
    %c0_36 = arith.constant 0 : index
    %23 = vector.load %arg33[%c0_34, %c0_35, %c0_36] : memref<2x256x128xbf16, #tpu.memory_space<vmem>>, vector<1x256x128xbf16>
    %24 = vector.shape_cast %23 : vector<1x256x128xbf16> to vector<256x128xbf16>
    %25 = arith.truncf %0 : vector<8x128xf32> to vector<8x128xbf16>
    %cst = arith.constant dense<0.000000e+00> : vector<8x384xf32>
    %26 = tpu.matmul %25, %12, %cst {dimension_numbers = #tpu.dot_dimension_numbers<[1], [0], [0], [1], [0, 0, 1, 1], [], []>} : vector<8x128xbf16>, vector<128x384xbf16>, vector<8x384xf32> -> vector<8x384xf32>
    %27 = vector.broadcast %4 : vector<1x384xf32> to vector<8x384xf32>
    %28 = arith.addf %26, %27 : vector<8x384xf32>
    %29 = arith.truncf %28 : vector<8x384xf32> to vector<8x384xbf16>
    %30 = vector.extract_strided_slice %29 {offsets = [0, 0], sizes = [8, 128], strides = [1, 1]} : vector<8x384xbf16> to vector<8x128xbf16>
    %31 = vector.extract_strided_slice %30 {offsets = [0, 0], sizes = [8, 32], strides = [1, 1]} : vector<8x128xbf16> to vector<8x32xbf16>
    %32 = vector.extract_strided_slice %29 {offsets = [0, 128], sizes = [8, 32], strides = [1, 1]} : vector<8x384xbf16> to vector<8x32xbf16>
    %33 = vector.extract_strided_slice %29 {offsets = [0, 256], sizes = [8, 32], strides = [1, 1]} : vector<8x384xbf16> to vector<8x32xbf16>
    %cst_37 = arith.constant dense<0.000000e+00> : vector<8x8xf32>
    %34 = tpu.matmul %31, %32, %cst_37 {dimension_numbers = #tpu.dot_dimension_numbers<[1], [1], [0], [0], [0, 0, 1, 0], [], []>} : vector<8x32xbf16>, vector<8x32xbf16>, vector<8x8xf32> -> vector<8x8xf32>
    %cst_38 = arith.constant dense<0xFF800000> : vector<8xf32>
    %35 = vector.multi_reduction <maximumf>, %34, %cst_38 [1] : vector<8x8xf32> to vector<8xf32>
    %36 = vector.shape_cast %35 : vector<8xf32> to vector<8x1xf32>
    %37 = vector.broadcast %36 : vector<8x1xf32> to vector<8x8xf32>
    %38 = arith.subf %34, %37 : vector<8x8xf32>
    %39 = math.exp %38 : vector<8x8xf32>
    %cst_39 = arith.constant dense<0.000000e+00> : vector<8xf32>
    %40 = vector.multi_reduction <add>, %39, %cst_39 [1] : vector<8x8xf32> to vector<8xf32>
    %41 = vector.shape_cast %40 : vector<8xf32> to vector<8x1xf32>
    %42 = tpu.reciprocal %41 {approx = true} : vector<8x1xf32> -> vector<8x1xf32>
    %43 = vector.broadcast %42 : vector<8x1xf32> to vector<8x8xf32>
    %44 = arith.mulf %39, %43 : vector<8x8xf32>
    %45 = arith.truncf %44 : vector<8x8xf32> to vector<8x8xbf16>
    %cst_40 = arith.constant dense<0.000000e+00> : vector<8x32xf32>
    %46 = tpu.matmul %45, %33, %cst_40 {dimension_numbers = #tpu.dot_dimension_numbers<[1], [0], [0], [1], [0, 0, 1, 1], [], []>} : vector<8x8xbf16>, vector<8x32xbf16>, vector<8x32xf32> -> vector<8x32xf32>
    %47 = vector.extract_strided_slice %30 {offsets = [0, 32], sizes = [8, 32], strides = [1, 1]} : vector<8x128xbf16> to vector<8x32xbf16>
    %48 = vector.extract_strided_slice %29 {offsets = [0, 160], sizes = [8, 32], strides = [1, 1]} : vector<8x384xbf16> to vector<8x32xbf16>
    %49 = vector.extract_strided_slice %29 {offsets = [0, 288], sizes = [8, 32], strides = [1, 1]} : vector<8x384xbf16> to vector<8x32xbf16>
    %cst_41 = arith.constant dense<0.000000e+00> : vector<8x8xf32>
    %50 = tpu.matmul %47, %48, %cst_41 {dimension_numbers = #tpu.dot_dimension_numbers<[1], [1], [0], [0], [0, 0, 1, 0], [], []>} : vector<8x32xbf16>, vector<8x32xbf16>, vector<8x8xf32> -> vector<8x8xf32>
    %cst_42 = arith.constant dense<0xFF800000> : vector<8xf32>
    %51 = vector.multi_reduction <maximumf>, %50, %cst_42 [1] : vector<8x8xf32> to vector<8xf32>
    %52 = vector.shape_cast %51 : vector<8xf32> to vector<8x1xf32>
    %53 = vector.broadcast %52 : vector<8x1xf32> to vector<8x8xf32>
    %54 = arith.subf %50, %53 : vector<8x8xf32>
    %55 = math.exp %54 : vector<8x8xf32>
    %cst_43 = arith.constant dense<0.000000e+00> : vector<8xf32>
    %56 = vector.multi_reduction <add>, %55, %cst_43 [1] : vector<8x8xf32> to vector<8xf32>
    %57 = vector.shape_cast %56 : vector<8xf32> to vector<8x1xf32>
    %58 = tpu.reciprocal %57 {approx = true} : vector<8x1xf32> -> vector<8x1xf32>
    %59 = vector.broadcast %58 : vector<8x1xf32> to vector<8x8xf32>
    %60 = arith.mulf %55, %59 : vector<8x8xf32>
    %61 = arith.truncf %60 : vector<8x8xf32> to vector<8x8xbf16>
    %cst_44 = arith.constant dense<0.000000e+00> : vector<8x32xf32>
    %62 = tpu.matmul %61, %49, %cst_44 {dimension_numbers = #tpu.dot_dimension_numbers<[1], [0], [0], [1], [0, 0, 1, 1], [], []>} : vector<8x8xbf16>, vector<8x32xbf16>, vector<8x32xf32> -> vector<8x32xf32>
    %63 = vector.extract_strided_slice %30 {offsets = [0, 64], sizes = [8, 32], strides = [1, 1]} : vector<8x128xbf16> to vector<8x32xbf16>
    %64 = vector.extract_strided_slice %29 {offsets = [0, 192], sizes = [8, 32], strides = [1, 1]} : vector<8x384xbf16> to vector<8x32xbf16>
    %65 = vector.extract_strided_slice %29 {offsets = [0, 320], sizes = [8, 32], strides = [1, 1]} : vector<8x384xbf16> to vector<8x32xbf16>
    %cst_45 = arith.constant dense<0.000000e+00> : vector<8x8xf32>
    %66 = tpu.matmul %63, %64, %cst_45 {dimension_numbers = #tpu.dot_dimension_numbers<[1], [1], [0], [0], [0, 0, 1, 0], [], []>} : vector<8x32xbf16>, vector<8x32xbf16>, vector<8x8xf32> -> vector<8x8xf32>
    %cst_46 = arith.constant dense<0xFF800000> : vector<8xf32>
    %67 = vector.multi_reduction <maximumf>, %66, %cst_46 [1] : vector<8x8xf32> to vector<8xf32>
    %68 = vector.shape_cast %67 : vector<8xf32> to vector<8x1xf32>
    %69 = vector.broadcast %68 : vector<8x1xf32> to vector<8x8xf32>
    %70 = arith.subf %66, %69 : vector<8x8xf32>
    %71 = math.exp %70 : vector<8x8xf32>
    %cst_47 = arith.constant dense<0.000000e+00> : vector<8xf32>
    %72 = vector.multi_reduction <add>, %71, %cst_47 [1] : vector<8x8xf32> to vector<8xf32>
    %73 = vector.shape_cast %72 : vector<8xf32> to vector<8x1xf32>
    %74 = tpu.reciprocal %73 {approx = true} : vector<8x1xf32> -> vector<8x1xf32>
    %75 = vector.broadcast %74 : vector<8x1xf32> to vector<8x8xf32>
    %76 = arith.mulf %71, %75 : vector<8x8xf32>
    %77 = arith.truncf %76 : vector<8x8xf32> to vector<8x8xbf16>
    %cst_48 = arith.constant dense<0.000000e+00> : vector<8x32xf32>
    %78 = tpu.matmul %77, %65, %cst_48 {dimension_numbers = #tpu.dot_dimension_numbers<[1], [0], [0], [1], [0, 0, 1, 1], [], []>} : vector<8x8xbf16>, vector<8x32xbf16>, vector<8x32xf32> -> vector<8x32xf32>
    %79 = vector.extract_strided_slice %30 {offsets = [0, 96], sizes = [8, 32], strides = [1, 1]} : vector<8x128xbf16> to vector<8x32xbf16>
    %80 = vector.extract_strided_slice %29 {offsets = [0, 224], sizes = [8, 32], strides = [1, 1]} : vector<8x384xbf16> to vector<8x32xbf16>
    %81 = vector.extract_strided_slice %29 {offsets = [0, 352], sizes = [8, 32], strides = [1, 1]} : vector<8x384xbf16> to vector<8x32xbf16>
    %cst_49 = arith.constant dense<0.000000e+00> : vector<8x8xf32>
    %82 = tpu.matmul %79, %80, %cst_49 {dimension_numbers = #tpu.dot_dimension_numbers<[1], [1], [0], [0], [0, 0, 1, 0], [], []>} : vector<8x32xbf16>, vector<8x32xbf16>, vector<8x8xf32> -> vector<8x8xf32>
    %cst_50 = arith.constant dense<0xFF800000> : vector<8xf32>
    %83 = vector.multi_reduction <maximumf>, %82, %cst_50 [1] : vector<8x8xf32> to vector<8xf32>
    %84 = vector.shape_cast %83 : vector<8xf32> to vector<8x1xf32>
    %85 = vector.broadcast %84 : vector<8x1xf32> to vector<8x8xf32>
    %86 = arith.subf %82, %85 : vector<8x8xf32>
    %87 = math.exp %86 : vector<8x8xf32>
    %cst_51 = arith.constant dense<0.000000e+00> : vector<8xf32>
    %88 = vector.multi_reduction <add>, %87, %cst_51 [1] : vector<8x8xf32> to vector<8xf32>
    %89 = vector.shape_cast %88 : vector<8xf32> to vector<8x1xf32>
    %90 = tpu.reciprocal %89 {approx = true} : vector<8x1xf32> -> vector<8x1xf32>
    %91 = vector.broadcast %90 : vector<8x1xf32> to vector<8x8xf32>
    %92 = arith.mulf %87, %91 : vector<8x8xf32>
    %93 = arith.truncf %92 : vector<8x8xf32> to vector<8x8xbf16>
    %cst_52 = arith.constant dense<0.000000e+00> : vector<8x32xf32>
    %94 = tpu.matmul %93, %81, %cst_52 {dimension_numbers = #tpu.dot_dimension_numbers<[1], [0], [0], [1], [0, 0, 1, 1], [], []>} : vector<8x8xbf16>, vector<8x32xbf16>, vector<8x32xf32> -> vector<8x32xf32>
    %95 = tpu.concatenate %46, %62, %78, %94 in 1 : vector<8x32xf32>, vector<8x32xf32>, vector<8x32xf32>, vector<8x32xf32> -> vector<8x128xf32>
    %96 = arith.truncf %95 : vector<8x128xf32> to vector<8x128xbf16>
    %cst_53 = arith.constant dense<0.000000e+00> : vector<8x128xf32>
    %97 = tpu.matmul %96, %10, %cst_53 {dimension_numbers = #tpu.dot_dimension_numbers<[1], [0], [0], [1], [0, 0, 1, 1], [], []>} : vector<8x128xbf16>, vector<128x128xbf16>, vector<8x128xf32> -> vector<8x128xf32>
    %98 = vector.broadcast %2 : vector<1x128xf32> to vector<8x128xf32>
    %99 = arith.addf %97, %98 : vector<8x128xf32>
    %100 = arith.addf %0, %99 : vector<8x128xf32>
    %cst_54 = arith.constant dense<0.000000e+00> : vector<8xf32>
    %101 = vector.multi_reduction <add>, %100, %cst_54 [1] : vector<8x128xf32> to vector<8xf32>
    %102 = vector.shape_cast %101 : vector<8xf32> to vector<8x1xf32>
    %cst_55 = arith.constant 7.812500e-03 : f32
    %103 = vector.broadcast %cst_55 : f32 to vector<8x1xf32>
    %104 = arith.mulf %102, %103 : vector<8x1xf32>
    %105 = arith.mulf %100, %100 : vector<8x128xf32>
    %cst_56 = arith.constant dense<0.000000e+00> : vector<8xf32>
    %106 = vector.multi_reduction <add>, %105, %cst_56 [1] : vector<8x128xf32> to vector<8xf32>
    %107 = vector.shape_cast %106 : vector<8xf32> to vector<8x1xf32>
    %cst_57 = arith.constant 7.812500e-03 : f32
    %108 = vector.broadcast %cst_57 : f32 to vector<8x1xf32>
    %109 = arith.mulf %107, %108 : vector<8x1xf32>
    %110 = arith.mulf %104, %104 : vector<8x1xf32>
    %111 = arith.subf %109, %110 : vector<8x1xf32>
    %112 = vector.broadcast %104 : vector<8x1xf32> to vector<8x128xf32>
    %113 = arith.subf %100, %112 : vector<8x128xf32>
    %cst_58 = arith.constant 9.99999974E-6 : f32
    %114 = vector.broadcast %cst_58 : f32 to vector<8x1xf32>
    %115 = arith.addf %111, %114 : vector<8x1xf32>
    %116 = math.rsqrt %115 : vector<8x1xf32>
    %117 = vector.broadcast %8 : vector<1x128xf32> to vector<8x128xf32>
    %118 = vector.broadcast %116 : vector<8x1xf32> to vector<8x128xf32>
    %119 = arith.mulf %117, %118 : vector<8x128xf32>
    %120 = arith.mulf %113, %119 : vector<8x128xf32>
    %121 = vector.broadcast %6 : vector<1x128xf32> to vector<8x128xf32>
    %122 = arith.addf %120, %121 : vector<8x128xf32>
    %123 = arith.truncf %122 : vector<8x128xf32> to vector<8x128xbf16>
    %cst_59 = arith.constant dense<0.000000e+00> : vector<8x256xf32>
    %124 = tpu.matmul %123, %22, %cst_59 {dimension_numbers = #tpu.dot_dimension_numbers<[1], [0], [0], [1], [0, 0, 1, 1], [], []>} : vector<8x128xbf16>, vector<128x256xbf16>, vector<8x256xf32> -> vector<8x256xf32>
    %125 = vector.broadcast %14 : vector<1x256xf32> to vector<8x256xf32>
    %126 = arith.addf %124, %125 : vector<8x256xf32>
    %cst_60 = arith.constant 0.000000e+00 : f32
    %127 = vector.broadcast %cst_60 : f32 to vector<8x256xf32>
    %128 = arith.maximumf %126, %127 : vector<8x256xf32>
    %129 = arith.truncf %128 : vector<8x256xf32> to vector<8x256xbf16>
    %cst_61 = arith.constant dense<0.000000e+00> : vector<8x128xf32>
    %130 = tpu.matmul %129, %24, %cst_61 {dimension_numbers = #tpu.dot_dimension_numbers<[1], [0], [0], [1], [0, 0, 1, 1], [], []>} : vector<8x256xbf16>, vector<256x128xbf16>, vector<8x128xf32> -> vector<8x128xf32>
    %131 = vector.broadcast %16 : vector<1x128xf32> to vector<8x128xf32>
    %132 = arith.addf %130, %131 : vector<8x128xf32>
    %133 = arith.addf %122, %132 : vector<8x128xf32>
    %cst_62 = arith.constant dense<0.000000e+00> : vector<8xf32>
    %134 = vector.multi_reduction <add>, %133, %cst_62 [1] : vector<8x128xf32> to vector<8xf32>
    %135 = vector.shape_cast %134 : vector<8xf32> to vector<8x1xf32>
    %cst_63 = arith.constant 7.812500e-03 : f32
    %136 = vector.broadcast %cst_63 : f32 to vector<8x1xf32>
    %137 = arith.mulf %135, %136 : vector<8x1xf32>
    %138 = arith.mulf %133, %133 : vector<8x128xf32>
    %cst_64 = arith.constant dense<0.000000e+00> : vector<8xf32>
    %139 = vector.multi_reduction <add>, %138, %cst_64 [1] : vector<8x128xf32> to vector<8xf32>
    %140 = vector.shape_cast %139 : vector<8xf32> to vector<8x1xf32>
    %cst_65 = arith.constant 7.812500e-03 : f32
    %141 = vector.broadcast %cst_65 : f32 to vector<8x1xf32>
    %142 = arith.mulf %140, %141 : vector<8x1xf32>
    %143 = arith.mulf %137, %137 : vector<8x1xf32>
    %144 = arith.subf %142, %143 : vector<8x1xf32>
    %145 = vector.broadcast %137 : vector<8x1xf32> to vector<8x128xf32>
    %146 = arith.subf %133, %145 : vector<8x128xf32>
    %cst_66 = arith.constant 9.99999974E-6 : f32
    %147 = vector.broadcast %cst_66 : f32 to vector<8x1xf32>
    %148 = arith.addf %144, %147 : vector<8x1xf32>
    %149 = math.rsqrt %148 : vector<8x1xf32>
    %150 = vector.broadcast %20 : vector<1x128xf32> to vector<8x128xf32>
    %151 = vector.broadcast %149 : vector<8x1xf32> to vector<8x128xf32>
    %152 = arith.mulf %150, %151 : vector<8x128xf32>
    %153 = arith.mulf %146, %152 : vector<8x128xf32>
    %154 = vector.broadcast %18 : vector<1x128xf32> to vector<8x128xf32>
    %155 = arith.addf %153, %154 : vector<8x128xf32>
    %c1 = arith.constant 1 : index
    %c0_67 = arith.constant 0 : index
    %c0_68 = arith.constant 0 : index
    %156 = vector.load %arg22[%c1, %c0_67, %c0_68] : memref<2x1x128xf32, #tpu.memory_space<vmem>>, vector<1x1x128xf32>
    %157 = vector.shape_cast %156 : vector<1x1x128xf32> to vector<1x128xf32>
    %c1_69 = arith.constant 1 : index
    %c0_70 = arith.constant 0 : index
    %c0_71 = arith.constant 0 : index
    %158 = vector.load %arg23[%c1_69, %c0_70, %c0_71] : memref<2x1x384xf32, #tpu.memory_space<vmem>>, vector<1x1x384xf32>
    %159 = vector.shape_cast %158 : vector<1x1x384xf32> to vector<1x384xf32>
    %c1_72 = arith.constant 1 : index
    %c0_73 = arith.constant 0 : index
    %c0_74 = arith.constant 0 : index
    %160 = vector.load %arg24[%c1_72, %c0_73, %c0_74] : memref<2x1x128xf32, #tpu.memory_space<vmem>>, vector<1x1x128xf32>
    %161 = vector.shape_cast %160 : vector<1x1x128xf32> to vector<1x128xf32>
    %c1_75 = arith.constant 1 : index
    %c0_76 = arith.constant 0 : index
    %c0_77 = arith.constant 0 : index
    %162 = vector.load %arg25[%c1_75, %c0_76, %c0_77] : memref<2x1x128xf32, #tpu.memory_space<vmem>>, vector<1x1x128xf32>
    %163 = vector.shape_cast %162 : vector<1x1x128xf32> to vector<1x128xf32>
    %c1_78 = arith.constant 1 : index
    %c0_79 = arith.constant 0 : index
    %c0_80 = arith.constant 0 : index
    %164 = vector.load %arg26[%c1_78, %c0_79, %c0_80] : memref<2x128x128xbf16, #tpu.memory_space<vmem>>, vector<1x128x128xbf16>
    %165 = vector.shape_cast %164 : vector<1x128x128xbf16> to vector<128x128xbf16>
    %c1_81 = arith.constant 1 : index
    %c0_82 = arith.constant 0 : index
    %c0_83 = arith.constant 0 : index
    %166 = vector.load %arg27[%c1_81, %c0_82, %c0_83] : memref<2x128x384xbf16, #tpu.memory_space<vmem>>, vector<1x128x384xbf16>
    %167 = vector.shape_cast %166 : vector<1x128x384xbf16> to vector<128x384xbf16>
    %c1_84 = arith.constant 1 : index
    %c0_85 = arith.constant 0 : index
    %c0_86 = arith.constant 0 : index
    %168 = vector.load %arg28[%c1_84, %c0_85, %c0_86] : memref<2x1x256xf32, #tpu.memory_space<vmem>>, vector<1x1x256xf32>
    %169 = vector.shape_cast %168 : vector<1x1x256xf32> to vector<1x256xf32>
    %c1_87 = arith.constant 1 : index
    %c0_88 = arith.constant 0 : index
    %c0_89 = arith.constant 0 : index
    %170 = vector.load %arg29[%c1_87, %c0_88, %c0_89] : memref<2x1x128xf32, #tpu.memory_space<vmem>>, vector<1x1x128xf32>
    %171 = vector.shape_cast %170 : vector<1x1x128xf32> to vector<1x128xf32>
    %c1_90 = arith.constant 1 : index
    %c0_91 = arith.constant 0 : index
    %c0_92 = arith.constant 0 : index
    %172 = vector.load %arg30[%c1_90, %c0_91, %c0_92] : memref<2x1x128xf32, #tpu.memory_space<vmem>>, vector<1x1x128xf32>
    %173 = vector.shape_cast %172 : vector<1x1x128xf32> to vector<1x128xf32>
    %c1_93 = arith.constant 1 : index
    %c0_94 = arith.constant 0 : index
    %c0_95 = arith.constant 0 : index
    %174 = vector.load %arg31[%c1_93, %c0_94, %c0_95] : memref<2x1x128xf32, #tpu.memory_space<vmem>>, vector<1x1x128xf32>
    %175 = vector.shape_cast %174 : vector<1x1x128xf32> to vector<1x128xf32>
    %c1_96 = arith.constant 1 : index
    %c0_97 = arith.constant 0 : index
    %c0_98 = arith.constant 0 : index
    %176 = vector.load %arg32[%c1_96, %c0_97, %c0_98] : memref<2x128x256xbf16, #tpu.memory_space<vmem>>, vector<1x128x256xbf16>
    %177 = vector.shape_cast %176 : vector<1x128x256xbf16> to vector<128x256xbf16>
    %c1_99 = arith.constant 1 : index
    %c0_100 = arith.constant 0 : index
    %c0_101 = arith.constant 0 : index
    %178 = vector.load %arg33[%c1_99, %c0_100, %c0_101] : memref<2x256x128xbf16, #tpu.memory_space<vmem>>, vector<1x256x128xbf16>
    %179 = vector.shape_cast %178 : vector<1x256x128xbf16> to vector<256x128xbf16>
    %180 = arith.truncf %155 : vector<8x128xf32> to vector<8x128xbf16>
    %cst_102 = arith.constant dense<0.000000e+00> : vector<8x384xf32>
    %181 = tpu.matmul %180, %167, %cst_102 {dimension_numbers = #tpu.dot_dimension_numbers<[1], [0], [0], [1], [0, 0, 1, 1], [], []>} : vector<8x128xbf16>, vector<128x384xbf16>, vector<8x384xf32> -> vector<8x384xf32>
    %182 = vector.broadcast %159 : vector<1x384xf32> to vector<8x384xf32>
    %183 = arith.addf %181, %182 : vector<8x384xf32>
    %184 = arith.truncf %183 : vector<8x384xf32> to vector<8x384xbf16>
    %185 = vector.extract_strided_slice %184 {offsets = [0, 0], sizes = [8, 128], strides = [1, 1]} : vector<8x384xbf16> to vector<8x128xbf16>
    %186 = vector.extract_strided_slice %185 {offsets = [0, 0], sizes = [8, 32], strides = [1, 1]} : vector<8x128xbf16> to vector<8x32xbf16>
    %187 = vector.extract_strided_slice %184 {offsets = [0, 128], sizes = [8, 32], strides = [1, 1]} : vector<8x384xbf16> to vector<8x32xbf16>
    %188 = vector.extract_strided_slice %184 {offsets = [0, 256], sizes = [8, 32], strides = [1, 1]} : vector<8x384xbf16> to vector<8x32xbf16>
    %cst_103 = arith.constant dense<0.000000e+00> : vector<8x8xf32>
    %189 = tpu.matmul %186, %187, %cst_103 {dimension_numbers = #tpu.dot_dimension_numbers<[1], [1], [0], [0], [0, 0, 1, 0], [], []>} : vector<8x32xbf16>, vector<8x32xbf16>, vector<8x8xf32> -> vector<8x8xf32>
    %cst_104 = arith.constant dense<0xFF800000> : vector<8xf32>
    %190 = vector.multi_reduction <maximumf>, %189, %cst_104 [1] : vector<8x8xf32> to vector<8xf32>
    %191 = vector.shape_cast %190 : vector<8xf32> to vector<8x1xf32>
    %192 = vector.broadcast %191 : vector<8x1xf32> to vector<8x8xf32>
    %193 = arith.subf %189, %192 : vector<8x8xf32>
    %194 = math.exp %193 : vector<8x8xf32>
    %cst_105 = arith.constant dense<0.000000e+00> : vector<8xf32>
    %195 = vector.multi_reduction <add>, %194, %cst_105 [1] : vector<8x8xf32> to vector<8xf32>
    %196 = vector.shape_cast %195 : vector<8xf32> to vector<8x1xf32>
    %197 = tpu.reciprocal %196 {approx = true} : vector<8x1xf32> -> vector<8x1xf32>
    %198 = vector.broadcast %197 : vector<8x1xf32> to vector<8x8xf32>
    %199 = arith.mulf %194, %198 : vector<8x8xf32>
    %200 = arith.truncf %199 : vector<8x8xf32> to vector<8x8xbf16>
    %cst_106 = arith.constant dense<0.000000e+00> : vector<8x32xf32>
    %201 = tpu.matmul %200, %188, %cst_106 {dimension_numbers = #tpu.dot_dimension_numbers<[1], [0], [0], [1], [0, 0, 1, 1], [], []>} : vector<8x8xbf16>, vector<8x32xbf16>, vector<8x32xf32> -> vector<8x32xf32>
    %202 = vector.extract_strided_slice %185 {offsets = [0, 32], sizes = [8, 32], strides = [1, 1]} : vector<8x128xbf16> to vector<8x32xbf16>
    %203 = vector.extract_strided_slice %184 {offsets = [0, 160], sizes = [8, 32], strides = [1, 1]} : vector<8x384xbf16> to vector<8x32xbf16>
    %204 = vector.extract_strided_slice %184 {offsets = [0, 288], sizes = [8, 32], strides = [1, 1]} : vector<8x384xbf16> to vector<8x32xbf16>
    %cst_107 = arith.constant dense<0.000000e+00> : vector<8x8xf32>
    %205 = tpu.matmul %202, %203, %cst_107 {dimension_numbers = #tpu.dot_dimension_numbers<[1], [1], [0], [0], [0, 0, 1, 0], [], []>} : vector<8x32xbf16>, vector<8x32xbf16>, vector<8x8xf32> -> vector<8x8xf32>
    %cst_108 = arith.constant dense<0xFF800000> : vector<8xf32>
    %206 = vector.multi_reduction <maximumf>, %205, %cst_108 [1] : vector<8x8xf32> to vector<8xf32>
    %207 = vector.shape_cast %206 : vector<8xf32> to vector<8x1xf32>
    %208 = vector.broadcast %207 : vector<8x1xf32> to vector<8x8xf32>
    %209 = arith.subf %205, %208 : vector<8x8xf32>
    %210 = math.exp %209 : vector<8x8xf32>
    %cst_109 = arith.constant dense<0.000000e+00> : vector<8xf32>
    %211 = vector.multi_reduction <add>, %210, %cst_109 [1] : vector<8x8xf32> to vector<8xf32>
    %212 = vector.shape_cast %211 : vector<8xf32> to vector<8x1xf32>
    %213 = tpu.reciprocal %212 {approx = true} : vector<8x1xf32> -> vector<8x1xf32>
    %214 = vector.broadcast %213 : vector<8x1xf32> to vector<8x8xf32>
    %215 = arith.mulf %210, %214 : vector<8x8xf32>
    %216 = arith.truncf %215 : vector<8x8xf32> to vector<8x8xbf16>
    %cst_110 = arith.constant dense<0.000000e+00> : vector<8x32xf32>
    %217 = tpu.matmul %216, %204, %cst_110 {dimension_numbers = #tpu.dot_dimension_numbers<[1], [0], [0], [1], [0, 0, 1, 1], [], []>} : vector<8x8xbf16>, vector<8x32xbf16>, vector<8x32xf32> -> vector<8x32xf32>
    %218 = vector.extract_strided_slice %185 {offsets = [0, 64], sizes = [8, 32], strides = [1, 1]} : vector<8x128xbf16> to vector<8x32xbf16>
    %219 = vector.extract_strided_slice %184 {offsets = [0, 192], sizes = [8, 32], strides = [1, 1]} : vector<8x384xbf16> to vector<8x32xbf16>
    %220 = vector.extract_strided_slice %184 {offsets = [0, 320], sizes = [8, 32], strides = [1, 1]} : vector<8x384xbf16> to vector<8x32xbf16>
    %cst_111 = arith.constant dense<0.000000e+00> : vector<8x8xf32>
    %221 = tpu.matmul %218, %219, %cst_111 {dimension_numbers = #tpu.dot_dimension_numbers<[1], [1], [0], [0], [0, 0, 1, 0], [], []>} : vector<8x32xbf16>, vector<8x32xbf16>, vector<8x8xf32> -> vector<8x8xf32>
    %cst_112 = arith.constant dense<0xFF800000> : vector<8xf32>
    %222 = vector.multi_reduction <maximumf>, %221, %cst_112 [1] : vector<8x8xf32> to vector<8xf32>
    %223 = vector.shape_cast %222 : vector<8xf32> to vector<8x1xf32>
    %224 = vector.broadcast %223 : vector<8x1xf32> to vector<8x8xf32>
    %225 = arith.subf %221, %224 : vector<8x8xf32>
    %226 = math.exp %225 : vector<8x8xf32>
    %cst_113 = arith.constant dense<0.000000e+00> : vector<8xf32>
    %227 = vector.multi_reduction <add>, %226, %cst_113 [1] : vector<8x8xf32> to vector<8xf32>
    %228 = vector.shape_cast %227 : vector<8xf32> to vector<8x1xf32>
    %229 = tpu.reciprocal %228 {approx = true} : vector<8x1xf32> -> vector<8x1xf32>
    %230 = vector.broadcast %229 : vector<8x1xf32> to vector<8x8xf32>
    %231 = arith.mulf %226, %230 : vector<8x8xf32>
    %232 = arith.truncf %231 : vector<8x8xf32> to vector<8x8xbf16>
    %cst_114 = arith.constant dense<0.000000e+00> : vector<8x32xf32>
    %233 = tpu.matmul %232, %220, %cst_114 {dimension_numbers = #tpu.dot_dimension_numbers<[1], [0], [0], [1], [0, 0, 1, 1], [], []>} : vector<8x8xbf16>, vector<8x32xbf16>, vector<8x32xf32> -> vector<8x32xf32>
    %234 = vector.extract_strided_slice %185 {offsets = [0, 96], sizes = [8, 32], strides = [1, 1]} : vector<8x128xbf16> to vector<8x32xbf16>
    %235 = vector.extract_strided_slice %184 {offsets = [0, 224], sizes = [8, 32], strides = [1, 1]} : vector<8x384xbf16> to vector<8x32xbf16>
    %236 = vector.extract_strided_slice %184 {offsets = [0, 352], sizes = [8, 32], strides = [1, 1]} : vector<8x384xbf16> to vector<8x32xbf16>
    %cst_115 = arith.constant dense<0.000000e+00> : vector<8x8xf32>
    %237 = tpu.matmul %234, %235, %cst_115 {dimension_numbers = #tpu.dot_dimension_numbers<[1], [1], [0], [0], [0, 0, 1, 0], [], []>} : vector<8x32xbf16>, vector<8x32xbf16>, vector<8x8xf32> -> vector<8x8xf32>
    %cst_116 = arith.constant dense<0xFF800000> : vector<8xf32>
    %238 = vector.multi_reduction <maximumf>, %237, %cst_116 [1] : vector<8x8xf32> to vector<8xf32>
    %239 = vector.shape_cast %238 : vector<8xf32> to vector<8x1xf32>
    %240 = vector.broadcast %239 : vector<8x1xf32> to vector<8x8xf32>
    %241 = arith.subf %237, %240 : vector<8x8xf32>
    %242 = math.exp %241 : vector<8x8xf32>
    %cst_117 = arith.constant dense<0.000000e+00> : vector<8xf32>
    %243 = vector.multi_reduction <add>, %242, %cst_117 [1] : vector<8x8xf32> to vector<8xf32>
    %244 = vector.shape_cast %243 : vector<8xf32> to vector<8x1xf32>
    %245 = tpu.reciprocal %244 {approx = true} : vector<8x1xf32> -> vector<8x1xf32>
    %246 = vector.broadcast %245 : vector<8x1xf32> to vector<8x8xf32>
    %247 = arith.mulf %242, %246 : vector<8x8xf32>
    %248 = arith.truncf %247 : vector<8x8xf32> to vector<8x8xbf16>
    %cst_118 = arith.constant dense<0.000000e+00> : vector<8x32xf32>
    %249 = tpu.matmul %248, %236, %cst_118 {dimension_numbers = #tpu.dot_dimension_numbers<[1], [0], [0], [1], [0, 0, 1, 1], [], []>} : vector<8x8xbf16>, vector<8x32xbf16>, vector<8x32xf32> -> vector<8x32xf32>
    %250 = tpu.concatenate %201, %217, %233, %249 in 1 : vector<8x32xf32>, vector<8x32xf32>, vector<8x32xf32>, vector<8x32xf32> -> vector<8x128xf32>
    %251 = arith.truncf %250 : vector<8x128xf32> to vector<8x128xbf16>
    %cst_119 = arith.constant dense<0.000000e+00> : vector<8x128xf32>
    %252 = tpu.matmul %251, %165, %cst_119 {dimension_numbers = #tpu.dot_dimension_numbers<[1], [0], [0], [1], [0, 0, 1, 1], [], []>} : vector<8x128xbf16>, vector<128x128xbf16>, vector<8x128xf32> -> vector<8x128xf32>
    %253 = vector.broadcast %157 : vector<1x128xf32> to vector<8x128xf32>
    %254 = arith.addf %252, %253 : vector<8x128xf32>
    %255 = arith.addf %155, %254 : vector<8x128xf32>
    %cst_120 = arith.constant dense<0.000000e+00> : vector<8xf32>
    %256 = vector.multi_reduction <add>, %255, %cst_120 [1] : vector<8x128xf32> to vector<8xf32>
    %257 = vector.shape_cast %256 : vector<8xf32> to vector<8x1xf32>
    %cst_121 = arith.constant 7.812500e-03 : f32
    %258 = vector.broadcast %cst_121 : f32 to vector<8x1xf32>
    %259 = arith.mulf %257, %258 : vector<8x1xf32>
    %260 = arith.mulf %255, %255 : vector<8x128xf32>
    %cst_122 = arith.constant dense<0.000000e+00> : vector<8xf32>
    %261 = vector.multi_reduction <add>, %260, %cst_122 [1] : vector<8x128xf32> to vector<8xf32>
    %262 = vector.shape_cast %261 : vector<8xf32> to vector<8x1xf32>
    %cst_123 = arith.constant 7.812500e-03 : f32
    %263 = vector.broadcast %cst_123 : f32 to vector<8x1xf32>
    %264 = arith.mulf %262, %263 : vector<8x1xf32>
    %265 = arith.mulf %259, %259 : vector<8x1xf32>
    %266 = arith.subf %264, %265 : vector<8x1xf32>
    %267 = vector.broadcast %259 : vector<8x1xf32> to vector<8x128xf32>
    %268 = arith.subf %255, %267 : vector<8x128xf32>
    %cst_124 = arith.constant 9.99999974E-6 : f32
    %269 = vector.broadcast %cst_124 : f32 to vector<8x1xf32>
    %270 = arith.addf %266, %269 : vector<8x1xf32>
    %271 = math.rsqrt %270 : vector<8x1xf32>
    %272 = vector.broadcast %163 : vector<1x128xf32> to vector<8x128xf32>
    %273 = vector.broadcast %271 : vector<8x1xf32> to vector<8x128xf32>
    %274 = arith.mulf %272, %273 : vector<8x128xf32>
    %275 = arith.mulf %268, %274 : vector<8x128xf32>
    %276 = vector.broadcast %161 : vector<1x128xf32> to vector<8x128xf32>
    %277 = arith.addf %275, %276 : vector<8x128xf32>
    %278 = arith.truncf %277 : vector<8x128xf32> to vector<8x128xbf16>
    %cst_125 = arith.constant dense<0.000000e+00> : vector<8x256xf32>
    %279 = tpu.matmul %278, %177, %cst_125 {dimension_numbers = #tpu.dot_dimension_numbers<[1], [0], [0], [1], [0, 0, 1, 1], [], []>} : vector<8x128xbf16>, vector<128x256xbf16>, vector<8x256xf32> -> vector<8x256xf32>
    %280 = vector.broadcast %169 : vector<1x256xf32> to vector<8x256xf32>
    %281 = arith.addf %279, %280 : vector<8x256xf32>
    %cst_126 = arith.constant 0.000000e+00 : f32
    %282 = vector.broadcast %cst_126 : f32 to vector<8x256xf32>
    %283 = arith.maximumf %281, %282 : vector<8x256xf32>
    %284 = arith.truncf %283 : vector<8x256xf32> to vector<8x256xbf16>
    %cst_127 = arith.constant dense<0.000000e+00> : vector<8x128xf32>
    %285 = tpu.matmul %284, %179, %cst_127 {dimension_numbers = #tpu.dot_dimension_numbers<[1], [0], [0], [1], [0, 0, 1, 1], [], []>} : vector<8x256xbf16>, vector<256x128xbf16>, vector<8x128xf32> -> vector<8x128xf32>
    %286 = vector.broadcast %171 : vector<1x128xf32> to vector<8x128xf32>
    %287 = arith.addf %285, %286 : vector<8x128xf32>
    %288 = arith.addf %277, %287 : vector<8x128xf32>
    %cst_128 = arith.constant dense<0.000000e+00> : vector<8xf32>
    %289 = vector.multi_reduction <add>, %288, %cst_128 [1] : vector<8x128xf32> to vector<8xf32>
    %290 = vector.shape_cast %289 : vector<8xf32> to vector<8x1xf32>
    %cst_129 = arith.constant 7.812500e-03 : f32
    %291 = vector.broadcast %cst_129 : f32 to vector<8x1xf32>
    %292 = arith.mulf %290, %291 : vector<8x1xf32>
    %293 = arith.mulf %288, %288 : vector<8x128xf32>
    %cst_130 = arith.constant dense<0.000000e+00> : vector<8xf32>
    %294 = vector.multi_reduction <add>, %293, %cst_130 [1] : vector<8x128xf32> to vector<8xf32>
    %295 = vector.shape_cast %294 : vector<8xf32> to vector<8x1xf32>
    %cst_131 = arith.constant 7.812500e-03 : f32
    %296 = vector.broadcast %cst_131 : f32 to vector<8x1xf32>
    %297 = arith.mulf %295, %296 : vector<8x1xf32>
    %298 = arith.mulf %292, %292 : vector<8x1xf32>
    %299 = arith.subf %297, %298 : vector<8x1xf32>
    %300 = vector.broadcast %292 : vector<8x1xf32> to vector<8x128xf32>
    %301 = arith.subf %288, %300 : vector<8x128xf32>
    %cst_132 = arith.constant 9.99999974E-6 : f32
    %302 = vector.broadcast %cst_132 : f32 to vector<8x1xf32>
    %303 = arith.addf %299, %302 : vector<8x1xf32>
    %304 = math.rsqrt %303 : vector<8x1xf32>
    %305 = vector.broadcast %175 : vector<1x128xf32> to vector<8x128xf32>
    %306 = vector.broadcast %304 : vector<8x1xf32> to vector<8x128xf32>
    %307 = arith.mulf %305, %306 : vector<8x128xf32>
    %308 = arith.mulf %301, %307 : vector<8x128xf32>
    %309 = vector.broadcast %173 : vector<1x128xf32> to vector<8x128xf32>
    %310 = arith.addf %308, %309 : vector<8x128xf32>
    %311 = arith.truncf %310 : vector<8x128xf32> to vector<8x128xbf16>
    %c0_133 = arith.constant 0 : index
    %c0_134 = arith.constant 0 : index
    %312 = vector.load %arg21[%c0_133, %c0_134] : memref<128x1024xbf16, #tpu.memory_space<vmem>>, vector<128x1024xbf16>
    %cst_135 = arith.constant dense<0.000000e+00> : vector<8x1024xf32>
    %313 = tpu.matmul %311, %312, %cst_135 {dimension_numbers = #tpu.dot_dimension_numbers<[1], [0], [0], [1], [0, 0, 1, 1], [], []>} : vector<8x128xbf16>, vector<128x1024xbf16>, vector<8x1024xf32> -> vector<8x1024xf32>
    %c0_136 = arith.constant 0 : index
    %c0_137 = arith.constant 0 : index
    %314 = vector.load %arg20[%c0_136, %c0_137] : memref<1x1024xf32, #tpu.memory_space<vmem>>, vector<1x1024xf32>
    %315 = vector.broadcast %314 : vector<1x1024xf32> to vector<8x1024xf32>
    %316 = arith.addf %313, %315 : vector<8x1024xf32>
    %317 = arith.truncf %316 : vector<8x1024xf32> to vector<8x1024xbf16>
    %c0_138 = arith.constant 0 : index
    %c0_139 = arith.constant 0 : index
    %318 = vector.load %arg1[%c0_138, %c0_139] : memref<8x128xf32, #tpu.memory_space<vmem>>, vector<8x128xf32>
    %c0_140 = arith.constant 0 : index
    %c0_141 = arith.constant 0 : index
    %c0_142 = arith.constant 0 : index
    %319 = vector.load %arg2[%c0_140, %c0_141, %c0_142] : memref<2x1x128xf32, #tpu.memory_space<vmem>>, vector<1x1x128xf32>
    %320 = vector.shape_cast %319 : vector<1x1x128xf32> to vector<1x128xf32>
    %c0_143 = arith.constant 0 : index
    %c0_144 = arith.constant 0 : index
    %c0_145 = arith.constant 0 : index
    %321 = vector.load %arg3[%c0_143, %c0_144, %c0_145] : memref<2x1x128xf32, #tpu.memory_space<vmem>>, vector<1x1x128xf32>
    %322 = vector.shape_cast %321 : vector<1x1x128xf32> to vector<1x128xf32>
    %c0_146 = arith.constant 0 : index
    %c0_147 = arith.constant 0 : index
    %c0_148 = arith.constant 0 : index
    %323 = vector.load %arg4[%c0_146, %c0_147, %c0_148] : memref<2x1x128xf32, #tpu.memory_space<vmem>>, vector<1x1x128xf32>
    %324 = vector.shape_cast %323 : vector<1x1x128xf32> to vector<1x128xf32>
    %c0_149 = arith.constant 0 : index
    %c0_150 = arith.constant 0 : index
    %c0_151 = arith.constant 0 : index
    %325 = vector.load %arg5[%c0_149, %c0_150, %c0_151] : memref<2x1x128xf32, #tpu.memory_space<vmem>>, vector<1x1x128xf32>
    %326 = vector.shape_cast %325 : vector<1x1x128xf32> to vector<1x128xf32>
    %c0_152 = arith.constant 0 : index
    %c0_153 = arith.constant 0 : index
    %c0_154 = arith.constant 0 : index
    %327 = vector.load %arg6[%c0_152, %c0_153, %c0_154] : memref<2x128x128xbf16, #tpu.memory_space<vmem>>, vector<1x128x128xbf16>
    %328 = vector.shape_cast %327 : vector<1x128x128xbf16> to vector<128x128xbf16>
    %c0_155 = arith.constant 0 : index
    %c0_156 = arith.constant 0 : index
    %c0_157 = arith.constant 0 : index
    %329 = vector.load %arg7[%c0_155, %c0_156, %c0_157] : memref<2x128x128xbf16, #tpu.memory_space<vmem>>, vector<1x128x128xbf16>
    %330 = vector.shape_cast %329 : vector<1x128x128xbf16> to vector<128x128xbf16>
    %c0_158 = arith.constant 0 : index
    %c0_159 = arith.constant 0 : index
    %c0_160 = arith.constant 0 : index
    %331 = vector.load %arg8[%c0_158, %c0_159, %c0_160] : memref<2x1x256xf32, #tpu.memory_space<vmem>>, vector<1x1x256xf32>
    %332 = vector.shape_cast %331 : vector<1x1x256xf32> to vector<1x256xf32>
    %c0_161 = arith.constant 0 : index
    %c0_162 = arith.constant 0 : index
    %c0_163 = arith.constant 0 : index
    %333 = vector.load %arg9[%c0_161, %c0_162, %c0_163] : memref<2x1x128xf32, #tpu.memory_space<vmem>>, vector<1x1x128xf32>
    %334 = vector.shape_cast %333 : vector<1x1x128xf32> to vector<1x128xf32>
    %c0_164 = arith.constant 0 : index
    %c0_165 = arith.constant 0 : index
    %c0_166 = arith.constant 0 : index
    %335 = vector.load %arg10[%c0_164, %c0_165, %c0_166] : memref<2x1x128xf32, #tpu.memory_space<vmem>>, vector<1x1x128xf32>
    %336 = vector.shape_cast %335 : vector<1x1x128xf32> to vector<1x128xf32>
    %c0_167 = arith.constant 0 : index
    %c0_168 = arith.constant 0 : index
    %c0_169 = arith.constant 0 : index
    %337 = vector.load %arg11[%c0_167, %c0_168, %c0_169] : memref<2x1x128xf32, #tpu.memory_space<vmem>>, vector<1x1x128xf32>
    %338 = vector.shape_cast %337 : vector<1x1x128xf32> to vector<1x128xf32>
    %c0_170 = arith.constant 0 : index
    %c0_171 = arith.constant 0 : index
    %c0_172 = arith.constant 0 : index
    %339 = vector.load %arg12[%c0_170, %c0_171, %c0_172] : memref<2x128x256xbf16, #tpu.memory_space<vmem>>, vector<1x128x256xbf16>
    %340 = vector.shape_cast %339 : vector<1x128x256xbf16> to vector<128x256xbf16>
    %c0_173 = arith.constant 0 : index
    %c0_174 = arith.constant 0 : index
    %c0_175 = arith.constant 0 : index
    %341 = vector.load %arg13[%c0_173, %c0_174, %c0_175] : memref<2x256x128xbf16, #tpu.memory_space<vmem>>, vector<1x256x128xbf16>
    %342 = vector.shape_cast %341 : vector<1x256x128xbf16> to vector<256x128xbf16>
    %c0_176 = arith.constant 0 : index
    %c0_177 = arith.constant 0 : index
    %c0_178 = arith.constant 0 : index
    %343 = vector.load %arg14[%c0_176, %c0_177, %c0_178] : memref<2x1x128xf32, #tpu.memory_space<vmem>>, vector<1x1x128xf32>
    %344 = vector.shape_cast %343 : vector<1x1x128xf32> to vector<1x128xf32>
    %c0_179 = arith.constant 0 : index
    %c0_180 = arith.constant 0 : index
    %c0_181 = arith.constant 0 : index
    %345 = vector.load %arg15[%c0_179, %c0_180, %c0_181] : memref<2x1x128xf32, #tpu.memory_space<vmem>>, vector<1x1x128xf32>
    %346 = vector.shape_cast %345 : vector<1x1x128xf32> to vector<1x128xf32>
    %c0_182 = arith.constant 0 : index
    %c0_183 = arith.constant 0 : index
    %c0_184 = arith.constant 0 : index
    %347 = vector.load %arg16[%c0_182, %c0_183, %c0_184] : memref<2x1x128xf32, #tpu.memory_space<vmem>>, vector<1x1x128xf32>
    %348 = vector.shape_cast %347 : vector<1x1x128xf32> to vector<1x128xf32>
    %c0_185 = arith.constant 0 : index
    %c0_186 = arith.constant 0 : index
    %c0_187 = arith.constant 0 : index
    %349 = vector.load %arg17[%c0_185, %c0_186, %c0_187] : memref<2x1x128xf32, #tpu.memory_space<vmem>>, vector<1x1x128xf32>
    %350 = vector.shape_cast %349 : vector<1x1x128xf32> to vector<1x128xf32>
    %c0_188 = arith.constant 0 : index
    %c0_189 = arith.constant 0 : index
    %c0_190 = arith.constant 0 : index
    %351 = vector.load %arg18[%c0_188, %c0_189, %c0_190] : memref<2x128x128xbf16, #tpu.memory_space<vmem>>, vector<1x128x128xbf16>
    %352 = vector.shape_cast %351 : vector<1x128x128xbf16> to vector<128x128xbf16>
    %c0_191 = arith.constant 0 : index
    %c0_192 = arith.constant 0 : index
    %c0_193 = arith.constant 0 : index
    %353 = vector.load %arg19[%c0_191, %c0_192, %c0_193] : memref<2x128x128xbf16, #tpu.memory_space<vmem>>, vector<1x128x128xbf16>
    %354 = vector.shape_cast %353 : vector<1x128x128xbf16> to vector<128x128xbf16>
    %355 = arith.truncf %318 : vector<8x128xf32> to vector<8x128xbf16>
    %cst_194 = arith.constant dense<0.000000e+00> : vector<8x128xf32>
    %356 = tpu.matmul %355, %354, %cst_194 {dimension_numbers = #tpu.dot_dimension_numbers<[1], [0], [0], [1], [0, 0, 1, 1], [], []>} : vector<8x128xbf16>, vector<128x128xbf16>, vector<8x128xf32> -> vector<8x128xf32>
    %357 = vector.broadcast %346 : vector<1x128xf32> to vector<8x128xf32>
    %358 = arith.addf %356, %357 : vector<8x128xf32>
    %359 = arith.truncf %358 : vector<8x128xf32> to vector<8x128xbf16>
    %360 = vector.extract_strided_slice %359 {offsets = [0, 0], sizes = [8, 32], strides = [1, 1]} : vector<8x128xbf16> to vector<8x32xbf16>
    %361 = vector.extract_strided_slice %317 {offsets = [0, 0], sizes = [8, 32], strides = [1, 1]} : vector<8x1024xbf16> to vector<8x32xbf16>
    %362 = vector.extract_strided_slice %317 {offsets = [0, 128], sizes = [8, 32], strides = [1, 1]} : vector<8x1024xbf16> to vector<8x32xbf16>
    %cst_195 = arith.constant dense<0.000000e+00> : vector<8x8xf32>
    %363 = tpu.matmul %360, %361, %cst_195 {dimension_numbers = #tpu.dot_dimension_numbers<[1], [1], [0], [0], [0, 0, 1, 0], [], []>} : vector<8x32xbf16>, vector<8x32xbf16>, vector<8x8xf32> -> vector<8x8xf32>
    %cst_196 = arith.constant dense<0xFF800000> : vector<8xf32>
    %364 = vector.multi_reduction <maximumf>, %363, %cst_196 [1] : vector<8x8xf32> to vector<8xf32>
    %365 = vector.shape_cast %364 : vector<8xf32> to vector<8x1xf32>
    %366 = vector.broadcast %365 : vector<8x1xf32> to vector<8x8xf32>
    %367 = arith.subf %363, %366 : vector<8x8xf32>
    %368 = math.exp %367 : vector<8x8xf32>
    %cst_197 = arith.constant dense<0.000000e+00> : vector<8xf32>
    %369 = vector.multi_reduction <add>, %368, %cst_197 [1] : vector<8x8xf32> to vector<8xf32>
    %370 = vector.shape_cast %369 : vector<8xf32> to vector<8x1xf32>
    %371 = tpu.reciprocal %370 {approx = true} : vector<8x1xf32> -> vector<8x1xf32>
    %372 = vector.broadcast %371 : vector<8x1xf32> to vector<8x8xf32>
    %373 = arith.mulf %368, %372 : vector<8x8xf32>
    %374 = arith.truncf %373 : vector<8x8xf32> to vector<8x8xbf16>
    %cst_198 = arith.constant dense<0.000000e+00> : vector<8x32xf32>
    %375 = tpu.matmul %374, %362, %cst_198 {dimension_numbers = #tpu.dot_dimension_numbers<[1], [0], [0], [1], [0, 0, 1, 1], [], []>} : vector<8x8xbf16>, vector<8x32xbf16>, vector<8x32xf32> -> vector<8x32xf32>
    %376 = vector.extract_strided_slice %359 {offsets = [0, 32], sizes = [8, 32], strides = [1, 1]} : vector<8x128xbf16> to vector<8x32xbf16>
    %377 = vector.extract_strided_slice %317 {offsets = [0, 32], sizes = [8, 32], strides = [1, 1]} : vector<8x1024xbf16> to vector<8x32xbf16>
    %378 = vector.extract_strided_slice %317 {offsets = [0, 160], sizes = [8, 32], strides = [1, 1]} : vector<8x1024xbf16> to vector<8x32xbf16>
    %cst_199 = arith.constant dense<0.000000e+00> : vector<8x8xf32>
    %379 = tpu.matmul %376, %377, %cst_199 {dimension_numbers = #tpu.dot_dimension_numbers<[1], [1], [0], [0], [0, 0, 1, 0], [], []>} : vector<8x32xbf16>, vector<8x32xbf16>, vector<8x8xf32> -> vector<8x8xf32>
    %cst_200 = arith.constant dense<0xFF800000> : vector<8xf32>
    %380 = vector.multi_reduction <maximumf>, %379, %cst_200 [1] : vector<8x8xf32> to vector<8xf32>
    %381 = vector.shape_cast %380 : vector<8xf32> to vector<8x1xf32>
    %382 = vector.broadcast %381 : vector<8x1xf32> to vector<8x8xf32>
    %383 = arith.subf %379, %382 : vector<8x8xf32>
    %384 = math.exp %383 : vector<8x8xf32>
    %cst_201 = arith.constant dense<0.000000e+00> : vector<8xf32>
    %385 = vector.multi_reduction <add>, %384, %cst_201 [1] : vector<8x8xf32> to vector<8xf32>
    %386 = vector.shape_cast %385 : vector<8xf32> to vector<8x1xf32>
    %387 = tpu.reciprocal %386 {approx = true} : vector<8x1xf32> -> vector<8x1xf32>
    %388 = vector.broadcast %387 : vector<8x1xf32> to vector<8x8xf32>
    %389 = arith.mulf %384, %388 : vector<8x8xf32>
    %390 = arith.truncf %389 : vector<8x8xf32> to vector<8x8xbf16>
    %cst_202 = arith.constant dense<0.000000e+00> : vector<8x32xf32>
    %391 = tpu.matmul %390, %378, %cst_202 {dimension_numbers = #tpu.dot_dimension_numbers<[1], [0], [0], [1], [0, 0, 1, 1], [], []>} : vector<8x8xbf16>, vector<8x32xbf16>, vector<8x32xf32> -> vector<8x32xf32>
    %392 = vector.extract_strided_slice %359 {offsets = [0, 64], sizes = [8, 32], strides = [1, 1]} : vector<8x128xbf16> to vector<8x32xbf16>
    %393 = vector.extract_strided_slice %317 {offsets = [0, 64], sizes = [8, 32], strides = [1, 1]} : vector<8x1024xbf16> to vector<8x32xbf16>
    %394 = vector.extract_strided_slice %317 {offsets = [0, 192], sizes = [8, 32], strides = [1, 1]} : vector<8x1024xbf16> to vector<8x32xbf16>
    %cst_203 = arith.constant dense<0.000000e+00> : vector<8x8xf32>
    %395 = tpu.matmul %392, %393, %cst_203 {dimension_numbers = #tpu.dot_dimension_numbers<[1], [1], [0], [0], [0, 0, 1, 0], [], []>} : vector<8x32xbf16>, vector<8x32xbf16>, vector<8x8xf32> -> vector<8x8xf32>
    %cst_204 = arith.constant dense<0xFF800000> : vector<8xf32>
    %396 = vector.multi_reduction <maximumf>, %395, %cst_204 [1] : vector<8x8xf32> to vector<8xf32>
    %397 = vector.shape_cast %396 : vector<8xf32> to vector<8x1xf32>
    %398 = vector.broadcast %397 : vector<8x1xf32> to vector<8x8xf32>
    %399 = arith.subf %395, %398 : vector<8x8xf32>
    %400 = math.exp %399 : vector<8x8xf32>
    %cst_205 = arith.constant dense<0.000000e+00> : vector<8xf32>
    %401 = vector.multi_reduction <add>, %400, %cst_205 [1] : vector<8x8xf32> to vector<8xf32>
    %402 = vector.shape_cast %401 : vector<8xf32> to vector<8x1xf32>
    %403 = tpu.reciprocal %402 {approx = true} : vector<8x1xf32> -> vector<8x1xf32>
    %404 = vector.broadcast %403 : vector<8x1xf32> to vector<8x8xf32>
    %405 = arith.mulf %400, %404 : vector<8x8xf32>
    %406 = arith.truncf %405 : vector<8x8xf32> to vector<8x8xbf16>
    %cst_206 = arith.constant dense<0.000000e+00> : vector<8x32xf32>
    %407 = tpu.matmul %406, %394, %cst_206 {dimension_numbers = #tpu.dot_dimension_numbers<[1], [0], [0], [1], [0, 0, 1, 1], [], []>} : vector<8x8xbf16>, vector<8x32xbf16>, vector<8x32xf32> -> vector<8x32xf32>
    %408 = vector.extract_strided_slice %359 {offsets = [0, 96], sizes = [8, 32], strides = [1, 1]} : vector<8x128xbf16> to vector<8x32xbf16>
    %409 = vector.extract_strided_slice %317 {offsets = [0, 96], sizes = [8, 32], strides = [1, 1]} : vector<8x1024xbf16> to vector<8x32xbf16>
    %410 = vector.extract_strided_slice %317 {offsets = [0, 224], sizes = [8, 32], strides = [1, 1]} : vector<8x1024xbf16> to vector<8x32xbf16>
    %cst_207 = arith.constant dense<0.000000e+00> : vector<8x8xf32>
    %411 = tpu.matmul %408, %409, %cst_207 {dimension_numbers = #tpu.dot_dimension_numbers<[1], [1], [0], [0], [0, 0, 1, 0], [], []>} : vector<8x32xbf16>, vector<8x32xbf16>, vector<8x8xf32> -> vector<8x8xf32>
    %cst_208 = arith.constant dense<0xFF800000> : vector<8xf32>
    %412 = vector.multi_reduction <maximumf>, %411, %cst_208 [1] : vector<8x8xf32> to vector<8xf32>
    %413 = vector.shape_cast %412 : vector<8xf32> to vector<8x1xf32>
    %414 = vector.broadcast %413 : vector<8x1xf32> to vector<8x8xf32>
    %415 = arith.subf %411, %414 : vector<8x8xf32>
    %416 = math.exp %415 : vector<8x8xf32>
    %cst_209 = arith.constant dense<0.000000e+00> : vector<8xf32>
    %417 = vector.multi_reduction <add>, %416, %cst_209 [1] : vector<8x8xf32> to vector<8xf32>
    %418 = vector.shape_cast %417 : vector<8xf32> to vector<8x1xf32>
    %419 = tpu.reciprocal %418 {approx = true} : vector<8x1xf32> -> vector<8x1xf32>
    %420 = vector.broadcast %419 : vector<8x1xf32> to vector<8x8xf32>
    %421 = arith.mulf %416, %420 : vector<8x8xf32>
    %422 = arith.truncf %421 : vector<8x8xf32> to vector<8x8xbf16>
    %cst_210 = arith.constant dense<0.000000e+00> : vector<8x32xf32>
    %423 = tpu.matmul %422, %410, %cst_210 {dimension_numbers = #tpu.dot_dimension_numbers<[1], [0], [0], [1], [0, 0, 1, 1], [], []>} : vector<8x8xbf16>, vector<8x32xbf16>, vector<8x32xf32> -> vector<8x32xf32>
    %424 = tpu.concatenate %375, %391, %407, %423 in 1 : vector<8x32xf32>, vector<8x32xf32>, vector<8x32xf32>, vector<8x32xf32> -> vector<8x128xf32>
    %425 = arith.truncf %424 : vector<8x128xf32> to vector<8x128xbf16>
    %cst_211 = arith.constant dense<0.000000e+00> : vector<8x128xf32>
    %426 = tpu.matmul %425, %352, %cst_211 {dimension_numbers = #tpu.dot_dimension_numbers<[1], [0], [0], [1], [0, 0, 1, 1], [], []>} : vector<8x128xbf16>, vector<128x128xbf16>, vector<8x128xf32> -> vector<8x128xf32>
    %427 = vector.broadcast %344 : vector<1x128xf32> to vector<8x128xf32>
    %428 = arith.addf %426, %427 : vector<8x128xf32>
    %429 = arith.addf %310, %428 : vector<8x128xf32>
    %cst_212 = arith.constant dense<0.000000e+00> : vector<8xf32>
    %430 = vector.multi_reduction <add>, %429, %cst_212 [1] : vector<8x128xf32> to vector<8xf32>
    %431 = vector.shape_cast %430 : vector<8xf32> to vector<8x1xf32>
    %cst_213 = arith.constant 7.812500e-03 : f32
    %432 = vector.broadcast %cst_213 : f32 to vector<8x1xf32>
    %433 = arith.mulf %431, %432 : vector<8x1xf32>
    %434 = arith.mulf %429, %429 : vector<8x128xf32>
    %cst_214 = arith.constant dense<0.000000e+00> : vector<8xf32>
    %435 = vector.multi_reduction <add>, %434, %cst_214 [1] : vector<8x128xf32> to vector<8xf32>
    %436 = vector.shape_cast %435 : vector<8xf32> to vector<8x1xf32>
    %cst_215 = arith.constant 7.812500e-03 : f32
    %437 = vector.broadcast %cst_215 : f32 to vector<8x1xf32>
    %438 = arith.mulf %436, %437 : vector<8x1xf32>
    %439 = arith.mulf %433, %433 : vector<8x1xf32>
    %440 = arith.subf %438, %439 : vector<8x1xf32>
    %441 = vector.broadcast %433 : vector<8x1xf32> to vector<8x128xf32>
    %442 = arith.subf %429, %441 : vector<8x128xf32>
    %cst_216 = arith.constant 9.99999974E-6 : f32
    %443 = vector.broadcast %cst_216 : f32 to vector<8x1xf32>
    %444 = arith.addf %440, %443 : vector<8x1xf32>
    %445 = math.rsqrt %444 : vector<8x1xf32>
    %446 = vector.broadcast %350 : vector<1x128xf32> to vector<8x128xf32>
    %447 = vector.broadcast %445 : vector<8x1xf32> to vector<8x128xf32>
    %448 = arith.mulf %446, %447 : vector<8x128xf32>
    %449 = arith.mulf %442, %448 : vector<8x128xf32>
    %450 = vector.broadcast %348 : vector<1x128xf32> to vector<8x128xf32>
    %451 = arith.addf %449, %450 : vector<8x128xf32>
    %452 = arith.truncf %451 : vector<8x128xf32> to vector<8x128xbf16>
    %cst_217 = arith.constant dense<0.000000e+00> : vector<8x128xf32>
    %453 = tpu.matmul %452, %330, %cst_217 {dimension_numbers = #tpu.dot_dimension_numbers<[1], [0], [0], [1], [0, 0, 1, 1], [], []>} : vector<8x128xbf16>, vector<128x128xbf16>, vector<8x128xf32> -> vector<8x128xf32>
    %454 = vector.broadcast %322 : vector<1x128xf32> to vector<8x128xf32>
    %455 = arith.addf %453, %454 : vector<8x128xf32>
    %456 = arith.truncf %455 : vector<8x128xf32> to vector<8x128xbf16>
    %457 = vector.extract_strided_slice %456 {offsets = [0, 0], sizes = [8, 32], strides = [1, 1]} : vector<8x128xbf16> to vector<8x32xbf16>
    %458 = vector.extract_strided_slice %317 {offsets = [0, 256], sizes = [8, 32], strides = [1, 1]} : vector<8x1024xbf16> to vector<8x32xbf16>
    %459 = vector.extract_strided_slice %317 {offsets = [0, 384], sizes = [8, 32], strides = [1, 1]} : vector<8x1024xbf16> to vector<8x32xbf16>
    %cst_218 = arith.constant dense<0.000000e+00> : vector<8x8xf32>
    %460 = tpu.matmul %457, %458, %cst_218 {dimension_numbers = #tpu.dot_dimension_numbers<[1], [1], [0], [0], [0, 0, 1, 0], [], []>} : vector<8x32xbf16>, vector<8x32xbf16>, vector<8x8xf32> -> vector<8x8xf32>
    %cst_219 = arith.constant dense<0xFF800000> : vector<8xf32>
    %461 = vector.multi_reduction <maximumf>, %460, %cst_219 [1] : vector<8x8xf32> to vector<8xf32>
    %462 = vector.shape_cast %461 : vector<8xf32> to vector<8x1xf32>
    %463 = vector.broadcast %462 : vector<8x1xf32> to vector<8x8xf32>
    %464 = arith.subf %460, %463 : vector<8x8xf32>
    %465 = math.exp %464 : vector<8x8xf32>
    %cst_220 = arith.constant dense<0.000000e+00> : vector<8xf32>
    %466 = vector.multi_reduction <add>, %465, %cst_220 [1] : vector<8x8xf32> to vector<8xf32>
    %467 = vector.shape_cast %466 : vector<8xf32> to vector<8x1xf32>
    %468 = tpu.reciprocal %467 {approx = true} : vector<8x1xf32> -> vector<8x1xf32>
    %469 = vector.broadcast %468 : vector<8x1xf32> to vector<8x8xf32>
    %470 = arith.mulf %465, %469 : vector<8x8xf32>
    %471 = arith.truncf %470 : vector<8x8xf32> to vector<8x8xbf16>
    %cst_221 = arith.constant dense<0.000000e+00> : vector<8x32xf32>
    %472 = tpu.matmul %471, %459, %cst_221 {dimension_numbers = #tpu.dot_dimension_numbers<[1], [0], [0], [1], [0, 0, 1, 1], [], []>} : vector<8x8xbf16>, vector<8x32xbf16>, vector<8x32xf32> -> vector<8x32xf32>
    %473 = vector.extract_strided_slice %456 {offsets = [0, 32], sizes = [8, 32], strides = [1, 1]} : vector<8x128xbf16> to vector<8x32xbf16>
    %474 = vector.extract_strided_slice %317 {offsets = [0, 288], sizes = [8, 32], strides = [1, 1]} : vector<8x1024xbf16> to vector<8x32xbf16>
    %475 = vector.extract_strided_slice %317 {offsets = [0, 416], sizes = [8, 32], strides = [1, 1]} : vector<8x1024xbf16> to vector<8x32xbf16>
    %cst_222 = arith.constant dense<0.000000e+00> : vector<8x8xf32>
    %476 = tpu.matmul %473, %474, %cst_222 {dimension_numbers = #tpu.dot_dimension_numbers<[1], [1], [0], [0], [0, 0, 1, 0], [], []>} : vector<8x32xbf16>, vector<8x32xbf16>, vector<8x8xf32> -> vector<8x8xf32>
    %cst_223 = arith.constant dense<0xFF800000> : vector<8xf32>
    %477 = vector.multi_reduction <maximumf>, %476, %cst_223 [1] : vector<8x8xf32> to vector<8xf32>
    %478 = vector.shape_cast %477 : vector<8xf32> to vector<8x1xf32>
    %479 = vector.broadcast %478 : vector<8x1xf32> to vector<8x8xf32>
    %480 = arith.subf %476, %479 : vector<8x8xf32>
    %481 = math.exp %480 : vector<8x8xf32>
    %cst_224 = arith.constant dense<0.000000e+00> : vector<8xf32>
    %482 = vector.multi_reduction <add>, %481, %cst_224 [1] : vector<8x8xf32> to vector<8xf32>
    %483 = vector.shape_cast %482 : vector<8xf32> to vector<8x1xf32>
    %484 = tpu.reciprocal %483 {approx = true} : vector<8x1xf32> -> vector<8x1xf32>
    %485 = vector.broadcast %484 : vector<8x1xf32> to vector<8x8xf32>
    %486 = arith.mulf %481, %485 : vector<8x8xf32>
    %487 = arith.truncf %486 : vector<8x8xf32> to vector<8x8xbf16>
    %cst_225 = arith.constant dense<0.000000e+00> : vector<8x32xf32>
    %488 = tpu.matmul %487, %475, %cst_225 {dimension_numbers = #tpu.dot_dimension_numbers<[1], [0], [0], [1], [0, 0, 1, 1], [], []>} : vector<8x8xbf16>, vector<8x32xbf16>, vector<8x32xf32> -> vector<8x32xf32>
    %489 = vector.extract_strided_slice %456 {offsets = [0, 64], sizes = [8, 32], strides = [1, 1]} : vector<8x128xbf16> to vector<8x32xbf16>
    %490 = vector.extract_strided_slice %317 {offsets = [0, 320], sizes = [8, 32], strides = [1, 1]} : vector<8x1024xbf16> to vector<8x32xbf16>
    %491 = vector.extract_strided_slice %317 {offsets = [0, 448], sizes = [8, 32], strides = [1, 1]} : vector<8x1024xbf16> to vector<8x32xbf16>
    %cst_226 = arith.constant dense<0.000000e+00> : vector<8x8xf32>
    %492 = tpu.matmul %489, %490, %cst_226 {dimension_numbers = #tpu.dot_dimension_numbers<[1], [1], [0], [0], [0, 0, 1, 0], [], []>} : vector<8x32xbf16>, vector<8x32xbf16>, vector<8x8xf32> -> vector<8x8xf32>
    %cst_227 = arith.constant dense<0xFF800000> : vector<8xf32>
    %493 = vector.multi_reduction <maximumf>, %492, %cst_227 [1] : vector<8x8xf32> to vector<8xf32>
    %494 = vector.shape_cast %493 : vector<8xf32> to vector<8x1xf32>
    %495 = vector.broadcast %494 : vector<8x1xf32> to vector<8x8xf32>
    %496 = arith.subf %492, %495 : vector<8x8xf32>
    %497 = math.exp %496 : vector<8x8xf32>
    %cst_228 = arith.constant dense<0.000000e+00> : vector<8xf32>
    %498 = vector.multi_reduction <add>, %497, %cst_228 [1] : vector<8x8xf32> to vector<8xf32>
    %499 = vector.shape_cast %498 : vector<8xf32> to vector<8x1xf32>
    %500 = tpu.reciprocal %499 {approx = true} : vector<8x1xf32> -> vector<8x1xf32>
    %501 = vector.broadcast %500 : vector<8x1xf32> to vector<8x8xf32>
    %502 = arith.mulf %497, %501 : vector<8x8xf32>
    %503 = arith.truncf %502 : vector<8x8xf32> to vector<8x8xbf16>
    %cst_229 = arith.constant dense<0.000000e+00> : vector<8x32xf32>
    %504 = tpu.matmul %503, %491, %cst_229 {dimension_numbers = #tpu.dot_dimension_numbers<[1], [0], [0], [1], [0, 0, 1, 1], [], []>} : vector<8x8xbf16>, vector<8x32xbf16>, vector<8x32xf32> -> vector<8x32xf32>
    %505 = vector.extract_strided_slice %456 {offsets = [0, 96], sizes = [8, 32], strides = [1, 1]} : vector<8x128xbf16> to vector<8x32xbf16>
    %506 = vector.extract_strided_slice %317 {offsets = [0, 352], sizes = [8, 32], strides = [1, 1]} : vector<8x1024xbf16> to vector<8x32xbf16>
    %507 = vector.extract_strided_slice %317 {offsets = [0, 480], sizes = [8, 32], strides = [1, 1]} : vector<8x1024xbf16> to vector<8x32xbf16>
    %cst_230 = arith.constant dense<0.000000e+00> : vector<8x8xf32>
    %508 = tpu.matmul %505, %506, %cst_230 {dimension_numbers = #tpu.dot_dimension_numbers<[1], [1], [0], [0], [0, 0, 1, 0], [], []>} : vector<8x32xbf16>, vector<8x32xbf16>, vector<8x8xf32> -> vector<8x8xf32>
    %cst_231 = arith.constant dense<0xFF800000> : vector<8xf32>
    %509 = vector.multi_reduction <maximumf>, %508, %cst_231 [1] : vector<8x8xf32> to vector<8xf32>
    %510 = vector.shape_cast %509 : vector<8xf32> to vector<8x1xf32>
    %511 = vector.broadcast %510 : vector<8x1xf32> to vector<8x8xf32>
    %512 = arith.subf %508, %511 : vector<8x8xf32>
    %513 = math.exp %512 : vector<8x8xf32>
    %cst_232 = arith.constant dense<0.000000e+00> : vector<8xf32>
    %514 = vector.multi_reduction <add>, %513, %cst_232 [1] : vector<8x8xf32> to vector<8xf32>
    %515 = vector.shape_cast %514 : vector<8xf32> to vector<8x1xf32>
    %516 = tpu.reciprocal %515 {approx = true} : vector<8x1xf32> -> vector<8x1xf32>
    %517 = vector.broadcast %516 : vector<8x1xf32> to vector<8x8xf32>
    %518 = arith.mulf %513, %517 : vector<8x8xf32>
    %519 = arith.truncf %518 : vector<8x8xf32> to vector<8x8xbf16>
    %cst_233 = arith.constant dense<0.000000e+00> : vector<8x32xf32>
    %520 = tpu.matmul %519, %507, %cst_233 {dimension_numbers = #tpu.dot_dimension_numbers<[1], [0], [0], [1], [0, 0, 1, 1], [], []>} : vector<8x8xbf16>, vector<8x32xbf16>, vector<8x32xf32> -> vector<8x32xf32>
    %521 = tpu.concatenate %472, %488, %504, %520 in 1 : vector<8x32xf32>, vector<8x32xf32>, vector<8x32xf32>, vector<8x32xf32> -> vector<8x128xf32>
    %522 = arith.truncf %521 : vector<8x128xf32> to vector<8x128xbf16>
    %cst_234 = arith.constant dense<0.000000e+00> : vector<8x128xf32>
    %523 = tpu.matmul %522, %328, %cst_234 {dimension_numbers = #tpu.dot_dimension_numbers<[1], [0], [0], [1], [0, 0, 1, 1], [], []>} : vector<8x128xbf16>, vector<128x128xbf16>, vector<8x128xf32> -> vector<8x128xf32>
    %524 = vector.broadcast %320 : vector<1x128xf32> to vector<8x128xf32>
    %525 = arith.addf %523, %524 : vector<8x128xf32>
    %526 = arith.addf %310, %525 : vector<8x128xf32>
    %cst_235 = arith.constant dense<0.000000e+00> : vector<8xf32>
    %527 = vector.multi_reduction <add>, %526, %cst_235 [1] : vector<8x128xf32> to vector<8xf32>
    %528 = vector.shape_cast %527 : vector<8xf32> to vector<8x1xf32>
    %cst_236 = arith.constant 7.812500e-03 : f32
    %529 = vector.broadcast %cst_236 : f32 to vector<8x1xf32>
    %530 = arith.mulf %528, %529 : vector<8x1xf32>
    %531 = arith.mulf %526, %526 : vector<8x128xf32>
    %cst_237 = arith.constant dense<0.000000e+00> : vector<8xf32>
    %532 = vector.multi_reduction <add>, %531, %cst_237 [1] : vector<8x128xf32> to vector<8xf32>
    %533 = vector.shape_cast %532 : vector<8xf32> to vector<8x1xf32>
    %cst_238 = arith.constant 7.812500e-03 : f32
    %534 = vector.broadcast %cst_238 : f32 to vector<8x1xf32>
    %535 = arith.mulf %533, %534 : vector<8x1xf32>
    %536 = arith.mulf %530, %530 : vector<8x1xf32>
    %537 = arith.subf %535, %536 : vector<8x1xf32>
    %538 = vector.broadcast %530 : vector<8x1xf32> to vector<8x128xf32>
    %539 = arith.subf %526, %538 : vector<8x128xf32>
    %cst_239 = arith.constant 9.99999974E-6 : f32
    %540 = vector.broadcast %cst_239 : f32 to vector<8x1xf32>
    %541 = arith.addf %537, %540 : vector<8x1xf32>
    %542 = math.rsqrt %541 : vector<8x1xf32>
    %543 = vector.broadcast %326 : vector<1x128xf32> to vector<8x128xf32>
    %544 = vector.broadcast %542 : vector<8x1xf32> to vector<8x128xf32>
    %545 = arith.mulf %543, %544 : vector<8x128xf32>
    %546 = arith.mulf %539, %545 : vector<8x128xf32>
    %547 = vector.broadcast %324 : vector<1x128xf32> to vector<8x128xf32>
    %548 = arith.addf %546, %547 : vector<8x128xf32>
    %549 = arith.truncf %548 : vector<8x128xf32> to vector<8x128xbf16>
    %cst_240 = arith.constant dense<0.000000e+00> : vector<8x256xf32>
    %550 = tpu.matmul %549, %340, %cst_240 {dimension_numbers = #tpu.dot_dimension_numbers<[1], [0], [0], [1], [0, 0, 1, 1], [], []>} : vector<8x128xbf16>, vector<128x256xbf16>, vector<8x256xf32> -> vector<8x256xf32>
    %551 = vector.broadcast %332 : vector<1x256xf32> to vector<8x256xf32>
    %552 = arith.addf %550, %551 : vector<8x256xf32>
    %cst_241 = arith.constant 0.000000e+00 : f32
    %553 = vector.broadcast %cst_241 : f32 to vector<8x256xf32>
    %554 = arith.maximumf %552, %553 : vector<8x256xf32>
    %555 = arith.truncf %554 : vector<8x256xf32> to vector<8x256xbf16>
    %cst_242 = arith.constant dense<0.000000e+00> : vector<8x128xf32>
    %556 = tpu.matmul %555, %342, %cst_242 {dimension_numbers = #tpu.dot_dimension_numbers<[1], [0], [0], [1], [0, 0, 1, 1], [], []>} : vector<8x256xbf16>, vector<256x128xbf16>, vector<8x128xf32> -> vector<8x128xf32>
    %557 = vector.broadcast %334 : vector<1x128xf32> to vector<8x128xf32>
    %558 = arith.addf %556, %557 : vector<8x128xf32>
    %559 = arith.addf %548, %558 : vector<8x128xf32>
    %cst_243 = arith.constant dense<0.000000e+00> : vector<8xf32>
    %560 = vector.multi_reduction <add>, %559, %cst_243 [1] : vector<8x128xf32> to vector<8xf32>
    %561 = vector.shape_cast %560 : vector<8xf32> to vector<8x1xf32>
    %cst_244 = arith.constant 7.812500e-03 : f32
    %562 = vector.broadcast %cst_244 : f32 to vector<8x1xf32>
    %563 = arith.mulf %561, %562 : vector<8x1xf32>
    %564 = arith.mulf %559, %559 : vector<8x128xf32>
    %cst_245 = arith.constant dense<0.000000e+00> : vector<8xf32>
    %565 = vector.multi_reduction <add>, %564, %cst_245 [1] : vector<8x128xf32> to vector<8xf32>
    %566 = vector.shape_cast %565 : vector<8xf32> to vector<8x1xf32>
    %cst_246 = arith.constant 7.812500e-03 : f32
    %567 = vector.broadcast %cst_246 : f32 to vector<8x1xf32>
    %568 = arith.mulf %566, %567 : vector<8x1xf32>
    %569 = arith.mulf %563, %563 : vector<8x1xf32>
    %570 = arith.subf %568, %569 : vector<8x1xf32>
    %571 = vector.broadcast %563 : vector<8x1xf32> to vector<8x128xf32>
    %572 = arith.subf %559, %571 : vector<8x128xf32>
    %cst_247 = arith.constant 9.99999974E-6 : f32
    %573 = vector.broadcast %cst_247 : f32 to vector<8x1xf32>
    %574 = arith.addf %570, %573 : vector<8x1xf32>
    %575 = math.rsqrt %574 : vector<8x1xf32>
    %576 = vector.broadcast %338 : vector<1x128xf32> to vector<8x128xf32>
    %577 = vector.broadcast %575 : vector<8x1xf32> to vector<8x128xf32>
    %578 = arith.mulf %576, %577 : vector<8x128xf32>
    %579 = arith.mulf %572, %578 : vector<8x128xf32>
    %580 = vector.broadcast %336 : vector<1x128xf32> to vector<8x128xf32>
    %581 = arith.addf %579, %580 : vector<8x128xf32>
    %c1_248 = arith.constant 1 : index
    %c0_249 = arith.constant 0 : index
    %c0_250 = arith.constant 0 : index
    %582 = vector.load %arg2[%c1_248, %c0_249, %c0_250] : memref<2x1x128xf32, #tpu.memory_space<vmem>>, vector<1x1x128xf32>
    %583 = vector.shape_cast %582 : vector<1x1x128xf32> to vector<1x128xf32>
    %c1_251 = arith.constant 1 : index
    %c0_252 = arith.constant 0 : index
    %c0_253 = arith.constant 0 : index
    %584 = vector.load %arg3[%c1_251, %c0_252, %c0_253] : memref<2x1x128xf32, #tpu.memory_space<vmem>>, vector<1x1x128xf32>
    %585 = vector.shape_cast %584 : vector<1x1x128xf32> to vector<1x128xf32>
    %c1_254 = arith.constant 1 : index
    %c0_255 = arith.constant 0 : index
    %c0_256 = arith.constant 0 : index
    %586 = vector.load %arg4[%c1_254, %c0_255, %c0_256] : memref<2x1x128xf32, #tpu.memory_space<vmem>>, vector<1x1x128xf32>
    %587 = vector.shape_cast %586 : vector<1x1x128xf32> to vector<1x128xf32>
    %c1_257 = arith.constant 1 : index
    %c0_258 = arith.constant 0 : index
    %c0_259 = arith.constant 0 : index
    %588 = vector.load %arg5[%c1_257, %c0_258, %c0_259] : memref<2x1x128xf32, #tpu.memory_space<vmem>>, vector<1x1x128xf32>
    %589 = vector.shape_cast %588 : vector<1x1x128xf32> to vector<1x128xf32>
    %c1_260 = arith.constant 1 : index
    %c0_261 = arith.constant 0 : index
    %c0_262 = arith.constant 0 : index
    %590 = vector.load %arg6[%c1_260, %c0_261, %c0_262] : memref<2x128x128xbf16, #tpu.memory_space<vmem>>, vector<1x128x128xbf16>
    %591 = vector.shape_cast %590 : vector<1x128x128xbf16> to vector<128x128xbf16>
    %c1_263 = arith.constant 1 : index
    %c0_264 = arith.constant 0 : index
    %c0_265 = arith.constant 0 : index
    %592 = vector.load %arg7[%c1_263, %c0_264, %c0_265] : memref<2x128x128xbf16, #tpu.memory_space<vmem>>, vector<1x128x128xbf16>
    %593 = vector.shape_cast %592 : vector<1x128x128xbf16> to vector<128x128xbf16>
    %c1_266 = arith.constant 1 : index
    %c0_267 = arith.constant 0 : index
    %c0_268 = arith.constant 0 : index
    %594 = vector.load %arg8[%c1_266, %c0_267, %c0_268] : memref<2x1x256xf32, #tpu.memory_space<vmem>>, vector<1x1x256xf32>
    %595 = vector.shape_cast %594 : vector<1x1x256xf32> to vector<1x256xf32>
    %c1_269 = arith.constant 1 : index
    %c0_270 = arith.constant 0 : index
    %c0_271 = arith.constant 0 : index
    %596 = vector.load %arg9[%c1_269, %c0_270, %c0_271] : memref<2x1x128xf32, #tpu.memory_space<vmem>>, vector<1x1x128xf32>
    %597 = vector.shape_cast %596 : vector<1x1x128xf32> to vector<1x128xf32>
    %c1_272 = arith.constant 1 : index
    %c0_273 = arith.constant 0 : index
    %c0_274 = arith.constant 0 : index
    %598 = vector.load %arg10[%c1_272, %c0_273, %c0_274] : memref<2x1x128xf32, #tpu.memory_space<vmem>>, vector<1x1x128xf32>
    %599 = vector.shape_cast %598 : vector<1x1x128xf32> to vector<1x128xf32>
    %c1_275 = arith.constant 1 : index
    %c0_276 = arith.constant 0 : index
    %c0_277 = arith.constant 0 : index
    %600 = vector.load %arg11[%c1_275, %c0_276, %c0_277] : memref<2x1x128xf32, #tpu.memory_space<vmem>>, vector<1x1x128xf32>
    %601 = vector.shape_cast %600 : vector<1x1x128xf32> to vector<1x128xf32>
    %c1_278 = arith.constant 1 : index
    %c0_279 = arith.constant 0 : index
    %c0_280 = arith.constant 0 : index
    %602 = vector.load %arg12[%c1_278, %c0_279, %c0_280] : memref<2x128x256xbf16, #tpu.memory_space<vmem>>, vector<1x128x256xbf16>
    %603 = vector.shape_cast %602 : vector<1x128x256xbf16> to vector<128x256xbf16>
    %c1_281 = arith.constant 1 : index
    %c0_282 = arith.constant 0 : index
    %c0_283 = arith.constant 0 : index
    %604 = vector.load %arg13[%c1_281, %c0_282, %c0_283] : memref<2x256x128xbf16, #tpu.memory_space<vmem>>, vector<1x256x128xbf16>
    %605 = vector.shape_cast %604 : vector<1x256x128xbf16> to vector<256x128xbf16>
    %c1_284 = arith.constant 1 : index
    %c0_285 = arith.constant 0 : index
    %c0_286 = arith.constant 0 : index
    %606 = vector.load %arg14[%c1_284, %c0_285, %c0_286] : memref<2x1x128xf32, #tpu.memory_space<vmem>>, vector<1x1x128xf32>
    %607 = vector.shape_cast %606 : vector<1x1x128xf32> to vector<1x128xf32>
    %c1_287 = arith.constant 1 : index
    %c0_288 = arith.constant 0 : index
    %c0_289 = arith.constant 0 : index
    %608 = vector.load %arg15[%c1_287, %c0_288, %c0_289] : memref<2x1x128xf32, #tpu.memory_space<vmem>>, vector<1x1x128xf32>
    %609 = vector.shape_cast %608 : vector<1x1x128xf32> to vector<1x128xf32>
    %c1_290 = arith.constant 1 : index
    %c0_291 = arith.constant 0 : index
    %c0_292 = arith.constant 0 : index
    %610 = vector.load %arg16[%c1_290, %c0_291, %c0_292] : memref<2x1x128xf32, #tpu.memory_space<vmem>>, vector<1x1x128xf32>
    %611 = vector.shape_cast %610 : vector<1x1x128xf32> to vector<1x128xf32>
    %c1_293 = arith.constant 1 : index
    %c0_294 = arith.constant 0 : index
    %c0_295 = arith.constant 0 : index
    %612 = vector.load %arg17[%c1_293, %c0_294, %c0_295] : memref<2x1x128xf32, #tpu.memory_space<vmem>>, vector<1x1x128xf32>
    %613 = vector.shape_cast %612 : vector<1x1x128xf32> to vector<1x128xf32>
    %c1_296 = arith.constant 1 : index
    %c0_297 = arith.constant 0 : index
    %c0_298 = arith.constant 0 : index
    %614 = vector.load %arg18[%c1_296, %c0_297, %c0_298] : memref<2x128x128xbf16, #tpu.memory_space<vmem>>, vector<1x128x128xbf16>
    %615 = vector.shape_cast %614 : vector<1x128x128xbf16> to vector<128x128xbf16>
    %c1_299 = arith.constant 1 : index
    %c0_300 = arith.constant 0 : index
    %c0_301 = arith.constant 0 : index
    %616 = vector.load %arg19[%c1_299, %c0_300, %c0_301] : memref<2x128x128xbf16, #tpu.memory_space<vmem>>, vector<1x128x128xbf16>
    %617 = vector.shape_cast %616 : vector<1x128x128xbf16> to vector<128x128xbf16>
    %618 = arith.truncf %581 : vector<8x128xf32> to vector<8x128xbf16>
    %cst_302 = arith.constant dense<0.000000e+00> : vector<8x128xf32>
    %619 = tpu.matmul %618, %617, %cst_302 {dimension_numbers = #tpu.dot_dimension_numbers<[1], [0], [0], [1], [0, 0, 1, 1], [], []>} : vector<8x128xbf16>, vector<128x128xbf16>, vector<8x128xf32> -> vector<8x128xf32>
    %620 = vector.broadcast %609 : vector<1x128xf32> to vector<8x128xf32>
    %621 = arith.addf %619, %620 : vector<8x128xf32>
    %622 = arith.truncf %621 : vector<8x128xf32> to vector<8x128xbf16>
    %623 = vector.extract_strided_slice %622 {offsets = [0, 0], sizes = [8, 32], strides = [1, 1]} : vector<8x128xbf16> to vector<8x32xbf16>
    %624 = vector.extract_strided_slice %317 {offsets = [0, 512], sizes = [8, 32], strides = [1, 1]} : vector<8x1024xbf16> to vector<8x32xbf16>
    %625 = vector.extract_strided_slice %317 {offsets = [0, 640], sizes = [8, 32], strides = [1, 1]} : vector<8x1024xbf16> to vector<8x32xbf16>
    %cst_303 = arith.constant dense<0.000000e+00> : vector<8x8xf32>
    %626 = tpu.matmul %623, %624, %cst_303 {dimension_numbers = #tpu.dot_dimension_numbers<[1], [1], [0], [0], [0, 0, 1, 0], [], []>} : vector<8x32xbf16>, vector<8x32xbf16>, vector<8x8xf32> -> vector<8x8xf32>
    %cst_304 = arith.constant dense<0xFF800000> : vector<8xf32>
    %627 = vector.multi_reduction <maximumf>, %626, %cst_304 [1] : vector<8x8xf32> to vector<8xf32>
    %628 = vector.shape_cast %627 : vector<8xf32> to vector<8x1xf32>
    %629 = vector.broadcast %628 : vector<8x1xf32> to vector<8x8xf32>
    %630 = arith.subf %626, %629 : vector<8x8xf32>
    %631 = math.exp %630 : vector<8x8xf32>
    %cst_305 = arith.constant dense<0.000000e+00> : vector<8xf32>
    %632 = vector.multi_reduction <add>, %631, %cst_305 [1] : vector<8x8xf32> to vector<8xf32>
    %633 = vector.shape_cast %632 : vector<8xf32> to vector<8x1xf32>
    %634 = tpu.reciprocal %633 {approx = true} : vector<8x1xf32> -> vector<8x1xf32>
    %635 = vector.broadcast %634 : vector<8x1xf32> to vector<8x8xf32>
    %636 = arith.mulf %631, %635 : vector<8x8xf32>
    %637 = arith.truncf %636 : vector<8x8xf32> to vector<8x8xbf16>
    %cst_306 = arith.constant dense<0.000000e+00> : vector<8x32xf32>
    %638 = tpu.matmul %637, %625, %cst_306 {dimension_numbers = #tpu.dot_dimension_numbers<[1], [0], [0], [1], [0, 0, 1, 1], [], []>} : vector<8x8xbf16>, vector<8x32xbf16>, vector<8x32xf32> -> vector<8x32xf32>
    %639 = vector.extract_strided_slice %622 {offsets = [0, 32], sizes = [8, 32], strides = [1, 1]} : vector<8x128xbf16> to vector<8x32xbf16>
    %640 = vector.extract_strided_slice %317 {offsets = [0, 544], sizes = [8, 32], strides = [1, 1]} : vector<8x1024xbf16> to vector<8x32xbf16>
    %641 = vector.extract_strided_slice %317 {offsets = [0, 672], sizes = [8, 32], strides = [1, 1]} : vector<8x1024xbf16> to vector<8x32xbf16>
    %cst_307 = arith.constant dense<0.000000e+00> : vector<8x8xf32>
    %642 = tpu.matmul %639, %640, %cst_307 {dimension_numbers = #tpu.dot_dimension_numbers<[1], [1], [0], [0], [0, 0, 1, 0], [], []>} : vector<8x32xbf16>, vector<8x32xbf16>, vector<8x8xf32> -> vector<8x8xf32>
    %cst_308 = arith.constant dense<0xFF800000> : vector<8xf32>
    %643 = vector.multi_reduction <maximumf>, %642, %cst_308 [1] : vector<8x8xf32> to vector<8xf32>
    %644 = vector.shape_cast %643 : vector<8xf32> to vector<8x1xf32>
    %645 = vector.broadcast %644 : vector<8x1xf32> to vector<8x8xf32>
    %646 = arith.subf %642, %645 : vector<8x8xf32>
    %647 = math.exp %646 : vector<8x8xf32>
    %cst_309 = arith.constant dense<0.000000e+00> : vector<8xf32>
    %648 = vector.multi_reduction <add>, %647, %cst_309 [1] : vector<8x8xf32> to vector<8xf32>
    %649 = vector.shape_cast %648 : vector<8xf32> to vector<8x1xf32>
    %650 = tpu.reciprocal %649 {approx = true} : vector<8x1xf32> -> vector<8x1xf32>
    %651 = vector.broadcast %650 : vector<8x1xf32> to vector<8x8xf32>
    %652 = arith.mulf %647, %651 : vector<8x8xf32>
    %653 = arith.truncf %652 : vector<8x8xf32> to vector<8x8xbf16>
    %cst_310 = arith.constant dense<0.000000e+00> : vector<8x32xf32>
    %654 = tpu.matmul %653, %641, %cst_310 {dimension_numbers = #tpu.dot_dimension_numbers<[1], [0], [0], [1], [0, 0, 1, 1], [], []>} : vector<8x8xbf16>, vector<8x32xbf16>, vector<8x32xf32> -> vector<8x32xf32>
    %655 = vector.extract_strided_slice %622 {offsets = [0, 64], sizes = [8, 32], strides = [1, 1]} : vector<8x128xbf16> to vector<8x32xbf16>
    %656 = vector.extract_strided_slice %317 {offsets = [0, 576], sizes = [8, 32], strides = [1, 1]} : vector<8x1024xbf16> to vector<8x32xbf16>
    %657 = vector.extract_strided_slice %317 {offsets = [0, 704], sizes = [8, 32], strides = [1, 1]} : vector<8x1024xbf16> to vector<8x32xbf16>
    %cst_311 = arith.constant dense<0.000000e+00> : vector<8x8xf32>
    %658 = tpu.matmul %655, %656, %cst_311 {dimension_numbers = #tpu.dot_dimension_numbers<[1], [1], [0], [0], [0, 0, 1, 0], [], []>} : vector<8x32xbf16>, vector<8x32xbf16>, vector<8x8xf32> -> vector<8x8xf32>
    %cst_312 = arith.constant dense<0xFF800000> : vector<8xf32>
    %659 = vector.multi_reduction <maximumf>, %658, %cst_312 [1] : vector<8x8xf32> to vector<8xf32>
    %660 = vector.shape_cast %659 : vector<8xf32> to vector<8x1xf32>
    %661 = vector.broadcast %660 : vector<8x1xf32> to vector<8x8xf32>
    %662 = arith.subf %658, %661 : vector<8x8xf32>
    %663 = math.exp %662 : vector<8x8xf32>
    %cst_313 = arith.constant dense<0.000000e+00> : vector<8xf32>
    %664 = vector.multi_reduction <add>, %663, %cst_313 [1] : vector<8x8xf32> to vector<8xf32>
    %665 = vector.shape_cast %664 : vector<8xf32> to vector<8x1xf32>
    %666 = tpu.reciprocal %665 {approx = true} : vector<8x1xf32> -> vector<8x1xf32>
    %667 = vector.broadcast %666 : vector<8x1xf32> to vector<8x8xf32>
    %668 = arith.mulf %663, %667 : vector<8x8xf32>
    %669 = arith.truncf %668 : vector<8x8xf32> to vector<8x8xbf16>
    %cst_314 = arith.constant dense<0.000000e+00> : vector<8x32xf32>
    %670 = tpu.matmul %669, %657, %cst_314 {dimension_numbers = #tpu.dot_dimension_numbers<[1], [0], [0], [1], [0, 0, 1, 1], [], []>} : vector<8x8xbf16>, vector<8x32xbf16>, vector<8x32xf32> -> vector<8x32xf32>
    %671 = vector.extract_strided_slice %622 {offsets = [0, 96], sizes = [8, 32], strides = [1, 1]} : vector<8x128xbf16> to vector<8x32xbf16>
    %672 = vector.extract_strided_slice %317 {offsets = [0, 608], sizes = [8, 32], strides = [1, 1]} : vector<8x1024xbf16> to vector<8x32xbf16>
    %673 = vector.extract_strided_slice %317 {offsets = [0, 736], sizes = [8, 32], strides = [1, 1]} : vector<8x1024xbf16> to vector<8x32xbf16>
    %cst_315 = arith.constant dense<0.000000e+00> : vector<8x8xf32>
    %674 = tpu.matmul %671, %672, %cst_315 {dimension_numbers = #tpu.dot_dimension_numbers<[1], [1], [0], [0], [0, 0, 1, 0], [], []>} : vector<8x32xbf16>, vector<8x32xbf16>, vector<8x8xf32> -> vector<8x8xf32>
    %cst_316 = arith.constant dense<0xFF800000> : vector<8xf32>
    %675 = vector.multi_reduction <maximumf>, %674, %cst_316 [1] : vector<8x8xf32> to vector<8xf32>
    %676 = vector.shape_cast %675 : vector<8xf32> to vector<8x1xf32>
    %677 = vector.broadcast %676 : vector<8x1xf32> to vector<8x8xf32>
    %678 = arith.subf %674, %677 : vector<8x8xf32>
    %679 = math.exp %678 : vector<8x8xf32>
    %cst_317 = arith.constant dense<0.000000e+00> : vector<8xf32>
    %680 = vector.multi_reduction <add>, %679, %cst_317 [1] : vector<8x8xf32> to vector<8xf32>
    %681 = vector.shape_cast %680 : vector<8xf32> to vector<8x1xf32>
    %682 = tpu.reciprocal %681 {approx = true} : vector<8x1xf32> -> vector<8x1xf32>
    %683 = vector.broadcast %682 : vector<8x1xf32> to vector<8x8xf32>
    %684 = arith.mulf %679, %683 : vector<8x8xf32>
    %685 = arith.truncf %684 : vector<8x8xf32> to vector<8x8xbf16>
    %cst_318 = arith.constant dense<0.000000e+00> : vector<8x32xf32>
    %686 = tpu.matmul %685, %673, %cst_318 {dimension_numbers = #tpu.dot_dimension_numbers<[1], [0], [0], [1], [0, 0, 1, 1], [], []>} : vector<8x8xbf16>, vector<8x32xbf16>, vector<8x32xf32> -> vector<8x32xf32>
    %687 = tpu.concatenate %638, %654, %670, %686 in 1 : vector<8x32xf32>, vector<8x32xf32>, vector<8x32xf32>, vector<8x32xf32> -> vector<8x128xf32>
    %688 = arith.truncf %687 : vector<8x128xf32> to vector<8x128xbf16>
    %cst_319 = arith.constant dense<0.000000e+00> : vector<8x128xf32>
    %689 = tpu.matmul %688, %615, %cst_319 {dimension_numbers = #tpu.dot_dimension_numbers<[1], [0], [0], [1], [0, 0, 1, 1], [], []>} : vector<8x128xbf16>, vector<128x128xbf16>, vector<8x128xf32> -> vector<8x128xf32>
    %690 = vector.broadcast %607 : vector<1x128xf32> to vector<8x128xf32>
    %691 = arith.addf %689, %690 : vector<8x128xf32>
    %692 = arith.addf %310, %691 : vector<8x128xf32>
    %cst_320 = arith.constant dense<0.000000e+00> : vector<8xf32>
    %693 = vector.multi_reduction <add>, %692, %cst_320 [1] : vector<8x128xf32> to vector<8xf32>
    %694 = vector.shape_cast %693 : vector<8xf32> to vector<8x1xf32>
    %cst_321 = arith.constant 7.812500e-03 : f32
    %695 = vector.broadcast %cst_321 : f32 to vector<8x1xf32>
    %696 = arith.mulf %694, %695 : vector<8x1xf32>
    %697 = arith.mulf %692, %692 : vector<8x128xf32>
    %cst_322 = arith.constant dense<0.000000e+00> : vector<8xf32>
    %698 = vector.multi_reduction <add>, %697, %cst_322 [1] : vector<8x128xf32> to vector<8xf32>
    %699 = vector.shape_cast %698 : vector<8xf32> to vector<8x1xf32>
    %cst_323 = arith.constant 7.812500e-03 : f32
    %700 = vector.broadcast %cst_323 : f32 to vector<8x1xf32>
    %701 = arith.mulf %699, %700 : vector<8x1xf32>
    %702 = arith.mulf %696, %696 : vector<8x1xf32>
    %703 = arith.subf %701, %702 : vector<8x1xf32>
    %704 = vector.broadcast %696 : vector<8x1xf32> to vector<8x128xf32>
    %705 = arith.subf %692, %704 : vector<8x128xf32>
    %cst_324 = arith.constant 9.99999974E-6 : f32
    %706 = vector.broadcast %cst_324 : f32 to vector<8x1xf32>
    %707 = arith.addf %703, %706 : vector<8x1xf32>
    %708 = math.rsqrt %707 : vector<8x1xf32>
    %709 = vector.broadcast %613 : vector<1x128xf32> to vector<8x128xf32>
    %710 = vector.broadcast %708 : vector<8x1xf32> to vector<8x128xf32>
    %711 = arith.mulf %709, %710 : vector<8x128xf32>
    %712 = arith.mulf %705, %711 : vector<8x128xf32>
    %713 = vector.broadcast %611 : vector<1x128xf32> to vector<8x128xf32>
    %714 = arith.addf %712, %713 : vector<8x128xf32>
    %715 = arith.truncf %714 : vector<8x128xf32> to vector<8x128xbf16>
    %cst_325 = arith.constant dense<0.000000e+00> : vector<8x128xf32>
    %716 = tpu.matmul %715, %593, %cst_325 {dimension_numbers = #tpu.dot_dimension_numbers<[1], [0], [0], [1], [0, 0, 1, 1], [], []>} : vector<8x128xbf16>, vector<128x128xbf16>, vector<8x128xf32> -> vector<8x128xf32>
    %717 = vector.broadcast %585 : vector<1x128xf32> to vector<8x128xf32>
    %718 = arith.addf %716, %717 : vector<8x128xf32>
    %719 = arith.truncf %718 : vector<8x128xf32> to vector<8x128xbf16>
    %720 = vector.extract_strided_slice %719 {offsets = [0, 0], sizes = [8, 32], strides = [1, 1]} : vector<8x128xbf16> to vector<8x32xbf16>
    %721 = vector.extract_strided_slice %317 {offsets = [0, 768], sizes = [8, 32], strides = [1, 1]} : vector<8x1024xbf16> to vector<8x32xbf16>
    %722 = vector.extract_strided_slice %317 {offsets = [0, 896], sizes = [8, 32], strides = [1, 1]} : vector<8x1024xbf16> to vector<8x32xbf16>
    %cst_326 = arith.constant dense<0.000000e+00> : vector<8x8xf32>
    %723 = tpu.matmul %720, %721, %cst_326 {dimension_numbers = #tpu.dot_dimension_numbers<[1], [1], [0], [0], [0, 0, 1, 0], [], []>} : vector<8x32xbf16>, vector<8x32xbf16>, vector<8x8xf32> -> vector<8x8xf32>
    %cst_327 = arith.constant dense<0xFF800000> : vector<8xf32>
    %724 = vector.multi_reduction <maximumf>, %723, %cst_327 [1] : vector<8x8xf32> to vector<8xf32>
    %725 = vector.shape_cast %724 : vector<8xf32> to vector<8x1xf32>
    %726 = vector.broadcast %725 : vector<8x1xf32> to vector<8x8xf32>
    %727 = arith.subf %723, %726 : vector<8x8xf32>
    %728 = math.exp %727 : vector<8x8xf32>
    %cst_328 = arith.constant dense<0.000000e+00> : vector<8xf32>
    %729 = vector.multi_reduction <add>, %728, %cst_328 [1] : vector<8x8xf32> to vector<8xf32>
    %730 = vector.shape_cast %729 : vector<8xf32> to vector<8x1xf32>
    %731 = tpu.reciprocal %730 {approx = true} : vector<8x1xf32> -> vector<8x1xf32>
    %732 = vector.broadcast %731 : vector<8x1xf32> to vector<8x8xf32>
    %733 = arith.mulf %728, %732 : vector<8x8xf32>
    %734 = arith.truncf %733 : vector<8x8xf32> to vector<8x8xbf16>
    %cst_329 = arith.constant dense<0.000000e+00> : vector<8x32xf32>
    %735 = tpu.matmul %734, %722, %cst_329 {dimension_numbers = #tpu.dot_dimension_numbers<[1], [0], [0], [1], [0, 0, 1, 1], [], []>} : vector<8x8xbf16>, vector<8x32xbf16>, vector<8x32xf32> -> vector<8x32xf32>
    %736 = vector.extract_strided_slice %719 {offsets = [0, 32], sizes = [8, 32], strides = [1, 1]} : vector<8x128xbf16> to vector<8x32xbf16>
    %737 = vector.extract_strided_slice %317 {offsets = [0, 800], sizes = [8, 32], strides = [1, 1]} : vector<8x1024xbf16> to vector<8x32xbf16>
    %738 = vector.extract_strided_slice %317 {offsets = [0, 928], sizes = [8, 32], strides = [1, 1]} : vector<8x1024xbf16> to vector<8x32xbf16>
    %cst_330 = arith.constant dense<0.000000e+00> : vector<8x8xf32>
    %739 = tpu.matmul %736, %737, %cst_330 {dimension_numbers = #tpu.dot_dimension_numbers<[1], [1], [0], [0], [0, 0, 1, 0], [], []>} : vector<8x32xbf16>, vector<8x32xbf16>, vector<8x8xf32> -> vector<8x8xf32>
    %cst_331 = arith.constant dense<0xFF800000> : vector<8xf32>
    %740 = vector.multi_reduction <maximumf>, %739, %cst_331 [1] : vector<8x8xf32> to vector<8xf32>
    %741 = vector.shape_cast %740 : vector<8xf32> to vector<8x1xf32>
    %742 = vector.broadcast %741 : vector<8x1xf32> to vector<8x8xf32>
    %743 = arith.subf %739, %742 : vector<8x8xf32>
    %744 = math.exp %743 : vector<8x8xf32>
    %cst_332 = arith.constant dense<0.000000e+00> : vector<8xf32>
    %745 = vector.multi_reduction <add>, %744, %cst_332 [1] : vector<8x8xf32> to vector<8xf32>
    %746 = vector.shape_cast %745 : vector<8xf32> to vector<8x1xf32>
    %747 = tpu.reciprocal %746 {approx = true} : vector<8x1xf32> -> vector<8x1xf32>
    %748 = vector.broadcast %747 : vector<8x1xf32> to vector<8x8xf32>
    %749 = arith.mulf %744, %748 : vector<8x8xf32>
    %750 = arith.truncf %749 : vector<8x8xf32> to vector<8x8xbf16>
    %cst_333 = arith.constant dense<0.000000e+00> : vector<8x32xf32>
    %751 = tpu.matmul %750, %738, %cst_333 {dimension_numbers = #tpu.dot_dimension_numbers<[1], [0], [0], [1], [0, 0, 1, 1], [], []>} : vector<8x8xbf16>, vector<8x32xbf16>, vector<8x32xf32> -> vector<8x32xf32>
    %752 = vector.extract_strided_slice %719 {offsets = [0, 64], sizes = [8, 32], strides = [1, 1]} : vector<8x128xbf16> to vector<8x32xbf16>
    %753 = vector.extract_strided_slice %317 {offsets = [0, 832], sizes = [8, 32], strides = [1, 1]} : vector<8x1024xbf16> to vector<8x32xbf16>
    %754 = vector.extract_strided_slice %317 {offsets = [0, 960], sizes = [8, 32], strides = [1, 1]} : vector<8x1024xbf16> to vector<8x32xbf16>
    %cst_334 = arith.constant dense<0.000000e+00> : vector<8x8xf32>
    %755 = tpu.matmul %752, %753, %cst_334 {dimension_numbers = #tpu.dot_dimension_numbers<[1], [1], [0], [0], [0, 0, 1, 0], [], []>} : vector<8x32xbf16>, vector<8x32xbf16>, vector<8x8xf32> -> vector<8x8xf32>
    %cst_335 = arith.constant dense<0xFF800000> : vector<8xf32>
    %756 = vector.multi_reduction <maximumf>, %755, %cst_335 [1] : vector<8x8xf32> to vector<8xf32>
    %757 = vector.shape_cast %756 : vector<8xf32> to vector<8x1xf32>
    %758 = vector.broadcast %757 : vector<8x1xf32> to vector<8x8xf32>
    %759 = arith.subf %755, %758 : vector<8x8xf32>
    %760 = math.exp %759 : vector<8x8xf32>
    %cst_336 = arith.constant dense<0.000000e+00> : vector<8xf32>
    %761 = vector.multi_reduction <add>, %760, %cst_336 [1] : vector<8x8xf32> to vector<8xf32>
    %762 = vector.shape_cast %761 : vector<8xf32> to vector<8x1xf32>
    %763 = tpu.reciprocal %762 {approx = true} : vector<8x1xf32> -> vector<8x1xf32>
    %764 = vector.broadcast %763 : vector<8x1xf32> to vector<8x8xf32>
    %765 = arith.mulf %760, %764 : vector<8x8xf32>
    %766 = arith.truncf %765 : vector<8x8xf32> to vector<8x8xbf16>
    %cst_337 = arith.constant dense<0.000000e+00> : vector<8x32xf32>
    %767 = tpu.matmul %766, %754, %cst_337 {dimension_numbers = #tpu.dot_dimension_numbers<[1], [0], [0], [1], [0, 0, 1, 1], [], []>} : vector<8x8xbf16>, vector<8x32xbf16>, vector<8x32xf32> -> vector<8x32xf32>
    %768 = vector.extract_strided_slice %719 {offsets = [0, 96], sizes = [8, 32], strides = [1, 1]} : vector<8x128xbf16> to vector<8x32xbf16>
    %769 = vector.extract_strided_slice %317 {offsets = [0, 864], sizes = [8, 32], strides = [1, 1]} : vector<8x1024xbf16> to vector<8x32xbf16>
    %770 = vector.extract_strided_slice %317 {offsets = [0, 992], sizes = [8, 32], strides = [1, 1]} : vector<8x1024xbf16> to vector<8x32xbf16>
    %cst_338 = arith.constant dense<0.000000e+00> : vector<8x8xf32>
    %771 = tpu.matmul %768, %769, %cst_338 {dimension_numbers = #tpu.dot_dimension_numbers<[1], [1], [0], [0], [0, 0, 1, 0], [], []>} : vector<8x32xbf16>, vector<8x32xbf16>, vector<8x8xf32> -> vector<8x8xf32>
    %cst_339 = arith.constant dense<0xFF800000> : vector<8xf32>
    %772 = vector.multi_reduction <maximumf>, %771, %cst_339 [1] : vector<8x8xf32> to vector<8xf32>
    %773 = vector.shape_cast %772 : vector<8xf32> to vector<8x1xf32>
    %774 = vector.broadcast %773 : vector<8x1xf32> to vector<8x8xf32>
    %775 = arith.subf %771, %774 : vector<8x8xf32>
    %776 = math.exp %775 : vector<8x8xf32>
    %cst_340 = arith.constant dense<0.000000e+00> : vector<8xf32>
    %777 = vector.multi_reduction <add>, %776, %cst_340 [1] : vector<8x8xf32> to vector<8xf32>
    %778 = vector.shape_cast %777 : vector<8xf32> to vector<8x1xf32>
    %779 = tpu.reciprocal %778 {approx = true} : vector<8x1xf32> -> vector<8x1xf32>
    %780 = vector.broadcast %779 : vector<8x1xf32> to vector<8x8xf32>
    %781 = arith.mulf %776, %780 : vector<8x8xf32>
    %782 = arith.truncf %781 : vector<8x8xf32> to vector<8x8xbf16>
    %cst_341 = arith.constant dense<0.000000e+00> : vector<8x32xf32>
    %783 = tpu.matmul %782, %770, %cst_341 {dimension_numbers = #tpu.dot_dimension_numbers<[1], [0], [0], [1], [0, 0, 1, 1], [], []>} : vector<8x8xbf16>, vector<8x32xbf16>, vector<8x32xf32> -> vector<8x32xf32>
    %784 = tpu.concatenate %735, %751, %767, %783 in 1 : vector<8x32xf32>, vector<8x32xf32>, vector<8x32xf32>, vector<8x32xf32> -> vector<8x128xf32>
    %785 = arith.truncf %784 : vector<8x128xf32> to vector<8x128xbf16>
    %cst_342 = arith.constant dense<0.000000e+00> : vector<8x128xf32>
    %786 = tpu.matmul %785, %591, %cst_342 {dimension_numbers = #tpu.dot_dimension_numbers<[1], [0], [0], [1], [0, 0, 1, 1], [], []>} : vector<8x128xbf16>, vector<128x128xbf16>, vector<8x128xf32> -> vector<8x128xf32>
    %787 = vector.broadcast %583 : vector<1x128xf32> to vector<8x128xf32>
    %788 = arith.addf %786, %787 : vector<8x128xf32>
    %789 = arith.addf %310, %788 : vector<8x128xf32>
    %cst_343 = arith.constant dense<0.000000e+00> : vector<8xf32>
    %790 = vector.multi_reduction <add>, %789, %cst_343 [1] : vector<8x128xf32> to vector<8xf32>
    %791 = vector.shape_cast %790 : vector<8xf32> to vector<8x1xf32>
    %cst_344 = arith.constant 7.812500e-03 : f32
    %792 = vector.broadcast %cst_344 : f32 to vector<8x1xf32>
    %793 = arith.mulf %791, %792 : vector<8x1xf32>
    %794 = arith.mulf %789, %789 : vector<8x128xf32>
    %cst_345 = arith.constant dense<0.000000e+00> : vector<8xf32>
    %795 = vector.multi_reduction <add>, %794, %cst_345 [1] : vector<8x128xf32> to vector<8xf32>
    %796 = vector.shape_cast %795 : vector<8xf32> to vector<8x1xf32>
    %cst_346 = arith.constant 7.812500e-03 : f32
    %797 = vector.broadcast %cst_346 : f32 to vector<8x1xf32>
    %798 = arith.mulf %796, %797 : vector<8x1xf32>
    %799 = arith.mulf %793, %793 : vector<8x1xf32>
    %800 = arith.subf %798, %799 : vector<8x1xf32>
    %801 = vector.broadcast %793 : vector<8x1xf32> to vector<8x128xf32>
    %802 = arith.subf %789, %801 : vector<8x128xf32>
    %cst_347 = arith.constant 9.99999974E-6 : f32
    %803 = vector.broadcast %cst_347 : f32 to vector<8x1xf32>
    %804 = arith.addf %800, %803 : vector<8x1xf32>
    %805 = math.rsqrt %804 : vector<8x1xf32>
    %806 = vector.broadcast %589 : vector<1x128xf32> to vector<8x128xf32>
    %807 = vector.broadcast %805 : vector<8x1xf32> to vector<8x128xf32>
    %808 = arith.mulf %806, %807 : vector<8x128xf32>
    %809 = arith.mulf %802, %808 : vector<8x128xf32>
    %810 = vector.broadcast %587 : vector<1x128xf32> to vector<8x128xf32>
    %811 = arith.addf %809, %810 : vector<8x128xf32>
    %812 = arith.truncf %811 : vector<8x128xf32> to vector<8x128xbf16>
    %cst_348 = arith.constant dense<0.000000e+00> : vector<8x256xf32>
    %813 = tpu.matmul %812, %603, %cst_348 {dimension_numbers = #tpu.dot_dimension_numbers<[1], [0], [0], [1], [0, 0, 1, 1], [], []>} : vector<8x128xbf16>, vector<128x256xbf16>, vector<8x256xf32> -> vector<8x256xf32>
    %814 = vector.broadcast %595 : vector<1x256xf32> to vector<8x256xf32>
    %815 = arith.addf %813, %814 : vector<8x256xf32>
    %cst_349 = arith.constant 0.000000e+00 : f32
    %816 = vector.broadcast %cst_349 : f32 to vector<8x256xf32>
    %817 = arith.maximumf %815, %816 : vector<8x256xf32>
    %818 = arith.truncf %817 : vector<8x256xf32> to vector<8x256xbf16>
    %cst_350 = arith.constant dense<0.000000e+00> : vector<8x128xf32>
    %819 = tpu.matmul %818, %605, %cst_350 {dimension_numbers = #tpu.dot_dimension_numbers<[1], [0], [0], [1], [0, 0, 1, 1], [], []>} : vector<8x256xbf16>, vector<256x128xbf16>, vector<8x128xf32> -> vector<8x128xf32>
    %820 = vector.broadcast %597 : vector<1x128xf32> to vector<8x128xf32>
    %821 = arith.addf %819, %820 : vector<8x128xf32>
    %822 = arith.addf %811, %821 : vector<8x128xf32>
    %cst_351 = arith.constant dense<0.000000e+00> : vector<8xf32>
    %823 = vector.multi_reduction <add>, %822, %cst_351 [1] : vector<8x128xf32> to vector<8xf32>
    %824 = vector.shape_cast %823 : vector<8xf32> to vector<8x1xf32>
    %cst_352 = arith.constant 7.812500e-03 : f32
    %825 = vector.broadcast %cst_352 : f32 to vector<8x1xf32>
    %826 = arith.mulf %824, %825 : vector<8x1xf32>
    %827 = arith.mulf %822, %822 : vector<8x128xf32>
    %cst_353 = arith.constant dense<0.000000e+00> : vector<8xf32>
    %828 = vector.multi_reduction <add>, %827, %cst_353 [1] : vector<8x128xf32> to vector<8xf32>
    %829 = vector.shape_cast %828 : vector<8xf32> to vector<8x1xf32>
    %cst_354 = arith.constant 7.812500e-03 : f32
    %830 = vector.broadcast %cst_354 : f32 to vector<8x1xf32>
    %831 = arith.mulf %829, %830 : vector<8x1xf32>
    %832 = arith.mulf %826, %826 : vector<8x1xf32>
    %833 = arith.subf %831, %832 : vector<8x1xf32>
    %834 = vector.broadcast %826 : vector<8x1xf32> to vector<8x128xf32>
    %835 = arith.subf %822, %834 : vector<8x128xf32>
    %cst_355 = arith.constant 9.99999974E-6 : f32
    %836 = vector.broadcast %cst_355 : f32 to vector<8x1xf32>
    %837 = arith.addf %833, %836 : vector<8x1xf32>
    %838 = math.rsqrt %837 : vector<8x1xf32>
    %839 = vector.broadcast %601 : vector<1x128xf32> to vector<8x128xf32>
    %840 = vector.broadcast %838 : vector<8x1xf32> to vector<8x128xf32>
    %841 = arith.mulf %839, %840 : vector<8x128xf32>
    %842 = arith.mulf %835, %841 : vector<8x128xf32>
    %843 = vector.broadcast %599 : vector<1x128xf32> to vector<8x128xf32>
    %844 = arith.addf %842, %843 : vector<8x128xf32>
    %845 = arith.truncf %844 : vector<8x128xf32> to vector<8x128xbf16>
    %c0_356 = arith.constant 0 : index
    %c0_357 = arith.constant 0 : index
    %846 = vector.load %arg35[%c0_356, %c0_357] : memref<128x128xbf16, #tpu.memory_space<vmem>>, vector<128x128xbf16>
    %cst_358 = arith.constant dense<0.000000e+00> : vector<8x128xf32>
    %847 = tpu.matmul %845, %846, %cst_358 {dimension_numbers = #tpu.dot_dimension_numbers<[1], [0], [0], [1], [0, 0, 1, 1], [], []>} : vector<8x128xbf16>, vector<128x128xbf16>, vector<8x128xf32> -> vector<8x128xf32>
    %c0_359 = arith.constant 0 : index
    %c0_360 = arith.constant 0 : index
    %848 = vector.load %arg34[%c0_359, %c0_360] : memref<1x128xf32, #tpu.memory_space<vmem>>, vector<1x128xf32>
    %849 = vector.broadcast %848 : vector<1x128xf32> to vector<8x128xf32>
    %850 = arith.addf %847, %849 : vector<8x128xf32>
    %c0_361 = arith.constant 0 : index
    %c0_362 = arith.constant 0 : index
    %851 = vector.load %arg36[%c0_361, %c0_362] : memref<8x128xf32, #tpu.memory_space<vmem>>, vector<8x128xf32>
    tpu.vector_store %arg36[%c0_361, %c0_362], %850 {strides = array<i32>} : memref<8x128xf32, #tpu.memory_space<vmem>>, vector<8x128xf32>,
    return
  }
}

</mosaic_0001>

<bundles_post_ra>
// kernel: transformer_forward.1
= control target key start
LH: loop header
LB: loop body
LE: loop exit
PB: predicated region body
PF: predicated region fallthrough
CT: control target
= control target key end

     0   :  { %s9631_s6 = smov 1   ;;  %s9632_s10 = smov 2   ;;  %s10867_s0 = inlined_call_operand.smem [shape: u32[37], index: -1, kind: input, shape index: {}] }
   0x1   :  { %s9714_s5 = sld [smem:[%s10867_s0]]   ;;  %s9633_s14 = smov 3  }
   0x2   :  { %s9719_s9 = sld [smem:[%s10867_s0 + %s9631_s6]]   ;;  %s9634_s18 = smov 4  }
   0x3   :  { %s9724_s13 = sld [smem:[%s10867_s0 + %s9632_s10]]   ;;  %s9635_s22 = smov 5  }
   0x4   :  { %s9729_s17 = sld [smem:[%s10867_s0 + %s9633_s14]]   ;;  %s9636_s26 = smov 6  }
   0x5   :  { %s9734_s21 = sld [smem:[%s10867_s0 + %s9634_s18]]   ;;  %s9637_s30 = smov 7  }
   0x6   :  { %s9739_s25 = sld [smem:[%s10867_s0 + %s9635_s22]]   ;;  %s9638_s4 = smov 8  }
   0x7   :  { %10886 = sst [smem:[#allocation55_spill]] %s9714_s5  ;;  %s9639_s10 = smov 9  }
   0x8   :  { %10887 = sst [smem:[#allocation56_spill]] %s9719_s9  ;;  %s9640_s15 = smov 10  }
   0x9   :  { %10888 = sst [smem:[#allocation57_spill]] %s9724_s13  ;;  %s9641_s20 = smov 11  }
   0xa   :  { %s9744_s29 = sld [smem:[%s10867_s0 + %s9636_s26]]   ;;  %s9642_s26 = smov 12  }
   0xb   :  { %s9749_s3 = sld [smem:[%s10867_s0 + %s9637_s30]]   ;;  %s9643_s1 = smov 13  }
   0xc   :  { %s9754_s8 = sld [smem:[%s10867_s0 + %s9638_s4]]   ;;  %s9644_s7 = smov 14  }
   0xd   :  { %s9759_s14 = sld [smem:[%s10867_s0 + %s9639_s10]]   ;;  %s9646_s22 = smov 16  }
   0xe   :  { %s9764_s19 = sld [smem:[%s10867_s0 + %s9640_s15]]   ;;  %s9645_s15 = smov 15  }
   0xf   :  { %s9769_s24 = sld [smem:[%s10867_s0 + %s9641_s20]]   ;;  %s9647_s28 = smov 17  }
  0x10   :  { %s9774_s30 = sld [smem:[%s10867_s0 + %s9642_s26]]  }
  0x11   :  { %s9779_s6 = sld [smem:[%s10867_s0 + %s9643_s1]]  }
  0x12   :  { %10889 = sst [smem:[#allocation58_spill]] %s9754_s8 }
  0x13   :  { %s9784_s12 = sld [smem:[%s10867_s0 + %s9644_s7]]   ;;  %s9648_s7 = smov 18  }
  0x14   :  { %10890 = sst [smem:[#allocation59_spill]] %s9764_s19 }
  0x15   :  { %s9789_s20 = sld [smem:[%s10867_s0 + %s9645_s15]]   ;;  %s9649_s15 = smov 19  }
  0x16   :  { %10891 = sst [smem:[#allocation60_spill]] %s9774_s30 }
  0x17   :  { %s9794_s27 = sld [smem:[%s10867_s0 + %s9646_s22]]   ;;  %s9650_s22 = smov 20  }
  0x18   :  { %s9799_s4 = sld [smem:[%s10867_s0 + %s9647_s28]]   ;;  %s9651_s28 = smov 21  }
  0x19   :  { %10892 = sst [smem:[#allocation61_spill]] %s9784_s12 }
  0x1a   :  { %s9804_s8 = sld [smem:[%s10867_s0 + %s9648_s7]]   ;;  %s9652_s7 = smov 22  }
  0x1b   :  { %s9809_s13 = sld [smem:[%s10867_s0 + %s9649_s15]]   ;;  %s9653_s15 = smov 23  }
  0x1c   :  { %s9814_s9 = sld [smem:[%s10867_s0 + %s9650_s22]]   ;;  %s9654_s22 = smov 24  }
  0x1d   :  { %10893 = sst [smem:[#allocation62_spill]] %s9794_s27 }
  0x1e   :  { %s9819_s5 = sld [smem:[%s10867_s0 + %s9651_s28]]   ;;  %s9655_s28 = smov 25  }
  0x1f   :  { %s9829_s27 = sld [smem:[%s10867_s0 + %s9653_s15]]   ;;  %s9657_s15 = smov 27  }
  0x20   :  { %10894 = sst [smem:[#allocation63_spill]] %s9804_s8 }
  0x21   :  { %s9824_s8 = sld [smem:[%s10867_s0 + %s9652_s7]]   ;;  %s9656_s7 = smov 26  }
  0x22   :  { %10895 = sst [smem:[#allocation64_spill]] %s9814_s9 }
  0x23   :  { %s9834_s9 = sld [smem:[%s10867_s0 + %s9654_s22]]   ;;  %s9658_s22 = smov 28  }
  0x24   :  { %10896 = sst [smem:[#allocation65_spill]] %s9819_s5 }
  0x25   :  { %10897 = sst [smem:[#allocation66_spill]] %s9829_s27 }
  0x26   :  { %s9839_s5 = sld [smem:[%s10867_s0 + %s9655_s28]]   ;;  %s9659_s28 = smov 29  }
  0x27   :  { %s9844_s12 = sld [smem:[%s10867_s0 + %s9656_s7]]   ;;  %s9660_s7 = smov 30  }
  0x28   :  { %s9849_s27 = sld [smem:[%s10867_s0 + %s9657_s15]]   ;;  %s9661_s15 = smov 31  }
  0x29   :  { %10898 = sst [smem:[#allocation67_spill]] %s9834_s9 }
  0x2a   :  { %s9854_s9 = sld [smem:[%s10867_s0 + %s9658_s22]]   ;;  %s9662_s22 = smov 32  }
  0x2b   :  { %s9859_s30 = sld [smem:[%s10867_s0 + %s9659_s28]]   ;;  %s9663_s28 = smov 33  }
  0x2d   :  { %10899 = sst [smem:[#allocation68_spill]] %s9844_s12 }
  0x2e   :  { %10900 = sst [smem:[#allocation69_spill]] %s9849_s27 }
  0x2f   :  { %s9864_s12 = sld [smem:[%s10867_s0 + %s9660_s7]]   ;;  %s9664_s7 = smov 34  }
  0x30   :  { %10901 = sst [smem:[#allocation70_spill]] %s9854_s9 }
  0x31   :  { %10902 = sst [smem:[#allocation71_spill]] %s9859_s30 }
  0x32   :  { %s9869_s27 = sld [smem:[%s10867_s0 + %s9661_s15]]   ;;  %s9665_s15 = smov 35  }
  0x33   :  { %s9874_s9 = sld [smem:[%s10867_s0 + %s9662_s22]]   ;;  %s9666_s22 = smov 36  }
  0x34   :  { %s9879_s30 = sld [smem:[%s10867_s0 + %s9663_s28]]  }
  0x35   :  { %10903 = sst [smem:[#allocation72_spill]] %s9864_s12 }
  0x36   :  { %s9884_s12 = sld [smem:[%s10867_s0 + %s9664_s7]]  }
  0x37   :  { %s9894_s19 = sld [smem:[%s10867_s0 + %s9666_s22]]  }
  0x38   :  { %10904 = sst [smem:[#allocation73_spill]] %s9869_s27 }
  0x39   :  { %s9889_s27 = sld [smem:[%s10867_s0 + %s9665_s15]]  }
  0x3a   :  { %78 = vsyncpa [#allocation3], 0 }
  0x3b   :  { %79 = vsyncpa [#allocation6], 0 }
  0x3c   :  { %80 = vsyncpa [#allocation9], 0 }
  0x3d   :  { %81 = vsyncpa [#allocation12], 0 }
  0x3e   :  { %82 = vsyncpa [#allocation15], 0 }
  0x3f   :  { %83 = vsyncpa [#allocation18], 0 }
  0x40   :  { %84 = vsyncpa [#allocation21], 0 }
  0x41   :  { %85 = vsyncpa [#allocation24], 0 }
  0x42   :  { %86 = vsyncpa [#allocation27], 0 }
  0x43   :  { %87 = vsyncpa [#allocation30], 0 }
  0x44   :  { %88 = vsyncpa [#allocation33], 0 }
  0x45   :  { %89 = vsyncpa [#allocation36], 0 }
  0x46   :  { %90 = vsyncpa [#allocation39], 0 }
  0x47   :  { %91 = vsyncpa [#allocation4], 0  ;;  %s9667_s28 = smov [#allocation5]   ;;  %s9668_s1 = smov [#allocation8]  }
  0x48   :  { %s115_s0 = sshll.u32 %s9667_s28, 4  ;;  %s139_s2 = sshll.u32 %s9668_s1, 4  ;;  %s116_s0 = int_to_ptr.vmem [resolvable:$true] %s115_s0  ;;  %s9896_s2 = int_to_ptr.vmem [resolvable:$true] %s139_s2 }
  0x49   :  { %s9053_s7 = scalar_lea.hbm %s9734_s21, 32 }
  0x4a   :  { %p9054_p0 = scmp.ne.s32.totalorder %s9734_s21, %s9053_s7  ;;  %p9057_p1 = scmp.lt.u32.totalorder %s9053_s7, %s9734_s21 }
  0x4c   :  { %p9059_p2 = pnand %p9057_p1, %p9054_p0 }
  0x4e   :  { %9062 = shalt.err (!%p9059_p2)
}
  0x4f   :  { %s9063_s10 = scalar_lea.vmem %s116_s0, 32  ;;  %p9068_p4 = scmp.lt.s32.totalorder %s116_s0, %s116_s0 }
  0x50   :  { %p9064_p3 = scmp.ne.s32.totalorder %s116_s0, %s9063_s10  ;;  %p9069_p5 = scmp.lt.s32.totalorder %s9063_s10, %s9063_s10 }
  0x52   :  { %p9070_p6 = por %p9069_p5, %p9068_p4 }
  0x54   :  { %p9071_p7 = pnand %p9070_p6, %p9064_p3 }
  0x56   :  { %9074 = shalt.err (!%p9071_p7)
}
  0x57   :  { %s9669_s11 = smov 16   ;;  %s9670_s15 = smov 1  }
  0x58   :  { %121 = dma.hbm_to_vmem [thread:$0]  %s9734_s21, 32, %s116_s0, [#allocation6], %s9669_s11, %s9669_s11, %s9670_s15  }
  0x59   :  { %s9075_s16 = scalar_lea.hbm %s9744_s29, 2048 }
  0x5a   :  { %p9076_p8 = scmp.ne.s32.totalorder %s9744_s29, %s9075_s16  ;;  %p9079_p9 = scmp.lt.u32.totalorder %s9075_s16, %s9744_s29 }
  0x5c   :  { %p9081_p10 = pnand %p9079_p9, %p9076_p8 }
  0x5e   :  { %9084 = shalt.err (!%p9081_p10)
}
  0x5f   :  { %s9085_s18 = scalar_lea.vmem %s9896_s2, 2048  ;;  %p9090_p12 = scmp.lt.s32.totalorder %s9896_s2, %s9896_s2 }
  0x60   :  { %p9086_p11 = scmp.ne.s32.totalorder %s9896_s2, %s9085_s18  ;;  %p9091_p13 = scmp.lt.s32.totalorder %s9085_s18, %s9085_s18 }
  0x62   :  { %p9092_p0 = por %p9091_p13, %p9090_p12 }
  0x64   :  { %p9093_p1 = pnand %p9092_p0, %p9086_p11 }
  0x66   :  { %9096 = shalt.err (!%p9093_p1)
}
  0x67   :  { %s9671_s22 = smov 64   ;;  %s9672_s21 = smov 4  }
  0x68   :  { %145 = dma.hbm_to_vmem [thread:$0]  %s9744_s29, 2048, %s9896_s2, [#allocation9], %s9671_s22, %s9671_s22, %s9672_s21  }
  0x69   :  { %s9673_s23 = smov [#allocation11]   ;;  %s9674_s28 = smov [#allocation14]  }
  0x6a   :  { %s165_s26 = sshll.u32 %s9673_s23, 4  ;;  %s189_s0 = sshll.u32 %s9674_s28, 4  ;;  %s166_s26 = int_to_ptr.vmem [resolvable:$true] %s165_s26  ;;  %s9917_s0 = int_to_ptr.vmem [resolvable:$true] %s189_s0 }
  0x6b   :  { %s9097_s1 = scalar_lea.hbm %s9759_s14, 32 }
  0x6c   :  { %p9098_p2 = scmp.ne.s32.totalorder %s9759_s14, %s9097_s1  ;;  %p9101_p3 = scmp.lt.u32.totalorder %s9097_s1, %s9759_s14 }
  0x6e   :  { %p9103_p4 = pnand %p9101_p3, %p9098_p2 }
  0x70   :  { %9106 = shalt.err (!%p9103_p4)
}
  0x71   :  { %s9107_s7 = scalar_lea.vmem %s166_s26, 32  ;;  %p9112_p6 = scmp.lt.s32.totalorder %s166_s26, %s166_s26 }
  0x72   :  { %p9108_p5 = scmp.ne.s32.totalorder %s166_s26, %s9107_s7  ;;  %p9113_p7 = scmp.lt.s32.totalorder %s9107_s7, %s9107_s7 }
  0x74   :  { %p9114_p8 = por %p9113_p7, %p9112_p6 }
  0x76   :  { %p9115_p9 = pnand %p9114_p8, %p9108_p5 }
  0x78   :  { %9118 = shalt.err (!%p9115_p9)
}
  0x79   :  { %171 = dma.hbm_to_vmem [thread:$0]  %s9759_s14, 32, %s166_s26, [#allocation12], %s9669_s11, %s9669_s11, %s9670_s15  }
  0x7a   :  { %s9119_s29 = scalar_lea.hbm %s9769_s24, 32 }
  0x7b   :  { %p9120_p10 = scmp.ne.s32.totalorder %s9769_s24, %s9119_s29  ;;  %p9123_p11 = scmp.lt.u32.totalorder %s9119_s29, %s9769_s24 }
  0x7d   :  { %p9125_p12 = pnand %p9123_p11, %p9120_p10 }
  0x7f   :  { %9128 = shalt.err (!%p9125_p12)
}
  0x80   :  { %s9129_s2 = scalar_lea.vmem %s9917_s0, 32  ;;  %p9134_p0 = scmp.lt.s32.totalorder %s9917_s0, %s9917_s0 }
  0x81   :  { %p9130_p13 = scmp.ne.s32.totalorder %s9917_s0, %s9129_s2  ;;  %p9135_p1 = scmp.lt.s32.totalorder %s9129_s2, %s9129_s2 }
  0x83   :  { %p9136_p2 = por %p9135_p1, %p9134_p0 }
  0x85   :  { %p9137_p3 = pnand %p9136_p2, %p9130_p13 }
  0x87   :  { %9140 = shalt.err (!%p9137_p3)
}
  0x88   :  { %195 = dma.hbm_to_vmem [thread:$0]  %s9769_s24, 32, %s9917_s0, [#allocation15], %s9669_s11, %s9669_s11, %s9670_s15  }
  0x89   :  { %s9675_s14 = smov [#allocation17]   ;;  %s9676_s16 = smov [#allocation20]  }
  0x8a   :  { %s213_s10 = sshll.u32 %s9675_s14, 4  ;;  %s237_s18 = sshll.u32 %s9676_s16, 4  ;;  %s214_s10 = int_to_ptr.vmem [resolvable:$true] %s213_s10  ;;  %s9938_s18 = int_to_ptr.vmem [resolvable:$true] %s237_s18 }
  0x8b   :  { %s9141_s23 = scalar_lea.hbm %s9779_s6, 4096 }
  0x8c   :  { %p9142_p4 = scmp.ne.s32.totalorder %s9779_s6, %s9141_s23  ;;  %p9145_p5 = scmp.lt.u32.totalorder %s9141_s23, %s9779_s6 }
  0x8e   :  { %p9147_p6 = pnand %p9145_p5, %p9142_p4 }
  0x90   :  { %9150 = shalt.err (!%p9147_p6)
}
  0x91   :  { %s9151_s26 = scalar_lea.vmem %s214_s10, 4096  ;;  %p9156_p8 = scmp.lt.s32.totalorder %s214_s10, %s214_s10 }
  0x92   :  { %p9152_p7 = scmp.ne.s32.totalorder %s214_s10, %s9151_s26  ;;  %p9157_p9 = scmp.lt.s32.totalorder %s9151_s26, %s9151_s26 }
  0x94   :  { %p9158_p10 = por %p9157_p9, %p9156_p8 }
  0x96   :  { %p9159_p11 = pnand %p9158_p10, %p9152_p7 }
  0x98   :  { %9162 = shalt.err (!%p9159_p11)
}
  0x99   :  { %219 = dma.hbm_to_vmem [thread:$0]  %s9779_s6, 4096, %s214_s10, [#allocation18], %s9671_s22, %s9671_s22, %s9672_s21  }
  0x9a   :  { %s9163_s24 = scalar_lea.hbm %s9789_s20, 32 }
  0x9b   :  { %p9164_p12 = scmp.ne.s32.totalorder %s9789_s20, %s9163_s24  ;;  %p9167_p13 = scmp.lt.u32.totalorder %s9163_s24, %s9789_s20 }
  0x9d   :  { %p9169_p0 = pnand %p9167_p13, %p9164_p12 }
  0x9f   :  { %9172 = shalt.err (!%p9169_p0)
}
  0xa0   :  { %s9173_s28 = scalar_lea.vmem %s9938_s18, 32  ;;  %p9178_p2 = scmp.lt.s32.totalorder %s9938_s18, %s9938_s18 }
  0xa1   :  { %p9174_p1 = scmp.ne.s32.totalorder %s9938_s18, %s9173_s28  ;;  %p9179_p3 = scmp.lt.s32.totalorder %s9173_s28, %s9173_s28 }
  0xa3   :  { %p9180_p4 = por %p9179_p3, %p9178_p2 }
  0xa5   :  { %p9181_p5 = pnand %p9180_p4, %p9174_p1 }
  0xa7   :  { %9184 = shalt.err (!%p9181_p5)
}
  0xa8   :  { %243 = dma.hbm_to_vmem [thread:$0]  %s9789_s20, 32, %s9938_s18, [#allocation21], %s9669_s11, %s9669_s11, %s9670_s15  }
  0xa9   :  { %s9677_s6 = smov [#allocation23]   ;;  %s9678_s1 = smov [#allocation26]  }
  0xaa   :  { %s261_s0 = sshll.u32 %s9677_s6, 4  ;;  %s285_s7 = sshll.u32 %s9678_s1, 4  ;;  %s262_s0 = int_to_ptr.vmem [resolvable:$true] %s261_s0  ;;  %s9959_s7 = int_to_ptr.vmem [resolvable:$true] %s285_s7 }
  0xab   :  { %s9185_s29 = scalar_lea.hbm %s9799_s4, 32 }
  0xac   :  { %p9186_p6 = scmp.ne.s32.totalorder %s9799_s4, %s9185_s29  ;;  %p9189_p7 = scmp.lt.u32.totalorder %s9185_s29, %s9799_s4 }
  0xae   :  { %p9191_p8 = pnand %p9189_p7, %p9186_p6 }
  0xb0   :  { %9194 = shalt.err (!%p9191_p8)
}
  0xb1   :  { %s9195_s2 = scalar_lea.vmem %s262_s0, 32  ;;  %p9200_p10 = scmp.lt.s32.totalorder %s262_s0, %s262_s0 }
  0xb2   :  { %p9196_p9 = scmp.ne.s32.totalorder %s262_s0, %s9195_s2  ;;  %p9201_p11 = scmp.lt.s32.totalorder %s9195_s2, %s9195_s2 }
  0xb4   :  { %p9202_p12 = por %p9201_p11, %p9200_p10 }
  0xb6   :  { %p9203_p13 = pnand %p9202_p12, %p9196_p9 }
  0xb8   :  { %9206 = shalt.err (!%p9203_p13)
}
  0xb9   :  { %267 = dma.hbm_to_vmem [thread:$0]  %s9799_s4, 32, %s262_s0, [#allocation24], %s9669_s11, %s9669_s11, %s9670_s15  }
  0xba   :  { %s9207_s20 = scalar_lea.hbm %s9809_s13, 2048 }
  0xbb   :  { %p9208_p0 = scmp.ne.s32.totalorder %s9809_s13, %s9207_s20  ;;  %p9211_p1 = scmp.lt.u32.totalorder %s9207_s20, %s9809_s13 }
  0xbd   :  { %p9213_p2 = pnand %p9211_p1, %p9208_p0 }
  0xbf   :  { %9216 = shalt.err (!%p9213_p2)
}
  0xc0   :  { %s9217_s14 = scalar_lea.vmem %s9959_s7, 2048  ;;  %p9222_p4 = scmp.lt.s32.totalorder %s9959_s7, %s9959_s7 }
  0xc1   :  { %p9218_p3 = scmp.ne.s32.totalorder %s9959_s7, %s9217_s14  ;;  %p9223_p5 = scmp.lt.s32.totalorder %s9217_s14, %s9217_s14 }
  0xc3   :  { %p9224_p6 = por %p9223_p5, %p9222_p4 }
  0xc5   :  { %p9225_p7 = pnand %p9224_p6, %p9218_p3 }
  0xc7   :  { %9228 = shalt.err (!%p9225_p7)
}
  0xc8   :  { %291 = dma.hbm_to_vmem [thread:$0]  %s9809_s13, 2048, %s9959_s7, [#allocation27], %s9671_s22, %s9671_s22, %s9672_s21  }
  0xc9   :  { %s9679_s4 = smov [#allocation29]   ;;  %s9680_s16 = smov [#allocation32]  }
  0xca   :  { %s311_s10 = sshll.u32 %s9679_s4, 4  ;;  %s337_s18 = sshll.u32 %s9680_s16, 4  ;;  %s312_s10 = int_to_ptr.vmem [resolvable:$true] %s311_s10  ;;  %s9980_s18 = int_to_ptr.vmem [resolvable:$true] %s337_s18 }
  0xcb   :  { %s9229_s23 = scalar_lea.hbm %s9824_s8, 32 }
  0xcc   :  { %p9230_p8 = scmp.ne.s32.totalorder %s9824_s8, %s9229_s23  ;;  %p9233_p9 = scmp.lt.u32.totalorder %s9229_s23, %s9824_s8 }
  0xce   :  { %p9235_p10 = pnand %p9233_p9, %p9230_p8 }
  0xd0   :  { %9238 = shalt.err (!%p9235_p10)
}
  0xd1   :  { %s9239_s26 = scalar_lea.vmem %s312_s10, 32  ;;  %p9244_p12 = scmp.lt.s32.totalorder %s312_s10, %s312_s10 }
  0xd2   :  { %p9240_p11 = scmp.ne.s32.totalorder %s312_s10, %s9239_s26  ;;  %p9245_p13 = scmp.lt.s32.totalorder %s9239_s26, %s9239_s26 }
  0xd4   :  { %p9246_p0 = por %p9245_p13, %p9244_p12 }
  0xd6   :  { %p9247_p1 = pnand %p9246_p0, %p9240_p11 }
  0xd8   :  { %9250 = shalt.err (!%p9247_p1)
}
  0xd9   :  { %317 = dma.hbm_to_vmem [thread:$0]  %s9824_s8, 32, %s312_s10, [#allocation30], %s9669_s11, %s9669_s11, %s9670_s15  }
  0xda   :  { %s9251_s13 = scalar_lea.hbm %s9839_s5, 32 }
  0xdb   :  { %p9252_p2 = scmp.ne.s32.totalorder %s9839_s5, %s9251_s13  ;;  %p9255_p3 = scmp.lt.u32.totalorder %s9251_s13, %s9839_s5 }
  0xdd   :  { %p9257_p4 = pnand %p9255_p3, %p9252_p2 }
  0xdf   :  { %9260 = shalt.err (!%p9257_p4)
}
  0xe0   :  { %s9261_s24 = scalar_lea.vmem %s9980_s18, 32  ;;  %p9266_p6 = scmp.lt.s32.totalorder %s9980_s18, %s9980_s18 }
  0xe1   :  { %p9262_p5 = scmp.ne.s32.totalorder %s9980_s18, %s9261_s24  ;;  %p9267_p7 = scmp.lt.s32.totalorder %s9261_s24, %s9261_s24 }
  0xe3   :  { %p9268_p8 = por %p9267_p7, %p9266_p6 }
  0xe5   :  { %p9269_p9 = pnand %p9268_p8, %p9262_p5 }
  0xe7   :  { %9272 = shalt.err (!%p9269_p9)
}
  0xe8   :  { %343 = dma.hbm_to_vmem [thread:$0]  %s9839_s5, 32, %s9980_s18, [#allocation33], %s9669_s11, %s9669_s11, %s9670_s15  }
  0xe9   :  { %s9681_s8 = smov [#allocation35]   ;;  %s9682_s6 = smov [#allocation2]  }
  0xea   :  { %s371_s28 = sshll.u32 %s9681_s8, 4  ;;  %s103_s0 = sshll.u32 %s9682_s6, 4  ;;  %s372_s28 = int_to_ptr.vmem [resolvable:$true] %s371_s28  ;;  %s10001_s0 = int_to_ptr.vmem [resolvable:$true] %s103_s0 }
  0xeb   :  { %s9273_s1 = scalar_lea.hbm %s9874_s9, 4096 }
  0xec   :  { %p9274_p10 = scmp.ne.s32.totalorder %s9874_s9, %s9273_s1  ;;  %p9277_p11 = scmp.lt.u32.totalorder %s9273_s1, %s9874_s9 }
  0xee   :  { %p9279_p12 = pnand %p9277_p11, %p9274_p10 }
  0xf0   :  { %9282 = shalt.err (!%p9279_p12)
}
  0xf1   :  { %s9283_s7 = scalar_lea.vmem %s372_s28, 4096  ;;  %p9288_p0 = scmp.lt.s32.totalorder %s372_s28, %s372_s28 }
  0xf2   :  { %p9284_p13 = scmp.ne.s32.totalorder %s372_s28, %s9283_s7  ;;  %p9289_p1 = scmp.lt.s32.totalorder %s9283_s7, %s9283_s7 }
  0xf4   :  { %p9290_p2 = por %p9289_p1, %p9288_p0 }
  0xf6   :  { %p9291_p3 = pnand %p9290_p2, %p9284_p13 }
  0xf8   :  { %9294 = shalt.err (!%p9291_p3)
}
  0xf9   :  { %s9683_s5 = smov 128   ;;  %s9684_s29 = smov 8  }
  0xfa   :  { %377 = dma.hbm_to_vmem [thread:$0]  %s9874_s9, 4096, %s372_s28, [#allocation36], %s9683_s5, %s9683_s5, %s9684_s29  }
  0xfb   :  { %s9295_s2 = scalar_lea.hbm %s9729_s17, 32 }
  0xfc   :  { %p9296_p4 = scmp.ne.s32.totalorder %s9729_s17, %s9295_s2  ;;  %p9299_p5 = scmp.lt.u32.totalorder %s9295_s2, %s9729_s17 }
  0xfe   :  { %p9301_p6 = pnand %p9299_p5, %p9296_p4 }
 0x100   :  { %9304 = shalt.err (!%p9301_p6)
}
 0x101   :  { %s9305_s20 = scalar_lea.vmem %s10001_s0, 32  ;;  %p9310_p8 = scmp.lt.s32.totalorder %s10001_s0, %s10001_s0 }
 0x102   :  { %p9306_p7 = scmp.ne.s32.totalorder %s10001_s0, %s9305_s20  ;;  %p9311_p9 = scmp.lt.s32.totalorder %s9305_s20, %s9305_s20 }
 0x104   :  { %p9312_p10 = por %p9311_p9, %p9310_p8 }
 0x106   :  { %p9313_p11 = pnand %p9312_p10, %p9306_p7 }
 0x108   :  { %9316 = shalt.err (!%p9313_p11)
}
 0x109   :  { %109 = dma.hbm_to_vmem [thread:$0]  %s9729_s17, 32, %s10001_s0, [#allocation3], %s9669_s11, %s9669_s11, %s9670_s15  }
 0x10a   :  { %s9685_s9 = smov [#allocation7]   ;;  %s9686_s4 = smov [#allocation10]  }
 0x10b   :  { %s127_s14 = sshll.u32 %s9685_s9, 4  ;;  %s151_s10 = sshll.u32 %s9686_s4, 4  ;;  %s128_s14 = int_to_ptr.vmem [resolvable:$true] %s127_s14  ;;  %s10022_s10 = int_to_ptr.vmem [resolvable:$true] %s151_s10 }
 0x10c   :  { %s9317_s16 = scalar_lea.hbm %s9739_s25, 32 }
 0x10d   :  { %p9318_p12 = scmp.ne.s32.totalorder %s9739_s25, %s9317_s16  ;;  %p9321_p13 = scmp.lt.u32.totalorder %s9317_s16, %s9739_s25 }
 0x10f   :  { %p9323_p0 = pnand %p9321_p13, %p9318_p12 }
 0x111   :  { %9326 = shalt.err (!%p9323_p0)
}
 0x112   :  { %s9327_s18 = scalar_lea.vmem %s128_s14, 32  ;;  %p9332_p2 = scmp.lt.s32.totalorder %s128_s14, %s128_s14 }
 0x113   :  { %p9328_p1 = scmp.ne.s32.totalorder %s128_s14, %s9327_s18  ;;  %p9333_p3 = scmp.lt.s32.totalorder %s9327_s18, %s9327_s18 }
 0x115   :  { %p9334_p4 = por %p9333_p3, %p9332_p2 }
 0x117   :  { %p9335_p5 = pnand %p9334_p4, %p9328_p1 }
 0x119   :  { %9338 = shalt.err (!%p9335_p5)
}
 0x11a   :  { %133 = dma.hbm_to_vmem [thread:$0]  %s9739_s25, 32, %s128_s14, [#allocation6], %s9669_s11, %s9669_s11, %s9670_s15  }
 0x11b   :  { %s9339_s17 = scalar_lea.hbm %s9749_s3, 2048 }
 0x11c   :  { %p9340_p6 = scmp.ne.s32.totalorder %s9749_s3, %s9339_s17  ;;  %p9343_p7 = scmp.lt.u32.totalorder %s9339_s17, %s9749_s3 }
 0x11e   :  { %p9345_p8 = pnand %p9343_p7, %p9340_p6 }
 0x120   :  { %9348 = shalt.err (!%p9345_p8)
}
 0x121   :  { %s9349_s23 = scalar_lea.vmem %s10022_s10, 2048  ;;  %p9354_p10 = scmp.lt.s32.totalorder %s10022_s10, %s10022_s10 }
 0x122   :  { %p9350_p9 = scmp.ne.s32.totalorder %s10022_s10, %s9349_s23  ;;  %p9355_p11 = scmp.lt.s32.totalorder %s9349_s23, %s9349_s23 }
 0x124   :  { %p9356_p12 = por %p9355_p11, %p9354_p10 }
 0x126   :  { %p9357_p13 = pnand %p9356_p12, %p9350_p9 }
 0x128   :  { %9360 = shalt.err (!%p9357_p13)
}
 0x129   :  { %s10905_s25 = sld [smem:[#allocation59_spill]]  ;;  %s9687_s26 = smov [#allocation13]  }
 0x12a   :  { %157 = dma.hbm_to_vmem [thread:$0]  %s9749_s3, 2048, %s10022_s10, [#allocation9], %s9671_s22, %s9671_s22, %s9672_s21  }
 0x12b   :  { %s177_s13 = sshll.u32 %s9687_s26, 4  ;;  %s9688_s24 = smov [#allocation16]   ;;  %s178_s13 = int_to_ptr.vmem [resolvable:$true] %s177_s13 }
 0x12c   :  { %s201_s8 = sshll.u32 %s9688_s24, 4  ;;  %s10043_s8 = int_to_ptr.vmem [resolvable:$true] %s201_s8 }
 0x12f   :  { %s9361_s28 = scalar_lea.hbm %s10905_s25, 32 }
 0x130   :  { %p9362_p0 = scmp.ne.s32.totalorder %s10905_s25, %s9361_s28  ;;  %p9365_p1 = scmp.lt.u32.totalorder %s9361_s28, %s10905_s25 }
 0x132   :  { %p9367_p2 = pnand %p9365_p1, %p9362_p0 }
 0x134   :  { %9370 = shalt.err (!%p9367_p2)
}
 0x135   :  { %s9371_s6 = scalar_lea.vmem %s178_s13, 32  ;;  %p9376_p4 = scmp.lt.s32.totalorder %s178_s13, %s178_s13 }
 0x136   :  { %p9372_p3 = scmp.ne.s32.totalorder %s178_s13, %s9371_s6  ;;  %p9377_p5 = scmp.lt.s32.totalorder %s9371_s6, %s9371_s6 }
 0x138   :  { %p9378_p6 = por %p9377_p5, %p9376_p4 }
 0x13a   :  { %p9379_p7 = pnand %p9378_p6, %p9372_p3 }
 0x13c   :  { %9382 = shalt.err (!%p9379_p7)
}
 0x13d   :  { %s10906_s3 = sld [smem:[#allocation60_spill]] }
 0x13e   :  { %183 = dma.hbm_to_vmem [thread:$0]  %s10905_s25, 32, %s178_s13, [#allocation12], %s9669_s11, %s9669_s11, %s9670_s15  }
 0x143   :  { %s9383_s0 = scalar_lea.hbm %s10906_s3, 4096 }
 0x144   :  { %p9384_p8 = scmp.ne.s32.totalorder %s10906_s3, %s9383_s0  ;;  %p9387_p9 = scmp.lt.u32.totalorder %s9383_s0, %s10906_s3 }
 0x146   :  { %p9389_p10 = pnand %p9387_p9, %p9384_p8 }
 0x148   :  { %9392 = shalt.err (!%p9389_p10)
}
 0x149   :  { %s9393_s1 = scalar_lea.vmem %s10043_s8, 4096  ;;  %p9398_p12 = scmp.lt.s32.totalorder %s10043_s8, %s10043_s8 }
 0x14a   :  { %p9394_p11 = scmp.ne.s32.totalorder %s10043_s8, %s9393_s1  ;;  %p9399_p13 = scmp.lt.s32.totalorder %s9393_s1, %s9393_s1 }
 0x14c   :  { %p9400_p0 = por %p9399_p13, %p9398_p12 }
 0x14e   :  { %p9401_p1 = pnand %p9400_p0, %p9394_p11 }
 0x150   :  { %9404 = shalt.err (!%p9401_p1)
}
 0x151   :  { %s10907_s7 = sld [smem:[#allocation61_spill]]  ;;  %s9689_s2 = smov [#allocation19]  }
 0x152   :  { %207 = dma.hbm_to_vmem [thread:$0]  %s10906_s3, 4096, %s10043_s8, [#allocation15], %s9683_s5, %s9683_s5, %s9684_s29  }
 0x153   :  { %s225_s20 = sshll.u32 %s9689_s2, 4  ;;  %s9690_s9 = smov [#allocation22]   ;;  %s226_s20 = int_to_ptr.vmem [resolvable:$true] %s225_s20 }
 0x154   :  { %s249_s14 = sshll.u32 %s9690_s9, 4  ;;  %s10064_s14 = int_to_ptr.vmem [resolvable:$true] %s249_s14 }
 0x157   :  { %s9405_s4 = scalar_lea.hbm %s10907_s7, 32 }
 0x158   :  { %p9406_p2 = scmp.ne.s32.totalorder %s10907_s7, %s9405_s4  ;;  %p9409_p3 = scmp.lt.u32.totalorder %s9405_s4, %s10907_s7 }
 0x15a   :  { %p9411_p4 = pnand %p9409_p3, %p9406_p2 }
 0x15c   :  { %9414 = shalt.err (!%p9411_p4)
}
 0x15d   :  { %s9415_s10 = scalar_lea.vmem %s226_s20, 32  ;;  %p9420_p6 = scmp.lt.s32.totalorder %s226_s20, %s226_s20 }
 0x15e   :  { %p9416_p5 = scmp.ne.s32.totalorder %s226_s20, %s9415_s10  ;;  %p9421_p7 = scmp.lt.s32.totalorder %s9415_s10, %s9415_s10 }
 0x160   :  { %p9422_p8 = por %p9421_p7, %p9420_p6 }
 0x162   :  { %p9423_p9 = pnand %p9422_p8, %p9416_p5 }
 0x164   :  { %9426 = shalt.err (!%p9423_p9)
}
 0x165   :  { %s10908_s5 = sld [smem:[#allocation62_spill]] }
 0x166   :  { %231 = dma.hbm_to_vmem [thread:$0]  %s10907_s7, 32, %s226_s20, [#allocation18], %s9669_s11, %s9669_s11, %s9670_s15  }
 0x16b   :  { %s9427_s29 = scalar_lea.hbm %s10908_s5, 32 }
 0x16c   :  { %p9428_p10 = scmp.ne.s32.totalorder %s10908_s5, %s9427_s29  ;;  %p9431_p11 = scmp.lt.u32.totalorder %s9427_s29, %s10908_s5 }
 0x16e   :  { %p9433_p12 = pnand %p9431_p11, %p9428_p10 }
 0x170   :  { %9436 = shalt.err (!%p9433_p12)
}
 0x171   :  { %s9437_s16 = scalar_lea.vmem %s10064_s14, 32  ;;  %p9442_p0 = scmp.lt.s32.totalorder %s10064_s14, %s10064_s14 }
 0x172   :  { %p9438_p13 = scmp.ne.s32.totalorder %s10064_s14, %s9437_s16  ;;  %p9443_p1 = scmp.lt.s32.totalorder %s9437_s16, %s9437_s16 }
 0x174   :  { %p9444_p2 = por %p9443_p1, %p9442_p0 }
 0x176   :  { %p9445_p3 = pnand %p9444_p2, %p9438_p13 }
 0x178   :  { %9448 = shalt.err (!%p9445_p3)
}
 0x179   :  { %s10909_s18 = sld [smem:[#allocation63_spill]]  ;;  %s9691_s17 = smov [#allocation25]  }
 0x17a   :  { %255 = dma.hbm_to_vmem [thread:$0]  %s10908_s5, 32, %s10064_s14, [#allocation21], %s9669_s11, %s9669_s11, %s9670_s15  }
 0x17b   :  { %s273_s23 = sshll.u32 %s9691_s17, 4  ;;  %s9692_s25 = smov [#allocation28]   ;;  %s274_s23 = int_to_ptr.vmem [resolvable:$true] %s273_s23 }
 0x17c   :  { %s299_s26 = sshll.u32 %s9692_s25, 4  ;;  %s10085_s26 = int_to_ptr.vmem [resolvable:$true] %s299_s26 }
 0x17f   :  { %s9449_s13 = scalar_lea.hbm %s10909_s18, 2048 }
 0x180   :  { %p9450_p4 = scmp.ne.s32.totalorder %s10909_s18, %s9449_s13  ;;  %p9453_p5 = scmp.lt.u32.totalorder %s9449_s13, %s10909_s18 }
 0x182   :  { %p9455_p6 = pnand %p9453_p5, %p9450_p4 }
 0x184   :  { %9458 = shalt.err (!%p9455_p6)
}
 0x185   :  { %s9459_s24 = scalar_lea.vmem %s274_s23, 2048  ;;  %p9464_p8 = scmp.lt.s32.totalorder %s274_s23, %s274_s23 }
 0x186   :  { %p9460_p7 = scmp.ne.s32.totalorder %s274_s23, %s9459_s24  ;;  %p9465_p9 = scmp.lt.s32.totalorder %s9459_s24, %s9459_s24 }
 0x188   :  { %p9466_p10 = por %p9465_p9, %p9464_p8 }
 0x18a   :  { %p9467_p11 = pnand %p9466_p10, %p9460_p7 }
 0x18c   :  { %9470 = shalt.err (!%p9467_p11)
}
 0x18d   :  { %s10910_s8 = sld [smem:[#allocation65_spill]] }
 0x18e   :  { %279 = dma.hbm_to_vmem [thread:$0]  %s10909_s18, 2048, %s274_s23, [#allocation24], %s9671_s22, %s9671_s22, %s9672_s21  }
 0x193   :  { %s9471_s28 = scalar_lea.hbm %s10910_s8, 8192 }
 0x194   :  { %p9472_p12 = scmp.ne.s32.totalorder %s10910_s8, %s9471_s28  ;;  %p9475_p13 = scmp.lt.u32.totalorder %s9471_s28, %s10910_s8 }
 0x196   :  { %p9477_p0 = pnand %p9475_p13, %p9472_p12 }
 0x198   :  { %9480 = shalt.err (!%p9477_p0)
}
 0x199   :  { %s9481_s6 = scalar_lea.vmem %s10085_s26, 8192  ;;  %p9486_p2 = scmp.lt.s32.totalorder %s10085_s26, %s10085_s26 }
 0x19a   :  { %p9482_p1 = scmp.ne.s32.totalorder %s10085_s26, %s9481_s6  ;;  %p9487_p3 = scmp.lt.s32.totalorder %s9481_s6, %s9481_s6 }
 0x19c   :  { %p9488_p4 = por %p9487_p3, %p9486_p2 }
 0x19e   :  { %p9489_p5 = pnand %p9488_p4, %p9482_p1 }
 0x1a0   :  { %9492 = shalt.err (!%p9489_p5)
}
 0x1a1   :  { %s9693_s3 = smov 512   ;;  %s10911_s0 = sld [smem:[#allocation67_spill]] }
 0x1a2   :  { %s9694_s1 = smov 32   ;;  %s9695_s7 = smov [#allocation31]  }
 0x1a3   :  { %305 = dma.hbm_to_vmem [thread:$0]  %s10910_s8, 8192, %s10085_s26, [#allocation27], %s9693_s3, %s9693_s3, %s9694_s1  }
 0x1a4   :  { %s325_s2 = sshll.u32 %s9695_s7, 4  ;;  %s9696_s20 = smov [#allocation34]   ;;  %s326_s2 = int_to_ptr.vmem [resolvable:$true] %s325_s2 }
 0x1a5   :  { %s351_s9 = sshll.u32 %s9696_s20, 4  ;;  %s10104_s9 = int_to_ptr.vmem [resolvable:$true] %s351_s9 }
 0x1a7   :  { %s9493_s14 = scalar_lea.hbm %s10911_s0, 32 }
 0x1a8   :  { %p9494_p6 = scmp.ne.s32.totalorder %s10911_s0, %s9493_s14  ;;  %p9497_p7 = scmp.lt.u32.totalorder %s9493_s14, %s10911_s0 }
 0x1aa   :  { %p9499_p8 = pnand %p9497_p7, %p9494_p6 }
 0x1ac   :  { %9502 = shalt.err (!%p9499_p8)
}
 0x1ad   :  { %s9503_s4 = scalar_lea.vmem %s326_s2, 32  ;;  %p9508_p10 = scmp.lt.s32.totalorder %s326_s2, %s326_s2 }
 0x1ae   :  { %p9504_p9 = scmp.ne.s32.totalorder %s326_s2, %s9503_s4  ;;  %p9509_p11 = scmp.lt.s32.totalorder %s9503_s4, %s9503_s4 }
 0x1b0   :  { %p9510_p12 = por %p9509_p11, %p9508_p10 }
 0x1b2   :  { %p9511_p13 = pnand %p9510_p12, %p9504_p9 }
 0x1b4   :  { %9514 = shalt.err (!%p9511_p13)
}
 0x1b5   :  { %s10912_s10 = sld [smem:[#allocation69_spill]] }
 0x1b6   :  { %331 = dma.hbm_to_vmem [thread:$0]  %s10911_s0, 32, %s326_s2, [#allocation30], %s9669_s11, %s9669_s11, %s9670_s15  }
 0x1bb   :  { %s9515_s5 = scalar_lea.hbm %s10912_s10, 6144 }
 0x1bc   :  { %p9516_p0 = scmp.ne.s32.totalorder %s10912_s10, %s9515_s5  ;;  %p9519_p1 = scmp.lt.u32.totalorder %s9515_s5, %s10912_s10 }
 0x1be   :  { %p9521_p2 = pnand %p9519_p1, %p9516_p0 }
 0x1c0   :  { %9524 = shalt.err (!%p9521_p2)
}
 0x1c1   :  { %s9525_s29 = scalar_lea.vmem %s10104_s9, 6144  ;;  %p9530_p4 = scmp.lt.s32.totalorder %s10104_s9, %s10104_s9 }
 0x1c2   :  { %p9526_p3 = scmp.ne.s32.totalorder %s10104_s9, %s9525_s29  ;;  %p9531_p5 = scmp.lt.s32.totalorder %s9525_s29, %s9525_s29 }
 0x1c4   :  { %p9532_p6 = por %p9531_p5, %p9530_p4 }
 0x1c6   :  { %p9533_p7 = pnand %p9532_p6, %p9526_p3 }
 0x1c8   :  { %9536 = shalt.err (!%p9533_p7)
}
 0x1c9   :  { %s9697_s16 = smov 192   ;;  %s9698_s11 = smov 12  }
 0x1ca   :  { %357 = dma.hbm_to_vmem [thread:$0]  %s10912_s10, 6144, %s10104_s9, [#allocation33], %s9697_s16, %s9697_s16, %s9698_s11  }
 0x1cb   :  { %s9699_s15 = smov [#allocation37]   ;;  %s9700_s17 = smov [#allocation38]  }
 0x1cc   :  { %s383_s18 = sshll.u32 %s9699_s15, 4  ;;  %s397_s23 = sshll.u32 %s9700_s17, 4  ;;  %s384_s18 = int_to_ptr.vmem [resolvable:$true] %s383_s18  ;;  %s10122_s23 = int_to_ptr.vmem [resolvable:$true] %s397_s23 }
 0x1cd   :  { %s9537_s25 = scalar_lea.hbm %s9879_s30, 4096 }
 0x1ce   :  { %p9538_p8 = scmp.ne.s32.totalorder %s9879_s30, %s9537_s25  ;;  %p9541_p9 = scmp.lt.u32.totalorder %s9537_s25, %s9879_s30 }
 0x1d0   :  { %p9543_p10 = pnand %p9541_p9, %p9538_p8 }
 0x1d2   :  { %9546 = shalt.err (!%p9543_p10)
}
 0x1d3   :  { %s9547_s26 = scalar_lea.vmem %s384_s18, 4096  ;;  %p9552_p12 = scmp.lt.s32.totalorder %s384_s18, %s384_s18 }
 0x1d4   :  { %p9548_p11 = scmp.ne.s32.totalorder %s384_s18, %s9547_s26  ;;  %p9553_p13 = scmp.lt.s32.totalorder %s9547_s26, %s9547_s26 }
 0x1d6   :  { %p9554_p0 = por %p9553_p13, %p9552_p12 }
 0x1d8   :  { %p9555_p1 = pnand %p9554_p0, %p9548_p11 }
 0x1da   :  { %9558 = shalt.err (!%p9555_p1)
}
 0x1db   :  { %389 = dma.hbm_to_vmem [thread:$0]  %s9879_s30, 4096, %s384_s18, [#allocation36], %s9671_s22, %s9671_s22, %s9672_s21  }
 0x1dc   :  { %s9559_s13 = scalar_lea.hbm %s9889_s27, 1024 }
 0x1dd   :  { %p9560_p2 = scmp.ne.s32.totalorder %s9889_s27, %s9559_s13  ;;  %p9563_p3 = scmp.lt.u32.totalorder %s9559_s13, %s9889_s27 }
 0x1df   :  { %p9565_p4 = pnand %p9563_p3, %p9560_p2 }
 0x1e1   :  { %9568 = shalt.err (!%p9565_p4)
}
 0x1e2   :  { %s9569_s24 = scalar_lea.vmem %s10122_s23, 1024  ;;  %p9574_p6 = scmp.lt.s32.totalorder %s10122_s23, %s10122_s23 }
 0x1e3   :  { %p9570_p5 = scmp.ne.s32.totalorder %s10122_s23, %s9569_s24  ;;  %p9575_p7 = scmp.lt.s32.totalorder %s9569_s24, %s9569_s24 }
 0x1e5   :  { %p9576_p8 = por %p9575_p7, %p9574_p6 }
 0x1e7   :  { %p9577_p9 = pnand %p9576_p8, %p9570_p5 }
 0x1e9   :  { %9580 = shalt.err (!%p9577_p9)
}
 0x1ea   :  { %403 = dma.hbm_to_vmem [thread:$0]  %s9889_s27, 1024, %s10122_s23, [#allocation39], %s9671_s22, %s9671_s22, %s9672_s21  }
 0x1eb   :  { %9603 = dma.done.wait [#allocation3], 32  }
 0x1ec   :  { %9604 = vsyncadd [#allocation3], 4294967264 }
 0x1ed   :  { %9605 = dma.done.wait [#allocation6], 64  }
 0x1ee   :  { %9606 = vsyncadd [#allocation6], 4294967232 }
 0x1ef   :  { %9607 = dma.done.wait [#allocation9], 4096  }
 0x1f0   :  { %9608 = vsyncadd [#allocation9], 4294963200 }
 0x1f1   :  { %9609 = dma.done.wait [#allocation12], 64  }
 0x1f2   :  { %9610 = vsyncadd [#allocation12], 4294967232 }
 0x1f3   :  { %9611 = dma.done.wait [#allocation15], 4128  }
 0x1f4   :  { %9612 = vsyncadd [#allocation15], 4294963168 }
 0x1f5   :  { %9613 = dma.done.wait [#allocation18], 4128  }
 0x1f6   :  { %9614 = vsyncadd [#allocation18], 4294963168 }
 0x1f7   :  { %9615 = dma.done.wait [#allocation21], 64  }
 0x1f8   :  { %9616 = vsyncadd [#allocation21], 4294967232 }
 0x1f9   :  { %9617 = dma.done.wait [#allocation24], 2080  }
 0x1fa   :  { %9618 = vsyncadd [#allocation24], 4294965216 }
 0x1fb   :  { %9619 = dma.done.wait [#allocation27], 10240  }
 0x1fc   :  { %9620 = vsyncadd [#allocation27], 4294957056 }
 0x1fd   :  { %9621 = dma.done.wait [#allocation30], 64  }
 0x1fe   :  { %9622 = vsyncadd [#allocation30], 4294967232 }
 0x1ff   :  { %9623 = dma.done.wait [#allocation33], 6176  }
 0x200   :  { %9624 = vsyncadd [#allocation33], 4294961120 }
 0x201   :  { %9625 = dma.done.wait [#allocation36], 8192  }
 0x202   :  { %9626 = vsyncadd [#allocation36], 4294959104 }
 0x203   :  { %9627 = dma.done.wait [#allocation39], 1024  }
 0x204   :  { %9628 = vsyncadd [#allocation39], 4294966272  ;;  %v9701_v0 = vmov 0   ;;  %v8623_v1 = vld [vmem:[#allocation34 + $0x4] ss:$12 sps:$4 sm:$0xff]   ;;  %s10913_s30 = sld [smem:[#allocation55_spill]]  ;;  %v584_v20 = vlaneseq }
 0x205   :  { %759 = vmatprep.mubr.bf16.mxu0 %v9701_v0  ;;  %v8625_v2 = vld [vmem:[#allocation34] ss:$12 sps:$4 sm:$0xff]   ;;  %727 = vmatprep.subr.bf16.mxu0 %v8623_v1  ;;  %v8626_v3 = vld [vmem:[#allocation34 + $0x1c] ss:$12 sps:$4 sm:$0xff]   ;;  %v8628_v4 = vld [vmem:[#allocation34 + $0x18] ss:$12 sps:$4 sm:$0xff]  }
 0x206   :  { %728 = vmatpush1.bf16.msra.mxu0 %v8625_v2  ;;  %v8629_v5 = vld [vmem:[#allocation34 + $0x34] ss:$12 sps:$4 sm:$0xff]   ;;  %v8631_v6 = vld [vmem:[#allocation34 + $0x30] ss:$12 sps:$4 sm:$0xff]   ;;  %v8632_v7 = vld [vmem:[#allocation34 + $0x4c] ss:$12 sps:$4 sm:$0xff]  }
 0x207   :  { %729 = vmatprep.subr.bf16.mxu0 %v8626_v3  ;;  %v8634_v8 = vld [vmem:[#allocation34 + $0x48] ss:$12 sps:$4 sm:$0xff]   ;;  %v8635_v9 = vld [vmem:[#allocation34 + $0x64] ss:$12 sps:$4 sm:$0xff]   ;;  %v8637_v10 = vld [vmem:[#allocation34 + $0x60] ss:$12 sps:$4 sm:$0xff]  }
 0x208   :  { %v8638_v11 = vld [vmem:[#allocation34 + $0x7c] ss:$12 sps:$4 sm:$0xff]   ;;  %v8640_v12 = vld [vmem:[#allocation34 + $0x78] ss:$12 sps:$4 sm:$0xff]   ;;  %v8641_v13 = vld [vmem:[#allocation34 + $0x94] ss:$12 sps:$4 sm:$0xff]  }
 0x209   :  { %v8643_v14 = vld [vmem:[#allocation34 + $0x90] ss:$12 sps:$4 sm:$0xff]   ;;  %v8644_v15 = vld [vmem:[#allocation34 + $0xac] ss:$12 sps:$4 sm:$0xff]   ;;  %v8646_v16 = vld [vmem:[#allocation34 + $0xa8] ss:$12 sps:$4 sm:$0xff]  }
 0x20a   :  { %730 = vmatpush1.bf16.msra.mxu0 %v8628_v4  ;;  %s10914_s27 = sld [smem:[#allocation66_spill]]  ;;  %v477_v17 = vld [vmem:[%s10913_s30] sm:$0xff]  ;;  %v9702_v19 = vmov 0.0   ;;  %vm9703_vm0 = vmmov 0   ;;  %v10154_v21 = vshrl.u32 %v584_v20, 7  ;;  %vm811_vm1 = vcmask 261120  }
 0x20b   :  { %731 = vmatprep.subr.bf16.mxu0 %v8629_v5  ;;  %v10145_v18 = vpack.c.bf16 %v477_v17, %v477_v17  ;;  %8000 = vmatprep.subr.bf16.mxu1 %v9702_v19  ;;  %s9704_s21 = smov 96   ;;  %v8647_v36 = vld [vmem:[#allocation34 + $0x8] ss:$12 sps:$4 sm:$0xff]   ;;  %v8648_v37 = vld [vmem:[#allocation34 + $0x20] ss:$12 sps:$4 sm:$0xff]   ;;  %vm858_vm2 = vcmask 64512  }
 0x20c   :  { %8016 = vmatprep.mubr.msk.bf16.mxu1 %vm9703_vm0, %v9702_v19  ;;  %v10157_v22 = vsub.s32 1, %v10154_v21  ;;  %v10163_v24 = vsub.s32 0, %v10154_v21  ;;  %8001 = vmatpush3.bf16.msra.mxu1 %v8647_v36  ;;  %v8649_v38 = vld [vmem:[#allocation34 + $0x38] ss:$12 sps:$4 sm:$0xff]   ;;  %v8650_v39 = vld [vmem:[#allocation34 + $0x50] ss:$12 sps:$4 sm:$0xff]  }
 0x20d   :  { %8002 = vmatprep.subr.bf16.mxu1 %v9702_v19  ;;  %v8651_v40 = vld [vmem:[#allocation34 + $0x68] ss:$12 sps:$4 sm:$0xff]   ;;  %v8652_v41 = vld [vmem:[#allocation34 + $0x80] ss:$12 sps:$4 sm:$0xff]   ;;  %v8653_v42 = vld [vmem:[#allocation34 + $0x98] ss:$12 sps:$4 sm:$0xff]  }
 0x20e   :  { %732 = vmatpush1.bf16.msra.mxu0 %v8631_v6  ;;  %v8654_v44 = vld [vmem:[#allocation34 + $0xb0] ss:$12 sps:$4 sm:$0xff]   ;;  %v10208_v58 = vsub.s32 2, %v10154_v21  ;;  %vm874_vm3 = vcmask 1043456   ;;  %s10915_s8 = sld [smem:[#allocation68_spill]]  ;;  %vm1264_vm4 = vcmask 523264  }
 0x20f   :  { %733 = vmatprep.subr.bf16.mxu0 %v8632_v7  ;;  %vm1266_vm5 = vcmask 785408   ;;  %s10916_s28 = sld [smem:[#allocation70_spill]]  ;;  %s10917_s6 = sld [smem:[#allocation71_spill]] }
 0x210   :  { %v10160_v23 = vld [vmem:[%s10914_s27] sm:$0x7]  ;;  %8003 = vmatpush3.bf16.msra.mxu1 %v8648_v37  ;;  %s10918_s3 = sld [smem:[#allocation73_spill]]  ;;  %s10919_s0 = sld [smem:[#allocation72_spill]] }
 0x211   :  { %v591_v25 = vrot.slane %v10160_v23, %v10157_v22  ;;  %v587_v26 = vrot.slane %v10160_v23, %v10163_v24  ;;  %8004 = vmatprep.subr.bf16.mxu1 %v9702_v19  ;;  %v595_v59 = vrot.slane %v10160_v23, %v10208_v58  ;;  %s10920_s7 = sld [smem:[#allocation56_spill]]  ;;  %s10922_s20 = sld [smem:[#allocation57_spill]] }
 0x212   :  { %734 = vmatpush1.bf16.msra.mxu0 %v8634_v8  ;;  %s10921_s2 = sld [smem:[#allocation64_spill]]  ;;  %s10923_s9 = sld [smem:[#allocation58_spill]] }
 0x213   :  { %735 = vmatprep.subr.bf16.mxu0 %v8635_v9 }
 0x214   :  { %8005 = vmatpush3.bf16.msra.mxu1 %v8649_v38 }
 0x215   :  { %8006 = vmatprep.subr.bf16.mxu1 %v9702_v19 }
 0x216   :  { %736 = vmatpush1.bf16.msra.mxu0 %v8637_v10 }
 0x217   :  { %737 = vmatprep.subr.bf16.mxu0 %v8638_v11 }
 0x218   :  { %8007 = vmatpush3.bf16.msra.mxu1 %v8650_v39 }
 0x219   :  { %8008 = vmatprep.subr.bf16.mxu1 %v9702_v19 }
 0x21a   :  { %738 = vmatpush1.bf16.msra.mxu0 %v8640_v12 }
 0x21b   :  { %739 = vmatprep.subr.bf16.mxu0 %v8641_v13 }
 0x21c   :  { %8009 = vmatpush3.bf16.msra.mxu1 %v8651_v40 }
 0x21d   :  { %8010 = vmatprep.subr.bf16.mxu1 %v9702_v19 }
 0x21e   :  { %740 = vmatpush1.bf16.msra.mxu0 %v8643_v14 }
 0x21f   :  { %741 = vmatprep.subr.bf16.mxu0 %v8644_v15 }
 0x220   :  { %8011 = vmatpush3.bf16.msra.mxu1 %v8652_v41 }
 0x221   :  { %8012 = vmatprep.subr.bf16.mxu1 %v9702_v19 }
 0x222   :  { %742 = vmatpush1.bf16.msra.mxu0 %v8646_v16 }
 0x223   :  { %8020 = vmatprep.subr.bf16.mxu0 %v9702_v19 }
 0x224   :  { %8013 = vmatpush3.bf16.msra.mxu1 %v8653_v42 }
 0x225   :  { %760 = vmatmul.mubr.bf16.vlgmr.msra.gmra.mrb[0].mxu0 %v10145_v18  ;;  %8014 = vmatprep.subr.bf16.mxu1 %v9702_v19 }
 0x226   :  { %8022 = vmatprep.mubr.msk.bf16.mxu0 %vm9703_vm0, %v9702_v19 }
 0x228   :  { %8015 = vmatpush3.bf16.msra.mxu1 %v8654_v44 }
 0x229   :  { %8026 = vmatprep.subr.bf16.mxu1 %v9702_v19 }
 0x22b   :  { %8017 = vmatmul.mubr.bf16.vlgmr.msra.gmra.mrb[0].mxu1 %v10145_v18 }
 0x22c   :  { %8028 = vmatprep.mubr.msk.bf16.mxu1 %vm9703_vm0, %v9702_v19 }
 0x2f8   :  { %v761_v27 = vpop.f32.mrb[0].mxu0 }
 0x2f9   :  { %v763_v28 = vpop.f32.mrb[1].mxu0  ;;  %v762_v32 = vadd.f32 %v761_v27, %v587_v26 }
 0x2fa   :  { %v764_v29 = vadd.f32 %v763_v28, %v591_v25  ;;  %v765_v30 = vpop.f32.mrb[2].mxu0 }
 0x2fb   :  { %v766_v31 = vpop.f32.mrb[3].mxu0  ;;  %v808_v35 = vpack.c.bf16 %v762_v32, %v762_v32 }
 0x2fc   :  { %v809_v33 = vpack.c.bf16 %v764_v29, %v764_v29 }
 0x2fe   :  { %1033 = vrot.lane.b32.xlu1 %v809_v33, %s9671_s22  ;;  %922 = vrot.lane.b32.xlu0 %v809_v33, %s9704_s21  ;;  %v816_v34 = vsel %vm811_vm1, %v809_v33, 0  ;;  %v802_v60 = vpop.f32.mrb[0].mxu1 }
 0x2ff   :  { %8021 = vmatpush3.bf16.xpose.msra.mxu0 %v816_v34  ;;  %v803_v61 = vadd.f32 %v802_v60, %v595_v59  ;;  %v8018_v62 = vpop.f32.mrb[1].mxu1 }
 0x300   :  { %8032 = vmatprep.subr.bf16.mxu0 %v9702_v19  ;;  %v805_v1 = vpop.f32.mrb[2].mxu1 }
 0x301   :  { %v810_v4 = vpack.c.bf16 %v803_v61, %v803_v61  ;;  %v8019_v5 = vpop.f32.mrb[3].mxu1 }
 0x302   :  { %1031 = vrot.lane.b32.xlu1 %v808_v35, %s9671_s22  ;;  %919 = vrot.lane.b32.xlu0 %v808_v35, %s9704_s21 }
 0x303   :  { %v876_v8 = vsel %vm874_vm3, %v810_v4, 0 }
 0x304   :  { %8027 = vmatpush3.bf16.msra.mxu1 %v876_v8  ;;  %v8656_v8 = vld [vmem:[%s10915_s8 + $0x8] sm:$0xff]  }
 0x305   :  { %8038 = vmatprep.subr.bf16.mxu1 %v9702_v19 }
 0x306   :  { %1141 = vrot.lane.b32.xlu1 %v808_v35, %s9694_s1  ;;  %1143 = vrot.lane.b32.xlu0 %v809_v33, %s9694_s1 }
 0x307   :  { %8023 = vmatmul.mubr.msk.bf16.vlgmr.msra.gmra.mrb[4].mxu0 %vm811_vm1, %v808_v35 }
 0x308   :  { %8034 = vmatprep.mubr.msk.bf16.mxu0 %vm9703_vm0, %v9702_v19 }
 0x370   :  { %v923_v43 = vpop.permute.xlu0 %922  ;;  %v1034_v46 = vpop.permute.xlu1 %1033 }
 0x371   :  { %v928_v45 = vsel %vm811_vm1, %v923_v43, 0  ;;  %v1039_v48 = vsel %vm811_vm1, %v1034_v46, 0 }
 0x372   :  { %8033 = vmatpush3.bf16.xpose.msra.mxu0 %v928_v45 }
 0x373   :  { %8044 = vmatprep.subr.bf16.mxu0 %v9702_v19 }
 0x374   :  { %v920_v47 = vpop.permute.xlu0 %919  ;;  %v1032_v50 = vpop.permute.xlu1 %1031 }
 0x378   :  { %v1144_v49 = vpop.permute.xlu0 %1143  ;;  %v1142_v52 = vpop.permute.xlu1 %1141 }
 0x379   :  { %8035 = vmatmul.mubr.msk.bf16.vlgmr.msra.gmra.mrb[8].mxu0 %vm811_vm1, %v920_v47  ;;  %v1149_v51 = vsel %vm811_vm1, %v1144_v49, 0 }
 0x37a   :  { %8045 = vmatpush3.bf16.xpose.msra.mxu0 %v1039_v48  ;;  %8046 = vmatprep.mubr.msk.bf16.mxu0 %vm9703_vm0, %v9702_v19 }
 0x37b   :  { %8056 = vmatprep.subr.bf16.mxu0 %v9702_v19 }
 0x381   :  { %8047 = vmatmul.mubr.msk.bf16.vlgmr.msra.gmra.mrb[12].mxu0 %vm811_vm1, %v1032_v50 }
 0x382   :  { %8057 = vmatpush3.bf16.xpose.msra.mxu0 %v1149_v51  ;;  %8058 = vmatprep.mubr.msk.bf16.mxu0 %vm9703_vm0, %v9702_v19 }
 0x383   :  { %8068 = vmatprep.subr.bf16.mxu0 %v9702_v19 }
 0x389   :  { %8059 = vmatmul.mubr.msk.bf16.vlgmr.msra.gmra.mrb[16].mxu0 %vm811_vm1, %v1142_v52 }
 0x38a   :  { %8084 = vmatprep.mubr.msk.bf16.mxu0 %vm9703_vm0, %v9702_v19 }
 0x3da   :  { %v852_v53 = vpop.f32.mrb[4].mxu0 }
 0x3db   :  { %v8024_v54 = vpop.f32.mrb[5].mxu0  ;;  %v859_v55 = vsel %vm858_vm2, %v852_v53, -inf }
 0x3dc   :  { %860 = vmax.xlane.f32.xlu0 %v859_v55  ;;  %v855_v56 = vpop.f32.mrb[6].mxu0 }
 0x3dd   :  { %v8025_v57 = vpop.f32.mrb[7].mxu0 }
 0x44c   :  { %v964_v63 = vpop.f32.mrb[8].mxu0 }
 0x44d   :  { %v8036_v2 = vpop.f32.mrb[9].mxu0  ;;  %v970_v3 = vsel %vm858_vm2, %v964_v63, -inf }
 0x44e   :  { %971 = vmax.xlane.f32.xlu1 %v970_v3  ;;  %v967_v6 = vpop.f32.mrb[10].mxu0 }
 0x44f   :  { %v8037_v7 = vpop.f32.mrb[11].mxu0 }
 0x450   :  { %v8655_v7 = vld [vmem:[%s10915_s8] sm:$0xff]  }
 0x451   :  { %8069 = vmatpush3.bf16.msra.mxu0 %v8655_v7  ;;  %v8693_v7 = vld [vmem:[#allocation37 + $0x58] sm:$0xff]  }
 0x452   :  { %8070 = vmatprep.subr.bf16.mxu0 %v9702_v19 }
 0x454   :  { %v1075_v9 = vpop.f32.mrb[12].mxu0 }
 0x455   :  { %v8048_v10 = vpop.f32.mrb[13].mxu0  ;;  %v1081_v11 = vsel %vm858_vm2, %v1075_v9, -inf  ;;  %8071 = vmatpush3.bf16.msra.mxu0 %v8656_v8  ;;  %v8694_v8 = vld [vmem:[#allocation37 + $0x18] sm:$0xff]  }
 0x456   :  { %1082 = vmax.xlane.f32.xlu0 %v1081_v11  ;;  %v1078_v12 = vpop.f32.mrb[14].mxu0  ;;  %8072 = vmatprep.subr.bf16.mxu0 %v9702_v19  ;;  %v8658_v10 = vld [vmem:[%s10915_s8 + $0x18] sm:$0xff]   ;;  %v8659_v11 = vld [vmem:[%s10915_s8 + $0x20] sm:$0xff]  }
 0x457   :  { %v8049_v13 = vpop.f32.mrb[15].mxu0  ;;  %v8660_v12 = vld [vmem:[%s10915_s8 + $0x28] sm:$0xff]  }
 0x458   :  { %v8661_v13 = vld [vmem:[%s10915_s8 + $0x30] sm:$0xff]  }
 0x45c   :  { %v1185_v14 = vpop.f32.mrb[16].mxu0 }
 0x45d   :  { %v8060_v15 = vpop.f32.mrb[17].mxu0  ;;  %v1191_v16 = vsel %vm858_vm2, %v1185_v14, -inf }
 0x45e   :  { %1192 = vmax.xlane.f32.xlu0 %v1191_v16  ;;  %v1188_v17 = vpop.f32.mrb[18].mxu0 }
 0x45f   :  { %v8061_v18 = vpop.f32.mrb[19].mxu0 }
 0x460   :  { %v8662_v18 = vld [vmem:[%s10915_s8 + $0x38] sm:$0xff]  }
 0x469   :  { %v861_v20 = vpop.xlane.xlu0 %860 }
 0x46a   :  { %v862_v23 = vsub.f32 %v852_v53, %v861_v20 }
 0x46c   :  { %v863_v25 = vmul.f32 1.442695, %v862_v23 }
 0x46e   :  { %8935 = vpow2.f32 %v863_v25 }
 0x478   :  { %v8936_v26 = vpop.eup %8935 }
 0x479   :  { %v865_v27 = vsel %vm858_vm2, %v8936_v26, 0.0 }
 0x47a   :  { %866 = vadd.xlane.f32.xlu1 %v865_v27 }
 0x48b   :  { %983 = vrot.lane.b32.xlu1 %v810_v4, %s9704_s21 }
 0x4db   :  { %v972_v28 = vpop.xlane.xlu1 %971 }
 0x4dc   :  { %v973_v29 = vsub.f32 %v964_v63, %v972_v28 }
 0x4de   :  { %v974_v30 = vmul.f32 1.442695, %v973_v29 }
 0x4e0   :  { %8937 = vpow2.f32 %v974_v30 }
 0x4e3   :  { %v1083_v31 = vpop.xlane.xlu0 %1082 }
 0x4e4   :  { %v1084_v32 = vsub.f32 %v1075_v9, %v1083_v31  ;;  %v8657_v9 = vld [vmem:[%s10915_s8 + $0x10] sm:$0xff]  }
 0x4e5   :  { %8073 = vmatpush3.bf16.msra.mxu0 %v8657_v9  ;;  %v8695_v9 = vld [vmem:[#allocation37 + $0x60] sm:$0xff]  }
 0x4e6   :  { %v1085_v33 = vmul.f32 1.442695, %v1084_v32  ;;  %8074 = vmatprep.subr.bf16.mxu0 %v9702_v19 }
 0x4e8   :  { %8939 = vpow2.f32 %v1085_v33 }
 0x4e9   :  { %8075 = vmatpush3.bf16.msra.mxu0 %v8658_v10  ;;  %v8696_v10 = vld [vmem:[#allocation37 + $0x20] sm:$0xff]  }
 0x4ea   :  { %v8938_v34 = vpop.eup %8937  ;;  %8076 = vmatprep.subr.bf16.mxu0 %v9702_v19 }
 0x4eb   :  { %v1193_v35 = vpop.xlane.xlu0 %1192  ;;  %v976_v36 = vsel %vm858_vm2, %v8938_v34, 0.0 }
 0x4ec   :  { %v1194_v37 = vsub.f32 %v1185_v14, %v1193_v35  ;;  %977 = vadd.xlane.f32.xlu0 %v976_v36 }
 0x4ed   :  { %8077 = vmatpush3.bf16.msra.mxu0 %v8659_v11  ;;  %v8697_v11 = vld [vmem:[#allocation37 + $0x68] sm:$0xff]  }
 0x4ee   :  { %v1195_v38 = vmul.f32 1.442695, %v1194_v37  ;;  %8078 = vmatprep.subr.bf16.mxu0 %v9702_v19 }
 0x4f0   :  { %8941 = vpow2.f32 %v1195_v38  ;;  %v8663_v38 = vld [vmem:[#allocation35] ss:$8 sps:$4 sm:$0xff]  }
 0x4f1   :  { %8079 = vmatpush3.bf16.msra.mxu0 %v8660_v12  ;;  %v8698_v12 = vld [vmem:[#allocation37 + $0x28] sm:$0xff]  }
 0x4f2   :  { %v8940_v39 = vpop.eup %8939  ;;  %8080 = vmatprep.subr.bf16.mxu0 %v9702_v19 }
 0x4f3   :  { %v1087_v40 = vsel %vm858_vm2, %v8940_v39, 0.0 }
 0x4f4   :  { %1088 = vadd.xlane.f32.xlu1 %v1087_v40  ;;  %v8668_v40 = vld [vmem:[#allocation35 + $0x14] ss:$8 sps:$4 sm:$0xff]  }
 0x4f5   :  { %8081 = vmatpush3.bf16.msra.mxu0 %v8661_v13 }
 0x4f6   :  { %8082 = vmatprep.subr.bf16.mxu0 %v9702_v19 }
 0x4f9   :  { %8083 = vmatpush3.bf16.msra.mxu0 %v8662_v18 }
 0x4fa   :  { %v8942_v41 = vpop.eup %8941 }
 0x4fb   :  { %v1197_v42 = vsel %vm858_vm2, %v8942_v41, 0.0 }
 0x4fc   :  { %1198 = vadd.xlane.f32.xlu0 %v1197_v42  ;;  %v7297_v42 = vld [vmem:[#allocation29] ss:$0 sm:$0xff] }
 0x505   :  { %1203 = vrot.lane.b32.xlu1 %v810_v4, %s9694_s1 }
 0x507   :  { %v867_v43 = vpop.xlane.xlu1 %866 }
 0x508   :  { %8943 = vrcp.f32 %v867_v43 }
 0x50b   :  { %v984_v45 = vpop.permute.xlu1 %983 }
 0x50c   :  { %v989_v48 = vsel %vm874_vm3, %v984_v45, 0 }
 0x512   :  { %v8944_v44 = vpop.eup %8943  ;;  %1093 = vrot.lane.b32.xlu0 %v810_v4, %s9671_s22 }
 0x513   :  { %v869_v46 = vmul.f32 %v8944_v44, %v8936_v26 }
 0x515   :  { %v870_v47 = vpack.c.bf16 %v869_v46, %v869_v46 }
 0x517   :  { %8029 = vmatmul.mubr.msk.bf16.vlgmr.msra.gmra.mrb[4].mxu1 %vm858_vm2, %v870_v47  ;;  %v9051_v47 = vld [vmem:[%s10913_s30] sm:$0xff] }
 0x518   :  { %8039 = vmatpush3.bf16.msra.mxu1 %v989_v48  ;;  %8040 = vmatprep.mubr.msk.bf16.mxu1 %vm9703_vm0, %v9702_v19 }
 0x519   :  { %8050 = vmatprep.subr.bf16.mxu1 %v9702_v19 }
 0x579   :  { %v978_v49 = vpop.xlane.xlu0 %977 }
 0x57a   :  { %8945 = vrcp.f32 %v978_v49 }
 0x581   :  { %v1089_v50 = vpop.xlane.xlu1 %1088 }
 0x582   :  { %8947 = vrcp.f32 %v1089_v50 }
 0x584   :  { %v8946_v51 = vpop.eup %8945 }
 0x585   :  { %v980_v52 = vmul.f32 %v8946_v51, %v8938_v34  ;;  %v1204_v60 = vpop.permute.xlu1 %1203  ;;  %v8671_v51 = vld [vmem:[#allocation35 + $0x24] ss:$8 sps:$4 sm:$0xff]  }
 0x586   :  { %v1209_v62 = vsel %vm874_vm3, %v1204_v60, 0  ;;  %v8683_v60 = vld [vmem:[#allocation35 + $0x64] ss:$8 sps:$4 sm:$0xff]  }
 0x587   :  { %v981_v53 = vpack.c.bf16 %v980_v52, %v980_v52  ;;  %v8669_v52 = vld [vmem:[#allocation35 + $0x20] ss:$8 sps:$4 sm:$0xff]  }
 0x589   :  { %8041 = vmatmul.mubr.msk.bf16.vlgmr.msra.gmra.mrb[8].mxu1 %vm858_vm2, %v981_v53  ;;  %v1199_v54 = vpop.xlane.xlu0 %1198  ;;  %v8674_v53 = vld [vmem:[#allocation35 + $0x34] ss:$8 sps:$4 sm:$0xff]  }
 0x58a   :  { %8949 = vrcp.f32 %v1199_v54  ;;  %8052 = vmatprep.mubr.msk.bf16.mxu1 %vm9703_vm0, %v9702_v19  ;;  %v8672_v54 = vld [vmem:[#allocation35 + $0x30] ss:$8 sps:$4 sm:$0xff]  }
 0x58c   :  { %v8948_v55 = vpop.eup %8947 }
 0x58d   :  { %v1094_v56 = vpop.permute.xlu0 %1093  ;;  %v1091_v57 = vmul.f32 %v8948_v55, %v8940_v39  ;;  %v8665_v39 = vld [vmem:[#allocation35 + $0x4] ss:$8 sps:$4 sm:$0xff]  }
 0x58e   :  { %v1099_v59 = vsel %vm874_vm3, %v1094_v56, 0  ;;  %v8677_v55 = vld [vmem:[#allocation35 + $0x44] ss:$8 sps:$4 sm:$0xff]   ;;  %v8675_v56 = vld [vmem:[#allocation35 + $0x40] ss:$8 sps:$4 sm:$0xff]  }
 0x58f   :  { %8051 = vmatpush3.bf16.msra.mxu1 %v1099_v59  ;;  %v1092_v61 = vpack.c.bf16 %v1091_v57, %v1091_v57  ;;  %v8680_v57 = vld [vmem:[#allocation35 + $0x54] ss:$8 sps:$4 sm:$0xff]   ;;  %v8678_v59 = vld [vmem:[#allocation35 + $0x50] ss:$8 sps:$4 sm:$0xff]  }
 0x590   :  { %8062 = vmatprep.subr.bf16.mxu1 %v9702_v19 }
 0x592   :  { %8053 = vmatmul.mubr.msk.bf16.vlgmr.msra.gmra.mrb[12].mxu1 %vm858_vm2, %v1092_v61  ;;  %v8681_v61 = vld [vmem:[#allocation35 + $0x60] ss:$8 sps:$4 sm:$0xff]  }
 0x593   :  { %8063 = vmatpush3.bf16.msra.mxu1 %v1209_v62  ;;  %8064 = vmatprep.mubr.msk.bf16.mxu1 %vm9703_vm0, %v9702_v19  ;;  %v8686_v62 = vld [vmem:[#allocation35 + $0x74] ss:$8 sps:$4 sm:$0xff]  }
 0x594   :  { %v8950_v63 = vpop.eup %8949  ;;  %1483 = vmatprep.subr.bf16.mxu1 %v8665_v39 }
 0x595   :  { %v1201_v1 = vmul.f32 %v8950_v63, %v8942_v41  ;;  %v8666_v41 = vld [vmem:[#allocation35 + $0x10] ss:$8 sps:$4 sm:$0xff]  }
 0x596   :  { %v8684_v63 = vld [vmem:[#allocation35 + $0x70] ss:$8 sps:$4 sm:$0xff]  }
 0x597   :  { %v1202_v2 = vpack.c.bf16 %v1201_v1, %v1201_v1  ;;  %v8687_v1 = vld [vmem:[#allocation37 + $0x40] sm:$0xff]  }
 0x598   :  { %7733 = vmatprep.subr.bf16.mxu0 %v8687_v1  ;;  %v8710_v1 = vld [vmem:[#allocation34 + $0xe0] ss:$12 sps:$4 sm:$0xff]  }
 0x59a   :  { %8065 = vmatmul.mubr.msk.bf16.vlgmr.msra.gmra.mrb[16].mxu1 %vm858_vm2, %v1202_v2  ;;  %v8688_v2 = vld [vmem:[#allocation37] sm:$0xff]  }
 0x59b   :  { %1515 = vmatprep.mubr.bf16.mxu1 %v9701_v0  ;;  %1484 = vmatpush1.bf16.msra.mxu1 %v8663_v38 }
 0x59c   :  { %1485 = vmatprep.subr.bf16.mxu1 %v8668_v40 }
 0x59f   :  { %1486 = vmatpush1.bf16.msra.mxu1 %v8666_v41 }
 0x5a0   :  { %1487 = vmatprep.subr.bf16.mxu1 %v8671_v51  ;;  %v8706_v51 = vld [vmem:[#allocation34 + $0xc8] ss:$12 sps:$4 sm:$0xff]  }
 0x5a3   :  { %1488 = vmatpush1.bf16.msra.mxu1 %v8669_v52 }
 0x5a4   :  { %1489 = vmatprep.subr.bf16.mxu1 %v8674_v53  ;;  %v7324_v53 = vld [vmem:[%s10917_s6] ss:$0 sm:$0xff] }
 0x5a7   :  { %1490 = vmatpush1.bf16.msra.mxu1 %v8672_v54 }
 0x5a8   :  { %1491 = vmatprep.subr.bf16.mxu1 %v8677_v55 }
 0x5ab   :  { %1492 = vmatpush1.bf16.msra.mxu1 %v8675_v56 }
 0x5ac   :  { %1493 = vmatprep.subr.bf16.mxu1 %v8680_v57 }
 0x5af   :  { %1494 = vmatpush1.bf16.msra.mxu1 %v8678_v59 }
 0x5b0   :  { %1495 = vmatprep.subr.bf16.mxu1 %v8683_v60 }
 0x5b3   :  { %1496 = vmatpush1.bf16.msra.mxu1 %v8681_v61 }
 0x5b4   :  { %1497 = vmatprep.subr.bf16.mxu1 %v8686_v62  ;;  %v8709_v62 = vld [vmem:[#allocation34 + $0xdc] ss:$12 sps:$4 sm:$0xff]  }
 0x5b7   :  { %1498 = vmatpush1.bf16.msra.mxu1 %v8684_v63  ;;  %v8707_v63 = vld [vmem:[#allocation34 + $0xd8] ss:$12 sps:$4 sm:$0xff]  }
 0x5ea   :  { %v912_v3 = vpop.f32.mrb[4].mxu1 }
 0x5eb   :  { %v8030_v4 = vpop.f32.mrb[5].mxu1 }
 0x5ec   :  { %v915_v5 = vpop.f32.mrb[6].mxu1  ;;  %v8690_v4 = vld [vmem:[#allocation37 + $0x8] sm:$0xff]  }
 0x5ed   :  { %v8031_v6 = vpop.f32.mrb[7].mxu1  ;;  %v8691_v5 = vld [vmem:[#allocation37 + $0x50] sm:$0xff]  }
 0x5ee   :  { %v8692_v6 = vld [vmem:[#allocation37 + $0x10] sm:$0xff]  }
 0x65c   :  { %v1025_v14 = vpop.f32.mrb[8].mxu1 }
 0x65d   :  { %1252 = vrot.lane.b32.xlu1 %v1025_v14, %s9694_s1  ;;  %v8042_v15 = vpop.f32.mrb[9].mxu1 }
 0x65e   :  { %v1028_v16 = vpop.f32.mrb[10].mxu1 }
 0x65f   :  { %v8043_v17 = vpop.f32.mrb[11].mxu1 }
 0x665   :  { %v1135_v20 = vpop.f32.mrb[12].mxu1 }
 0x666   :  { %1256 = vrot.lane.b32.xlu0 %v1135_v20, %s9671_s22  ;;  %v8054_v23 = vpop.f32.mrb[13].mxu1 }
 0x667   :  { %v1138_v25 = vpop.f32.mrb[14].mxu1  ;;  %v7306_v23 = vld [vmem:[#allocation32] ss:$0 sm:$0xff] }
 0x668   :  { %v8055_v26 = vpop.f32.mrb[15].mxu1 }
 0x66d   :  { %v1245_v27 = vpop.f32.mrb[16].mxu1 }
 0x66e   :  { %1260 = vrot.lane.b32.xlu1 %v1245_v27, %s9704_s21  ;;  %v8066_v28 = vpop.f32.mrb[17].mxu1 }
 0x66f   :  { %v1248_v29 = vpop.f32.mrb[18].mxu1  ;;  %v7307_v28 = vld [vmem:[#allocation31] ss:$0 sm:$0xff] }
 0x670   :  { %v8067_v30 = vpop.f32.mrb[19].mxu1 }
 0x6cf   :  { %v1253_v31 = vpop.permute.xlu1 %1252 }
 0x6d0   :  { %v1263_v33 = vsel %vm811_vm1, %v912_v3, %v1253_v31  ;;  %v8689_v3 = vld [vmem:[#allocation37 + $0x48] sm:$0xff]  }
 0x6d8   :  { %v1257_v32 = vpop.permute.xlu0 %1256 }
 0x6d9   :  { %v1265_v34 = vsel %vm1264_vm4, %v1263_v33, %v1257_v32  ;;  %v8699_v32 = vld [vmem:[#allocation37 + $0x70] sm:$0xff]  }
 0x6da   :  { %v8700_v33 = vld [vmem:[#allocation37 + $0x30] sm:$0xff]  }
 0x6e0   :  { %v1261_v35 = vpop.permute.xlu1 %1260 }
 0x6e1   :  { %v1267_v36 = vsel %vm1266_vm5, %v1265_v34, %v1261_v35  ;;  %v8701_v34 = vld [vmem:[#allocation37 + $0x78] sm:$0xff]  }
 0x6e2   :  { %v1268_v37 = vpack.c.bf16 %v1267_v36, %v1267_v36  ;;  %v8702_v35 = vld [vmem:[#allocation37 + $0x38] sm:$0xff]   ;;  %v530_v36 = vld [vmem:[%s10916_s28] sm:$0x3] }
 0x6e3   :  { %v1400_v38 = vrot.slane %v530_v36, %v10157_v22 }
 0x6e4   :  { %8085 = vmatmul.mubr.bf16.vlgmr.msra.gmra.mrb[20].mxu0 %v1268_v37  ;;  %v1396_v37 = vrot.slane %v530_v36, %v10163_v24 }
 0x6e5   :  { %7734 = vmatpush3.bf16.msra.mxu0 %v8688_v2  ;;  %v8713_v2 = vld [vmem:[#allocation34 + $0xf4] ss:$12 sps:$4 sm:$0xff]  }
 0x6e6   :  { %7735 = vmatprep.subr.bf16.mxu0 %v8689_v3  ;;  %v8711_v3 = vld [vmem:[#allocation34 + $0xf0] ss:$12 sps:$4 sm:$0xff]  }
 0x6e9   :  { %7736 = vmatpush3.bf16.msra.mxu0 %v8690_v4  ;;  %v8714_v4 = vld [vmem:[#allocation34 + $0xf8] ss:$12 sps:$4 sm:$0xff]  }
 0x6ea   :  { %7737 = vmatprep.subr.bf16.mxu0 %v8691_v5  ;;  %v8717_v5 = vld [vmem:[#allocation34 + $0x10c] ss:$12 sps:$4 sm:$0xff]  }
 0x6ed   :  { %7738 = vmatpush3.bf16.msra.mxu0 %v8692_v6  ;;  %v8715_v6 = vld [vmem:[#allocation34 + $0x108] ss:$12 sps:$4 sm:$0xff]  }
 0x6ee   :  { %7739 = vmatprep.subr.bf16.mxu0 %v8693_v7  ;;  %v8718_v7 = vld [vmem:[#allocation34 + $0x110] ss:$12 sps:$4 sm:$0xff]  }
 0x6f1   :  { %7740 = vmatpush3.bf16.msra.mxu0 %v8694_v8  ;;  %v8721_v8 = vld [vmem:[#allocation34 + $0x124] ss:$12 sps:$4 sm:$0xff]  }
 0x6f2   :  { %7741 = vmatprep.subr.bf16.mxu0 %v8695_v9  ;;  %v8719_v9 = vld [vmem:[#allocation34 + $0x120] ss:$12 sps:$4 sm:$0xff]  }
 0x6f5   :  { %7742 = vmatpush3.bf16.msra.mxu0 %v8696_v10  ;;  %v8722_v10 = vld [vmem:[#allocation34 + $0x128] ss:$12 sps:$4 sm:$0xff]  }
 0x6f6   :  { %7743 = vmatprep.subr.bf16.mxu0 %v8697_v11  ;;  %v8725_v11 = vld [vmem:[#allocation34 + $0x13c] ss:$12 sps:$4 sm:$0xff]  }
 0x6f9   :  { %7744 = vmatpush3.bf16.msra.mxu0 %v8698_v12  ;;  %v8723_v12 = vld [vmem:[#allocation34 + $0x138] ss:$12 sps:$4 sm:$0xff]  }
 0x6fa   :  { %7745 = vmatprep.subr.bf16.mxu0 %v8699_v32 }
 0x6fd   :  { %7746 = vmatpush3.bf16.msra.mxu0 %v8700_v33 }
 0x6fe   :  { %7747 = vmatprep.subr.bf16.mxu0 %v8701_v34 }
 0x701   :  { %7748 = vmatpush3.bf16.msra.mxu0 %v8702_v35  ;;  %v7342_v35 = vld [vmem:[%s10919_s0] ss:$0 sm:$0xff] }
 0x702   :  { %8088 = vmatprep.subr.bf16.mxu0 %v9702_v19 }
 0x7b7   :  { %v1357_v43 = vpop.f32.mrb[20].mxu0 }
 0x7b8   :  { %v1358_v44 = vadd.f32 %v7297_v42, %v1357_v43  ;;  %v8086_v45 = vpop.f32.mrb[21].mxu0 }
 0x7b9   :  { %v1360_v46 = vpop.f32.mrb[22].mxu0 }
 0x7ba   :  { %v10262_v48 = vadd.f32 %v9051_v47, %v1358_v44  ;;  %v8087_v49 = vpop.f32.mrb[23].mxu0 }
 0x7bb   :  { %v8703_v49 = vld [vmem:[#allocation34 + $0xc0] ss:$12 sps:$4 sm:$0xff]  }
 0x7bc   :  { %1364 = vadd.xlane.f32.xlu0 %v10262_v48  ;;  %v1367_v50 = vmul.f32 %v10262_v48, %v10262_v48 }
 0x7be   :  { %1368 = vadd.xlane.f32.xlu1 %v1367_v50  ;;  %v8705_v50 = vld [vmem:[#allocation34 + $0xc4] ss:$12 sps:$4 sm:$0xff]  }
 0x7bf   :  { %1959 = vmatprep.subr.bf16.mxu1 %v8705_v50 }
 0x849   :  { %v1365_v13 = vpop.xlane.xlu0 %1364 }
 0x84a   :  { %v1366_v14 = vmul.f32 0.0078125, %v1365_v13  ;;  %v8726_v13 = vld [vmem:[#allocation34 + $0x140] ss:$12 sps:$4 sm:$0xff]  }
 0x84b   :  { %v1369_v15 = vpop.xlane.xlu1 %1368 }
 0x84c   :  { %v1371_v16 = vmul.f32 %v1366_v14, %v1366_v14  ;;  %v1370_v17 = vmul.f32 0.0078125, %v1369_v15  ;;  %v1373_v26 = vsub.f32 %v10262_v48, %v1366_v14  ;;  %v8729_v14 = vld [vmem:[#allocation34 + $0x154] ss:$12 sps:$4 sm:$0xff]   ;;  %v8727_v15 = vld [vmem:[#allocation34 + $0x150] ss:$12 sps:$4 sm:$0xff]  }
 0x84e   :  { %v1372_v18 = vsub.f32 %v1370_v17, %v1371_v16  ;;  %v8730_v16 = vld [vmem:[#allocation34 + $0x158] ss:$12 sps:$4 sm:$0xff]  }
 0x84f   :  { %v8733_v17 = vld [vmem:[#allocation34 + $0x16c] ss:$12 sps:$4 sm:$0xff]  }
 0x850   :  { %v1374_v20 = vadd.f32 1e-05, %v1372_v18  ;;  %v8731_v18 = vld [vmem:[#allocation34 + $0x168] ss:$12 sps:$4 sm:$0xff]  }
 0x852   :  { %8951 = vrsqrt.f32 %v1374_v20  ;;  %v8734_v20 = vld [vmem:[#allocation34 + $0x170] ss:$12 sps:$4 sm:$0xff]  }
 0x85c   :  { %v8952_v25 = vpop.eup %8951 }
 0x85d   :  { %v1382_v27 = vmul.f32 %v8952_v25, %v7306_v23 }
 0x85f   :  { %v1383_v29 = vmul.f32 %v1382_v27, %v1373_v26 }
 0x861   :  { %v1390_v30 = vadd.f32 %v7307_v28, %v1383_v29 }
 0x863   :  { %v1391_v31 = vpack.c.bf16 %v1390_v30, %v1390_v30 }
 0x865   :  { %1516 = vmatmul.mubr.bf16.vlgmr.msra.gmra.mrb[20].mxu1 %v1391_v31  ;;  %v7341_v31 = vld [vmem:[%s10918_s3] ss:$0 sm:$0xff] }
 0x866   :  { %1991 = vmatprep.mubr.bf16.mxu1 %v9701_v0  ;;  %1960 = vmatpush1.bf16.msra.mxu1 %v8703_v49 }
 0x867   :  { %1961 = vmatprep.subr.bf16.mxu1 %v8709_v62 }
 0x86a   :  { %1962 = vmatpush1.bf16.msra.mxu1 %v8707_v63 }
 0x86b   :  { %1963 = vmatprep.subr.bf16.mxu1 %v8713_v2 }
 0x86e   :  { %1964 = vmatpush1.bf16.msra.mxu1 %v8711_v3 }
 0x86f   :  { %1965 = vmatprep.subr.bf16.mxu1 %v8717_v5 }
 0x872   :  { %1966 = vmatpush1.bf16.msra.mxu1 %v8715_v6 }
 0x873   :  { %1967 = vmatprep.subr.bf16.mxu1 %v8721_v8 }
 0x876   :  { %1968 = vmatpush1.bf16.msra.mxu1 %v8719_v9 }
 0x877   :  { %1969 = vmatprep.subr.bf16.mxu1 %v8725_v11 }
 0x87a   :  { %1970 = vmatpush1.bf16.msra.mxu1 %v8723_v12 }
 0x87b   :  { %1971 = vmatprep.subr.bf16.mxu1 %v8729_v14 }
 0x87e   :  { %1972 = vmatpush1.bf16.msra.mxu1 %v8727_v15 }
 0x87f   :  { %1973 = vmatprep.subr.bf16.mxu1 %v8733_v17 }
 0x882   :  { %1974 = vmatpush1.bf16.msra.mxu1 %v8731_v18 }
 0x883   :  { %8108 = vmatprep.subr.bf16.mxu1 %v9702_v19 }
 0x938   :  { %v1517_v39 = vpop.f32.mrb[20].mxu1 }
 0x939   :  { %v1518_v40 = vadd.f32 %v1517_v39, %v1396_v37  ;;  %v1519_v41 = vpop.f32.mrb[21].mxu1  ;;  %v7343_v39 = vld [vmem:[%s10914_s27 + $0x3] sm:$0x7] }
 0x93a   :  { %v1520_v42 = vadd.f32 %v1519_v41, %v1400_v38  ;;  %v1521_v43 = vpop.f32.mrb[22].mxu1 }
 0x93b   :  { %v1524_v44 = vmax.f32 %v1518_v40, 0.0  ;;  %v1522_v45 = vpop.f32.mrb[23].mxu1  ;;  %v1823_v40 = vrot.slane %v7343_v39, %v10157_v22 }
 0x93c   :  { %v1525_v46 = vmax.f32 %v1520_v42, 0.0  ;;  %v1827_v45 = vrot.slane %v7343_v39, %v10208_v58 }
 0x93d   :  { %v1526_v48 = vpack.c.bf16 %v1524_v44, %v1524_v44 }
 0x93e   :  { %v1527_v47 = vpack.c.bf16 %v1525_v46, %v1525_v46 }
 0x940   :  { %1662 = vmatprep.mubr.bf16.mxu0 %v1527_v47 }
 0x941   :  { %1663 = vmatmul.mubr.bf16.vlgmr.msra.gmra.mrb[24].mxu0 %v1526_v48 }
 0x942   :  { %8104 = vmatprep.mubr.msk.bf16.mxu0 %vm9703_vm0, %v9702_v19  ;;  %8089 = vmatpush3.bf16.msra.mxu0 %v8706_v51  ;;  %v1819_v51 = vrot.slane %v7343_v39, %v10163_v24 }
 0x943   :  { %8090 = vmatprep.subr.bf16.mxu0 %v9702_v19 }
 0x946   :  { %8091 = vmatpush3.bf16.msra.mxu0 %v8710_v1 }
 0x947   :  { %8092 = vmatprep.subr.bf16.mxu0 %v9702_v19 }
 0x94a   :  { %8093 = vmatpush3.bf16.msra.mxu0 %v8714_v4 }
 0x94b   :  { %8094 = vmatprep.subr.bf16.mxu0 %v9702_v19 }
 0x94e   :  { %8095 = vmatpush3.bf16.msra.mxu0 %v8718_v7 }
 0x94f   :  { %8096 = vmatprep.subr.bf16.mxu0 %v9702_v19 }
 0x952   :  { %8097 = vmatpush3.bf16.msra.mxu0 %v8722_v10 }
 0x953   :  { %8098 = vmatprep.subr.bf16.mxu0 %v9702_v19 }
 0x956   :  { %8099 = vmatpush3.bf16.msra.mxu0 %v8726_v13 }
 0x957   :  { %8100 = vmatprep.subr.bf16.mxu0 %v9702_v19 }
 0x95a   :  { %8101 = vmatpush3.bf16.msra.mxu0 %v8730_v16 }
 0x95b   :  { %8102 = vmatprep.subr.bf16.mxu0 %v9702_v19 }
 0x95e   :  { %8103 = vmatpush3.bf16.msra.mxu0 %v8734_v20 }
 0x95f   :  { %8132 = vmatprep.subr.bf16.mxu0 %v9702_v19 }
 0xa14   :  { %v7749_v52 = vpop.f32.mrb[24].mxu0 }
 0xa15   :  { %v7750_v54 = vpop.f32.mrb[25].mxu0 }
 0xa16   :  { %v7751_v55 = vadd.f32 %v7750_v54, %v7749_v52  ;;  %v7752_v56 = vpop.f32.mrb[26].mxu0 }
 0xa17   :  { %v7753_v57 = vpop.f32.mrb[27].mxu0 }
 0xa18   :  { %v1665_v59 = vadd.f32 %v7751_v55, %v7324_v53 }
 0xa1a   :  { %v10277_v60 = vadd.f32 %v1665_v59, %v1390_v30 }
 0xa1c   :  { %1671 = vadd.xlane.f32.xlu0 %v10277_v60  ;;  %v1674_v61 = vmul.f32 %v10277_v60, %v10277_v60 }
 0xa20   :  { %1675 = vadd.xlane.f32.xlu0 %v1674_v61 }
 0xaa9   :  { %v1672_v23 = vpop.xlane.xlu0 %1671 }
 0xaaa   :  { %v1673_v25 = vmul.f32 0.0078125, %v1672_v23 }
 0xaac   :  { %v1678_v27 = vmul.f32 %v1673_v25, %v1673_v25  ;;  %v1680_v33 = vsub.f32 %v10277_v60, %v1673_v25 }
 0xaad   :  { %v1676_v26 = vpop.xlane.xlu0 %1675 }
 0xaae   :  { %v1677_v28 = vmul.f32 0.0078125, %v1676_v26 }
 0xab0   :  { %v1679_v29 = vsub.f32 %v1677_v28, %v1678_v27 }
 0xab2   :  { %v1681_v30 = vadd.f32 1e-05, %v1679_v29 }
 0xab4   :  { %8953 = vrsqrt.f32 %v1681_v30 }
 0xabe   :  { %v8954_v32 = vpop.eup %8953 }
 0xabf   :  { %v1689_v34 = vmul.f32 %v8954_v32, %v7341_v31 }
 0xac1   :  { %v1690_v36 = vmul.f32 %v1689_v34, %v1680_v33 }
 0xac3   :  { %v10293_v37 = vadd.f32 %v7342_v35, %v1690_v36 }
 0xac5   :  { %v1814_v38 = vpack.c.bf16 %v10293_v37, %v10293_v37 }
 0xac7   :  { %1992 = vmatmul.mubr.bf16.vlgmr.msra.gmra.mrb[24].mxu1 %v1814_v38  ;;  %8105 = vmatmul.mubr.bf16.vlgmr.msra.gmra.mrb[28].mxu0 %v1814_v38 }
 0xac8   :  { %8110 = vmatprep.mubr.msk.bf16.mxu1 %vm9703_vm0, %v9702_v19  ;;  %8134 = vmatprep.mubr.msk.bf16.mxu0 %vm9703_vm0, %v9702_v19 }
 0xb9a   :  { %v1993_v41 = vpop.f32.mrb[24].mxu1  ;;  %v2034_v42 = vpop.f32.mrb[28].mxu0 }
 0xb9b   :  { %v1995_v43 = vpop.f32.mrb[25].mxu1  ;;  %v8106_v44 = vpop.f32.mrb[29].mxu0  ;;  %v2035_v53 = vadd.f32 %v2034_v42, %v1827_v45  ;;  %v1994_v55 = vadd.f32 %v1993_v41, %v1819_v51 }
 0xb9c   :  { %v1996_v46 = vadd.f32 %v1995_v43, %v1823_v40  ;;  %v1997_v47 = vpop.f32.mrb[26].mxu1  ;;  %v2037_v48 = vpop.f32.mrb[30].mxu0 }
 0xb9d   :  { %v1998_v49 = vpop.f32.mrb[27].mxu1  ;;  %v8107_v50 = vpop.f32.mrb[31].mxu0  ;;  %v10307_v56 = vpack.c.bf16 %v2035_v53, %v2035_v53  ;;  %v2040_v57 = vpack.c.bf16 %v1994_v55, %v1994_v55 }
 0xb9e   :  { %v2041_v52 = vpack.c.bf16 %v1996_v46, %v1996_v46 }
 0xb9f   :  { %v2105_v59 = vsel %vm874_vm3, %v10307_v56, 0 }
 0xba0   :  { %v2047_v54 = vsel %vm811_vm1, %v2041_v52, 0 }
 0xba1   :  { %8109 = vmatpush3.bf16.xpose.msra.mxu1 %v2047_v54 }
 0xba2   :  { %8114 = vmatprep.subr.bf16.mxu1 %v9702_v19 }
 0xba8   :  { %8111 = vmatmul.mubr.msk.bf16.vlgmr.msra.gmra.mrb[28].mxu1 %vm811_vm1, %v2040_v57 }
 0xba9   :  { %8115 = vmatpush3.bf16.msra.mxu1 %v2105_v59  ;;  %8116 = vmatprep.mubr.msk.bf16.mxu1 %vm9703_vm0, %v9702_v19 }
 0xbaa   :  { %8120 = vmatprep.subr.bf16.mxu1 %v9702_v19 }
 0xc7b   :  { %v2083_v60 = vpop.f32.mrb[28].mxu1 }
 0xc7c   :  { %v8112_v61 = vpop.f32.mrb[29].mxu1  ;;  %v2089_v62 = vsel %vm858_vm2, %v2083_v60, -inf }
 0xc7d   :  { %2090 = vmax.xlane.f32.xlu1 %v2089_v62  ;;  %v2086_v63 = vpop.f32.mrb[30].mxu1 }
 0xc7e   :  { %v8113_v1 = vpop.f32.mrb[31].mxu1 }
 0xc8e   :  { %2151 = vrot.lane.b32.xlu1 %v2041_v52, %s9704_s21 }
 0xc92   :  { %2262 = vrot.lane.b32.xlu1 %v2041_v52, %s9671_s22 }
 0xc96   :  { %2260 = vrot.lane.b32.xlu1 %v2040_v57, %s9671_s22 }
 0xc9a   :  { %2370 = vrot.lane.b32.xlu1 %v2040_v57, %s9694_s1 }
 0xd0a   :  { %v2091_v2 = vpop.xlane.xlu1 %2090 }
 0xd0b   :  { %v2092_v3 = vsub.f32 %v2083_v60, %v2091_v2 }
 0xd0d   :  { %v2093_v4 = vmul.f32 1.442695, %v2092_v3 }
 0xd0e   :  { %v2152_v5 = vpop.permute.xlu1 %2151 }
 0xd0f   :  { %8955 = vpow2.f32 %v2093_v4  ;;  %v2157_v18 = vsel %vm811_vm1, %v2152_v5, 0 }
 0xd12   :  { %v2263_v6 = vpop.permute.xlu1 %2262 }
 0xd13   :  { %v2268_v7 = vsel %vm811_vm1, %v2263_v6, 0 }
 0xd14   :  { %8133 = vmatpush3.bf16.xpose.msra.mxu0 %v2268_v7 }
 0xd15   :  { %8144 = vmatprep.subr.bf16.mxu0 %v9702_v19 }
 0xd16   :  { %v2261_v9 = vpop.permute.xlu1 %2260 }
 0xd19   :  { %v8956_v8 = vpop.eup %8955 }
 0xd1a   :  { %v2095_v10 = vsel %vm858_vm2, %v8956_v8, 0.0  ;;  %v2371_v20 = vpop.permute.xlu1 %2370 }
 0xd1b   :  { %2096 = vadd.xlane.f32.xlu0 %v2095_v10  ;;  %8135 = vmatmul.mubr.msk.bf16.vlgmr.msra.gmra.mrb[32].mxu0 %vm811_vm1, %v2261_v9 }
 0xd1c   :  { %8146 = vmatprep.mubr.msk.bf16.mxu0 %vm9703_vm0, %v9702_v19 }
 0xd31   :  { %2148 = vrot.lane.b32.xlu0 %v2040_v57, %s9704_s21 }
 0xd35   :  { %2372 = vrot.lane.b32.xlu0 %v2041_v52, %s9694_s1 }
 0xda8   :  { %v2097_v11 = vpop.xlane.xlu0 %2096 }
 0xda9   :  { %8957 = vrcp.f32 %v2097_v11 }
 0xdac   :  { %v2149_v12 = vpop.permute.xlu0 %2148 }
 0xdb0   :  { %v2373_v13 = vpop.permute.xlu0 %2372 }
 0xdb1   :  { %v2378_v14 = vsel %vm811_vm1, %v2373_v13, 0 }
 0xdb2   :  { %8145 = vmatpush3.bf16.xpose.msra.mxu0 %v2378_v14 }
 0xdb3   :  { %v8958_v15 = vpop.eup %8957  ;;  %8156 = vmatprep.subr.bf16.mxu0 %v9702_v19 }
 0xdb4   :  { %v2099_v16 = vmul.f32 %v8958_v15, %v8956_v8  ;;  %v8735_v15 = vld [vmem:[%s10915_s8 + $0x40] sm:$0xff]  }
 0xdb6   :  { %v2100_v17 = vpack.c.bf16 %v2099_v16, %v2099_v16  ;;  %v8736_v16 = vld [vmem:[%s10915_s8 + $0x48] sm:$0xff]  }
 0xdb8   :  { %8117 = vmatmul.mubr.msk.bf16.vlgmr.msra.gmra.mrb[32].mxu1 %vm858_vm2, %v2100_v17  ;;  %v8737_v17 = vld [vmem:[%s10915_s8 + $0x50] sm:$0xff]  }
 0xdb9   :  { %8121 = vmatpush3.bf16.xpose.msra.mxu1 %v2157_v18  ;;  %8147 = vmatmul.mubr.msk.bf16.vlgmr.msra.gmra.mrb[36].mxu0 %vm811_vm1, %v2371_v20  ;;  %v8738_v18 = vld [vmem:[%s10915_s8 + $0x58] sm:$0xff]   ;;  %v8739_v20 = vld [vmem:[%s10915_s8 + $0x60] sm:$0xff]  }
 0xdba   :  { %8122 = vmatprep.mubr.msk.bf16.mxu1 %vm9703_vm0, %v9702_v19  ;;  %8126 = vmatprep.subr.bf16.mxu1 %v9702_v19 }
 0xdbb   :  { %8172 = vmatprep.mubr.msk.bf16.mxu0 %vm9703_vm0, %v9702_v19  ;;  %8157 = vmatpush3.bf16.msra.mxu0 %v8735_v15  ;;  %v8774_v15 = vld [vmem:[#allocation37 + $0x98] sm:$0xff]  }
 0xdbc   :  { %8158 = vmatprep.subr.bf16.mxu0 %v9702_v19 }
 0xdbf   :  { %8159 = vmatpush3.bf16.msra.mxu0 %v8736_v16  ;;  %v8775_v16 = vld [vmem:[#allocation37 + $0xe0] sm:$0xff]  }
 0xdc0   :  { %8123 = vmatmul.mubr.msk.bf16.vlgmr.msra.gmra.mrb[36].mxu1 %vm811_vm1, %v2149_v12  ;;  %8160 = vmatprep.subr.bf16.mxu0 %v9702_v19 }
 0xdc1   :  { %8128 = vmatprep.mubr.msk.bf16.mxu1 %vm9703_vm0, %v9702_v19 }
 0xdc3   :  { %8161 = vmatpush3.bf16.msra.mxu0 %v8737_v17  ;;  %v8776_v17 = vld [vmem:[#allocation37 + $0xa0] sm:$0xff]  }
 0xdc4   :  { %8162 = vmatprep.subr.bf16.mxu0 %v9702_v19 }
 0xdc7   :  { %8163 = vmatpush3.bf16.msra.mxu0 %v8738_v18  ;;  %v8777_v18 = vld [vmem:[#allocation37 + $0xe8] sm:$0xff]  }
 0xdc8   :  { %8164 = vmatprep.subr.bf16.mxu0 %v9702_v19 }
 0xdcb   :  { %8165 = vmatpush3.bf16.msra.mxu0 %v8739_v20  ;;  %v8778_v20 = vld [vmem:[#allocation37 + $0xa8] sm:$0xff]  }
 0xdcc   :  { %8166 = vmatprep.subr.bf16.mxu0 %v9702_v19 }
 0xdee   :  { %v2304_v23 = vpop.f32.mrb[32].mxu0 }
 0xdef   :  { %v8136_v25 = vpop.f32.mrb[33].mxu0  ;;  %v2310_v26 = vsel %vm858_vm2, %v2304_v23, -inf }
 0xdf0   :  { %2311 = vmax.xlane.f32.xlu1 %v2310_v26  ;;  %v2307_v27 = vpop.f32.mrb[34].mxu0  ;;  %v8741_v25 = vld [vmem:[%s10915_s8 + $0x70] sm:$0xff]  }
 0xdf1   :  { %v8137_v28 = vpop.f32.mrb[35].mxu0 }
 0xe7d   :  { %v2312_v29 = vpop.xlane.xlu1 %2311 }
 0xe7e   :  { %v2313_v30 = vsub.f32 %v2304_v23, %v2312_v29  ;;  %v8740_v23 = vld [vmem:[%s10915_s8 + $0x68] sm:$0xff]  }
 0xe7f   :  { %8167 = vmatpush3.bf16.msra.mxu0 %v8740_v23 }
 0xe80   :  { %v2314_v31 = vmul.f32 1.442695, %v2313_v30  ;;  %8168 = vmatprep.subr.bf16.mxu0 %v9702_v19  ;;  %v8742_v30 = vld [vmem:[%s10915_s8 + $0x78] sm:$0xff]  }
 0xe82   :  { %8959 = vpow2.f32 %v2314_v31 }
 0xe83   :  { %8169 = vmatpush3.bf16.msra.mxu0 %v8741_v25 }
 0xe84   :  { %8170 = vmatprep.subr.bf16.mxu0 %v9702_v19 }
 0xe87   :  { %8171 = vmatpush3.bf16.msra.mxu0 %v8742_v30 }
 0xe8b   :  { %v10342_v32 = vpop.f32.mrb[32].mxu1 }
 0xe8c   :  { %v8960_v33 = vpop.eup %8959  ;;  %v8118_v34 = vpop.f32.mrb[33].mxu1 }
 0xe8d   :  { %v2414_v35 = vpop.f32.mrb[36].mxu0  ;;  %v2144_v36 = vpop.f32.mrb[34].mxu1  ;;  %v2316_v39 = vsel %vm858_vm2, %v8960_v33, 0.0 }
 0xe8e   :  { %v8148_v38 = vpop.f32.mrb[37].mxu0  ;;  %2317 = vadd.xlane.f32.xlu1 %v2316_v39  ;;  %v8119_v41 = vpop.f32.mrb[35].mxu1  ;;  %v2420_v48 = vsel %vm858_vm2, %v2414_v35, -inf }
 0xe8f   :  { %v2417_v40 = vpop.f32.mrb[38].mxu0 }
 0xe90   :  { %v8149_v42 = vpop.f32.mrb[39].mxu0 }
 0xe93   :  { %v2193_v43 = vpop.f32.mrb[36].mxu1 }
 0xe94   :  { %v8124_v44 = vpop.f32.mrb[37].mxu1  ;;  %v2199_v45 = vsel %vm858_vm2, %v2193_v43, -inf }
 0xe95   :  { %2200 = vmax.xlane.f32.xlu0 %v2199_v45  ;;  %v2196_v46 = vpop.f32.mrb[38].mxu1 }
 0xe96   :  { %v8125_v47 = vpop.f32.mrb[39].mxu1 }
 0xe99   :  { %2421 = vmax.xlane.f32.xlu0 %v2420_v48  ;;  %v8743_v48 = vld [vmem:[#allocation35 + $0x80] ss:$8 sps:$4 sm:$0xff]  }
 0xe9f   :  { %2212 = vrot.lane.b32.xlu1 %v10307_v56, %s9704_s21 }
 0xea3   :  { %2432 = vrot.lane.b32.xlu1 %v10307_v56, %s9694_s1 }
 0xf1b   :  { %v2318_v49 = vpop.xlane.xlu1 %2317 }
 0xf1f   :  { %v2213_v50 = vpop.permute.xlu1 %2212 }
 0xf20   :  { %v2218_v51 = vsel %vm874_vm3, %v2213_v50, 0  ;;  %v8748_v50 = vld [vmem:[#allocation35 + $0x94] ss:$8 sps:$4 sm:$0xff]  }
 0xf21   :  { %8127 = vmatpush3.bf16.msra.mxu1 %v2218_v51  ;;  %v8746_v51 = vld [vmem:[#allocation35 + $0x90] ss:$8 sps:$4 sm:$0xff]  }
 0xf22   :  { %v2201_v52 = vpop.xlane.xlu0 %2200  ;;  %8138 = vmatprep.subr.bf16.mxu1 %v9702_v19 }
 0xf23   :  { %v2202_v53 = vsub.f32 %v2193_v43, %v2201_v52  ;;  %v2433_v9 = vpop.permute.xlu1 %2432  ;;  %v7396_v52 = vld [vmem:[#allocation29 + $0x1] ss:$0 sm:$0xff] }
 0xf24   :  { %v2438_v12 = vsel %vm874_vm3, %v2433_v9, 0  ;;  %v8768_v9 = vld [vmem:[#allocation37 + $0x80] sm:$0xff]  }
 0xf25   :  { %v2203_v54 = vmul.f32 1.442695, %v2202_v53 }
 0xf26   :  { %v2422_v55 = vpop.xlane.xlu0 %2421 }
 0xf27   :  { %8961 = vpow2.f32 %v2203_v54  ;;  %v2423_v57 = vsub.f32 %v2414_v35, %v2422_v55 }
 0xf29   :  { %v2424_v59 = vmul.f32 1.442695, %v2423_v57 }
 0xf2b   :  { %8963 = vpow2.f32 %v2424_v59 }
 0xf31   :  { %v8962_v60 = vpop.eup %8961 }
 0xf32   :  { %v2205_v61 = vsel %vm858_vm2, %v8962_v60, 0.0 }
 0xf33   :  { %2206 = vadd.xlane.f32.xlu0 %v2205_v61  ;;  %v8751_v61 = vld [vmem:[#allocation35 + $0xa4] ss:$8 sps:$4 sm:$0xff]  }
 0xf35   :  { %v8964_v62 = vpop.eup %8963 }
 0xf36   :  { %v2426_v63 = vsel %vm858_vm2, %v8964_v62, 0.0 }
 0xf37   :  { %2427 = vadd.xlane.f32.xlu0 %v2426_v63  ;;  %v8754_v63 = vld [vmem:[#allocation35 + $0xb4] ss:$8 sps:$4 sm:$0xff]  }
 0xf4d   :  { %2322 = vrot.lane.b32.xlu0 %v10307_v56, %s9671_s22 }
 0xfc0   :  { %v2207_v1 = vpop.xlane.xlu0 %2206 }
 0xfc1   :  { %8965 = vrcp.f32 %v2207_v1  ;;  %v8752_v1 = vld [vmem:[#allocation35 + $0xb0] ss:$8 sps:$4 sm:$0xff]  }
 0xfc2   :  { %8967 = vrcp.f32 %v2318_v49  ;;  %v8745_v49 = vld [vmem:[#allocation35 + $0x84] ss:$8 sps:$4 sm:$0xff]  }
 0xfc4   :  { %v2428_v2 = vpop.xlane.xlu0 %2427 }
 0xfc5   :  { %8969 = vrcp.f32 %v2428_v2  ;;  %v8757_v2 = vld [vmem:[#allocation35 + $0xc4] ss:$8 sps:$4 sm:$0xff]  }
 0xfc8   :  { %v2323_v5 = vpop.permute.xlu0 %2322 }
 0xfc9   :  { %v2328_v8 = vsel %vm874_vm3, %v2323_v5, 0  ;;  %v8763_v5 = vld [vmem:[#allocation35 + $0xe4] ss:$8 sps:$4 sm:$0xff]  }
 0xfcb   :  { %v8966_v3 = vpop.eup %8965 }
 0xfcc   :  { %v2209_v4 = vmul.f32 %v8966_v3, %v8962_v60  ;;  %v8968_v7 = vpop.eup %8967  ;;  %v8755_v3 = vld [vmem:[#allocation35 + $0xc0] ss:$8 sps:$4 sm:$0xff]  }
 0xfcd   :  { %v2320_v56 = vmul.f32 %v8968_v7, %v8960_v33  ;;  %v8766_v7 = vld [vmem:[#allocation35 + $0xf4] ss:$8 sps:$4 sm:$0xff]  }
 0xfce   :  { %v2210_v6 = vpack.c.bf16 %v2209_v4, %v2209_v4  ;;  %v8758_v4 = vld [vmem:[#allocation35 + $0xd0] ss:$8 sps:$4 sm:$0xff]  }
 0xfcf   :  { %v2321_v10 = vpack.c.bf16 %v2320_v56, %v2320_v56  ;;  %v8970_v11 = vpop.eup %8969  ;;  %v8767_v56 = vld [vmem:[#allocation37 + $0xc0] sm:$0xff]  }
 0xfd0   :  { %8129 = vmatmul.mubr.msk.bf16.vlgmr.msra.gmra.mrb[40].mxu1 %vm858_vm2, %v2210_v6  ;;  %v2430_v13 = vmul.f32 %v8970_v11, %v8964_v62  ;;  %v8749_v62 = vld [vmem:[#allocation35 + $0xa0] ss:$8 sps:$4 sm:$0xff]   ;;  %7789 = vmatprep.subr.bf16.mxu0 %v8767_v56 }
 0xfd1   :  { %8139 = vmatpush3.bf16.msra.mxu1 %v2328_v8  ;;  %8140 = vmatprep.mubr.msk.bf16.mxu1 %vm9703_vm0, %v9702_v19  ;;  %v8761_v6 = vld [vmem:[#allocation35 + $0xe0] ss:$8 sps:$4 sm:$0xff]   ;;  %v8764_v8 = vld [vmem:[#allocation35 + $0xf0] ss:$8 sps:$4 sm:$0xff]  }
 0xfd2   :  { %8150 = vmatprep.subr.bf16.mxu1 %v9702_v19  ;;  %v2431_v14 = vpack.c.bf16 %v2430_v13, %v2430_v13  ;;  %v8770_v11 = vld [vmem:[#allocation37 + $0x88] sm:$0xff]   ;;  %v8772_v13 = vld [vmem:[#allocation37 + $0x90] sm:$0xff]  }
 0xfd8   :  { %8141 = vmatmul.mubr.msk.bf16.vlgmr.msra.gmra.mrb[44].mxu1 %vm858_vm2, %v2321_v10  ;;  %v8769_v10 = vld [vmem:[#allocation37 + $0xc8] sm:$0xff]  }
 0xfd9   :  { %8151 = vmatpush3.bf16.msra.mxu1 %v2438_v12  ;;  %8152 = vmatprep.mubr.msk.bf16.mxu1 %vm9703_vm0, %v9702_v19  ;;  %v8771_v12 = vld [vmem:[#allocation37 + $0xd0] sm:$0xff]  }
 0xfda   :  { %2710 = vmatprep.subr.bf16.mxu1 %v8745_v49 }
 0xfe0   :  { %8153 = vmatmul.mubr.msk.bf16.vlgmr.msra.gmra.mrb[48].mxu1 %vm858_vm2, %v2431_v14  ;;  %v8773_v14 = vld [vmem:[#allocation37 + $0xd8] sm:$0xff]  }
 0xfe1   :  { %2742 = vmatprep.mubr.bf16.mxu1 %v9701_v0  ;;  %2711 = vmatpush1.bf16.msra.mxu1 %v8743_v48 }
 0xfe2   :  { %2712 = vmatprep.subr.bf16.mxu1 %v8748_v50 }
 0xfe5   :  { %2713 = vmatpush1.bf16.msra.mxu1 %v8746_v51 }
 0xfe6   :  { %2714 = vmatprep.subr.bf16.mxu1 %v8751_v61  ;;  %v2927_v61 = vld [vmem:[#allocation28 + $0x8] sm:$0xff] }
 0xfe9   :  { %2715 = vmatpush1.bf16.msra.mxu1 %v8749_v62 }
 0xfea   :  { %2716 = vmatprep.subr.bf16.mxu1 %v8754_v63 }
 0xfed   :  { %2717 = vmatpush1.bf16.msra.mxu1 %v8752_v1  ;;  %v2931_v1 = vld [vmem:[#allocation28 + $0x28] sm:$0xff] }
 0xfee   :  { %2718 = vmatprep.subr.bf16.mxu1 %v8757_v2  ;;  %v7444_v2 = vcombine.low %v2927_v61, %v2931_v1 }
 0xff1   :  { %2719 = vmatpush1.bf16.msra.mxu1 %v8755_v3  ;;  %v7445_v3 = vcombine.high %v2927_v61, %v2931_v1 }
0x10a3   :  { %v2254_v26 = vpop.f32.mrb[40].mxu1 }
0x10a4   :  { %2481 = vrot.lane.b32.xlu1 %v2254_v26, %s9694_s1  ;;  %v8130_v27 = vpop.f32.mrb[41].mxu1 }
0x10a5   :  { %v2257_v28 = vpop.f32.mrb[42].mxu1 }
0x10a6   :  { %v8131_v29 = vpop.f32.mrb[43].mxu1 }
0x10ab   :  { %v2364_v31 = vpop.f32.mrb[44].mxu1 }
0x10ac   :  { %2485 = vrot.lane.b32.xlu0 %v2364_v31, %s9671_s22  ;;  %v8142_v33 = vpop.f32.mrb[45].mxu1  ;;  %v7405_v31 = vld [vmem:[#allocation32 + $0x1] ss:$0 sm:$0xff] }
0x10ad   :  { %v2367_v34 = vpop.f32.mrb[46].mxu1 }
0x10ae   :  { %v8143_v35 = vpop.f32.mrb[47].mxu1 }
0x10b3   :  { %v2474_v36 = vpop.f32.mrb[48].mxu1 }
0x10b4   :  { %2489 = vrot.lane.b32.xlu1 %v2474_v36, %s9704_s21  ;;  %v8154_v38 = vpop.f32.mrb[49].mxu1  ;;  %v7406_v36 = vld [vmem:[#allocation31 + $0x1] ss:$0 sm:$0xff] }
0x10b5   :  { %v2477_v39 = vpop.f32.mrb[50].mxu1 }
0x10b6   :  { %v8155_v40 = vpop.f32.mrb[51].mxu1 }
0x1116   :  { %v2482_v41 = vpop.permute.xlu1 %2481 }
0x1117   :  { %v2492_v43 = vsel %vm811_vm1, %v10342_v32, %v2482_v41  ;;  %v8779_v41 = vld [vmem:[#allocation37 + $0xf0] sm:$0xff]  }
0x111e   :  { %v2486_v42 = vpop.permute.xlu0 %2485 }
0x111f   :  { %v2493_v44 = vsel %vm1264_vm4, %v2492_v43, %v2486_v42  ;;  %v8780_v42 = vld [vmem:[#allocation37 + $0xb0] sm:$0xff]   ;;  %v8781_v43 = vld [vmem:[#allocation37 + $0xf8] sm:$0xff]  }
0x1126   :  { %v2490_v45 = vpop.permute.xlu1 %2489 }
0x1127   :  { %v2494_v46 = vsel %vm1266_vm5, %v2493_v44, %v2490_v45  ;;  %v8782_v44 = vld [vmem:[#allocation37 + $0xb8] sm:$0xff]   ;;  %v7360_v45 = vld [vmem:[%s10916_s28 + $0x2] sm:$0x3] }
0x1128   :  { %v2495_v47 = vpack.c.bf16 %v2494_v46, %v2494_v46  ;;  %v2623_v46 = vrot.slane %v7360_v45, %v10163_v24 }
0x112a   :  { %8173 = vmatmul.mubr.bf16.vlgmr.msra.gmra.mrb[40].mxu0 %v2495_v47  ;;  %v2627_v47 = vrot.slane %v7360_v45, %v10157_v22  ;;  %v2963_v45 = vld [vmem:[#allocation28 + $0x128] sm:$0xff] }
0x112b   :  { %7790 = vmatpush3.bf16.msra.mxu0 %v8768_v9 }
0x112c   :  { %7791 = vmatprep.subr.bf16.mxu0 %v8769_v10 }
0x112f   :  { %7792 = vmatpush3.bf16.msra.mxu0 %v8770_v11  ;;  %v2934_v11 = vld [vmem:[#allocation28 + $0x40] sm:$0xff] }
0x1130   :  { %7793 = vmatprep.subr.bf16.mxu0 %v8771_v12  ;;  %v2938_v12 = vld [vmem:[#allocation28 + $0x60] sm:$0xff] }
0x1133   :  { %7794 = vmatpush3.bf16.msra.mxu0 %v8772_v13  ;;  %v2935_v13 = vld [vmem:[#allocation28 + $0x48] sm:$0xff] }
0x1134   :  { %7795 = vmatprep.subr.bf16.mxu0 %v8773_v14  ;;  %v7451_v14 = vcombine.high %v2934_v11, %v2938_v12 }
0x1137   :  { %7796 = vmatpush3.bf16.msra.mxu0 %v8774_v15  ;;  %v2939_v15 = vld [vmem:[#allocation28 + $0x68] sm:$0xff] }
0x1138   :  { %7797 = vmatprep.subr.bf16.mxu0 %v8775_v16  ;;  %v7450_v16 = vcombine.low %v2934_v11, %v2938_v12  ;;  %v2932_v11 = vld [vmem:[#allocation28 + $0x30] sm:$0xff]  ;;  %v2929_v12 = vld [vmem:[#allocation28 + $0x18] sm:$0xff] }
0x113b   :  { %7798 = vmatpush3.bf16.msra.mxu0 %v8776_v17  ;;  %v7452_v17 = vcombine.low %v2935_v13, %v2939_v15 }
0x113c   :  { %7799 = vmatprep.subr.bf16.mxu0 %v8777_v18  ;;  %v7453_v18 = vcombine.high %v2935_v13, %v2939_v15  ;;  %v2933_v15 = vld [vmem:[#allocation28 + $0x38] sm:$0xff] }
0x113f   :  { %7800 = vmatpush3.bf16.msra.mxu0 %v8778_v20  ;;  %v2942_v20 = vld [vmem:[#allocation28 + $0x80] sm:$0xff] }
0x1140   :  { %7801 = vmatprep.subr.bf16.mxu0 %v8779_v41  ;;  %v2958_v41 = vld [vmem:[#allocation28 + $0x100] sm:$0xff] }
0x1143   :  { %7802 = vmatpush3.bf16.msra.mxu0 %v8780_v42  ;;  %v2962_v42 = vld [vmem:[#allocation28 + $0x120] sm:$0xff] }
0x1144   :  { %7803 = vmatprep.subr.bf16.mxu0 %v8781_v43  ;;  %v2959_v43 = vld [vmem:[#allocation28 + $0x108] sm:$0xff] }
0x1147   :  { %7804 = vmatpush3.bf16.msra.mxu0 %v8782_v44  ;;  %v7475_v44 = vcombine.high %v2958_v41, %v2962_v42 }
0x1148   :  { %3393 = vmatprep.subr.bf16.mxu0 %v7445_v3  ;;  %v2982_v3 = vld [vmem:[#allocation28 + $0x1c0] sm:$0xff] }
0x11fd   :  { %v2584_v53 = vpop.f32.mrb[40].mxu0 }
0x11fe   :  { %v2585_v54 = vadd.f32 %v7396_v52, %v2584_v53  ;;  %v8174_v55 = vpop.f32.mrb[41].mxu0 }
0x11ff   :  { %v2587_v32 = vpop.f32.mrb[42].mxu0 }
0x1200   :  { %v10391_v57 = vadd.f32 %v2585_v54, %v10293_v37  ;;  %v8175_v59 = vpop.f32.mrb[43].mxu0  ;;  %v8760_v37 = vld [vmem:[#allocation35 + $0xd4] ss:$8 sps:$4 sm:$0xff]  }
0x1201   :  { %2720 = vmatprep.subr.bf16.mxu1 %v8760_v37  ;;  %v2926_v59 = vld [vmem:[#allocation28] sm:$0xff] }
0x1202   :  { %2591 = vadd.xlane.f32.xlu0 %v10391_v57  ;;  %v2594_v60 = vmul.f32 %v10391_v57, %v10391_v57  ;;  %2721 = vmatpush1.bf16.msra.mxu1 %v8758_v4  ;;  %v7423_v4 = vld [vmem:[%s10917_s6 + $0x1] ss:$0 sm:$0xff] }
0x1203   :  { %2722 = vmatprep.subr.bf16.mxu1 %v8763_v5 }
0x1204   :  { %2595 = vadd.xlane.f32.xlu1 %v2594_v60  ;;  %v2930_v60 = vld [vmem:[#allocation28 + $0x20] sm:$0xff] }
0x1205   :  { %v7442_v62 = vcombine.low %v2926_v59, %v2930_v60  ;;  %v7443_v63 = vcombine.high %v2926_v59, %v2930_v60  ;;  %v2978_v59 = vld [vmem:[#allocation28 + $0x1a0] sm:$0xff]  ;;  %v2975_v60 = vld [vmem:[#allocation28 + $0x188] sm:$0xff] }
0x1206   :  { %2723 = vmatpush1.bf16.msra.mxu1 %v8761_v6 }
0x1207   :  { %2724 = vmatprep.subr.bf16.mxu1 %v8766_v7 }
0x120a   :  { %2725 = vmatpush1.bf16.msra.mxu1 %v8764_v8 }
0x120b   :  { %3352 = vmatprep.subr.bf16.mxu1 %v7443_v63 }
0x128f   :  { %v2592_v23 = vpop.xlane.xlu0 %2591 }
0x1290   :  { %v2593_v25 = vmul.f32 0.0078125, %v2592_v23  ;;  %v2946_v23 = vld [vmem:[#allocation28 + $0xa0] sm:$0xff] }
0x1291   :  { %v2596_v26 = vpop.xlane.xlu1 %2595 }
0x1292   :  { %v2598_v27 = vmul.f32 %v2593_v25, %v2593_v25  ;;  %v2597_v28 = vmul.f32 0.0078125, %v2596_v26  ;;  %v2600_v34 = vsub.f32 %v10391_v57, %v2593_v25  ;;  %v2943_v25 = vld [vmem:[#allocation28 + $0x88] sm:$0xff] }
0x1293   :  { %v2947_v26 = vld [vmem:[#allocation28 + $0xa8] sm:$0xff] }
0x1294   :  { %v2599_v29 = vsub.f32 %v2597_v28, %v2598_v27  ;;  %v7458_v27 = vcombine.low %v2942_v20, %v2946_v23  ;;  %v7459_v28 = vcombine.high %v2942_v20, %v2946_v23 }
0x1296   :  { %v2601_v30 = vadd.f32 1e-05, %v2599_v29  ;;  %v7460_v29 = vcombine.low %v2943_v25, %v2947_v26 }
0x1298   :  { %8971 = vrsqrt.f32 %v2601_v30  ;;  %v7461_v30 = vcombine.high %v2943_v25, %v2947_v26 }
0x12a2   :  { %v8972_v33 = vpop.eup %8971 }
0x12a3   :  { %v2609_v35 = vmul.f32 %v8972_v33, %v7405_v31  ;;  %v2950_v31 = vld [vmem:[#allocation28 + $0xc0] sm:$0xff] }
0x12a4   :  { %v2954_v33 = vld [vmem:[#allocation28 + $0xe0] sm:$0xff] }
0x12a5   :  { %v2610_v38 = vmul.f32 %v2609_v35, %v2600_v34  ;;  %v2951_v34 = vld [vmem:[#allocation28 + $0xc8] sm:$0xff]  ;;  %v7467_v35 = vcombine.high %v2950_v31, %v2954_v33 }
0x12a7   :  { %v2617_v39 = vadd.f32 %v7406_v36, %v2610_v38  ;;  %v2955_v36 = vld [vmem:[#allocation28 + $0xe8] sm:$0xff]  ;;  %v7466_v38 = vcombine.low %v2950_v31, %v2954_v33 }
0x12a9   :  { %v2618_v40 = vpack.c.bf16 %v2617_v39, %v2617_v39 }
0x12ab   :  { %2743 = vmatmul.mubr.bf16.vlgmr.msra.gmra.mrb[52].mxu1 %v2618_v40  ;;  %v7469_v40 = vcombine.high %v2951_v34, %v2955_v36 }
0x12ac   :  { %3384 = vmatprep.mubr.bf16.mxu1 %v9701_v0  ;;  %3353 = vmatpush1.bf16.msra.mxu1 %v7442_v62  ;;  %v2979_v62 = vld [vmem:[#allocation28 + $0x1a8] sm:$0xff] }
0x12ad   :  { %3354 = vmatprep.subr.bf16.mxu1 %v7451_v14  ;;  %v7492_v1 = vcombine.low %v2975_v60, %v2979_v62 }
0x12b0   :  { %3355 = vmatpush1.bf16.msra.mxu1 %v7450_v16  ;;  %v7448_v16 = vcombine.low %v2929_v12, %v2933_v15 }
0x12b1   :  { %3356 = vmatprep.subr.bf16.mxu1 %v7459_v28 }
0x12b4   :  { %3357 = vmatpush1.bf16.msra.mxu1 %v7458_v27 }
0x12b5   :  { %3358 = vmatprep.subr.bf16.mxu1 %v7467_v35 }
0x12b8   :  { %3359 = vmatpush1.bf16.msra.mxu1 %v7466_v38  ;;  %v2940_v38 = vld [vmem:[#allocation28 + $0x70] sm:$0xff] }
0x12b9   :  { %3360 = vmatprep.subr.bf16.mxu1 %v7475_v44 }
0x137e   :  { %v2744_v48 = vpop.f32.mrb[52].mxu1 }
0x137f   :  { %v2745_v49 = vadd.f32 %v2744_v48, %v2623_v46  ;;  %v2746_v50 = vpop.f32.mrb[53].mxu1  ;;  %v7474_v46 = vcombine.low %v2958_v41, %v2962_v42  ;;  %v7477_v48 = vcombine.high %v2959_v43, %v2963_v45 }
0x1380   :  { %v2747_v51 = vadd.f32 %v2746_v50, %v2627_v47  ;;  %v2748_v52 = vpop.f32.mrb[54].mxu1  ;;  %v7476_v47 = vcombine.low %v2959_v43, %v2963_v45  ;;  %v2970_v50 = vld [vmem:[#allocation28 + $0x160] sm:$0xff]  ;;  %v2944_v45 = vld [vmem:[#allocation28 + $0x90] sm:$0xff] }
0x1381   :  { %v2751_v53 = vmax.f32 %v2745_v49, 0.0  ;;  %v2749_v54 = vpop.f32.mrb[55].mxu1  ;;  %v2966_v49 = vld [vmem:[#allocation28 + $0x140] sm:$0xff]  ;;  %3361 = vmatpush1.bf16.msra.mxu1 %v7474_v46  ;;  %v2948_v46 = vld [vmem:[#allocation28 + $0xb0] sm:$0xff] }
0x1382   :  { %v2752_v55 = vmax.f32 %v2747_v51, 0.0  ;;  %v2967_v51 = vld [vmem:[#allocation28 + $0x148] sm:$0xff]  ;;  %v7483_v52 = vcombine.high %v2966_v49, %v2970_v50  ;;  %v7482_v54 = vcombine.low %v2966_v49, %v2970_v50  ;;  %v7463_v50 = vcombine.high %v2944_v45, %v2948_v46 }
0x1383   :  { %v2753_v57 = vpack.c.bf16 %v2751_v53, %v2751_v53  ;;  %v2971_v53 = vld [vmem:[#allocation28 + $0x168] sm:$0xff] }
0x1384   :  { %v2754_v32 = vpack.c.bf16 %v2752_v55, %v2752_v55  ;;  %v7484_v55 = vcombine.low %v2967_v51, %v2971_v53  ;;  %3362 = vmatprep.subr.bf16.mxu1 %v7483_v52  ;;  %v2952_v52 = vld [vmem:[#allocation28 + $0xd0] sm:$0xff] }
0x1385   :  { %3363 = vmatpush1.bf16.msra.mxu1 %v7482_v54  ;;  %v2953_v54 = vld [vmem:[#allocation28 + $0xd8] sm:$0xff] }
0x1386   :  { %2889 = vmatprep.mubr.bf16.mxu0 %v2754_v32  ;;  %v7485_v32 = vcombine.high %v2967_v51, %v2971_v53  ;;  %v2956_v53 = vld [vmem:[#allocation28 + $0xf0] sm:$0xff] }
0x1387   :  { %2890 = vmatmul.mubr.bf16.vlgmr.msra.gmra.mrb[44].mxu0 %v2753_v57  ;;  %v2974_v57 = vld [vmem:[#allocation28 + $0x180] sm:$0xff] }
0x1388   :  { %3425 = vmatprep.mubr.bf16.mxu0 %v9701_v0  ;;  %3394 = vmatpush1.bf16.msra.mxu0 %v7444_v2  ;;  %v7491_v61 = vcombine.high %v2974_v57, %v2978_v59  ;;  %v7490_v63 = vcombine.low %v2974_v57, %v2978_v59  ;;  %v7493_v2 = vcombine.high %v2975_v60, %v2979_v62  ;;  %v2964_v62 = vld [vmem:[#allocation28 + $0x130] sm:$0xff] }
0x1389   :  { %3395 = vmatprep.subr.bf16.mxu0 %v7453_v18  ;;  %v7471_v59 = vcombine.high %v2952_v52, %v2956_v53 }
0x138a   :  { %3364 = vmatprep.subr.bf16.mxu1 %v7491_v61  ;;  %v2960_v61 = vld [vmem:[#allocation28 + $0x110] sm:$0xff] }
0x138b   :  { %3365 = vmatpush1.bf16.msra.mxu1 %v7490_v63  ;;  %v2961_v63 = vld [vmem:[#allocation28 + $0x118] sm:$0xff] }
0x138c   :  { %3396 = vmatpush1.bf16.msra.mxu0 %v7452_v17  ;;  %v7449_v17 = vcombine.high %v2929_v12, %v2933_v15  ;;  %v2977_v15 = vld [vmem:[#allocation28 + $0x198] sm:$0xff] }
0x138d   :  { %3397 = vmatprep.subr.bf16.mxu0 %v7461_v30 }
0x1390   :  { %3398 = vmatpush1.bf16.msra.mxu0 %v7460_v29  ;;  %v7440_v29 = vld [vmem:[%s10918_s3 + $0x1] ss:$0 sm:$0xff] }
0x1391   :  { %3399 = vmatprep.subr.bf16.mxu0 %v7469_v40  ;;  %v2941_v40 = vld [vmem:[#allocation28 + $0x78] sm:$0xff] }
0x145a   :  { %v7805_v37 = vpop.f32.mrb[44].mxu0 }
0x145b   :  { %v7806_v5 = vpop.f32.mrb[45].mxu0 }
0x145c   :  { %v7807_v6 = vadd.f32 %v7806_v5, %v7805_v37  ;;  %v7808_v7 = vpop.f32.mrb[46].mxu0  ;;  %v2986_v37 = vld [vmem:[#allocation28 + $0x1e0] sm:$0xff] }
0x145d   :  { %v7809_v8 = vpop.f32.mrb[47].mxu0  ;;  %v7499_v5 = vcombine.high %v2982_v3, %v2986_v37  ;;  %v7498_v7 = vcombine.low %v2982_v3, %v2986_v37  ;;  %v7479_v37 = vcombine.high %v2960_v61, %v2964_v62 }
0x145e   :  { %v2892_v56 = vadd.f32 %v7807_v6, %v7423_v4  ;;  %v2983_v4 = vld [vmem:[#allocation28 + $0x1c8] sm:$0xff] }
0x145f   :  { %v2987_v6 = vld [vmem:[#allocation28 + $0x1e8] sm:$0xff]  ;;  %3366 = vmatprep.subr.bf16.mxu1 %v7499_v5  ;;  %v2968_v5 = vld [vmem:[#allocation28 + $0x150] sm:$0xff] }
0x1460   :  { %v10403_v9 = vadd.f32 %v2892_v56, %v2617_v39  ;;  %v7468_v39 = vcombine.low %v2951_v34, %v2955_v36  ;;  %v7500_v8 = vcombine.low %v2983_v4, %v2987_v6  ;;  %v7501_v56 = vcombine.high %v2983_v4, %v2987_v6  ;;  %3367 = vmatpush1.bf16.msra.mxu1 %v7498_v7  ;;  %v7441_v34 = vld [vmem:[%s10919_s0 + $0x1] ss:$0 sm:$0xff]  ;;  %v2969_v7 = vld [vmem:[#allocation28 + $0x158] sm:$0xff] }
0x1461   :  { %v2936_v36 = vld [vmem:[#allocation28 + $0x50] sm:$0xff] }
0x1462   :  { %2898 = vadd.xlane.f32.xlu0 %v10403_v9  ;;  %v2901_v10 = vmul.f32 %v10403_v9, %v10403_v9  ;;  %3400 = vmatpush1.bf16.msra.mxu0 %v7468_v39  ;;  %v2937_v39 = vld [vmem:[#allocation28 + $0x58] sm:$0xff]  ;;  %v7455_v43 = vcombine.high %v2936_v36, %v2940_v38  ;;  %v2972_v6 = vld [vmem:[#allocation28 + $0x170] sm:$0xff] }
0x1463   :  { %3401 = vmatprep.subr.bf16.mxu0 %v7477_v48  ;;  %v7457_v44 = vcombine.high %v2937_v39, %v2941_v40  ;;  %v2949_v48 = vld [vmem:[#allocation28 + $0xb8] sm:$0xff]  ;;  %v7456_v49 = vcombine.low %v2937_v39, %v2941_v40  ;;  %v8785_v39 = vld [vmem:[#allocation26 + $0x10] sm:$0xff]  }
0x1464   :  { %v8786_v40 = vld [vmem:[#allocation26 + $0x18] sm:$0xff]  }
0x1466   :  { %2902 = vadd.xlane.f32.xlu0 %v2901_v10  ;;  %3402 = vmatpush1.bf16.msra.mxu0 %v7476_v47  ;;  %v2928_v10 = vld [vmem:[#allocation28 + $0x10] sm:$0xff]  ;;  %v2945_v47 = vld [vmem:[#allocation28 + $0x98] sm:$0xff] }
0x1467   :  { %3403 = vmatprep.subr.bf16.mxu0 %v7485_v32  ;;  %v7446_v13 = vcombine.low %v2928_v10, %v2932_v11  ;;  %v7447_v14 = vcombine.high %v2928_v10, %v2932_v11  ;;  %v7465_v51 = vcombine.high %v2945_v47, %v2949_v48  ;;  %v7462_v32 = vcombine.low %v2944_v45, %v2948_v46  ;;  %v8790_v45 = vld [vmem:[#allocation26 + $0x38] sm:$0xff]  }
0x1468   :  { %v7464_v57 = vcombine.low %v2945_v47, %v2949_v48  ;;  %v7487_v11 = vcombine.high %v2968_v5, %v2972_v6  ;;  %v3524_v46 = vld [vmem:[%s10920_s7] sm:$0xff] }
0x1469   :  { %3434 = vmatprep.subr.bf16.mxu1 %v7447_v14  ;;  %v2980_v14 = vld [vmem:[#allocation28 + $0x1b0] sm:$0xff]  ;;  %v3649_v47 = vpack.c.bf16 %v3524_v46, %v3524_v46 }
0x146a   :  { %3404 = vmatpush1.bf16.msra.mxu0 %v7484_v55  ;;  %v2957_v55 = vld [vmem:[#allocation28 + $0xf8] sm:$0xff] }
0x146b   :  { %3405 = vmatprep.subr.bf16.mxu0 %v7493_v2  ;;  %v7473_v60 = vcombine.high %v2953_v54, %v2957_v55  ;;  %v7470_v2 = vcombine.low %v2952_v52, %v2956_v53  ;;  %v7472_v3 = vcombine.low %v2953_v54, %v2957_v55  ;;  %v10441_v48 = vld [vmem:[%s10921_s2] sm:$0xff] }
0x146e   :  { %3406 = vmatpush1.bf16.msra.mxu0 %v7492_v1  ;;  %v2965_v1 = vld [vmem:[#allocation28 + $0x138] sm:$0xff] }
0x146f   :  { %3407 = vmatprep.subr.bf16.mxu0 %v7501_v56  ;;  %v7481_v4 = vcombine.high %v2961_v63, %v2965_v1  ;;  %v7478_v56 = vcombine.low %v2960_v61, %v2964_v62  ;;  %v7480_v10 = vcombine.low %v2961_v63, %v2965_v1 }
0x1472   :  { %3408 = vmatpush1.bf16.msra.mxu0 %v7500_v8  ;;  %v2973_v8 = vld [vmem:[#allocation28 + $0x178] sm:$0xff] }
0x1473   :  { %3475 = vmatprep.subr.bf16.mxu0 %v7449_v17  ;;  %v7489_v12 = vcombine.high %v2969_v7, %v2973_v8  ;;  %v7486_v17 = vcombine.low %v2968_v5, %v2972_v6 }
0x14ef   :  { %v2899_v18 = vpop.xlane.xlu0 %2898 }
0x14f0   :  { %v2900_v20 = vmul.f32 0.0078125, %v2899_v18  ;;  %v7488_v18 = vcombine.low %v2969_v7, %v2973_v8 }
0x14f2   :  { %v2905_v25 = vmul.f32 %v2900_v20, %v2900_v20  ;;  %v2907_v31 = vsub.f32 %v10403_v9, %v2900_v20  ;;  %v7454_v9 = vcombine.low %v2936_v36, %v2940_v38  ;;  %v8783_v36 = vld [vmem:[#allocation26] sm:$0xff]   ;;  %v8784_v38 = vld [vmem:[#allocation26 + $0x8] sm:$0xff]  }
0x14f3   :  { %v2903_v23 = vpop.xlane.xlu0 %2902 }
0x14f4   :  { %v2904_v26 = vmul.f32 0.0078125, %v2903_v23 }
0x14f6   :  { %v2906_v27 = vsub.f32 %v2904_v26, %v2905_v25  ;;  %v2984_v25 = vld [vmem:[#allocation28 + $0x1d0] sm:$0xff] }
0x14f7   :  { %v2988_v26 = vld [vmem:[#allocation28 + $0x1f0] sm:$0xff] }
0x14f8   :  { %v2908_v28 = vadd.f32 1e-05, %v2906_v27  ;;  %v2985_v27 = vld [vmem:[#allocation28 + $0x1d8] sm:$0xff] }
0x14fa   :  { %8973 = vrsqrt.f32 %v2908_v28  ;;  %v2989_v28 = vld [vmem:[#allocation28 + $0x1f8] sm:$0xff] }
0x1504   :  { %v8974_v30 = vpop.eup %8973 }
0x1505   :  { %v2916_v33 = vmul.f32 %v8974_v30, %v7440_v29 }
0x1507   :  { %v2917_v35 = vmul.f32 %v2916_v33, %v2907_v31  ;;  %v7503_v31 = vcombine.high %v2984_v25, %v2988_v26  ;;  %v7505_v33 = vcombine.high %v2985_v27, %v2989_v28 }
0x1509   :  { %v10411_v41 = vadd.f32 %v7441_v34, %v2917_v35  ;;  %v7502_v34 = vcombine.low %v2984_v25, %v2988_v26  ;;  %v7504_v35 = vcombine.low %v2985_v27, %v2989_v28 }
0x150b   :  { %v10415_v42 = vpack.c.bf16 %v10411_v41, %v10411_v41 }
0x150d   :  { %3385 = vmatmul.mubr.bf16.vlgmr.msra.gmra.mrb[56].mxu1 %v10415_v42  ;;  %3426 = vmatmul.mubr.bf16.vlgmr.msra.gmra.mrb[48].mxu0 %v10415_v42 }
0x150e   :  { %3435 = vmatpush1.bf16.msra.mxu1 %v7446_v13  ;;  %3476 = vmatpush1.bf16.msra.mxu0 %v7448_v16  ;;  %v2976_v13 = vld [vmem:[#allocation28 + $0x190] sm:$0xff]  ;;  %v2981_v16 = vld [vmem:[#allocation28 + $0x1b8] sm:$0xff] }
0x150f   :  { %3436 = vmatprep.subr.bf16.mxu1 %v7455_v43  ;;  %3477 = vmatprep.subr.bf16.mxu0 %v7457_v44  ;;  %v7495_v20 = vcombine.high %v2976_v13, %v2980_v14  ;;  %v7497_v23 = vcombine.high %v2977_v15, %v2981_v16  ;;  %v7494_v29 = vcombine.low %v2976_v13, %v2980_v14  ;;  %v8788_v43 = vld [vmem:[#allocation26 + $0x28] sm:$0xff]   ;;  %v8789_v44 = vld [vmem:[#allocation26 + $0x30] sm:$0xff]  }
0x1510   :  { %3466 = vmatprep.mubr.bf16.mxu1 %v9701_v0  ;;  %3507 = vmatprep.mubr.bf16.mxu0 %v9701_v0  ;;  %v7496_v30 = vcombine.low %v2977_v15, %v2981_v16 }
0x1512   :  { %3437 = vmatpush1.bf16.msra.mxu1 %v7454_v9  ;;  %3478 = vmatpush1.bf16.msra.mxu0 %v7456_v49  ;;  %v2995_v9 = vrot.slane %v10441_v48, %v10163_v24  ;;  %v2999_v49 = vrot.slane %v10441_v48, %v10157_v22 }
0x1513   :  { %3438 = vmatprep.subr.bf16.mxu1 %v7463_v50  ;;  %3479 = vmatprep.subr.bf16.mxu0 %v7465_v51 }
0x1516   :  { %3439 = vmatpush1.bf16.msra.mxu1 %v7462_v32  ;;  %3480 = vmatpush1.bf16.msra.mxu0 %v7464_v57 }
0x1517   :  { %3440 = vmatprep.subr.bf16.mxu1 %v7471_v59  ;;  %3481 = vmatprep.subr.bf16.mxu0 %v7473_v60 }
0x151a   :  { %3441 = vmatpush1.bf16.msra.mxu1 %v7470_v2  ;;  %3482 = vmatpush1.bf16.msra.mxu0 %v7472_v3 }
0x151b   :  { %3442 = vmatprep.subr.bf16.mxu1 %v7479_v37  ;;  %3483 = vmatprep.subr.bf16.mxu0 %v7481_v4 }
0x151e   :  { %3443 = vmatpush1.bf16.msra.mxu1 %v7478_v56  ;;  %3484 = vmatpush1.bf16.msra.mxu0 %v7480_v10  ;;  %v7506_v56 = vld [vmem:[#allocation20] ss:$0 sm:$0xff] }
0x151f   :  { %3444 = vmatprep.subr.bf16.mxu1 %v7487_v11  ;;  %3485 = vmatprep.subr.bf16.mxu0 %v7489_v12 }
0x1522   :  { %3445 = vmatpush1.bf16.msra.mxu1 %v7486_v17  ;;  %3486 = vmatpush1.bf16.msra.mxu0 %v7488_v18 }
0x1523   :  { %3446 = vmatprep.subr.bf16.mxu1 %v7495_v20  ;;  %3487 = vmatprep.subr.bf16.mxu0 %v7497_v23 }
0x1526   :  { %3447 = vmatpush1.bf16.msra.mxu1 %v7494_v29  ;;  %3488 = vmatpush1.bf16.msra.mxu0 %v7496_v30 }
0x1527   :  { %3448 = vmatprep.subr.bf16.mxu1 %v7503_v31  ;;  %3489 = vmatprep.subr.bf16.mxu0 %v7505_v33 }
0x152a   :  { %3449 = vmatpush1.bf16.msra.mxu1 %v7502_v34  ;;  %3490 = vmatpush1.bf16.msra.mxu0 %v7504_v35 }
0x152b   :  { %8176 = vmatprep.subr.bf16.mxu1 %v9702_v19  ;;  %8196 = vmatprep.subr.bf16.mxu0 %v9702_v19 }
0x152d   :  { %3467 = vmatmul.mubr.bf16.vlgmr.msra.gmra.mrb[60].mxu1 %v10415_v42  ;;  %3508 = vmatmul.mubr.bf16.vlgmr.msra.gmra.mrb[52].mxu0 %v10415_v42  ;;  %v8787_v42 = vld [vmem:[#allocation26 + $0x20] sm:$0xff]  }
0x152e   :  { %8177 = vmatpush3.bf16.msra.mxu1 %v8783_v36  ;;  %8192 = vmatprep.mubr.msk.bf16.mxu1 %vm9703_vm0, %v9702_v19 }
0x152f   :  { %8178 = vmatprep.subr.bf16.mxu1 %v9702_v19  ;;  %8198 = vmatprep.mubr.msk.bf16.mxu0 %vm9703_vm0, %v9702_v19 }
0x1532   :  { %8179 = vmatpush3.bf16.msra.mxu1 %v8784_v38 }
0x1533   :  { %8180 = vmatprep.subr.bf16.mxu1 %v9702_v19 }
0x1536   :  { %8181 = vmatpush3.bf16.msra.mxu1 %v8785_v39 }
0x1537   :  { %8182 = vmatprep.subr.bf16.mxu1 %v9702_v19 }
0x153a   :  { %8183 = vmatpush3.bf16.msra.mxu1 %v8786_v40 }
0x153b   :  { %8184 = vmatprep.subr.bf16.mxu1 %v9702_v19 }
0x153e   :  { %8185 = vmatpush3.bf16.msra.mxu1 %v8787_v42 }
0x153f   :  { %8186 = vmatprep.subr.bf16.mxu1 %v9702_v19 }
0x1542   :  { %8187 = vmatpush3.bf16.msra.mxu1 %v8788_v43 }
0x1543   :  { %8188 = vmatprep.subr.bf16.mxu1 %v9702_v19 }
0x1546   :  { %8189 = vmatpush3.bf16.msra.mxu1 %v8789_v44 }
0x1547   :  { %8190 = vmatprep.subr.bf16.mxu1 %v9702_v19 }
0x154a   :  { %8191 = vmatpush3.bf16.msra.mxu1 %v8790_v45 }
0x154b   :  { %8202 = vmatprep.subr.bf16.mxu1 %v9702_v19 }
0x154d   :  { %8193 = vmatmul.mubr.bf16.vlgmr.msra.gmra.mrb[64].mxu1 %v3649_v47 }
0x154e   :  { %8204 = vmatprep.mubr.msk.bf16.mxu1 %vm9703_vm0, %v9702_v19 }
0x15e0   :  { %v3386_v50 = vpop.f32.mrb[56].mxu1  ;;  %v10447_v51 = vpop.f32.mrb[48].mxu0 }
0x15e1   :  { %v3387_v52 = vadd.f32 %v3386_v50, %v2995_v9  ;;  %v3388_v53 = vpop.f32.mrb[57].mxu1  ;;  %v10449_v54 = vpop.f32.mrb[49].mxu0 }
0x15e2   :  { %v3389_v55 = vadd.f32 %v3388_v53, %v2999_v49  ;;  %v3390_v32 = vpop.f32.mrb[58].mxu1  ;;  %v3431_v57 = vpop.f32.mrb[50].mxu0 }
0x15e3   :  { %v3516_v59 = vpack.c.bf16 %v3387_v52, %v3387_v52  ;;  %v3391_v60 = vpop.f32.mrb[59].mxu1  ;;  %v3432_v61 = vpop.f32.mrb[51].mxu0 }
0x15e4   :  { %v10451_v62 = vpack.c.bf16 %v3389_v55, %v3389_v55 }
0x15e5   :  { %3853 = vrot.lane.b32.xlu1 %v3516_v59, %s9704_s21  ;;  %v3749_v63 = vsel %vm811_vm1, %v3516_v59, 0 }
0x15e6   :  { %8197 = vmatpush3.bf16.xpose.msra.mxu0 %v3749_v63  ;;  %v3807_v1 = vsel %vm874_vm3, %v10451_v62, 0 }
0x15e7   :  { %8203 = vmatpush3.bf16.msra.mxu1 %v3807_v1  ;;  %8208 = vmatprep.subr.bf16.mxu0 %v9702_v19 }
0x15e8   :  { %8214 = vmatprep.subr.bf16.mxu1 %v9702_v19 }
0x15e9   :  { %3964 = vrot.lane.b32.xlu1 %v3516_v59, %s9671_s22 }
0x1600   :  { %v10460_v2 = vpop.f32.mrb[60].mxu1  ;;  %v10462_v3 = vpop.f32.mrb[52].mxu0 }
0x1601   :  { %v10464_v37 = vpop.f32.mrb[61].mxu1  ;;  %v10466_v4 = vpop.f32.mrb[53].mxu0 }
0x1602   :  { %v3472_v5 = vpop.f32.mrb[62].mxu1  ;;  %v3513_v6 = vpop.f32.mrb[54].mxu0 }
0x1603   :  { %v3473_v7 = vpop.f32.mrb[63].mxu1  ;;  %v3514_v8 = vpop.f32.mrb[55].mxu0 }
0x1620   :  { %v3738_v10 = vpop.f32.mrb[64].mxu1 }
0x1621   :  { %v3739_v11 = vadd.f32 %v7506_v56, %v3738_v10  ;;  %v8194_v12 = vpop.f32.mrb[65].mxu1 }
0x1622   :  { %v3741_v13 = vpop.f32.mrb[66].mxu1 }
0x1623   :  { %v3744_v14 = vpack.c.bf16 %v3739_v11, %v3739_v11  ;;  %v8195_v15 = vpop.f32.mrb[67].mxu1 }
0x1625   :  { %3850 = vrot.lane.b32.xlu0 %v3744_v14, %s9704_s21  ;;  %3962 = vrot.lane.b32.xlu1 %v3744_v14, %s9671_s22 }
0x1626   :  { %8199 = vmatmul.mubr.msk.bf16.vlgmr.msra.gmra.mrb[56].mxu0 %vm811_vm1, %v3744_v14 }
0x1627   :  { %8210 = vmatprep.mubr.msk.bf16.mxu0 %vm9703_vm0, %v9702_v19 }
0x1629   :  { %4074 = vrot.lane.b32.xlu0 %v3516_v59, %s9694_s1  ;;  %4072 = vrot.lane.b32.xlu1 %v3744_v14, %s9694_s1 }
0x1657   :  { %v3854_v16 = vpop.permute.xlu1 %3853 }
0x1658   :  { %v3859_v17 = vsel %vm811_vm1, %v3854_v16, 0 }
0x1659   :  { %8209 = vmatpush3.bf16.xpose.msra.mxu0 %v3859_v17 }
0x165a   :  { %8220 = vmatprep.subr.bf16.mxu0 %v9702_v19 }
0x165b   :  { %v3965_v18 = vpop.permute.xlu1 %3964 }
0x165c   :  { %v3970_v23 = vsel %vm811_vm1, %v3965_v18, 0 }
0x1697   :  { %v3851_v20 = vpop.permute.xlu0 %3850  ;;  %v3963_v26 = vpop.permute.xlu1 %3962 }
0x1698   :  { %8211 = vmatmul.mubr.msk.bf16.vlgmr.msra.gmra.mrb[60].mxu0 %vm811_vm1, %v3851_v20 }
0x1699   :  { %8221 = vmatpush3.bf16.xpose.msra.mxu0 %v3970_v23  ;;  %8222 = vmatprep.mubr.msk.bf16.mxu0 %vm9703_vm0, %v9702_v19 }
0x169a   :  { %8232 = vmatprep.subr.bf16.mxu0 %v9702_v19 }
0x169b   :  { %v4075_v25 = vpop.permute.xlu0 %4074  ;;  %v4073_v28 = vpop.permute.xlu1 %4072 }
0x169c   :  { %v4080_v27 = vsel %vm811_vm1, %v4075_v25, 0 }
0x16a0   :  { %8223 = vmatmul.mubr.msk.bf16.vlgmr.msra.gmra.mrb[64].mxu0 %vm811_vm1, %v3963_v26 }
0x16a1   :  { %8233 = vmatpush3.bf16.xpose.msra.mxu0 %v4080_v27  ;;  %8234 = vmatprep.mubr.msk.bf16.mxu0 %vm9703_vm0, %v9702_v19 }
0x16a2   :  { %8244 = vmatprep.subr.bf16.mxu0 %v9702_v19 }
0x16a8   :  { %8235 = vmatmul.mubr.msk.bf16.vlgmr.msra.gmra.mrb[68].mxu0 %vm811_vm1, %v4073_v28 }
0x16a9   :  { %8260 = vmatprep.mubr.msk.bf16.mxu0 %vm9703_vm0, %v9702_v19 }
0x16f9   :  { %v3785_v29 = vpop.f32.mrb[56].mxu0 }
0x16fa   :  { %v8200_v30 = vpop.f32.mrb[57].mxu0  ;;  %v3791_v31 = vsel %vm858_vm2, %v3785_v29, -inf }
0x16fb   :  { %3792 = vmax.xlane.f32.xlu0 %v3791_v31  ;;  %v3788_v33 = vpop.f32.mrb[58].mxu0 }
0x16fc   :  { %v8201_v34 = vpop.f32.mrb[59].mxu0 }
0x176b   :  { %v3895_v35 = vpop.f32.mrb[60].mxu0 }
0x176c   :  { %v8212_v36 = vpop.f32.mrb[61].mxu0  ;;  %v3901_v38 = vsel %vm858_vm2, %v3895_v35, -inf }
0x176d   :  { %3902 = vmax.xlane.f32.xlu1 %v3901_v38  ;;  %v3898_v39 = vpop.f32.mrb[62].mxu0 }
0x176e   :  { %v8213_v40 = vpop.f32.mrb[63].mxu0 }
0x1773   :  { %v4006_v42 = vpop.f32.mrb[64].mxu0 }
0x1774   :  { %v8224_v43 = vpop.f32.mrb[65].mxu0  ;;  %v4012_v44 = vsel %vm858_vm2, %v4006_v42, -inf }
0x1775   :  { %4013 = vmax.xlane.f32.xlu0 %v4012_v44  ;;  %v4009_v45 = vpop.f32.mrb[66].mxu0 }
0x1776   :  { %v8225_v46 = vpop.f32.mrb[67].mxu0 }
0x177b   :  { %v4116_v47 = vpop.f32.mrb[68].mxu0 }
0x177c   :  { %v8236_v9 = vpop.f32.mrb[69].mxu0  ;;  %v4122_v49 = vsel %vm858_vm2, %v4116_v47, -inf }
0x177d   :  { %4123 = vmax.xlane.f32.xlu0 %v4122_v49  ;;  %v4119_v50 = vpop.f32.mrb[70].mxu0  ;;  %v8791_v9 = vld [vmem:[#allocation25] sm:$0xff]   ;;  %v8792_v49 = vld [vmem:[#allocation25 + $0x8] sm:$0xff]  }
0x177e   :  { %v8237_v52 = vpop.f32.mrb[71].mxu0  ;;  %8245 = vmatpush3.bf16.msra.mxu0 %v8791_v9  ;;  %v8793_v50 = vld [vmem:[#allocation25 + $0x10] sm:$0xff]  }
0x177f   :  { %8246 = vmatprep.subr.bf16.mxu0 %v9702_v19  ;;  %v8794_v52 = vld [vmem:[#allocation25 + $0x18] sm:$0xff]  }
0x1782   :  { %8247 = vmatpush3.bf16.msra.mxu0 %v8792_v49 }
0x1783   :  { %8248 = vmatprep.subr.bf16.mxu0 %v9702_v19 }
0x1786   :  { %8249 = vmatpush3.bf16.msra.mxu0 %v8793_v50  ;;  %v3006_v50 = vsub.s32 3, %v10154_v21 }
0x1787   :  { %8250 = vmatprep.subr.bf16.mxu0 %v9702_v19 }
0x1788   :  { %v3793_v53 = vpop.xlane.xlu0 %3792 }
0x1789   :  { %v3794_v55 = vsub.f32 %v3785_v29, %v3793_v53  ;;  %v8795_v53 = vld [vmem:[#allocation25 + $0x20] sm:$0xff]  }
0x178a   :  { %8251 = vmatpush3.bf16.msra.mxu0 %v8794_v52  ;;  %v3007_v52 = vrot.slane %v10441_v48, %v3006_v50 }
0x178b   :  { %v3795_v32 = vmul.f32 1.442695, %v3794_v55  ;;  %8252 = vmatprep.subr.bf16.mxu0 %v9702_v19  ;;  %v8796_v55 = vld [vmem:[#allocation25 + $0x28] sm:$0xff]  }
0x178d   :  { %8975 = vpow2.f32 %v3795_v32  ;;  %v8797_v32 = vld [vmem:[#allocation25 + $0x30] sm:$0xff]  }
0x178e   :  { %8253 = vmatpush3.bf16.msra.mxu0 %v8795_v53  ;;  %v7532_v53 = vld [vmem:[#allocation23] ss:$0 sm:$0xff] }
0x178f   :  { %8254 = vmatprep.subr.bf16.mxu0 %v9702_v19 }
0x1792   :  { %8255 = vmatpush3.bf16.msra.mxu0 %v8796_v55 }
0x1793   :  { %8256 = vmatprep.subr.bf16.mxu0 %v9702_v19 }
0x1796   :  { %8257 = vmatpush3.bf16.msra.mxu0 %v8797_v32  ;;  %v3430_v32 = vadd.f32 %v10449_v54, %v3007_v52 }
0x1797   :  { %v8976_v57 = vpop.eup %8975  ;;  %8258 = vmatprep.subr.bf16.mxu0 %v9702_v19 }
0x1798   :  { %v3797_v59 = vsel %vm858_vm2, %v8976_v57, 0.0 }
0x1799   :  { %3798 = vadd.xlane.f32.xlu1 %v3797_v59 }
0x17aa   :  { %3914 = vrot.lane.b32.xlu1 %v10451_v62, %s9704_s21 }
0x17fa   :  { %v3903_v60 = vpop.xlane.xlu1 %3902 }
0x17fb   :  { %v3904_v61 = vsub.f32 %v3895_v35, %v3903_v60 }
0x17fd   :  { %v3905_v63 = vmul.f32 1.442695, %v3904_v61 }
0x17ff   :  { %8977 = vpow2.f32 %v3905_v63 }
0x1802   :  { %v4014_v1 = vpop.xlane.xlu0 %4013 }
0x1803   :  { %v4015_v5 = vsub.f32 %v4006_v42, %v4014_v1 }
0x1805   :  { %v4016_v6 = vmul.f32 1.442695, %v4015_v5 }
0x1807   :  { %8979 = vpow2.f32 %v4016_v6 }
0x1809   :  { %v8978_v7 = vpop.eup %8977 }
0x180a   :  { %v4124_v8 = vpop.xlane.xlu0 %4123  ;;  %v3907_v56 = vsel %vm858_vm2, %v8978_v7, 0.0 }
0x180b   :  { %v4125_v10 = vsub.f32 %v4116_v47, %v4124_v8  ;;  %3908 = vadd.xlane.f32.xlu0 %v3907_v56 }
0x180d   :  { %v4126_v11 = vmul.f32 1.442695, %v4125_v10 }
0x180f   :  { %8981 = vpow2.f32 %v4126_v11 }
0x1811   :  { %v8980_v12 = vpop.eup %8979 }
0x1812   :  { %v4018_v13 = vsel %vm858_vm2, %v8980_v12, 0.0 }
0x1813   :  { %4019 = vadd.xlane.f32.xlu1 %v4018_v13 }
0x1819   :  { %v8982_v14 = vpop.eup %8981 }
0x181a   :  { %v4128_v15 = vsel %vm858_vm2, %v8982_v14, 0.0 }
0x181b   :  { %4129 = vadd.xlane.f32.xlu0 %v4128_v15 }
0x1824   :  { %4134 = vrot.lane.b32.xlu1 %v10451_v62, %s9694_s1 }
0x1826   :  { %v3799_v16 = vpop.xlane.xlu1 %3798 }
0x1827   :  { %8983 = vrcp.f32 %v3799_v16 }
0x182a   :  { %v3915_v20 = vpop.permute.xlu1 %3914 }
0x182b   :  { %v3920_v25 = vsel %vm874_vm3, %v3915_v20, 0 }
0x1831   :  { %v8984_v17 = vpop.eup %8983  ;;  %4024 = vrot.lane.b32.xlu0 %v10451_v62, %s9671_s22 }
0x1832   :  { %v3801_v18 = vmul.f32 %v8984_v17, %v8976_v57  ;;  %v8798_v57 = vld [vmem:[#allocation25 + $0x38] sm:$0xff]  }
0x1833   :  { %8259 = vmatpush3.bf16.msra.mxu0 %v8798_v57 }
0x1834   :  { %v3802_v23 = vpack.c.bf16 %v3801_v18, %v3801_v18  ;;  %8284 = vmatprep.subr.bf16.mxu0 %v9702_v19 }
0x1836   :  { %8205 = vmatmul.mubr.msk.bf16.vlgmr.msra.gmra.mrb[68].mxu1 %vm858_vm2, %v3802_v23 }
0x1837   :  { %8215 = vmatpush3.bf16.msra.mxu1 %v3920_v25  ;;  %8216 = vmatprep.mubr.msk.bf16.mxu1 %vm9703_vm0, %v9702_v19 }
0x1838   :  { %8226 = vmatprep.subr.bf16.mxu1 %v9702_v19 }
0x1898   :  { %v3909_v26 = vpop.xlane.xlu0 %3908 }
0x1899   :  { %8985 = vrcp.f32 %v3909_v26 }
0x18a0   :  { %v4020_v27 = vpop.xlane.xlu1 %4019 }
0x18a1   :  { %8987 = vrcp.f32 %v4020_v27  ;;  %v7523_v27 = vld [vmem:[#allocation19] ss:$0 sm:$0xff] }
0x18a3   :  { %v8986_v28 = vpop.eup %8985 }
0x18a4   :  { %v3911_v29 = vmul.f32 %v8986_v28, %v8978_v7  ;;  %v4135_v36 = vpop.permute.xlu1 %4134 }
0x18a5   :  { %v4140_v39 = vsel %vm874_vm3, %v4135_v36, 0  ;;  %v8802_v36 = vld [vmem:[#allocation10 + $0x18] sm:$0xff]  }
0x18a6   :  { %v3912_v62 = vpack.c.bf16 %v3911_v29, %v3911_v29 }
0x18a8   :  { %8217 = vmatmul.mubr.msk.bf16.vlgmr.msra.gmra.mrb[72].mxu1 %vm858_vm2, %v3912_v62  ;;  %v4130_v30 = vpop.xlane.xlu0 %4129 }
0x18a9   :  { %8989 = vrcp.f32 %v4130_v30  ;;  %8228 = vmatprep.mubr.msk.bf16.mxu1 %vm9703_vm0, %v9702_v19 }
0x18ab   :  { %v8988_v31 = vpop.eup %8987 }
0x18ac   :  { %v4022_v33 = vmul.f32 %v8988_v31, %v8980_v12  ;;  %v4025_v34 = vpop.permute.xlu0 %4024  ;;  %v3003_v12 = vrot.slane %v10441_v48, %v10208_v58  ;;  %v8799_v58 = vld [vmem:[#allocation10] sm:$0xff]  }
0x18ad   :  { %v4030_v35 = vsel %vm874_vm3, %v4025_v34, 0 }
0x18ae   :  { %8227 = vmatpush3.bf16.msra.mxu1 %v4030_v35  ;;  %v4023_v38 = vpack.c.bf16 %v4022_v33, %v4022_v33  ;;  %v3428_v13 = vadd.f32 %v10447_v51, %v3003_v12  ;;  %v8800_v51 = vld [vmem:[#allocation10 + $0x8] sm:$0xff]   ;;  %v8801_v35 = vld [vmem:[#allocation10 + $0x10] sm:$0xff]  }
0x18af   :  { %8238 = vmatprep.subr.bf16.mxu1 %v9702_v19 }
0x18b0   :  { %v3518_v17 = vpack.c.bf16 %v3428_v13, %v3428_v13 }
0x18b1   :  { %8229 = vmatmul.mubr.msk.bf16.vlgmr.msra.gmra.mrb[76].mxu1 %vm858_vm2, %v4023_v38  ;;  %v8803_v38 = vld [vmem:[#allocation10 + $0x20] sm:$0xff]  }
0x18b2   :  { %8239 = vmatpush3.bf16.msra.mxu1 %v4140_v39  ;;  %8240 = vmatprep.mubr.msk.bf16.mxu1 %vm9703_vm0, %v9702_v19  ;;  %v4420_v26 = vsel %vm811_vm1, %v3518_v17, 0  ;;  %v8804_v39 = vld [vmem:[#allocation10 + $0x28] sm:$0xff]  }
0x18b3   :  { %v8990_v40 = vpop.eup %8989  ;;  %8264 = vmatprep.subr.bf16.mxu1 %v9702_v19 }
0x18b4   :  { %v4132_v42 = vmul.f32 %v8990_v40, %v8982_v14  ;;  %v8805_v40 = vld [vmem:[#allocation10 + $0x30] sm:$0xff]  }
0x18b6   :  { %v4133_v43 = vpack.c.bf16 %v4132_v42, %v4132_v42  ;;  %v8806_v42 = vld [vmem:[#allocation10 + $0x38] sm:$0xff]  }
0x18b9   :  { %8241 = vmatmul.mubr.msk.bf16.vlgmr.msra.gmra.mrb[80].mxu1 %vm858_vm2, %v4133_v43 }
0x18ba   :  { %8280 = vmatprep.mubr.msk.bf16.mxu1 %vm9703_vm0, %v9702_v19  ;;  %8265 = vmatpush3.bf16.msra.mxu1 %v8799_v58 }
0x18bb   :  { %8266 = vmatprep.subr.bf16.mxu1 %v9702_v19 }
0x18be   :  { %8267 = vmatpush3.bf16.msra.mxu1 %v8800_v51 }
0x18bf   :  { %8268 = vmatprep.subr.bf16.mxu1 %v9702_v19 }
0x18c2   :  { %8269 = vmatpush3.bf16.msra.mxu1 %v8801_v35 }
0x18c3   :  { %8270 = vmatprep.subr.bf16.mxu1 %v9702_v19 }
0x18c6   :  { %8271 = vmatpush3.bf16.msra.mxu1 %v8802_v36 }
0x18c7   :  { %8272 = vmatprep.subr.bf16.mxu1 %v9702_v19 }
0x18ca   :  { %8273 = vmatpush3.bf16.msra.mxu1 %v8803_v38 }
0x18cb   :  { %8274 = vmatprep.subr.bf16.mxu1 %v9702_v19 }
0x18ce   :  { %8275 = vmatpush3.bf16.msra.mxu1 %v8804_v39 }
0x18cf   :  { %8276 = vmatprep.subr.bf16.mxu1 %v9702_v19 }
0x18d2   :  { %8277 = vmatpush3.bf16.msra.mxu1 %v8805_v40 }
0x18d3   :  { %8278 = vmatprep.subr.bf16.mxu1 %v9702_v19 }
0x18d6   :  { %8279 = vmatpush3.bf16.msra.mxu1 %v8806_v42 }
0x18d7   :  { %8290 = vmatprep.subr.bf16.mxu1 %v9702_v19 }
0x1909   :  { %v3843_v44 = vpop.f32.mrb[68].mxu1 }
0x190a   :  { %v8206_v45 = vpop.f32.mrb[69].mxu1 }
0x190b   :  { %v3846_v46 = vpop.f32.mrb[70].mxu1 }
0x190c   :  { %v8207_v47 = vpop.f32.mrb[71].mxu1 }
0x197b   :  { %v3956_v59 = vpop.f32.mrb[72].mxu1 }
0x197c   :  { %4183 = vrot.lane.b32.xlu1 %v3956_v59, %s9694_s1  ;;  %v8218_v60 = vpop.f32.mrb[73].mxu1 }
0x197d   :  { %v3959_v61 = vpop.f32.mrb[74].mxu1  ;;  %v7533_v60 = vld [vmem:[#allocation22] ss:$0 sm:$0xff] }
0x197e   :  { %v8219_v63 = vpop.f32.mrb[75].mxu1 }
0x197f   :  { %v10558_v63 = vpack.c.bf16 %v3430_v32, %v3430_v32 }
0x1984   :  { %v4066_v1 = vpop.f32.mrb[76].mxu1 }
0x1985   :  { %4187 = vrot.lane.b32.xlu0 %v4066_v1, %s9671_s22  ;;  %v8230_v5 = vpop.f32.mrb[77].mxu1 }
0x1986   :  { %v4069_v6 = vpop.f32.mrb[78].mxu1 }
0x1987   :  { %v8231_v7 = vpop.f32.mrb[79].mxu1  ;;  %v4478_v6 = vsel %vm874_vm3, %v10558_v63, 0 }
0x1988   :  { %v7534_v7 = vld [vmem:[#allocation2] ss:$0 sm:$0xff] }
0x198c   :  { %v4176_v8 = vpop.f32.mrb[80].mxu1 }
0x198d   :  { %4191 = vrot.lane.b32.xlu1 %v4176_v8, %s9704_s21  ;;  %v8242_v56 = vpop.f32.mrb[81].mxu1 }
0x198e   :  { %v4179_v10 = vpop.f32.mrb[82].mxu1 }
0x198f   :  { %v8243_v11 = vpop.f32.mrb[83].mxu1 }
0x19ee   :  { %v4184_v14 = vpop.permute.xlu1 %4183 }
0x19ef   :  { %v4194_v16 = vsel %vm811_vm1, %v3843_v44, %v4184_v14 }
0x19f7   :  { %v4188_v15 = vpop.permute.xlu0 %4187 }
0x19f8   :  { %v4195_v18 = vsel %vm1264_vm4, %v4194_v16, %v4188_v15 }
0x19ff   :  { %v4192_v20 = vpop.permute.xlu1 %4191 }
0x1a00   :  { %v4196_v23 = vsel %vm1266_vm5, %v4195_v18, %v4192_v20 }
0x1a01   :  { %v4197_v25 = vpack.c.bf16 %v4196_v23, %v4196_v23 }
0x1a03   :  { %8261 = vmatmul.mubr.bf16.vlgmr.msra.gmra.mrb[72].mxu0 %v4197_v25 }
0x1a04   :  { %8285 = vmatpush3.bf16.xpose.msra.mxu0 %v4420_v26  ;;  %8286 = vmatprep.mubr.msk.bf16.mxu0 %vm9703_vm0, %v9702_v19 }
0x1a05   :  { %8296 = vmatprep.subr.bf16.mxu0 %v9702_v19 }
0x1ad6   :  { %v4286_v28 = vpop.f32.mrb[72].mxu0 }
0x1ad7   :  { %v4287_v29 = vadd.f32 %v7523_v27, %v4286_v28  ;;  %v8262_v62 = vpop.f32.mrb[73].mxu0 }
0x1ad8   :  { %v4289_v30 = vpop.f32.mrb[74].mxu0 }
0x1ad9   :  { %v4292_v31 = vadd.f32 %v4287_v29, %v10411_v41  ;;  %v8263_v33 = vpop.f32.mrb[75].mxu0 }
0x1adb   :  { %4293 = vadd.xlane.f32.xlu0 %v4292_v31  ;;  %v4296_v34 = vmul.f32 %v4292_v31, %v4292_v31 }
0x1add   :  { %4297 = vadd.xlane.f32.xlu1 %v4296_v34 }
0x1af1   :  { %4524 = vrot.lane.b32.xlu0 %v3518_v17, %s9704_s21 }
0x1af5   :  { %4635 = vrot.lane.b32.xlu0 %v3518_v17, %s9671_s22 }
0x1af9   :  { %4745 = vrot.lane.b32.xlu0 %v3518_v17, %s9694_s1 }
0x1b68   :  { %v4294_v43 = vpop.xlane.xlu0 %4293 }
0x1b69   :  { %v4295_v44 = vmul.f32 0.0078125, %v4294_v43 }
0x1b6a   :  { %v4298_v45 = vpop.xlane.xlu1 %4297 }
0x1b6b   :  { %v4300_v46 = vmul.f32 %v4295_v44, %v4295_v44  ;;  %v4299_v47 = vmul.f32 0.0078125, %v4298_v45  ;;  %v4302_v57 = vsub.f32 %v4292_v31, %v4295_v44 }
0x1b6c   :  { %v4525_v10 = vpop.permute.xlu0 %4524 }
0x1b6d   :  { %v4301_v9 = vsub.f32 %v4299_v47, %v4300_v46  ;;  %v4530_v14 = vsel %vm811_vm1, %v4525_v10, 0 }
0x1b6f   :  { %v4303_v49 = vadd.f32 1e-05, %v4301_v9 }
0x1b70   :  { %v4636_v15 = vpop.permute.xlu0 %4635 }
0x1b71   :  { %8991 = vrsqrt.f32 %v4303_v49  ;;  %v4641_v17 = vsel %vm811_vm1, %v4636_v15, 0 }
0x1b74   :  { %v4746_v18 = vpop.permute.xlu0 %4745 }
0x1b75   :  { %v4751_v23 = vsel %vm811_vm1, %v4746_v18, 0 }
0x1b7b   :  { %v8992_v55 = vpop.eup %8991 }
0x1b7c   :  { %v4311_v59 = vmul.f32 %v8992_v55, %v7532_v53 }
0x1b7e   :  { %v4312_v61 = vmul.f32 %v4311_v59, %v4302_v57 }
0x1b80   :  { %v4319_v1 = vadd.f32 %v7533_v60, %v4312_v61 }
0x1b82   :  { %v4320_v5 = vpack.c.bf16 %v4319_v1, %v4319_v1 }
0x1b84   :  { %8281 = vmatmul.mubr.bf16.vlgmr.msra.gmra.mrb[84].mxu1 %v4320_v5 }
0x1b85   :  { %8291 = vmatpush3.bf16.msra.mxu1 %v4478_v6  ;;  %8292 = vmatprep.mubr.msk.bf16.mxu1 %vm9703_vm0, %v9702_v19 }
0x1b86   :  { %8302 = vmatprep.subr.bf16.mxu1 %v9702_v19 }
0x1c57   :  { %v4409_v54 = vpop.f32.mrb[84].mxu1 }
0x1c58   :  { %v4410_v8 = vadd.f32 %v7534_v7, %v4409_v54  ;;  %v8282_v56 = vpop.f32.mrb[85].mxu1 }
0x1c59   :  { %v4412_v11 = vpop.f32.mrb[86].mxu1 }
0x1c5a   :  { %v4415_v12 = vpack.c.bf16 %v4410_v8, %v4410_v8  ;;  %v8283_v13 = vpop.f32.mrb[87].mxu1 }
0x1c5c   :  { %4521 = vrot.lane.b32.xlu1 %v4415_v12, %s9704_s21  ;;  %8287 = vmatmul.mubr.msk.bf16.vlgmr.msra.gmra.mrb[76].mxu0 %vm811_vm1, %v4415_v12 }
0x1c5d   :  { %8297 = vmatpush3.bf16.xpose.msra.mxu0 %v4530_v14  ;;  %8298 = vmatprep.mubr.msk.bf16.mxu0 %vm9703_vm0, %v9702_v19 }
0x1c5e   :  { %8308 = vmatprep.subr.bf16.mxu0 %v9702_v19 }
0x1c60   :  { %4633 = vrot.lane.b32.xlu1 %v4415_v12, %s9671_s22 }
0x1c64   :  { %4743 = vrot.lane.b32.xlu1 %v4415_v12, %s9694_s1 }
0x1cce   :  { %v4522_v16 = vpop.permute.xlu1 %4521 }
0x1ccf   :  { %8299 = vmatmul.mubr.msk.bf16.vlgmr.msra.gmra.mrb[80].mxu0 %vm811_vm1, %v4522_v16 }
0x1cd0   :  { %8309 = vmatpush3.bf16.xpose.msra.mxu0 %v4641_v17  ;;  %8310 = vmatprep.mubr.msk.bf16.mxu0 %vm9703_vm0, %v9702_v19 }
0x1cd1   :  { %8320 = vmatprep.subr.bf16.mxu0 %v9702_v19 }
0x1cd2   :  { %v4634_v20 = vpop.permute.xlu1 %4633 }
0x1cd6   :  { %v4744_v25 = vpop.permute.xlu1 %4743 }
0x1cd7   :  { %8311 = vmatmul.mubr.msk.bf16.vlgmr.msra.gmra.mrb[84].mxu0 %vm811_vm1, %v4634_v20 }
0x1cd8   :  { %8321 = vmatpush3.bf16.xpose.msra.mxu0 %v4751_v23  ;;  %8322 = vmatprep.mubr.msk.bf16.mxu0 %vm9703_vm0, %v9702_v19 }
0x1cd9   :  { %8332 = vmatprep.subr.bf16.mxu0 %v9702_v19 }
0x1cdf   :  { %8323 = vmatmul.mubr.msk.bf16.vlgmr.msra.gmra.mrb[88].mxu0 %vm811_vm1, %v4744_v25 }
0x1ce0   :  { %8348 = vmatprep.mubr.msk.bf16.mxu0 %vm9703_vm0, %v9702_v19 }
0x1d2f   :  { %v4456_v26 = vpop.f32.mrb[76].mxu0 }
0x1d30   :  { %v8288_v58 = vpop.f32.mrb[77].mxu0  ;;  %v4462_v51 = vsel %vm858_vm2, %v4456_v26, -inf }
0x1d31   :  { %4463 = vmax.xlane.f32.xlu0 %v4462_v51  ;;  %v4459_v27 = vpop.f32.mrb[78].mxu0 }
0x1d32   :  { %v8289_v28 = vpop.f32.mrb[79].mxu0 }
0x1da2   :  { %v4566_v29 = vpop.f32.mrb[80].mxu0 }
0x1da3   :  { %v8300_v62 = vpop.f32.mrb[81].mxu0  ;;  %v4572_v30 = vsel %vm858_vm2, %v4566_v29, -inf }
0x1da4   :  { %4573 = vmax.xlane.f32.xlu1 %v4572_v30  ;;  %v4569_v31 = vpop.f32.mrb[82].mxu0 }
0x1da5   :  { %v8301_v33 = vpop.f32.mrb[83].mxu0 }
0x1daa   :  { %v4677_v34 = vpop.f32.mrb[84].mxu0 }
0x1dab   :  { %v8312_v35 = vpop.f32.mrb[85].mxu0  ;;  %v4683_v36 = vsel %vm858_vm2, %v4677_v34, -inf }
0x1dac   :  { %4684 = vmax.xlane.f32.xlu0 %v4683_v36  ;;  %v4680_v38 = vpop.f32.mrb[86].mxu0 }
0x1dad   :  { %v8313_v39 = vpop.f32.mrb[87].mxu0  ;;  %v8807_v38 = vld [vmem:[#allocation8] sm:$0xff]  }
0x1dae   :  { %8333 = vmatpush3.bf16.msra.mxu0 %v8807_v38  ;;  %v8808_v39 = vld [vmem:[#allocation8 + $0x8] sm:$0xff]  }
0x1daf   :  { %8334 = vmatprep.subr.bf16.mxu0 %v9702_v19  ;;  %v8839_v38 = vld [vmem:[#allocation17 + $0x40] sm:$0xff]  }
0x1db2   :  { %v4787_v40 = vpop.f32.mrb[88].mxu0  ;;  %8335 = vmatpush3.bf16.msra.mxu0 %v8808_v39  ;;  %v8840_v39 = vld [vmem:[#allocation17] sm:$0xff]  }
0x1db3   :  { %v8324_v42 = vpop.f32.mrb[89].mxu0  ;;  %v4793_v43 = vsel %vm858_vm2, %v4787_v40, -inf  ;;  %8336 = vmatprep.subr.bf16.mxu0 %v9702_v19 }
0x1db4   :  { %4794 = vmax.xlane.f32.xlu0 %v4793_v43  ;;  %v4790_v44 = vpop.f32.mrb[90].mxu0  ;;  %v8810_v42 = vld [vmem:[#allocation8 + $0x18] sm:$0xff]   ;;  %v8811_v43 = vld [vmem:[#allocation8 + $0x20] sm:$0xff]  }
0x1db5   :  { %v8325_v45 = vpop.f32.mrb[91].mxu0  ;;  %v8812_v44 = vld [vmem:[#allocation8 + $0x28] sm:$0xff]  }
0x1db6   :  { %v8813_v45 = vld [vmem:[#allocation8 + $0x30] sm:$0xff]  }
0x1dbe   :  { %v4464_v46 = vpop.xlane.xlu0 %4463 }
0x1dbf   :  { %v4465_v47 = vsub.f32 %v4456_v26, %v4464_v46 }
0x1dc1   :  { %v4466_v9 = vmul.f32 1.442695, %v4465_v47 }
0x1dc3   :  { %8993 = vpow2.f32 %v4466_v9 }
0x1dcd   :  { %v8994_v49 = vpop.eup %8993 }
0x1dce   :  { %v4468_v50 = vsel %vm858_vm2, %v8994_v49, 0.0 }
0x1dcf   :  { %4469 = vadd.xlane.f32.xlu1 %v4468_v50  ;;  %v8814_v50 = vld [vmem:[#allocation8 + $0x38] sm:$0xff]  }
0x1de0   :  { %4585 = vrot.lane.b32.xlu1 %v10558_v63, %s9704_s21 }
0x1e31   :  { %v4574_v52 = vpop.xlane.xlu1 %4573 }
0x1e32   :  { %v4575_v53 = vsub.f32 %v4566_v29, %v4574_v52 }
0x1e34   :  { %v4576_v55 = vmul.f32 1.442695, %v4575_v53 }
0x1e36   :  { %8995 = vpow2.f32 %v4576_v55 }
0x1e39   :  { %v4685_v32 = vpop.xlane.xlu0 %4684 }
0x1e3a   :  { %v4686_v57 = vsub.f32 %v4677_v34, %v4685_v32 }
0x1e3c   :  { %v4687_v59 = vmul.f32 1.442695, %v4686_v57 }
0x1e3e   :  { %8997 = vpow2.f32 %v4687_v59 }
0x1e40   :  { %v8996_v60 = vpop.eup %8995 }
0x1e41   :  { %v4795_v61 = vpop.xlane.xlu0 %4794  ;;  %v4578_v1 = vsel %vm858_vm2, %v8996_v60, 0.0 }
0x1e42   :  { %v4796_v5 = vsub.f32 %v4787_v40, %v4795_v61  ;;  %4579 = vadd.xlane.f32.xlu0 %v4578_v1  ;;  %v8809_v40 = vld [vmem:[#allocation8 + $0x10] sm:$0xff]  }
0x1e43   :  { %8337 = vmatpush3.bf16.msra.mxu0 %v8809_v40  ;;  %v8841_v40 = vld [vmem:[#allocation17 + $0x48] sm:$0xff]  }
0x1e44   :  { %v4797_v6 = vmul.f32 1.442695, %v4796_v5  ;;  %8338 = vmatprep.subr.bf16.mxu0 %v9702_v19 }
0x1e46   :  { %8999 = vpow2.f32 %v4797_v6 }
0x1e47   :  { %8339 = vmatpush3.bf16.msra.mxu0 %v8810_v42  ;;  %v8842_v42 = vld [vmem:[#allocation17 + $0x8] sm:$0xff]  }
0x1e48   :  { %v8998_v7 = vpop.eup %8997  ;;  %8340 = vmatprep.subr.bf16.mxu0 %v9702_v19 }
0x1e49   :  { %v4689_v54 = vsel %vm858_vm2, %v8998_v7, 0.0 }
0x1e4a   :  { %4690 = vadd.xlane.f32.xlu1 %v4689_v54 }
0x1e4b   :  { %8341 = vmatpush3.bf16.msra.mxu0 %v8811_v43  ;;  %v8843_v43 = vld [vmem:[#allocation17 + $0x50] sm:$0xff]  }
0x1e4c   :  { %8342 = vmatprep.subr.bf16.mxu0 %v9702_v19 }
0x1e4f   :  { %8343 = vmatpush3.bf16.msra.mxu0 %v8812_v44  ;;  %v8844_v44 = vld [vmem:[#allocation17 + $0x10] sm:$0xff]  }
0x1e50   :  { %v9000_v8 = vpop.eup %8999  ;;  %8344 = vmatprep.subr.bf16.mxu0 %v9702_v19 }
0x1e51   :  { %v4799_v56 = vsel %vm858_vm2, %v9000_v8, 0.0 }
0x1e52   :  { %4800 = vadd.xlane.f32.xlu0 %v4799_v56 }
0x1e53   :  { %8345 = vmatpush3.bf16.msra.mxu0 %v8813_v45  ;;  %v8845_v45 = vld [vmem:[#allocation17 + $0x58] sm:$0xff]  }
0x1e54   :  { %8346 = vmatprep.subr.bf16.mxu0 %v9702_v19 }
0x1e57   :  { %8347 = vmatpush3.bf16.msra.mxu0 %v8814_v50  ;;  %v8850_v50 = vld [vmem:[#allocation17 + $0x28] sm:$0xff]  }
0x1e58   :  { %7879 = vmatprep.subr.bf16.mxu0 %v8839_v38 }
0x1e5b   :  { %4805 = vrot.lane.b32.xlu1 %v10558_v63, %s9694_s1 }
0x1e5c   :  { %v4470_v10 = vpop.xlane.xlu1 %4469 }
0x1e5d   :  { %9001 = vrcp.f32 %v4470_v10  ;;  %v8815_v10 = vld [vmem:[#allocation16] ss:$8 sps:$4 sm:$0xff]  }
0x1e60   :  { %v4586_v13 = vpop.permute.xlu1 %4585 }
0x1e61   :  { %v4591_v15 = vsel %vm874_vm3, %v4586_v13, 0  ;;  %v8818_v13 = vld [vmem:[#allocation16 + $0x10] ss:$8 sps:$4 sm:$0xff]  }
0x1e67   :  { %v9002_v11 = vpop.eup %9001 }
0x1e68   :  { %v4472_v12 = vmul.f32 %v9002_v11, %v8994_v49  ;;  %4695 = vrot.lane.b32.xlu0 %v10558_v63, %s9671_s22  ;;  %v8817_v11 = vld [vmem:[#allocation16 + $0x4] ss:$8 sps:$4 sm:$0xff]  }
0x1e6a   :  { %v4473_v14 = vpack.c.bf16 %v4472_v12, %v4472_v12  ;;  %v8820_v12 = vld [vmem:[#allocation16 + $0x14] ss:$8 sps:$4 sm:$0xff]  }
0x1e6c   :  { %8293 = vmatmul.mubr.msk.bf16.vlgmr.msra.gmra.mrb[88].mxu1 %vm858_vm2, %v4473_v14  ;;  %v7551_v14 = vld [vmem:[%s10922_s20] ss:$0 sm:$0xff] }
0x1e6d   :  { %8303 = vmatpush3.bf16.msra.mxu1 %v4591_v15  ;;  %8304 = vmatprep.mubr.msk.bf16.mxu1 %vm9703_vm0, %v9702_v19 }
0x1e6e   :  { %8314 = vmatprep.subr.bf16.mxu1 %v9702_v19 }
0x1ecf   :  { %v4580_v16 = vpop.xlane.xlu0 %4579 }
0x1ed0   :  { %9003 = vrcp.f32 %v4580_v16 }
0x1ed7   :  { %v4691_v17 = vpop.xlane.xlu1 %4690 }
0x1ed8   :  { %9005 = vrcp.f32 %v4691_v17 }
0x1eda   :  { %v9004_v18 = vpop.eup %9003 }
0x1edb   :  { %v4582_v20 = vmul.f32 %v9004_v18, %v8996_v60  ;;  %v4806_v27 = vpop.permute.xlu1 %4805 }
0x1edc   :  { %v4811_v29 = vsel %vm874_vm3, %v4806_v27, 0  ;;  %v8823_v27 = vld [vmem:[#allocation16 + $0x24] ss:$8 sps:$4 sm:$0xff]  }
0x1edd   :  { %v4583_v23 = vpack.c.bf16 %v4582_v20, %v4582_v20 }
0x1edf   :  { %8305 = vmatmul.mubr.msk.bf16.vlgmr.msra.gmra.mrb[92].mxu1 %vm858_vm2, %v4583_v23  ;;  %v4801_v63 = vpop.xlane.xlu0 %4800 }
0x1ee0   :  { %9007 = vrcp.f32 %v4801_v63  ;;  %8316 = vmatprep.mubr.msk.bf16.mxu1 %vm9703_vm0, %v9702_v19 }
0x1ee2   :  { %v9006_v25 = vpop.eup %9005 }
0x1ee3   :  { %v4693_v26 = vmul.f32 %v9006_v25, %v8998_v7  ;;  %v4696_v58 = vpop.permute.xlu0 %4695  ;;  %v3010_v25 = vsub.s32 4, %v10154_v21 }
0x1ee4   :  { %v4701_v51 = vsel %vm874_vm3, %v4696_v58, 0 }
0x1ee5   :  { %8315 = vmatpush3.bf16.msra.mxu1 %v4701_v51  ;;  %v4694_v28 = vpack.c.bf16 %v4693_v26, %v4693_v26  ;;  %v3011_v26 = vrot.slane %v10441_v48, %v3010_v25  ;;  %v8829_v48 = vld [vmem:[#allocation16 + $0x44] ss:$8 sps:$4 sm:$0xff]  }
0x1ee6   :  { %8326 = vmatprep.subr.bf16.mxu1 %v9702_v19 }
0x1ee7   :  { %v3469_v58 = vadd.f32 %v10460_v2, %v3011_v26  ;;  %v8830_v2 = vld [vmem:[#allocation16 + $0x50] ss:$8 sps:$4 sm:$0xff]  }
0x1ee8   :  { %8317 = vmatmul.mubr.msk.bf16.vlgmr.msra.gmra.mrb[96].mxu1 %vm858_vm2, %v4694_v28  ;;  %v8821_v28 = vld [vmem:[#allocation16 + $0x20] ss:$8 sps:$4 sm:$0xff]  }
0x1ee9   :  { %8327 = vmatpush3.bf16.msra.mxu1 %v4811_v29  ;;  %8328 = vmatprep.mubr.msk.bf16.mxu1 %vm9703_vm0, %v9702_v19  ;;  %v10639_v51 = vpack.c.bf16 %v3469_v58, %v3469_v58  ;;  %v8826_v29 = vld [vmem:[#allocation16 + $0x34] ss:$8 sps:$4 sm:$0xff]  }
0x1eea   :  { %v9008_v62 = vpop.eup %9007  ;;  %5083 = vmatprep.subr.bf16.mxu1 %v8817_v11 }
0x1eeb   :  { %v4803_v30 = vmul.f32 %v9008_v62, %v9000_v8  ;;  %v8824_v62 = vld [vmem:[#allocation16 + $0x30] ss:$8 sps:$4 sm:$0xff]  }
0x1eed   :  { %v4804_v31 = vpack.c.bf16 %v4803_v30, %v4803_v30  ;;  %v8827_v30 = vld [vmem:[#allocation16 + $0x40] ss:$8 sps:$4 sm:$0xff]  }
0x1ef0   :  { %8329 = vmatmul.mubr.msk.bf16.vlgmr.msra.gmra.mrb[100].mxu1 %vm858_vm2, %v4804_v31  ;;  %v8832_v31 = vld [vmem:[#allocation16 + $0x54] ss:$8 sps:$4 sm:$0xff]  }
0x1ef1   :  { %5115 = vmatprep.mubr.bf16.mxu1 %v9701_v0  ;;  %5084 = vmatpush1.bf16.msra.mxu1 %v8815_v10 }
0x1ef2   :  { %5085 = vmatprep.subr.bf16.mxu1 %v8820_v12 }
0x1ef5   :  { %5086 = vmatpush1.bf16.msra.mxu1 %v8818_v13  ;;  %v8854_v13 = vld [vmem:[#allocation17 + $0x38] sm:$0xff]  }
0x1ef6   :  { %5087 = vmatprep.subr.bf16.mxu1 %v8823_v27 }
0x1ef9   :  { %5088 = vmatpush1.bf16.msra.mxu1 %v8821_v28 }
0x1efa   :  { %5089 = vmatprep.subr.bf16.mxu1 %v8826_v29  ;;  %v5540_v29 = vsel %vm811_vm1, %v10639_v51, 0 }
0x1efd   :  { %5090 = vmatpush1.bf16.msra.mxu1 %v8824_v62  ;;  %v8855_v62 = vld [vmem:[#allocation26 + $0x40] sm:$0xff]  }
0x1efe   :  { %5091 = vmatprep.subr.bf16.mxu1 %v8829_v48  ;;  %v7578_v48 = vld [vmem:[#allocation11] ss:$0 sm:$0xff] }
0x1f01   :  { %5092 = vmatpush1.bf16.msra.mxu1 %v8827_v30 }
0x1f02   :  { %5093 = vmatprep.subr.bf16.mxu1 %v8832_v31 }
0x1f05   :  { %5094 = vmatpush1.bf16.msra.mxu1 %v8830_v2 }
0x1f3f   :  { %v4514_v33 = vpop.f32.mrb[88].mxu1 }
0x1f40   :  { %v8294_v34 = vpop.f32.mrb[89].mxu1 }
0x1f41   :  { %v4517_v35 = vpop.f32.mrb[90].mxu1  ;;  %v8833_v34 = vld [vmem:[#allocation16 + $0x60] ss:$8 sps:$4 sm:$0xff]  }
0x1f42   :  { %v8295_v36 = vpop.f32.mrb[91].mxu1  ;;  %v8838_v35 = vld [vmem:[#allocation16 + $0x74] ss:$8 sps:$4 sm:$0xff]  }
0x1f43   :  { %v8836_v36 = vld [vmem:[#allocation16 + $0x70] ss:$8 sps:$4 sm:$0xff]  }
0x1fb2   :  { %v4627_v46 = vpop.f32.mrb[92].mxu1 }
0x1fb3   :  { %4854 = vrot.lane.b32.xlu1 %v4627_v46, %s9694_s1  ;;  %v8306_v47 = vpop.f32.mrb[93].mxu1  ;;  %v8846_v46 = vld [vmem:[#allocation17 + $0x18] sm:$0xff]  }
0x1fb4   :  { %v4630_v9 = vpop.f32.mrb[94].mxu1  ;;  %v8847_v47 = vld [vmem:[#allocation17 + $0x60] sm:$0xff]  }
0x1fb5   :  { %v8307_v49 = vpop.f32.mrb[95].mxu1  ;;  %v8848_v9 = vld [vmem:[#allocation17 + $0x20] sm:$0xff]  }
0x1fb6   :  { %v8849_v49 = vld [vmem:[#allocation17 + $0x68] sm:$0xff]  }
0x1fbb   :  { %v4737_v52 = vpop.f32.mrb[96].mxu1 }
0x1fbc   :  { %4858 = vrot.lane.b32.xlu0 %v4737_v52, %s9671_s22  ;;  %v8318_v53 = vpop.f32.mrb[97].mxu1  ;;  %v8851_v52 = vld [vmem:[#allocation17 + $0x70] sm:$0xff]  }
0x1fbd   :  { %v4740_v55 = vpop.f32.mrb[98].mxu1  ;;  %v8852_v53 = vld [vmem:[#allocation17 + $0x30] sm:$0xff]  }
0x1fbe   :  { %v8319_v32 = vpop.f32.mrb[99].mxu1  ;;  %v8853_v55 = vld [vmem:[#allocation17 + $0x78] sm:$0xff]  }
0x1fc3   :  { %v4847_v57 = vpop.f32.mrb[100].mxu1 }
0x1fc4   :  { %4862 = vrot.lane.b32.xlu1 %v4847_v57, %s9704_s21  ;;  %v8330_v59 = vpop.f32.mrb[101].mxu1 }
0x1fc5   :  { %v4850_v60 = vpop.f32.mrb[102].mxu1 }
0x1fc6   :  { %v8331_v61 = vpop.f32.mrb[103].mxu1 }
0x2025   :  { %v4855_v1 = vpop.permute.xlu1 %4854 }
0x2026   :  { %v4865_v6 = vsel %vm811_vm1, %v4514_v33, %v4855_v1  ;;  %v8835_v33 = vld [vmem:[#allocation16 + $0x64] ss:$8 sps:$4 sm:$0xff]  }
0x2027   :  { %5095 = vmatprep.subr.bf16.mxu1 %v8835_v33 }
0x2028   :  { %5096 = vmatpush1.bf16.msra.mxu1 %v8833_v34 }
0x2029   :  { %5097 = vmatprep.subr.bf16.mxu1 %v8838_v35 }
0x202c   :  { %5098 = vmatpush1.bf16.msra.mxu1 %v8836_v36 }
0x202d   :  { %8352 = vmatprep.subr.bf16.mxu1 %v9702_v19 }
0x202e   :  { %v4859_v5 = vpop.permute.xlu0 %4858 }
0x202f   :  { %v4866_v7 = vsel %vm1264_vm4, %v4865_v6, %v4859_v5  ;;  %v7560_v6 = vld [vmem:[#allocation7] ss:$0 sm:$0xff] }
0x2036   :  { %v4863_v54 = vpop.permute.xlu1 %4862 }
0x2037   :  { %v4867_v8 = vsel %vm1266_vm5, %v4866_v7, %v4863_v54 }
0x2038   :  { %v4868_v56 = vpack.c.bf16 %v4867_v8, %v4867_v8 }
0x203a   :  { %8349 = vmatmul.mubr.bf16.vlgmr.msra.gmra.mrb[92].mxu0 %v4868_v56  ;;  %v7561_v56 = vld [vmem:[#allocation5] ss:$0 sm:$0xff] }
0x203b   :  { %7880 = vmatpush3.bf16.msra.mxu0 %v8840_v39  ;;  %v8856_v39 = vld [vmem:[#allocation26 + $0x48] sm:$0xff]  }
0x203c   :  { %7881 = vmatprep.subr.bf16.mxu0 %v8841_v40  ;;  %v8857_v40 = vld [vmem:[#allocation26 + $0x50] sm:$0xff]  }
0x203f   :  { %7882 = vmatpush3.bf16.msra.mxu0 %v8842_v42  ;;  %v8858_v42 = vld [vmem:[#allocation26 + $0x58] sm:$0xff]  }
0x2040   :  { %7883 = vmatprep.subr.bf16.mxu0 %v8843_v43  ;;  %v8859_v43 = vld [vmem:[#allocation26 + $0x60] sm:$0xff]  }
0x2043   :  { %7884 = vmatpush3.bf16.msra.mxu0 %v8844_v44  ;;  %v8860_v44 = vld [vmem:[#allocation26 + $0x68] sm:$0xff]  }
0x2044   :  { %7885 = vmatprep.subr.bf16.mxu0 %v8845_v45  ;;  %v8861_v45 = vld [vmem:[#allocation26 + $0x70] sm:$0xff]  }
0x2047   :  { %7886 = vmatpush3.bf16.msra.mxu0 %v8846_v46  ;;  %v8862_v46 = vld [vmem:[#allocation26 + $0x78] sm:$0xff]  }
0x2048   :  { %7887 = vmatprep.subr.bf16.mxu0 %v8847_v47 }
0x204b   :  { %7888 = vmatpush3.bf16.msra.mxu0 %v8848_v9 }
0x204c   :  { %7889 = vmatprep.subr.bf16.mxu0 %v8849_v49 }
0x204f   :  { %7890 = vmatpush3.bf16.msra.mxu0 %v8850_v50 }
0x2050   :  { %7891 = vmatprep.subr.bf16.mxu0 %v8851_v52 }
0x2053   :  { %7892 = vmatpush3.bf16.msra.mxu0 %v8852_v53 }
0x2054   :  { %7893 = vmatprep.subr.bf16.mxu0 %v8853_v55 }
0x2057   :  { %7894 = vmatpush3.bf16.msra.mxu0 %v8854_v13 }
0x2058   :  { %8372 = vmatprep.subr.bf16.mxu0 %v9702_v19 }
0x210d   :  { %v4957_v15 = vpop.f32.mrb[92].mxu0 }
0x210e   :  { %v4958_v16 = vadd.f32 %v7551_v14, %v4957_v15  ;;  %v8350_v17 = vpop.f32.mrb[93].mxu0  ;;  %v3561_v14 = vld [vmem:[%s10923_s9] sm:$0x3] }
0x210f   :  { %v4960_v18 = vpop.f32.mrb[94].mxu0  ;;  %v4996_v15 = vrot.slane %v3561_v14, %v10163_v24 }
0x2110   :  { %v10631_v20 = vadd.f32 %v4958_v16, %v10411_v41  ;;  %v8351_v23 = vpop.f32.mrb[95].mxu0  ;;  %v5000_v16 = vrot.slane %v3561_v14, %v10157_v22 }
0x2112   :  { %4964 = vadd.xlane.f32.xlu0 %v10631_v20  ;;  %v4967_v63 = vmul.f32 %v10631_v20, %v10631_v20 }
0x2114   :  { %4968 = vadd.xlane.f32.xlu1 %v4967_v63 }
0x2125   :  { %5644 = vrot.lane.b32.xlu1 %v10639_v51, %s9704_s21 }
0x2129   :  { %5755 = vrot.lane.b32.xlu1 %v10639_v51, %s9671_s22 }
0x219f   :  { %v4965_v32 = vpop.xlane.xlu0 %4964 }
0x21a0   :  { %v4966_v57 = vmul.f32 0.0078125, %v4965_v32  ;;  %v3014_v32 = vsub.s32 5, %v10154_v21 }
0x21a1   :  { %v4969_v59 = vpop.xlane.xlu1 %4968 }
0x21a2   :  { %v4971_v60 = vmul.f32 %v4966_v57, %v4966_v57  ;;  %v4970_v61 = vmul.f32 0.0078125, %v4969_v59  ;;  %v4973_v54 = vsub.f32 %v10631_v20, %v4966_v57  ;;  %v10668_v57 = vld [vmem:[%s10921_s2] sm:$0xff] }
0x21a3   :  { %v3015_v59 = vrot.slane %v10668_v57, %v3014_v32 }
0x21a4   :  { %v4972_v1 = vsub.f32 %v4970_v61, %v4971_v60  ;;  %v7595_v60 = vld [vmem:[#allocation14] ss:$0 sm:$0xff] }
0x21a6   :  { %v4974_v5 = vadd.f32 1e-05, %v4972_v1  ;;  %v3471_v1 = vadd.f32 %v10464_v37, %v3015_v59 }
0x21a8   :  { %9009 = vrsqrt.f32 %v4974_v5 }
0x21b2   :  { %v9010_v7 = vpop.eup %9009 }
0x21b3   :  { %v4982_v8 = vmul.f32 %v9010_v7, %v7560_v6  ;;  %v7596_v7 = vld [vmem:[#allocation13] ss:$0 sm:$0xff] }
0x21b5   :  { %v4983_v10 = vmul.f32 %v4982_v8, %v4973_v54  ;;  %v10672_v8 = vpack.c.bf16 %v3471_v1, %v3471_v1 }
0x21b7   :  { %v4990_v11 = vadd.f32 %v7561_v56, %v4983_v10 }
0x21b9   :  { %v4991_v12 = vpack.c.bf16 %v4990_v11, %v4990_v11 }
0x21bb   :  { %5116 = vmatmul.mubr.bf16.vlgmr.msra.gmra.mrb[104].mxu1 %v4991_v12  ;;  %v7599_v12 = vld [vmem:[#allocation20 + $0x1] ss:$0 sm:$0xff] }
0x21bc   :  { %8368 = vmatprep.mubr.msk.bf16.mxu1 %vm9703_vm0, %v9702_v19  ;;  %8353 = vmatpush3.bf16.msra.mxu1 %v8855_v62 }
0x21bd   :  { %8354 = vmatprep.subr.bf16.mxu1 %v9702_v19 }
0x21c0   :  { %8355 = vmatpush3.bf16.msra.mxu1 %v8856_v39 }
0x21c1   :  { %8356 = vmatprep.subr.bf16.mxu1 %v9702_v19 }
0x21c4   :  { %8357 = vmatpush3.bf16.msra.mxu1 %v8857_v40 }
0x21c5   :  { %8358 = vmatprep.subr.bf16.mxu1 %v9702_v19 }
0x21c8   :  { %8359 = vmatpush3.bf16.msra.mxu1 %v8858_v42 }
0x21c9   :  { %8360 = vmatprep.subr.bf16.mxu1 %v9702_v19 }
0x21cc   :  { %8361 = vmatpush3.bf16.msra.mxu1 %v8859_v43 }
0x21cd   :  { %8362 = vmatprep.subr.bf16.mxu1 %v9702_v19 }
0x21d0   :  { %8363 = vmatpush3.bf16.msra.mxu1 %v8860_v44 }
0x21d1   :  { %8364 = vmatprep.subr.bf16.mxu1 %v9702_v19 }
0x21d4   :  { %8365 = vmatpush3.bf16.msra.mxu1 %v8861_v45 }
0x21d5   :  { %8366 = vmatprep.subr.bf16.mxu1 %v9702_v19 }
0x21d8   :  { %8367 = vmatpush3.bf16.msra.mxu1 %v8862_v46 }
0x21d9   :  { %8378 = vmatprep.subr.bf16.mxu1 %v9702_v19 }
0x228e   :  { %v5117_v17 = vpop.f32.mrb[104].mxu1 }
0x228f   :  { %v5118_v18 = vadd.f32 %v5117_v17, %v4996_v15  ;;  %v5119_v20 = vpop.f32.mrb[105].mxu1 }
0x2290   :  { %v5120_v23 = vadd.f32 %v5119_v20, %v5000_v16  ;;  %v5121_v63 = vpop.f32.mrb[106].mxu1  ;;  %v5645_v16 = vpop.permute.xlu1 %5644 }
0x2291   :  { %v5124_v25 = vmax.f32 %v5118_v18, 0.0  ;;  %v5122_v26 = vpop.f32.mrb[107].mxu1  ;;  %v5650_v20 = vsel %vm811_vm1, %v5645_v16, 0 }
0x2292   :  { %v5125_v58 = vmax.f32 %v5120_v23, 0.0 }
0x2293   :  { %v5126_v28 = vpack.c.bf16 %v5124_v25, %v5124_v25 }
0x2294   :  { %v5127_v27 = vpack.c.bf16 %v5125_v58, %v5125_v58  ;;  %v5756_v23 = vpop.permute.xlu1 %5755 }
0x2295   :  { %v5761_v25 = vsel %vm811_vm1, %v5756_v23, 0 }
0x2296   :  { %5262 = vmatprep.mubr.bf16.mxu0 %v5127_v27 }
0x2297   :  { %5263 = vmatmul.mubr.bf16.vlgmr.msra.gmra.mrb[96].mxu0 %v5126_v28 }
0x2298   :  { %8373 = vmatpush3.bf16.xpose.msra.mxu0 %v5540_v29  ;;  %8374 = vmatprep.mubr.msk.bf16.mxu0 %vm9703_vm0, %v9702_v19 }
0x2299   :  { %8384 = vmatprep.subr.bf16.mxu0 %v9702_v19 }
0x236a   :  { %v7895_v30 = vpop.f32.mrb[96].mxu0 }
0x236b   :  { %v7896_v31 = vpop.f32.mrb[97].mxu0 }
0x236c   :  { %v7897_v2 = vadd.f32 %v7896_v31, %v7895_v30  ;;  %v7898_v33 = vpop.f32.mrb[98].mxu0 }
0x236d   :  { %v7899_v34 = vpop.f32.mrb[99].mxu0 }
0x236e   :  { %v5265_v35 = vadd.f32 %v7897_v2, %v7578_v48 }
0x2370   :  { %v5270_v36 = vadd.f32 %v5265_v35, %v4990_v11  ;;  %v5598_v11 = vsel %vm874_vm3, %v10672_v8, 0 }
0x2372   :  { %5271 = vadd.xlane.f32.xlu0 %v5270_v36  ;;  %v5274_v38 = vmul.f32 %v5270_v36, %v5270_v36 }
0x2376   :  { %5275 = vadd.xlane.f32.xlu0 %v5274_v38 }
0x23ff   :  { %v5272_v47 = vpop.xlane.xlu0 %5271 }
0x2400   :  { %v5273_v9 = vmul.f32 0.0078125, %v5272_v47 }
0x2402   :  { %v5278_v50 = vmul.f32 %v5273_v9, %v5273_v9  ;;  %v5280_v5 = vsub.f32 %v5270_v36, %v5273_v9 }
0x2403   :  { %v5276_v49 = vpop.xlane.xlu0 %5275 }
0x2404   :  { %v5277_v52 = vmul.f32 0.0078125, %v5276_v49 }
0x2406   :  { %v5279_v53 = vsub.f32 %v5277_v52, %v5278_v50 }
0x2408   :  { %v5281_v55 = vadd.f32 1e-05, %v5279_v53 }
0x240a   :  { %9011 = vrsqrt.f32 %v5281_v55 }
0x2414   :  { %v9012_v61 = vpop.eup %9011 }
0x2415   :  { %v5289_v6 = vmul.f32 %v9012_v61, %v7595_v60 }
0x2417   :  { %v5290_v54 = vmul.f32 %v5289_v6, %v5280_v5 }
0x2419   :  { %v5297_v56 = vadd.f32 %v7596_v7, %v5290_v54 }
0x241b   :  { %v5440_v10 = vpack.c.bf16 %v5297_v56, %v5297_v56 }
0x241d   :  { %8369 = vmatmul.mubr.bf16.vlgmr.msra.gmra.mrb[108].mxu1 %v5440_v10 }
0x241e   :  { %8379 = vmatpush3.bf16.msra.mxu1 %v5598_v11  ;;  %8380 = vmatprep.mubr.msk.bf16.mxu1 %vm9703_vm0, %v9702_v19 }
0x241f   :  { %8390 = vmatprep.subr.bf16.mxu1 %v9702_v19 }
0x24f0   :  { %v5529_v37 = vpop.f32.mrb[108].mxu1 }
0x24f1   :  { %v5530_v13 = vadd.f32 %v7599_v12, %v5529_v37  ;;  %v8370_v14 = vpop.f32.mrb[109].mxu1 }
0x24f2   :  { %v5532_v15 = vpop.f32.mrb[110].mxu1 }
0x24f3   :  { %v5535_v17 = vpack.c.bf16 %v5530_v13, %v5530_v13  ;;  %v8371_v18 = vpop.f32.mrb[111].mxu1 }
0x24f5   :  { %5753 = vrot.lane.b32.xlu1 %v5535_v17, %s9671_s22  ;;  %5641 = vrot.lane.b32.xlu0 %v5535_v17, %s9704_s21 }
0x24f6   :  { %8375 = vmatmul.mubr.msk.bf16.vlgmr.msra.gmra.mrb[100].mxu0 %vm811_vm1, %v5535_v17 }
0x24f7   :  { %8385 = vmatpush3.bf16.xpose.msra.mxu0 %v5650_v20  ;;  %8386 = vmatprep.mubr.msk.bf16.mxu0 %vm9703_vm0, %v9702_v19 }
0x24f8   :  { %8396 = vmatprep.subr.bf16.mxu0 %v9702_v19 }
0x24f9   :  { %5863 = vrot.lane.b32.xlu1 %v5535_v17, %s9694_s1  ;;  %5865 = vrot.lane.b32.xlu0 %v10639_v51, %s9694_s1 }
0x2567   :  { %v5642_v63 = vpop.permute.xlu0 %5641  ;;  %v5754_v58 = vpop.permute.xlu1 %5753 }
0x2568   :  { %8387 = vmatmul.mubr.msk.bf16.vlgmr.msra.gmra.mrb[104].mxu0 %vm811_vm1, %v5642_v63 }
0x2569   :  { %8397 = vmatpush3.bf16.xpose.msra.mxu0 %v5761_v25  ;;  %8398 = vmatprep.mubr.msk.bf16.mxu0 %vm9703_vm0, %v9702_v19 }
0x256a   :  { %8408 = vmatprep.subr.bf16.mxu0 %v9702_v19 }
0x256b   :  { %v5866_v26 = vpop.permute.xlu0 %5865  ;;  %v5864_v51 = vpop.permute.xlu1 %5863 }
0x256c   :  { %v5871_v27 = vsel %vm811_vm1, %v5866_v26, 0 }
0x2570   :  { %8399 = vmatmul.mubr.msk.bf16.vlgmr.msra.gmra.mrb[108].mxu0 %vm811_vm1, %v5754_v58 }
0x2571   :  { %8409 = vmatpush3.bf16.xpose.msra.mxu0 %v5871_v27  ;;  %8410 = vmatprep.mubr.msk.bf16.mxu0 %vm9703_vm0, %v9702_v19 }
0x2572   :  { %8420 = vmatprep.subr.bf16.mxu0 %v9702_v19 }
0x2578   :  { %8411 = vmatmul.mubr.msk.bf16.vlgmr.msra.gmra.mrb[112].mxu0 %vm811_vm1, %v5864_v51 }
0x2579   :  { %8436 = vmatprep.mubr.msk.bf16.mxu0 %vm9703_vm0, %v9702_v19 }
0x25c9   :  { %v5576_v28 = vpop.f32.mrb[100].mxu0 }
0x25ca   :  { %v8376_v29 = vpop.f32.mrb[101].mxu0  ;;  %v5582_v62 = vsel %vm858_vm2, %v5576_v28, -inf }
0x25cb   :  { %5583 = vmax.xlane.f32.xlu0 %v5582_v62  ;;  %v5579_v30 = vpop.f32.mrb[102].mxu0 }
0x25cc   :  { %v8377_v48 = vpop.f32.mrb[103].mxu0 }
0x263b   :  { %v5686_v31 = vpop.f32.mrb[104].mxu0 }
0x263c   :  { %v8388_v2 = vpop.f32.mrb[105].mxu0  ;;  %v5692_v33 = vsel %vm858_vm2, %v5686_v31, -inf }
0x263d   :  { %5693 = vmax.xlane.f32.xlu1 %v5692_v33  ;;  %v5689_v34 = vpop.f32.mrb[106].mxu0 }
0x263e   :  { %v8389_v35 = vpop.f32.mrb[107].mxu0 }
0x2643   :  { %v5797_v36 = vpop.f32.mrb[108].mxu0 }
0x2644   :  { %v8400_v38 = vpop.f32.mrb[109].mxu0  ;;  %v5803_v39 = vsel %vm858_vm2, %v5797_v36, -inf }
0x2645   :  { %5804 = vmax.xlane.f32.xlu0 %v5803_v39  ;;  %v5800_v40 = vpop.f32.mrb[110].mxu0  ;;  %v8863_v38 = vld [vmem:[#allocation25 + $0x40] sm:$0xff]   ;;  %v8864_v39 = vld [vmem:[#allocation25 + $0x48] sm:$0xff]  }
0x2646   :  { %v8401_v42 = vpop.f32.mrb[111].mxu0  ;;  %8421 = vmatpush3.bf16.msra.mxu0 %v8863_v38  ;;  %v8865_v40 = vld [vmem:[#allocation25 + $0x50] sm:$0xff]  }
0x2647   :  { %8422 = vmatprep.subr.bf16.mxu0 %v9702_v19  ;;  %v8866_v42 = vld [vmem:[#allocation25 + $0x58] sm:$0xff]  }
0x264a   :  { %8423 = vmatpush3.bf16.msra.mxu0 %v8864_v39  ;;  %v7625_v39 = vld [vmem:[#allocation23 + $0x1] ss:$0 sm:$0xff] }
0x264b   :  { %v5907_v43 = vpop.f32.mrb[112].mxu0  ;;  %8424 = vmatprep.subr.bf16.mxu0 %v9702_v19 }
0x264c   :  { %v8412_v44 = vpop.f32.mrb[113].mxu0  ;;  %v5913_v45 = vsel %vm858_vm2, %v5907_v43, -inf }
0x264d   :  { %5914 = vmax.xlane.f32.xlu0 %v5913_v45  ;;  %v5910_v46 = vpop.f32.mrb[114].mxu0  ;;  %v8868_v44 = vld [vmem:[#allocation25 + $0x68] sm:$0xff]   ;;  %v8869_v45 = vld [vmem:[#allocation25 + $0x70] sm:$0xff]  }
0x264e   :  { %v8413_v47 = vpop.f32.mrb[115].mxu0  ;;  %8425 = vmatpush3.bf16.msra.mxu0 %v8865_v40  ;;  %v8870_v46 = vld [vmem:[#allocation25 + $0x78] sm:$0xff]  }
0x264f   :  { %8426 = vmatprep.subr.bf16.mxu0 %v9702_v19 }
0x2652   :  { %8427 = vmatpush3.bf16.msra.mxu0 %v8866_v42 }
0x2653   :  { %8428 = vmatprep.subr.bf16.mxu0 %v9702_v19 }
0x2658   :  { %v5584_v9 = vpop.xlane.xlu0 %5583 }
0x2659   :  { %v5585_v49 = vsub.f32 %v5576_v28, %v5584_v9 }
0x265b   :  { %v5586_v50 = vmul.f32 1.442695, %v5585_v49 }
0x265d   :  { %9013 = vpow2.f32 %v5586_v50 }
0x2667   :  { %v9014_v52 = vpop.eup %9013 }
0x2668   :  { %v5588_v53 = vsel %vm858_vm2, %v9014_v52, 0.0 }
0x2669   :  { %5589 = vadd.xlane.f32.xlu1 %v5588_v53 }
0x267a   :  { %5705 = vrot.lane.b32.xlu1 %v10672_v8, %s9704_s21 }
0x26ca   :  { %v5694_v55 = vpop.xlane.xlu1 %5693 }
0x26cb   :  { %v5695_v32 = vsub.f32 %v5686_v31, %v5694_v55 }
0x26cd   :  { %v5696_v59 = vmul.f32 1.442695, %v5695_v32 }
0x26cf   :  { %9015 = vpow2.f32 %v5696_v59 }
0x26d2   :  { %v5805_v60 = vpop.xlane.xlu0 %5804 }
0x26d3   :  { %v5806_v61 = vsub.f32 %v5797_v36, %v5805_v60 }
0x26d5   :  { %v5807_v1 = vmul.f32 1.442695, %v5806_v61 }
0x26d7   :  { %9017 = vpow2.f32 %v5807_v1 }
0x26d9   :  { %v9016_v5 = vpop.eup %9015 }
0x26da   :  { %v5915_v6 = vpop.xlane.xlu0 %5914  ;;  %v5698_v7 = vsel %vm858_vm2, %v9016_v5, 0.0 }
0x26db   :  { %v5916_v54 = vsub.f32 %v5907_v43, %v5915_v6  ;;  %5699 = vadd.xlane.f32.xlu0 %v5698_v7  ;;  %v8867_v43 = vld [vmem:[#allocation25 + $0x60] sm:$0xff]  }
0x26dc   :  { %8429 = vmatpush3.bf16.msra.mxu0 %v8867_v43 }
0x26dd   :  { %v5917_v56 = vmul.f32 1.442695, %v5916_v54  ;;  %8430 = vmatprep.subr.bf16.mxu0 %v9702_v19 }
0x26df   :  { %9019 = vpow2.f32 %v5917_v56 }
0x26e0   :  { %8431 = vmatpush3.bf16.msra.mxu0 %v8868_v44 }
0x26e1   :  { %v9018_v10 = vpop.eup %9017  ;;  %8432 = vmatprep.subr.bf16.mxu0 %v9702_v19 }
0x26e2   :  { %v5809_v11 = vsel %vm858_vm2, %v9018_v10, 0.0 }
0x26e3   :  { %5810 = vadd.xlane.f32.xlu1 %v5809_v11 }
0x26e4   :  { %8433 = vmatpush3.bf16.msra.mxu0 %v8869_v45  ;;  %v7626_v45 = vld [vmem:[#allocation22 + $0x1] ss:$0 sm:$0xff] }
0x26e5   :  { %8434 = vmatprep.subr.bf16.mxu0 %v9702_v19 }
0x26e8   :  { %8435 = vmatpush3.bf16.msra.mxu0 %v8870_v46 }
0x26e9   :  { %v9020_v12 = vpop.eup %9019  ;;  %8460 = vmatprep.subr.bf16.mxu0 %v9702_v19 }
0x26ea   :  { %v5919_v37 = vsel %vm858_vm2, %v9020_v12, 0.0 }
0x26eb   :  { %5920 = vadd.xlane.f32.xlu0 %v5919_v37 }
0x26f4   :  { %5925 = vrot.lane.b32.xlu1 %v10672_v8, %s9694_s1 }
0x26f6   :  { %v5590_v13 = vpop.xlane.xlu1 %5589 }
0x26f7   :  { %9021 = vrcp.f32 %v5590_v13 }
0x26fa   :  { %v5706_v16 = vpop.permute.xlu1 %5705 }
0x26fb   :  { %v5711_v18 = vsel %vm874_vm3, %v5706_v16, 0  ;;  %v8872_v16 = vld [vmem:[#allocation10 + $0x48] sm:$0xff]  }
0x2701   :  { %v9022_v14 = vpop.eup %9021  ;;  %5815 = vrot.lane.b32.xlu0 %v10672_v8, %s9671_s22 }
0x2702   :  { %v5592_v15 = vmul.f32 %v9022_v14, %v9014_v52 }
0x2704   :  { %v5593_v17 = vpack.c.bf16 %v5592_v15, %v5592_v15 }
0x2706   :  { %8381 = vmatmul.mubr.msk.bf16.vlgmr.msra.gmra.mrb[112].mxu1 %vm858_vm2, %v5593_v17  ;;  %v7616_v17 = vld [vmem:[#allocation19 + $0x1] ss:$0 sm:$0xff] }
0x2707   :  { %8391 = vmatpush3.bf16.msra.mxu1 %v5711_v18  ;;  %8392 = vmatprep.mubr.msk.bf16.mxu1 %vm9703_vm0, %v9702_v19 }
0x2708   :  { %8402 = vmatprep.subr.bf16.mxu1 %v9702_v19 }
0x2768   :  { %v5700_v20 = vpop.xlane.xlu0 %5699 }
0x2769   :  { %9023 = vrcp.f32 %v5700_v20 }
0x2770   :  { %v5811_v23 = vpop.xlane.xlu1 %5810 }
0x2771   :  { %9025 = vrcp.f32 %v5811_v23 }
0x2773   :  { %v9024_v63 = vpop.eup %9023 }
0x2774   :  { %v5702_v25 = vmul.f32 %v9024_v63, %v9016_v5  ;;  %v5926_v29 = vpop.permute.xlu1 %5925  ;;  %v3018_v5 = vsub.s32 6, %v10154_v21 }
0x2775   :  { %v5931_v30 = vsel %vm874_vm3, %v5926_v29, 0  ;;  %v8877_v29 = vld [vmem:[#allocation10 + $0x70] sm:$0xff]  }
0x2776   :  { %v5703_v8 = vpack.c.bf16 %v5702_v25, %v5702_v25  ;;  %v3019_v6 = vrot.slane %v10668_v57, %v3018_v5 }
0x2778   :  { %8393 = vmatmul.mubr.msk.bf16.vlgmr.msra.gmra.mrb[116].mxu1 %vm858_vm2, %v5703_v8  ;;  %v5921_v26 = vpop.xlane.xlu0 %5920  ;;  %v3510_v7 = vadd.f32 %v10462_v3, %v3019_v6  ;;  %v8871_v3 = vld [vmem:[#allocation10 + $0x40] sm:$0xff]  }
0x2779   :  { %9027 = vrcp.f32 %v5921_v26  ;;  %8404 = vmatprep.mubr.msk.bf16.mxu1 %vm9703_vm0, %v9702_v19 }
0x277a   :  { %v3522_v11 = vpack.c.bf16 %v3510_v7, %v3510_v7 }
0x277b   :  { %v9026_v58 = vpop.eup %9025 }
0x277c   :  { %v5813_v27 = vmul.f32 %v9026_v58, %v9018_v10  ;;  %v5816_v51 = vpop.permute.xlu0 %5815  ;;  %v6211_v15 = vsel %vm811_vm1, %v3522_v11, 0  ;;  %v8873_v58 = vld [vmem:[#allocation10 + $0x50] sm:$0xff]  }
0x277d   :  { %v5821_v28 = vsel %vm874_vm3, %v5816_v51, 0  ;;  %v8875_v51 = vld [vmem:[#allocation10 + $0x60] sm:$0xff]  }
0x277e   :  { %8403 = vmatpush3.bf16.msra.mxu1 %v5821_v28  ;;  %v5814_v62 = vpack.c.bf16 %v5813_v27, %v5813_v27  ;;  %v8874_v27 = vld [vmem:[#allocation10 + $0x58] sm:$0xff]   ;;  %v8876_v28 = vld [vmem:[#allocation10 + $0x68] sm:$0xff]  }
0x277f   :  { %8414 = vmatprep.subr.bf16.mxu1 %v9702_v19 }
0x2781   :  { %8405 = vmatmul.mubr.msk.bf16.vlgmr.msra.gmra.mrb[120].mxu1 %vm858_vm2, %v5814_v62  ;;  %v8878_v62 = vld [vmem:[#allocation10 + $0x78] sm:$0xff]  }
0x2782   :  { %8415 = vmatpush3.bf16.msra.mxu1 %v5931_v30  ;;  %8416 = vmatprep.mubr.msk.bf16.mxu1 %vm9703_vm0, %v9702_v19 }
0x2783   :  { %v9028_v48 = vpop.eup %9027  ;;  %8440 = vmatprep.subr.bf16.mxu1 %v9702_v19 }
0x2784   :  { %v5923_v31 = vmul.f32 %v9028_v48, %v9020_v12 }
0x2786   :  { %v5924_v2 = vpack.c.bf16 %v5923_v31, %v5923_v31 }
0x2789   :  { %8417 = vmatmul.mubr.msk.bf16.vlgmr.msra.gmra.mrb[124].mxu1 %vm858_vm2, %v5924_v2 }
0x278a   :  { %8456 = vmatprep.mubr.msk.bf16.mxu1 %vm9703_vm0, %v9702_v19  ;;  %8441 = vmatpush3.bf16.msra.mxu1 %v8871_v3 }
0x278b   :  { %8442 = vmatprep.subr.bf16.mxu1 %v9702_v19 }
0x278e   :  { %8443 = vmatpush3.bf16.msra.mxu1 %v8872_v16 }
0x278f   :  { %8444 = vmatprep.subr.bf16.mxu1 %v9702_v19 }
0x2792   :  { %8445 = vmatpush3.bf16.msra.mxu1 %v8873_v58 }
0x2793   :  { %8446 = vmatprep.subr.bf16.mxu1 %v9702_v19 }
0x2796   :  { %8447 = vmatpush3.bf16.msra.mxu1 %v8874_v27 }
0x2797   :  { %8448 = vmatprep.subr.bf16.mxu1 %v9702_v19 }
0x279a   :  { %8449 = vmatpush3.bf16.msra.mxu1 %v8875_v51 }
0x279b   :  { %8450 = vmatprep.subr.bf16.mxu1 %v9702_v19 }
0x279e   :  { %8451 = vmatpush3.bf16.msra.mxu1 %v8876_v28 }
0x279f   :  { %8452 = vmatprep.subr.bf16.mxu1 %v9702_v19 }
0x27a2   :  { %8453 = vmatpush3.bf16.msra.mxu1 %v8877_v29 }
0x27a3   :  { %8454 = vmatprep.subr.bf16.mxu1 %v9702_v19 }
0x27a6   :  { %8455 = vmatpush3.bf16.msra.mxu1 %v8878_v62 }
0x27a7   :  { %8466 = vmatprep.subr.bf16.mxu1 %v9702_v19 }
0x27d9   :  { %v5634_v33 = vpop.f32.mrb[112].mxu1 }
0x27da   :  { %v8382_v34 = vpop.f32.mrb[113].mxu1 }
0x27db   :  { %v5637_v35 = vpop.f32.mrb[114].mxu1 }
0x27dc   :  { %v8383_v36 = vpop.f32.mrb[115].mxu1 }
0x27dd   :  { %v3022_v36 = vsub.s32 7, %v10154_v21  ;;  %v7627_v21 = vld [vmem:[#allocation2 + $0x1] ss:$0 sm:$0xff] }
0x27df   :  { %v3023_v38 = vrot.slane %v10668_v57, %v3022_v36 }
0x27e1   :  { %v3512_v42 = vadd.f32 %v10466_v4, %v3023_v38 }
0x284b   :  { %v5747_v47 = vpop.f32.mrb[116].mxu1 }
0x284c   :  { %5974 = vrot.lane.b32.xlu1 %v5747_v47, %s9694_s1  ;;  %v8394_v9 = vpop.f32.mrb[117].mxu1  ;;  %v10770_v47 = vpack.c.bf16 %v3512_v42, %v3512_v42 }
0x284d   :  { %v5750_v49 = vpop.f32.mrb[118].mxu1 }
0x284e   :  { %v8395_v50 = vpop.f32.mrb[119].mxu1 }
0x284f   :  { %v6269_v50 = vsel %vm874_vm3, %v10770_v47, 0 }
0x2854   :  { %v5857_v52 = vpop.f32.mrb[120].mxu1 }
0x2855   :  { %5978 = vrot.lane.b32.xlu0 %v5857_v52, %s9671_s22  ;;  %v8406_v53 = vpop.f32.mrb[121].mxu1 }
0x2856   :  { %v5860_v55 = vpop.f32.mrb[122].mxu1 }
0x2857   :  { %v8407_v32 = vpop.f32.mrb[123].mxu1 }
0x285c   :  { %v5967_v59 = vpop.f32.mrb[124].mxu1 }
0x285d   :  { %5982 = vrot.lane.b32.xlu1 %v5967_v59, %s9704_s21  ;;  %v8418_v60 = vpop.f32.mrb[125].mxu1 }
0x285e   :  { %v5970_v61 = vpop.f32.mrb[126].mxu1 }
0x285f   :  { %v8419_v1 = vpop.f32.mrb[127].mxu1 }
0x28be   :  { %v5975_v54 = vpop.permute.xlu1 %5974 }
0x28bf   :  { %v5985_v10 = vsel %vm811_vm1, %v5634_v33, %v5975_v54 }
0x28c7   :  { %v5979_v56 = vpop.permute.xlu0 %5978 }
0x28c8   :  { %v5986_v12 = vsel %vm1264_vm4, %v5985_v10, %v5979_v56 }
0x28cf   :  { %v5983_v37 = vpop.permute.xlu1 %5982 }
0x28d0   :  { %v5987_v13 = vsel %vm1266_vm5, %v5986_v12, %v5983_v37 }
0x28d1   :  { %v5988_v14 = vpack.c.bf16 %v5987_v13, %v5987_v13 }
0x28d3   :  { %8437 = vmatmul.mubr.bf16.vlgmr.msra.gmra.mrb[116].mxu0 %v5988_v14 }
0x28d4   :  { %8461 = vmatpush3.bf16.xpose.msra.mxu0 %v6211_v15  ;;  %8462 = vmatprep.mubr.msk.bf16.mxu0 %vm9703_vm0, %v9702_v19 }
0x28d5   :  { %8472 = vmatprep.subr.bf16.mxu0 %v9702_v19 }
0x29a6   :  { %v6077_v18 = vpop.f32.mrb[116].mxu0 }
0x29a7   :  { %v6078_v20 = vadd.f32 %v7616_v17, %v6077_v18  ;;  %v8438_v23 = vpop.f32.mrb[117].mxu0 }
0x29a8   :  { %v6080_v63 = vpop.f32.mrb[118].mxu0 }
0x29a9   :  { %v6083_v25 = vadd.f32 %v6078_v20, %v10411_v41  ;;  %v8439_v8 = vpop.f32.mrb[119].mxu0 }
0x29ab   :  { %6084 = vadd.xlane.f32.xlu0 %v6083_v25  ;;  %v6087_v26 = vmul.f32 %v6083_v25, %v6083_v25 }
0x29ad   :  { %6088 = vadd.xlane.f32.xlu1 %v6087_v26 }
0x29c1   :  { %6315 = vrot.lane.b32.xlu0 %v3522_v11, %s9704_s21 }
0x29c5   :  { %6426 = vrot.lane.b32.xlu0 %v3522_v11, %s9671_s22 }
0x29c9   :  { %6536 = vrot.lane.b32.xlu0 %v3522_v11, %s9694_s1 }
0x2a38   :  { %v6085_v30 = vpop.xlane.xlu0 %6084 }
0x2a39   :  { %v6086_v48 = vmul.f32 0.0078125, %v6085_v30 }
0x2a3a   :  { %v6089_v31 = vpop.xlane.xlu1 %6088 }
0x2a3b   :  { %v6091_v2 = vmul.f32 %v6086_v48, %v6086_v48  ;;  %v6090_v33 = vmul.f32 0.0078125, %v6089_v31  ;;  %v6093_v43 = vsub.f32 %v6083_v25, %v6086_v48 }
0x2a3c   :  { %v6316_v53 = vpop.permute.xlu0 %6315 }
0x2a3d   :  { %v6092_v34 = vsub.f32 %v6090_v33, %v6091_v2  ;;  %v6321_v60 = vsel %vm811_vm1, %v6316_v53, 0 }
0x2a3f   :  { %v6094_v35 = vadd.f32 1e-05, %v6092_v34 }
0x2a40   :  { %v6427_v61 = vpop.permute.xlu0 %6426 }
0x2a41   :  { %9029 = vrsqrt.f32 %v6094_v35  ;;  %v6432_v5 = vsel %vm811_vm1, %v6427_v61, 0 }
0x2a44   :  { %v6537_v6 = vpop.permute.xlu0 %6536 }
0x2a45   :  { %v6542_v54 = vsel %vm811_vm1, %v6537_v6, 0 }
0x2a4b   :  { %v9030_v40 = vpop.eup %9029 }
0x2a4c   :  { %v6102_v44 = vmul.f32 %v9030_v40, %v7625_v39 }
0x2a4e   :  { %v6103_v46 = vmul.f32 %v6102_v44, %v6093_v43 }
0x2a50   :  { %v6110_v9 = vadd.f32 %v7626_v45, %v6103_v46 }
0x2a52   :  { %v6111_v49 = vpack.c.bf16 %v6110_v9, %v6110_v9 }
0x2a54   :  { %8457 = vmatmul.mubr.bf16.vlgmr.msra.gmra.mrb[128].mxu1 %v6111_v49 }
0x2a55   :  { %8467 = vmatpush3.bf16.msra.mxu1 %v6269_v50  ;;  %8468 = vmatprep.mubr.msk.bf16.mxu1 %vm9703_vm0, %v9702_v19 }
0x2a56   :  { %8478 = vmatprep.subr.bf16.mxu1 %v9702_v19 }
0x2b27   :  { %v6200_v4 = vpop.f32.mrb[128].mxu1 }
0x2b28   :  { %v6201_v57 = vadd.f32 %v7627_v21, %v6200_v4  ;;  %v8458_v52 = vpop.f32.mrb[129].mxu1 }
0x2b29   :  { %v6203_v55 = vpop.f32.mrb[130].mxu1 }
0x2b2a   :  { %v6206_v32 = vpack.c.bf16 %v6201_v57, %v6201_v57  ;;  %v8459_v59 = vpop.f32.mrb[131].mxu1 }
0x2b2c   :  { %6312 = vrot.lane.b32.xlu1 %v6206_v32, %s9704_s21  ;;  %8463 = vmatmul.mubr.msk.bf16.vlgmr.msra.gmra.mrb[120].mxu0 %vm811_vm1, %v6206_v32 }
0x2b2d   :  { %8473 = vmatpush3.bf16.xpose.msra.mxu0 %v6321_v60  ;;  %8474 = vmatprep.mubr.msk.bf16.mxu0 %vm9703_vm0, %v9702_v19 }
0x2b2e   :  { %8484 = vmatprep.subr.bf16.mxu0 %v9702_v19 }
0x2b30   :  { %6424 = vrot.lane.b32.xlu1 %v6206_v32, %s9671_s22 }
0x2b34   :  { %6534 = vrot.lane.b32.xlu1 %v6206_v32, %s9694_s1 }
0x2b9e   :  { %v6313_v1 = vpop.permute.xlu1 %6312 }
0x2b9f   :  { %8475 = vmatmul.mubr.msk.bf16.vlgmr.msra.gmra.mrb[124].mxu0 %vm811_vm1, %v6313_v1 }
0x2ba0   :  { %8485 = vmatpush3.bf16.xpose.msra.mxu0 %v6432_v5  ;;  %8486 = vmatprep.mubr.msk.bf16.mxu0 %vm9703_vm0, %v9702_v19 }
0x2ba1   :  { %8496 = vmatprep.subr.bf16.mxu0 %v9702_v19 }
0x2ba2   :  { %v6425_v7 = vpop.permute.xlu1 %6424 }
0x2ba6   :  { %v6535_v56 = vpop.permute.xlu1 %6534 }
0x2ba7   :  { %8487 = vmatmul.mubr.msk.bf16.vlgmr.msra.gmra.mrb[128].mxu0 %vm811_vm1, %v6425_v7 }
0x2ba8   :  { %8497 = vmatpush3.bf16.xpose.msra.mxu0 %v6542_v54  ;;  %8498 = vmatprep.mubr.msk.bf16.mxu0 %vm9703_vm0, %v9702_v19 }
0x2ba9   :  { %8508 = vmatprep.subr.bf16.mxu0 %v9702_v19 }
0x2baf   :  { %8499 = vmatmul.mubr.msk.bf16.vlgmr.msra.gmra.mrb[132].mxu0 %vm811_vm1, %v6535_v56 }
0x2bb0   :  { %8524 = vmatprep.mubr.msk.bf16.mxu0 %vm9703_vm0, %v9702_v19 }
0x2bff   :  { %v6247_v10 = vpop.f32.mrb[120].mxu0 }
0x2c00   :  { %v8464_v11 = vpop.f32.mrb[121].mxu0  ;;  %v6253_v12 = vsel %vm858_vm2, %v6247_v10, -inf }
0x2c01   :  { %6254 = vmax.xlane.f32.xlu0 %v6253_v12  ;;  %v6250_v37 = vpop.f32.mrb[122].mxu0 }
0x2c02   :  { %v8465_v13 = vpop.f32.mrb[123].mxu0 }
0x2c72   :  { %v6357_v14 = vpop.f32.mrb[124].mxu0 }
0x2c73   :  { %v8476_v15 = vpop.f32.mrb[125].mxu0  ;;  %v6363_v3 = vsel %vm858_vm2, %v6357_v14, -inf }
0x2c74   :  { %6364 = vmax.xlane.f32.xlu1 %v6363_v3  ;;  %v6360_v16 = vpop.f32.mrb[126].mxu0  ;;  %v8879_v3 = vld [vmem:[#allocation8 + $0x40] sm:$0xff]  }
0x2c75   :  { %v8477_v17 = vpop.f32.mrb[127].mxu0  ;;  %8509 = vmatpush3.bf16.msra.mxu0 %v8879_v3  ;;  %v8880_v16 = vld [vmem:[#allocation8 + $0x48] sm:$0xff]  }
0x2c76   :  { %8510 = vmatprep.subr.bf16.mxu0 %v9702_v19  ;;  %v8881_v17 = vld [vmem:[#allocation8 + $0x50] sm:$0xff]  }
0x2c77   :  { %v8921_v3 = vld [vmem:[#allocation17 + $0xe8] sm:$0xff]  }
0x2c79   :  { %8511 = vmatpush3.bf16.msra.mxu0 %v8880_v16  ;;  %v8922_v16 = vld [vmem:[#allocation17 + $0xa8] sm:$0xff]  }
0x2c7a   :  { %v6468_v18 = vpop.f32.mrb[128].mxu0  ;;  %8512 = vmatprep.subr.bf16.mxu0 %v9702_v19 }
0x2c7b   :  { %v8488_v20 = vpop.f32.mrb[129].mxu0  ;;  %v6474_v23 = vsel %vm858_vm2, %v6468_v18, -inf }
0x2c7c   :  { %6475 = vmax.xlane.f32.xlu0 %v6474_v23  ;;  %v6471_v63 = vpop.f32.mrb[130].mxu0  ;;  %v8883_v20 = vld [vmem:[#allocation8 + $0x60] sm:$0xff]   ;;  %v8885_v23 = vld [vmem:[#allocation8 + $0x70] sm:$0xff]  }
0x2c7d   :  { %v8489_v25 = vpop.f32.mrb[131].mxu0  ;;  %8513 = vmatpush3.bf16.msra.mxu0 %v8881_v17 }
0x2c7e   :  { %8514 = vmatprep.subr.bf16.mxu0 %v9702_v19 }
0x2c82   :  { %v6578_v8 = vpop.f32.mrb[132].mxu0 }
0x2c83   :  { %v8500_v26 = vpop.f32.mrb[133].mxu0  ;;  %v6584_v58 = vsel %vm858_vm2, %v6578_v8, -inf }
0x2c84   :  { %6585 = vmax.xlane.f32.xlu0 %v6584_v58  ;;  %v6581_v27 = vpop.f32.mrb[134].mxu0  ;;  %v8886_v58 = vld [vmem:[#allocation8 + $0x78] sm:$0xff]  }
0x2c85   :  { %v8501_v51 = vpop.f32.mrb[135].mxu0 }
0x2c8e   :  { %v6255_v28 = vpop.xlane.xlu0 %6254 }
0x2c8f   :  { %v6256_v29 = vsub.f32 %v6247_v10, %v6255_v28 }
0x2c91   :  { %v6257_v62 = vmul.f32 1.442695, %v6256_v29 }
0x2c93   :  { %9031 = vpow2.f32 %v6257_v62 }
0x2c9d   :  { %v9032_v30 = vpop.eup %9031 }
0x2c9e   :  { %v6259_v48 = vsel %vm858_vm2, %v9032_v30, 0.0 }
0x2c9f   :  { %6260 = vadd.xlane.f32.xlu1 %v6259_v48 }
0x2cb0   :  { %6376 = vrot.lane.b32.xlu1 %v10770_v47, %s9704_s21 }
0x2d01   :  { %v6365_v31 = vpop.xlane.xlu1 %6364 }
0x2d02   :  { %v6366_v2 = vsub.f32 %v6357_v14, %v6365_v31 }
0x2d04   :  { %v6367_v33 = vmul.f32 1.442695, %v6366_v2 }
0x2d06   :  { %9033 = vpow2.f32 %v6367_v33 }
0x2d09   :  { %v6476_v34 = vpop.xlane.xlu0 %6475 }
0x2d0a   :  { %v6477_v35 = vsub.f32 %v6468_v18, %v6476_v34  ;;  %v8882_v18 = vld [vmem:[#allocation8 + $0x58] sm:$0xff]  }
0x2d0b   :  { %8515 = vmatpush3.bf16.msra.mxu0 %v8882_v18 }
0x2d0c   :  { %v6478_v36 = vmul.f32 1.442695, %v6477_v35  ;;  %8516 = vmatprep.subr.bf16.mxu0 %v9702_v19 }
0x2d0e   :  { %9035 = vpow2.f32 %v6478_v36 }
0x2d0f   :  { %8517 = vmatpush3.bf16.msra.mxu0 %v8883_v20 }
0x2d10   :  { %v9034_v38 = vpop.eup %9033  ;;  %8518 = vmatprep.subr.bf16.mxu0 %v9702_v19 }
0x2d11   :  { %v6586_v39 = vpop.xlane.xlu0 %6585  ;;  %v6369_v40 = vsel %vm858_vm2, %v9034_v38, 0.0 }
0x2d12   :  { %v6587_v42 = vsub.f32 %v6578_v8, %v6586_v39  ;;  %6370 = vadd.xlane.f32.xlu0 %v6369_v40  ;;  %v8887_v40 = vld [vmem:[#allocation16 + $0x80] ss:$8 sps:$4 sm:$0xff]  }
0x2d14   :  { %v6588_v43 = vmul.f32 1.442695, %v6587_v42  ;;  %v8889_v42 = vld [vmem:[#allocation16 + $0x84] ss:$8 sps:$4 sm:$0xff]  }
0x2d16   :  { %9037 = vpow2.f32 %v6588_v43  ;;  %v8892_v43 = vld [vmem:[#allocation16 + $0x94] ss:$8 sps:$4 sm:$0xff]  }
0x2d18   :  { %v9036_v44 = vpop.eup %9035 }
0x2d19   :  { %v6480_v45 = vsel %vm858_vm2, %v9036_v44, 0.0 }
0x2d1a   :  { %6481 = vadd.xlane.f32.xlu1 %v6480_v45  ;;  %v7644_v45 = vld [vmem:[%s10922_s20 + $0x1] ss:$0 sm:$0xff] }
0x2d20   :  { %v9038_v46 = vpop.eup %9037 }
0x2d21   :  { %v6590_v9 = vsel %vm858_vm2, %v9038_v46, 0.0 }
0x2d22   :  { %6591 = vadd.xlane.f32.xlu0 %v6590_v9 }
0x2d2b   :  { %6596 = vrot.lane.b32.xlu1 %v10770_v47, %s9694_s1 }
0x2d2c   :  { %v6261_v49 = vpop.xlane.xlu1 %6260 }
0x2d2d   :  { %9039 = vrcp.f32 %v6261_v49 }
0x2d30   :  { %v6377_v4 = vpop.permute.xlu1 %6376 }
0x2d31   :  { %v6382_v52 = vsel %vm874_vm3, %v6377_v4, 0 }
0x2d37   :  { %v9040_v50 = vpop.eup %9039 }
0x2d38   :  { %v6263_v21 = vmul.f32 %v9040_v50, %v9032_v30  ;;  %6486 = vrot.lane.b32.xlu0 %v10770_v47, %s9671_s22 }
0x2d3a   :  { %v6264_v57 = vpack.c.bf16 %v6263_v21, %v6263_v21 }
0x2d3c   :  { %8469 = vmatmul.mubr.msk.bf16.vlgmr.msra.gmra.mrb[132].mxu1 %vm858_vm2, %v6264_v57 }
0x2d3d   :  { %8479 = vmatpush3.bf16.msra.mxu1 %v6382_v52  ;;  %8480 = vmatprep.mubr.msk.bf16.mxu1 %vm9703_vm0, %v9702_v19  ;;  %v8895_v52 = vld [vmem:[#allocation16 + $0xa4] ss:$8 sps:$4 sm:$0xff]  }
0x2d3e   :  { %8490 = vmatprep.subr.bf16.mxu1 %v9702_v19 }
0x2d9f   :  { %v6371_v53 = vpop.xlane.xlu0 %6370 }
0x2da0   :  { %9041 = vrcp.f32 %v6371_v53  ;;  %v8893_v53 = vld [vmem:[#allocation16 + $0xa0] ss:$8 sps:$4 sm:$0xff]  }
0x2da7   :  { %v6482_v55 = vpop.xlane.xlu1 %6481 }
0x2da8   :  { %9043 = vrcp.f32 %v6482_v55  ;;  %v8898_v55 = vld [vmem:[#allocation16 + $0xb4] ss:$8 sps:$4 sm:$0xff]  }
0x2daa   :  { %v9042_v32 = vpop.eup %9041 }
0x2dab   :  { %v6373_v59 = vmul.f32 %v9042_v32, %v9034_v38  ;;  %v6597_v7 = vpop.permute.xlu1 %6596  ;;  %v8896_v32 = vld [vmem:[#allocation16 + $0xb0] ss:$8 sps:$4 sm:$0xff]  }
0x2dac   :  { %v6602_v56 = vsel %vm874_vm3, %v6597_v7, 0  ;;  %v8911_v7 = vld [vmem:[#allocation17 + $0xc0] sm:$0xff]  }
0x2dad   :  { %v6374_v60 = vpack.c.bf16 %v6373_v59, %v6373_v59  ;;  %v8901_v59 = vld [vmem:[#allocation16 + $0xc4] ss:$8 sps:$4 sm:$0xff]  }
0x2daf   :  { %8481 = vmatmul.mubr.msk.bf16.vlgmr.msra.gmra.mrb[136].mxu1 %vm858_vm2, %v6374_v60  ;;  %v6592_v47 = vpop.xlane.xlu0 %6591  ;;  %v8899_v60 = vld [vmem:[#allocation16 + $0xc0] ss:$8 sps:$4 sm:$0xff]  }
0x2db0   :  { %9045 = vrcp.f32 %v6592_v47  ;;  %8492 = vmatprep.mubr.msk.bf16.mxu1 %vm9703_vm0, %v9702_v19  ;;  %v8902_v47 = vld [vmem:[#allocation16 + $0xd0] ss:$8 sps:$4 sm:$0xff]  }
0x2db2   :  { %v9044_v61 = vpop.eup %9043 }
0x2db3   :  { %v6484_v1 = vmul.f32 %v9044_v61, %v9036_v44  ;;  %v6487_v5 = vpop.permute.xlu0 %6486  ;;  %v8890_v44 = vld [vmem:[#allocation16 + $0x90] ss:$8 sps:$4 sm:$0xff]   ;;  %v8907_v61 = vld [vmem:[#allocation16 + $0xe4] ss:$8 sps:$4 sm:$0xff]  }
0x2db4   :  { %v6492_v6 = vsel %vm874_vm3, %v6487_v5, 0  ;;  %v8910_v5 = vld [vmem:[#allocation16 + $0xf4] ss:$8 sps:$4 sm:$0xff]  }
0x2db5   :  { %8491 = vmatpush3.bf16.msra.mxu1 %v6492_v6  ;;  %v6485_v54 = vpack.c.bf16 %v6484_v1, %v6484_v1  ;;  %v8905_v1 = vld [vmem:[#allocation16 + $0xe0] ss:$8 sps:$4 sm:$0xff]   ;;  %v8908_v6 = vld [vmem:[#allocation16 + $0xf0] ss:$8 sps:$4 sm:$0xff]  }
0x2db6   :  { %8502 = vmatprep.subr.bf16.mxu1 %v9702_v19 }
0x2db8   :  { %8493 = vmatmul.mubr.msk.bf16.vlgmr.msra.gmra.mrb[140].mxu1 %vm858_vm2, %v6485_v54  ;;  %v8912_v54 = vld [vmem:[#allocation17 + $0x80] sm:$0xff]  }
0x2db9   :  { %8503 = vmatpush3.bf16.msra.mxu1 %v6602_v56  ;;  %8504 = vmatprep.mubr.msk.bf16.mxu1 %vm9703_vm0, %v9702_v19  ;;  %v8913_v56 = vld [vmem:[#allocation17 + $0xc8] sm:$0xff]  }
0x2dba   :  { %v9046_v10 = vpop.eup %9045  ;;  %6874 = vmatprep.subr.bf16.mxu1 %v8889_v42 }
0x2dbb   :  { %v6594_v11 = vmul.f32 %v9046_v10, %v9038_v46  ;;  %v8914_v10 = vld [vmem:[#allocation17 + $0x88] sm:$0xff]  }
0x2dbd   :  { %v6595_v12 = vpack.c.bf16 %v6594_v11, %v6594_v11  ;;  %v8915_v11 = vld [vmem:[#allocation17 + $0xd0] sm:$0xff]  }
0x2dc0   :  { %8505 = vmatmul.mubr.msk.bf16.vlgmr.msra.gmra.mrb[144].mxu1 %vm858_vm2, %v6595_v12  ;;  %v8916_v12 = vld [vmem:[#allocation17 + $0x90] sm:$0xff]  }
0x2dc1   :  { %6906 = vmatprep.mubr.bf16.mxu1 %v9701_v0  ;;  %v8884_v0 = vld [vmem:[#allocation8 + $0x68] sm:$0xff]   ;;  %6875 = vmatpush1.bf16.msra.mxu1 %v8887_v40 }
0x2dc2   :  { %8519 = vmatpush3.bf16.msra.mxu0 %v8884_v0  ;;  %6876 = vmatprep.subr.bf16.mxu1 %v8892_v43 }
0x2dc3   :  { %8520 = vmatprep.subr.bf16.mxu0 %v9702_v19 }
0x2dc5   :  { %6877 = vmatpush1.bf16.msra.mxu1 %v8890_v44 }
0x2dc6   :  { %8521 = vmatpush3.bf16.msra.mxu0 %v8885_v23  ;;  %6878 = vmatprep.subr.bf16.mxu1 %v8895_v52 }
0x2dc7   :  { %8522 = vmatprep.subr.bf16.mxu0 %v9702_v19 }
0x2dc9   :  { %6879 = vmatpush1.bf16.msra.mxu1 %v8893_v53 }
0x2dca   :  { %8523 = vmatpush3.bf16.msra.mxu0 %v8886_v58  ;;  %6880 = vmatprep.subr.bf16.mxu1 %v8898_v55 }
0x2dcb   :  { %7969 = vmatprep.subr.bf16.mxu0 %v8911_v7 }
0x2dcd   :  { %6881 = vmatpush1.bf16.msra.mxu1 %v8896_v32  ;;  %v8928_v32 = vld [vmem:[#allocation38 + $0x8] sm:$0xff]  }
0x2dce   :  { %6882 = vmatprep.subr.bf16.mxu1 %v8901_v59  ;;  %v8929_v59 = vld [vmem:[#allocation38 + $0x10] sm:$0xff]  }
0x2dd1   :  { %6883 = vmatpush1.bf16.msra.mxu1 %v8899_v60  ;;  %v8930_v60 = vld [vmem:[#allocation38 + $0x18] sm:$0xff]  }
0x2e0f   :  { %v6305_v37 = vpop.f32.mrb[132].mxu1 }
0x2e10   :  { %v8470_v13 = vpop.f32.mrb[133].mxu1 }
0x2e11   :  { %v6308_v14 = vpop.f32.mrb[134].mxu1  ;;  %v8918_v13 = vld [vmem:[#allocation17 + $0x98] sm:$0xff]  }
0x2e12   :  { %v8471_v15 = vpop.f32.mrb[135].mxu1  ;;  %v8919_v14 = vld [vmem:[#allocation17 + $0xe0] sm:$0xff]  }
0x2e13   :  { %v8920_v15 = vld [vmem:[#allocation17 + $0xa0] sm:$0xff]  }
0x2e82   :  { %v6418_v63 = vpop.f32.mrb[136].mxu1 }
0x2e83   :  { %6645 = vrot.lane.b32.xlu1 %v6418_v63, %s9694_s1  ;;  %v8482_v25 = vpop.f32.mrb[137].mxu1 }
0x2e84   :  { %v6421_v8 = vpop.f32.mrb[138].mxu1 }
0x2e85   :  { %v8483_v26 = vpop.f32.mrb[139].mxu1  ;;  %v7653_v8 = vld [vmem:[#allocation7 + $0x1] ss:$0 sm:$0xff] }
0x2e8b   :  { %v6528_v27 = vpop.f32.mrb[140].mxu1 }
0x2e8c   :  { %6649 = vrot.lane.b32.xlu0 %v6528_v27, %s9671_s22  ;;  %v8494_v51 = vpop.f32.mrb[141].mxu1  ;;  %s9705_s22 = smov [#allocation40]  }
0x2e8d   :  { %v6531_v28 = vpop.f32.mrb[142].mxu1  ;;  %v7654_v51 = vld [vmem:[#allocation5 + $0x1] ss:$0 sm:$0xff]  ;;  %s7208_s1 = sshll.u32 %s9705_s22, 4  ;;  %s7209_s1 = int_to_ptr.vmem [resolvable:$true] %s7208_s1 }
0x2e8e   :  { %v8495_v29 = vpop.f32.mrb[143].mxu1  ;;  %s9581_s14 = scalar_lea.vmem %s7209_s1, 128  ;;  %p9586_p11 = scmp.lt.s32.totalorder %s7209_s1, %s7209_s1 }
0x2e8f   :  { %p9582_p10 = scmp.ne.s32.totalorder %s7209_s1, %s9581_s14  ;;  %p9587_p12 = scmp.lt.s32.totalorder %s9581_s14, %s9581_s14 }
0x2e91   :  { %p9588_p13 = por %p9587_p12, %p9586_p11 }
0x2e93   :  { %v6638_v62 = vpop.f32.mrb[144].mxu1  ;;  %p9589_p0 = pnand %p9588_p13, %p9582_p10 }
0x2e94   :  { %6653 = vrot.lane.b32.xlu1 %v6638_v62, %s9704_s21  ;;  %v8506_v30 = vpop.f32.mrb[145].mxu1 }
0x2e95   :  { %v6641_v48 = vpop.f32.mrb[146].mxu1  ;;  %v8923_v30 = vld [vmem:[#allocation17 + $0xf0] sm:$0xff]  }
0x2e96   :  { %v8507_v31 = vpop.f32.mrb[147].mxu1  ;;  %v8924_v48 = vld [vmem:[#allocation17 + $0xb0] sm:$0xff]  }
0x2e97   :  { %v8925_v31 = vld [vmem:[#allocation17 + $0xf8] sm:$0xff]  }
0x2ef5   :  { %v6646_v2 = vpop.permute.xlu1 %6645 }
0x2ef6   :  { %v6656_v34 = vsel %vm811_vm1, %v6305_v37, %v6646_v2  ;;  %v8917_v37 = vld [vmem:[#allocation17 + $0xd8] sm:$0xff]  }
0x2ef7   :  { %v8926_v2 = vld [vmem:[#allocation17 + $0xb8] sm:$0xff]  }
0x2efe   :  { %v6650_v33 = vpop.permute.xlu0 %6649 }
0x2eff   :  { %v6657_v35 = vsel %vm1264_vm4, %v6656_v34, %v6650_v33  ;;  %v7598_v33 = vld [vmem:[%s10923_s9 + $0x2] sm:$0x3] }
0x2f00   :  { %v6787_v34 = vrot.slane %v7598_v33, %v10163_v24  ;;  %v7671_v24 = vld [vmem:[#allocation11 + $0x1] ss:$0 sm:$0xff] }
0x2f06   :  { %v6654_v36 = vpop.permute.xlu1 %6653 }
0x2f07   :  { %v6658_v38 = vsel %vm1266_vm5, %v6657_v35, %v6654_v36  ;;  %v6791_v35 = vrot.slane %v7598_v33, %v10157_v22 }
0x2f08   :  { %v6659_v39 = vpack.c.bf16 %v6658_v38, %v6658_v38 }
0x2f0a   :  { %8525 = vmatmul.mubr.bf16.vlgmr.msra.gmra.mrb[136].mxu0 %v6659_v39 }
0x2f0b   :  { %7970 = vmatpush3.bf16.msra.mxu0 %v8912_v54 }
0x2f0c   :  { %7971 = vmatprep.subr.bf16.mxu0 %v8913_v56 }
0x2f0f   :  { %7972 = vmatpush3.bf16.msra.mxu0 %v8914_v10 }
0x2f10   :  { %7973 = vmatprep.subr.bf16.mxu0 %v8915_v11 }
0x2f13   :  { %7974 = vmatpush3.bf16.msra.mxu0 %v8916_v12  ;;  %v7688_v12 = vld [vmem:[#allocation14 + $0x1] ss:$0 sm:$0xff] }
0x2f14   :  { %7975 = vmatprep.subr.bf16.mxu0 %v8917_v37 }
0x2f17   :  { %7976 = vmatpush3.bf16.msra.mxu0 %v8918_v13 }
0x2f18   :  { %7977 = vmatprep.subr.bf16.mxu0 %v8919_v14 }
0x2f1b   :  { %7978 = vmatpush3.bf16.msra.mxu0 %v8920_v15  ;;  %v7689_v15 = vld [vmem:[#allocation13 + $0x1] ss:$0 sm:$0xff] }
0x2f1c   :  { %7979 = vmatprep.subr.bf16.mxu0 %v8921_v3 }
0x2f1f   :  { %7980 = vmatpush3.bf16.msra.mxu0 %v8922_v16 }
0x2f20   :  { %7981 = vmatprep.subr.bf16.mxu0 %v8923_v30 }
0x2f23   :  { %7982 = vmatpush3.bf16.msra.mxu0 %v8924_v48 }
0x2f24   :  { %7983 = vmatprep.subr.bf16.mxu0 %v8925_v31 }
0x2f27   :  { %7984 = vmatpush3.bf16.msra.mxu0 %v8926_v2 }
0x2fdd   :  { %v6748_v46 = vpop.f32.mrb[136].mxu0 }
0x2fde   :  { %v6749_v9 = vadd.f32 %v7644_v45, %v6748_v46  ;;  %v8526_v49 = vpop.f32.mrb[137].mxu0 }
0x2fdf   :  { %v6751_v50 = vpop.f32.mrb[138].mxu0  ;;  %v8927_v49 = vld [vmem:[#allocation38] sm:$0xff]  }
0x2fe0   :  { %v10843_v21 = vadd.f32 %v6749_v9, %v10411_v41  ;;  %v8527_v4 = vpop.f32.mrb[139].mxu0  ;;  %v8904_v41 = vld [vmem:[#allocation16 + $0xd4] ss:$8 sps:$4 sm:$0xff]  }
0x2fe1   :  { %6884 = vmatprep.subr.bf16.mxu1 %v8904_v41  ;;  %v8931_v41 = vld [vmem:[#allocation38 + $0x20] sm:$0xff]  }
0x2fe2   :  { %6755 = vadd.xlane.f32.xlu0 %v10843_v21  ;;  %v6758_v57 = vmul.f32 %v10843_v21, %v10843_v21  ;;  %6885 = vmatpush1.bf16.msra.mxu1 %v8902_v47  ;;  %v8932_v47 = vld [vmem:[#allocation38 + $0x28] sm:$0xff]  }
0x2fe3   :  { %6886 = vmatprep.subr.bf16.mxu1 %v8907_v61  ;;  %v8933_v61 = vld [vmem:[#allocation38 + $0x30] sm:$0xff]  }
0x2fe4   :  { %6759 = vadd.xlane.f32.xlu1 %v6758_v57 }
0x2fe6   :  { %6887 = vmatpush1.bf16.msra.mxu1 %v8905_v1  ;;  %v8934_v1 = vld [vmem:[#allocation38 + $0x38] sm:$0xff]  }
0x2fe7   :  { %6888 = vmatprep.subr.bf16.mxu1 %v8910_v5 }
0x2fea   :  { %6889 = vmatpush1.bf16.msra.mxu1 %v8908_v6 }
0x2feb   :  { %8528 = vmatprep.subr.bf16.mxu1 %v9702_v19 }
0x306f   :  { %v6756_v17 = vpop.xlane.xlu0 %6755 }
0x3070   :  { %v6757_v18 = vmul.f32 0.0078125, %v6756_v17 }
0x3071   :  { %v6760_v20 = vpop.xlane.xlu1 %6759 }
0x3072   :  { %v6762_v0 = vmul.f32 %v6757_v18, %v6757_v18  ;;  %v6761_v23 = vmul.f32 0.0078125, %v6760_v20  ;;  %v6764_v58 = vsub.f32 %v10843_v21, %v6757_v18 }
0x3074   :  { %v6763_v63 = vsub.f32 %v6761_v23, %v6762_v0 }
0x3076   :  { %v6765_v25 = vadd.f32 1e-05, %v6763_v63 }
0x3078   :  { %9047 = vrsqrt.f32 %v6765_v25 }
0x3082   :  { %v9048_v26 = vpop.eup %9047 }
0x3083   :  { %v6773_v27 = vmul.f32 %v9048_v26, %v7653_v8 }
0x3085   :  { %v6774_v28 = vmul.f32 %v6773_v27, %v6764_v58 }
0x3087   :  { %v6781_v29 = vadd.f32 %v7654_v51, %v6774_v28 }
0x3089   :  { %v6782_v62 = vpack.c.bf16 %v6781_v29, %v6781_v29 }
0x308b   :  { %6907 = vmatmul.mubr.bf16.vlgmr.msra.gmra.mrb[148].mxu1 %v6782_v62 }
0x308c   :  { %8544 = vmatprep.mubr.msk.bf16.mxu1 %vm9703_vm0, %v9702_v19  ;;  %8529 = vmatpush3.bf16.msra.mxu1 %v8927_v49 }
0x308d   :  { %8530 = vmatprep.subr.bf16.mxu1 %v9702_v19 }
0x3090   :  { %8531 = vmatpush3.bf16.msra.mxu1 %v8928_v32 }
0x3091   :  { %8532 = vmatprep.subr.bf16.mxu1 %v9702_v19 }
0x3094   :  { %8533 = vmatpush3.bf16.msra.mxu1 %v8929_v59 }
0x3095   :  { %8534 = vmatprep.subr.bf16.mxu1 %v9702_v19 }
0x3098   :  { %8535 = vmatpush3.bf16.msra.mxu1 %v8930_v60 }
0x3099   :  { %8536 = vmatprep.subr.bf16.mxu1 %v9702_v19 }
0x309c   :  { %8537 = vmatpush3.bf16.msra.mxu1 %v8931_v41 }
0x309d   :  { %8538 = vmatprep.subr.bf16.mxu1 %v9702_v19 }
0x30a0   :  { %8539 = vmatpush3.bf16.msra.mxu1 %v8932_v47 }
0x30a1   :  { %8540 = vmatprep.subr.bf16.mxu1 %v9702_v19 }
0x30a4   :  { %8541 = vmatpush3.bf16.msra.mxu1 %v8933_v61 }
0x30a5   :  { %8542 = vmatprep.subr.bf16.mxu1 %v9702_v19  ;;  %v7690_v19 = vld [vmem:[%s9884_s12] ss:$0 sm:$0xff] }
0x30a8   :  { %8543 = vmatpush3.bf16.msra.mxu1 %v8934_v1 }
0x315e   :  { %v6908_v36 = vpop.f32.mrb[148].mxu1 }
0x315f   :  { %v6909_v38 = vadd.f32 %v6908_v36, %v6787_v34  ;;  %v6910_v39 = vpop.f32.mrb[149].mxu1 }
0x3160   :  { %v6911_v40 = vadd.f32 %v6910_v39, %v6791_v35  ;;  %v6912_v42 = vpop.f32.mrb[150].mxu1 }
0x3161   :  { %v6915_v43 = vmax.f32 %v6909_v38, 0.0  ;;  %v6913_v44 = vpop.f32.mrb[151].mxu1 }
0x3162   :  { %v6916_v45 = vmax.f32 %v6911_v40, 0.0 }
0x3163   :  { %v6917_v9 = vpack.c.bf16 %v6915_v43, %v6915_v43 }
0x3164   :  { %v6918_v46 = vpack.c.bf16 %v6916_v45, %v6916_v45 }
0x3166   :  { %7053 = vmatprep.mubr.bf16.mxu0 %v6918_v46 }
0x3167   :  { %7054 = vmatmul.mubr.bf16.vlgmr.msra.gmra.mrb[140].mxu0 %v6917_v9 }
0x323a   :  { %v7985_v50 = vpop.f32.mrb[140].mxu0 }
0x323b   :  { %v7986_v21 = vpop.f32.mrb[141].mxu0 }
0x323c   :  { %v7987_v22 = vadd.f32 %v7986_v21, %v7985_v50  ;;  %v7988_v4 = vpop.f32.mrb[142].mxu0 }
0x323d   :  { %v7989_v57 = vpop.f32.mrb[143].mxu0 }
0x323e   :  { %v7056_v52 = vadd.f32 %v7987_v22, %v7671_v24 }
0x3240   :  { %v7061_v53 = vadd.f32 %v7056_v52, %v6781_v29 }
0x3242   :  { %7062 = vadd.xlane.f32.xlu0 %v7061_v53  ;;  %v7065_v55 = vmul.f32 %v7061_v53, %v7061_v53 }
0x3246   :  { %7066 = vadd.xlane.f32.xlu0 %v7065_v55 }
0x32cf   :  { %v7063_v5 = vpop.xlane.xlu0 %7062 }
0x32d0   :  { %v7064_v6 = vmul.f32 0.0078125, %v7063_v5 }
0x32d2   :  { %v7069_v54 = vmul.f32 %v7064_v6, %v7064_v6  ;;  %v7071_v13 = vsub.f32 %v7061_v53, %v7064_v6 }
0x32d3   :  { %v7067_v7 = vpop.xlane.xlu0 %7066 }
0x32d4   :  { %v7068_v56 = vmul.f32 0.0078125, %v7067_v7 }
0x32d6   :  { %v7070_v10 = vsub.f32 %v7068_v56, %v7069_v54 }
0x32d8   :  { %v7072_v11 = vadd.f32 1e-05, %v7070_v10 }
0x32da   :  { %9049 = vrsqrt.f32 %v7072_v11 }
0x32e4   :  { %v9050_v37 = vpop.eup %9049 }
0x32e5   :  { %v7080_v14 = vmul.f32 %v9050_v37, %v7688_v12 }
0x32e7   :  { %v7081_v3 = vmul.f32 %v7080_v14, %v7071_v13 }
0x32e9   :  { %v7088_v16 = vadd.f32 %v7689_v15, %v7081_v3 }
0x32eb   :  { %v7089_v17 = vpack.c.bf16 %v7088_v16, %v7088_v16 }
0x32ed   :  { %8545 = vmatmul.mubr.bf16.vlgmr.msra.gmra.mrb[152].mxu1 %v7089_v17 }
0x33c0   :  { %v7195_v18 = vpop.f32.mrb[152].mxu1 }
0x33c1   :  { %v7196_v20 = vadd.f32 %v7690_v19, %v7195_v18  ;;  %v8546_v0 = vpop.f32.mrb[153].mxu1 }
0x33c2   :  { %v7198_v23 = vpop.f32.mrb[154].mxu1 }
0x33c3   :  { %7201 = vst [vmem:[#allocation40] sm:$0xff] %v7196_v20  ;;  %v8547_v63 = vpop.f32.mrb[155].mxu1 }
0x33c4   :  { %9592 = shalt.err (!%p9589_p0)
}
0x33c5   :  { %s9593_s12 = scalar_lea.hbm %s9894_s19, 128 }
0x33c6   :  { %p9594_p1 = scmp.ne.s32.totalorder %s9894_s19, %s9593_s12  ;;  %p9597_p2 = scmp.lt.u32.totalorder %s9593_s12, %s9894_s19 }
0x33c8   :  { %p9599_p3 = pnand %p9597_p2, %p9594_p1 }
0x33ca   :  { %9602 = shalt.err (!%p9599_p3)
}
0x33cb   :  { %7211 = dma.vmem_to_hbm [thread:$0]  %s7209_s1, 128, %s9894_s19, [#allocation4]  }
0x33cc   :  { %9629 = dma.done.wait [#allocation4], 128  }
0x33cd   :  { %9630 = vsyncadd [#allocation4], 4294967168 }
0x33ce   :  { %7215 = vsyncpa [#allocation3], 1 }
0x33cf   :  { %7216 = vsyncpa [#allocation6], 1 }
0x33d0   :  { %7217 = vsyncpa [#allocation9], 1 }
0x33d1   :  { %7218 = vsyncpa [#allocation12], 1 }
0x33d2   :  { %7219 = vsyncpa [#allocation15], 1 }
0x33d3   :  { %7220 = vsyncpa [#allocation18], 1 }
0x33d4   :  { %7221 = vsyncpa [#allocation21], 1 }
0x33d5   :  { %7222 = vsyncpa [#allocation24], 1 }
0x33d6   :  { %7223 = vsyncpa [#allocation27], 1 }
0x33d7   :  { %7224 = vsyncpa [#allocation30], 1 }
0x33d8   :  { %7225 = vsyncpa [#allocation33], 1 }
0x33d9   :  { %7226 = vsyncpa [#allocation36], 1 }
0x33da   :  { %7227 = vsyncpa [#allocation39], 1 }
0x33db   :  { %7228 = vsyncpa [#allocation4], 1 }

</bundles_post_ra>
